<compile_context>
chip_gen: v7x
topology: tpu7x:2x2x1
jax: 0.10.0
libtpu: 0.0.40
codegen_flags: <defaults>
</compile_context>

<pallas_src>
import jax
import jax.numpy as jnp
from jax.experimental import pallas as pl
from jax.experimental.pallas import tpu as pltpu

EPS = 1e-5
_VMEM_LIMIT = 64 * 1024 * 1024  # fits v7x physical (64 MiB), generous for v5e/v6e


# ---------------------------------------------------------------------------
# Kernels
# ---------------------------------------------------------------------------
def _make_conv_stats_kernel(prelude: bool):
  """Per-image: [optional scale/shift+ReLU] -> zero-pad -> im2col 3x3 conv
  (single MXU matmul) -> write conv output + per-image (sum, sum_sq) stats."""

  def kernel(*refs):
    if prelude:
      x_ref, s_ref, t_ref, w_ref, y_ref, stats_ref, xpad = refs
    else:
      x_ref, w_ref, y_ref, stats_ref, xpad = refs

    _, H, W, cin = x_ref.shape
    cout = y_ref.shape[-1]

    xin = x_ref[0]                                      # (H, W, Cin)
    if prelude:
      # Previous stage's BatchNorm (folded scale/shift) + ReLU, fused here so
      # the un-normalized intermediate never takes an extra HBM round trip.
      xin = jnp.maximum(xin * s_ref[0, 0] + t_ref[0, 0], 0.0)

    # Zero-padded halo built in VMEM (no wrapper-side jnp.pad / HBM copy).
    xpad[...] = jnp.zeros_like(xpad)
    xpad[1:H + 1, 1:W + 1, :] = xin

    # im2col: 9 shifted windows concatenated along channels -> (H*W, 9*Cin),
    # then ONE matmul with the (9*Cin, Cout) weight slab (MXU accumulates
    # internally over all taps/channels).
    taps = [xpad[dy:dy + H, dx:dx + W, :]
            for dy in range(3) for dx in range(3)]
    slab = jnp.concatenate(taps, axis=-1).reshape(H * W, 9 * cin)
    acc = jnp.dot(slab, w_ref[...], preferred_element_type=jnp.float32)

    y_ref[0] = acc.reshape(H, W, cout)

    # Per-image partial BN statistics (reduced over N in tiny JAX glue).
    stats_ref[0] = jnp.concatenate(
        [jnp.sum(acc, axis=0, keepdims=True),
         jnp.sum(acc * acc, axis=0, keepdims=True)], axis=0)

  return kernel


def _norm_relu_kernel(y_ref, s_ref, t_ref, o_ref):
  """Final BatchNorm (folded scale/shift) + ReLU: o = max(y*s + t, 0)."""
  o_ref[...] = jnp.maximum(y_ref[...] * s_ref[...] + t_ref[...], 0.0)


# ---------------------------------------------------------------------------
# pallas_call wrappers
# ---------------------------------------------------------------------------
def _compiler_params():
  return pltpu.CompilerParams(
      dimension_semantics=("parallel",),      # image axis: independent tiles
      vmem_limit_bytes=_VMEM_LIMIT)


def conv_stats(x, w9, scale=None, shift=None):
  """One conv stage. x: (N,H,W,Cin) NHWC; w9: (9*Cin, Cout).
  If scale/shift are given, applies y=max(x*scale+shift,0) to the input first
  (i.e. the previous stage's BN+ReLU).  Returns (conv_out, per_image_stats)."""
  N, H, W, Cin = x.shape
  Cout = w9.shape[-1]
  prelude = scale is not None

  in_specs = [pl.BlockSpec((1, H, W, Cin), lambda n: (n, 0, 0, 0))]
  args = [x]
  if prelude:
    vec_spec = pl.BlockSpec((1, 1, 1, Cin), lambda n: (0, 0, 0, 0))
    in_specs += [vec_spec, vec_spec]
    args += [scale, shift]
  in_specs.append(pl.BlockSpec((9 * Cin, Cout), lambda n: (0, 0)))
  args.append(w9)

  return pl.pallas_call(
      _make_conv_stats_kernel(prelude),
      grid=(N,),
      in_specs=in_specs,
      out_specs=[pl.BlockSpec((1, H, W, Cout), lambda n: (n, 0, 0, 0)),
                 pl.BlockSpec((1, 2, Cout), lambda n: (n, 0, 0))],
      out_shape=(jax.ShapeDtypeStruct((N, H, W, Cout), jnp.float32),
                 jax.ShapeDtypeStruct((N, 2, Cout), jnp.float32)),
      scratch_shapes=[pltpu.VMEM((H + 2, W + 2, Cin), jnp.float32)],
      compiler_params=_compiler_params(),
  )(*args)


def norm_relu(y, scale, shift):
  """Final tiled BN(scale,shift) + ReLU over (N,H,W,C)."""
  N, H, W, C = y.shape
  vec_spec = pl.BlockSpec((1, 1, 1, C), lambda n: (0, 0, 0, 0))
  return pl.pallas_call(
      _norm_relu_kernel,
      grid=(N,),
      in_specs=[pl.BlockSpec((1, H, W, C), lambda n: (n, 0, 0, 0)),
                vec_spec, vec_spec],
      out_specs=pl.BlockSpec((1, H, W, C), lambda n: (n, 0, 0, 0)),
      out_shape=jax.ShapeDtypeStruct((N, H, W, C), jnp.float32),
      compiler_params=_compiler_params(),
  )(y, scale, shift)


def _scale_shift(stats, gamma, beta, count):
  """Fold batch stats + BN affine into per-channel scale/shift (tiny, in JAX)."""
  tot = jnp.sum(stats, axis=0)                    # (2, C): [sum, sum_sq]
  mean = tot[0] / count
  var = tot[1] / count - mean * mean              # biased variance (PyTorch)
  scale = gamma * jax.lax.rsqrt(var + EPS)
  shift = beta - mean * scale
  C = gamma.shape[0]
  return scale.reshape(1, 1, 1, C), shift.reshape(1, 1, 1, C)


# ---------------------------------------------------------------------------
# DoubleConv forward (PyTorch NCHW at the boundary)
# ---------------------------------------------------------------------------
@jax.jit
def double_conv(x_nchw, params):
  x = jnp.transpose(x_nchw, (0, 2, 3, 1))         # NCHW -> NHWC (once)
  N, H, W, _ = x.shape
  count = N * H * W

  # Stage 1: conv (bias cancels under training-mode BN) + batch stats.
  y1, st1 = conv_stats(x, params["w1"])
  s1, t1 = _scale_shift(st1, params["g1"], params["beta1"], count)

  # Stage 2: BN1+ReLU fused into the conv kernel, then conv2 + batch stats.
  y2, st2 = conv_stats(y1, params["w2"], s1, t1)
  s2, t2 = _scale_shift(st2, params["g2"], params["beta2"], count)

  # Final BN2 + ReLU.
  out = norm_relu(y2, s2, t2)
  return jnp.transpose(out, (0, 3, 1, 2))         # NHWC -> NCHW (once)


# ---------------------------------------------------------------------------
# Params (synthetic, deterministic; shapes mirror the PyTorch module)
# ---------------------------------------------------------------------------
def init_params(key, in_channels, out_channels):
  ks = jax.random.split(key, 8)

  def conv_w(k, ci, co):
    # PyTorch OIHW (Cout, Cin, 3, 3) -> im2col slab (9*Cin, Cout),
    # row index = (ky*3 + kx)*Cin + cin (matches kernel's tap concat order).
    w = jax.random.normal(k, (co, ci, 3, 3), jnp.float32) * 0.1
    return jnp.transpose(w, (2, 3, 1, 0)).reshape(9 * ci, co)

  def vec(k, c, scale, shift):
    return jax.random.normal(k, (c,), jnp.float32) * scale + shift

  return {
      "w1": conv_w(ks[0], in_channels, out_channels),
      "b1": vec(ks[1], out_channels, 0.05, 0.0),   # unused by kernel: cancels in BN
      "g1": vec(ks[2], out_channels, 0.1, 1.0),
      "beta1": vec(ks[3], out_channels, 0.1, 0.0),
      "w2": conv_w(ks[4], out_channels, out_channels),
      "b2": vec(ks[5], out_channels, 0.05, 0.0),   # unused by kernel: cancels in BN
      "g2": vec(ks[6], out_channels, 0.1, 1.0),
      "beta2": vec(ks[7], out_channels, 0.1, 0.0),
  }


# ---------------------------------------------------------------------------
# Pure-JAX reference (keeps the conv bias to verify it is a BN no-op)
# ---------------------------------------------------------------------------
def _ref_stage(x_nhwc, w9, b, gamma, beta):
  ci, co = x_nhwc.shape[-1], w9.shape[-1]
  hwio = w9.reshape(3, 3, ci, co)
  y = jax.lax.conv_general_dilated(
      x_nhwc, hwio, (1, 1), "SAME",
      dimension_numbers=("NHWC", "HWIO", "NHWC")) + b
  mean = jnp.mean(y, axis=(0, 1, 2), keepdims=True)
  var = jnp.mean(jnp.square(y - mean), axis=(0, 1, 2), keepdims=True)
  return jnp.maximum((y - mean) * jax.lax.rsqrt(var + EPS) * gamma + beta, 0.0)


def _ref_double_conv(x_nchw, params):
  x = jnp.transpose(x_nchw, (0, 2, 3, 1))
  y = _ref_stage(x, params["w1"], params["b1"], params["g1"], params["beta1"])
  y = _ref_stage(y, params["w2"], params["b2"], params["g2"], params["beta2"])
  return jnp.transpose(y, (0, 3, 1, 2))


if __name__ == "__main__":
  N, CIN, COUT, H, W = 2, 4, 8, 16, 16

  key = jax.random.PRNGKey(0)
  kx, kp = jax.random.split(key)
  x = jax.random.normal(kx, (N, CIN, H, W), jnp.float32)   # PyTorch NCHW input
  params = init_params(kp, CIN, COUT)

  out = jax.block_until_ready(double_conv(x, params))
  assert out.shape == (N, COUT, H, W), out.shape

  ref = jax.block_until_ready(_ref_double_conv(x, params))
  err = float(jnp.max(jnp.abs(out - ref)))
  assert jnp.allclose(out, ref, rtol=1e-3, atol=1e-3), err

  print("KERNEL_OK")
</pallas_src>

<mosaic_0001>
module attributes {stable_mosaic.version = 11 : i64} {
  func.func @kernel(%arg0: i32, %arg1: memref<1x16x16x4xf32, #tpu.memory_space<vmem>>, %arg2: memref<36x8xf32, #tpu.memory_space<vmem>>, %arg3: memref<1x16x16x8xf32, #tpu.memory_space<vmem>>, %arg4: memref<1x2x8xf32, #tpu.memory_space<vmem>>, %arg5: memref<18x18x4xf32, #tpu.memory_space<vmem>>) attributes {dimension_semantics = [#tpu.dimension_semantics<parallel>], iteration_bounds = array<i64: 2>, scalar_prefetch = 0 : i64, scratch_operands = 1 : i64, tpu.core_type = #tpu.core_type<tc>, window_params = [{transform_indices = @transform_0, window_bounds = array<i64: 1, 16, 16, 4>}, {pipeline_mode = #tpu.pipeline_mode<synchronous>, transform_indices = @transform_1, window_bounds = array<i64: 36, 8>}, {transform_indices = @transform_2, window_bounds = array<i64: 1, 16, 16, 8>}, {transform_indices = @transform_3, window_bounds = array<i64: 1, 2, 8>}]} {
    %c0 = arith.constant 0 : index
    %c0_0 = arith.constant 0 : index
    %c0_1 = arith.constant 0 : index
    %c0_2 = arith.constant 0 : index
    %0 = vector.load %arg1[%c0, %c0_0, %c0_1, %c0_2] : memref<1x16x16x4xf32, #tpu.memory_space<vmem>>, vector<1x16x16x4xf32>
    %1 = vector.shape_cast %0 : vector<1x16x16x4xf32> to vector<16x16x4xf32>
    %cst = arith.constant 0.000000e+00 : f32
    %2 = vector.broadcast %cst : f32 to vector<18x18x4xf32>
    %c0_3 = arith.constant 0 : index
    %c0_4 = arith.constant 0 : index
    %c0_5 = arith.constant 0 : index
    %3 = vector.load %arg5[%c0_3, %c0_4, %c0_5] : memref<18x18x4xf32, #tpu.memory_space<vmem>>, vector<18x18x4xf32>
    tpu.vector_store %arg5[%c0_3, %c0_4, %c0_5], %2 {strides = array<i32>} : memref<18x18x4xf32, #tpu.memory_space<vmem>>, vector<18x18x4xf32>,
    %c1 = arith.constant 1 : index
    %c1_6 = arith.constant 1 : index
    %c0_7 = arith.constant 0 : index
    %4 = vector.load %arg5[%c1, %c1_6, %c0_7] : memref<18x18x4xf32, #tpu.memory_space<vmem>>, vector<16x16x4xf32>
    tpu.vector_store %arg5[%c1, %c1_6, %c0_7], %1 {strides = array<i32>} : memref<18x18x4xf32, #tpu.memory_space<vmem>>, vector<16x16x4xf32>,
    %c0_8 = arith.constant 0 : index
    %c0_9 = arith.constant 0 : index
    %c0_10 = arith.constant 0 : index
    %5 = vector.load %arg5[%c0_8, %c0_9, %c0_10] : memref<18x18x4xf32, #tpu.memory_space<vmem>>, vector<16x16x4xf32>
    %c0_11 = arith.constant 0 : index
    %c1_12 = arith.constant 1 : index
    %c0_13 = arith.constant 0 : index
    %6 = vector.load %arg5[%c0_11, %c1_12, %c0_13] : memref<18x18x4xf32, #tpu.memory_space<vmem>>, vector<16x16x4xf32>
    %c0_14 = arith.constant 0 : index
    %c2 = arith.constant 2 : index
    %c0_15 = arith.constant 0 : index
    %7 = vector.load %arg5[%c0_14, %c2, %c0_15] : memref<18x18x4xf32, #tpu.memory_space<vmem>>, vector<16x16x4xf32>
    %c1_16 = arith.constant 1 : index
    %c0_17 = arith.constant 0 : index
    %c0_18 = arith.constant 0 : index
    %8 = vector.load %arg5[%c1_16, %c0_17, %c0_18] : memref<18x18x4xf32, #tpu.memory_space<vmem>>, vector<16x16x4xf32>
    %c1_19 = arith.constant 1 : index
    %c1_20 = arith.constant 1 : index
    %c0_21 = arith.constant 0 : index
    %9 = vector.load %arg5[%c1_19, %c1_20, %c0_21] : memref<18x18x4xf32, #tpu.memory_space<vmem>>, vector<16x16x4xf32>
    %c1_22 = arith.constant 1 : index
    %c2_23 = arith.constant 2 : index
    %c0_24 = arith.constant 0 : index
    %10 = vector.load %arg5[%c1_22, %c2_23, %c0_24] : memref<18x18x4xf32, #tpu.memory_space<vmem>>, vector<16x16x4xf32>
    %c2_25 = arith.constant 2 : index
    %c0_26 = arith.constant 0 : index
    %c0_27 = arith.constant 0 : index
    %11 = vector.load %arg5[%c2_25, %c0_26, %c0_27] : memref<18x18x4xf32, #tpu.memory_space<vmem>>, vector<16x16x4xf32>
    %c2_28 = arith.constant 2 : index
    %c1_29 = arith.constant 1 : index
    %c0_30 = arith.constant 0 : index
    %12 = vector.load %arg5[%c2_28, %c1_29, %c0_30] : memref<18x18x4xf32, #tpu.memory_space<vmem>>, vector<16x16x4xf32>
    %c2_31 = arith.constant 2 : index
    %c2_32 = arith.constant 2 : index
    %c0_33 = arith.constant 0 : index
    %13 = vector.load %arg5[%c2_31, %c2_32, %c0_33] : memref<18x18x4xf32, #tpu.memory_space<vmem>>, vector<16x16x4xf32>
    %14 = tpu.concatenate %5, %6, %7, %8, %9, %10, %11, %12, %13 in 2 : vector<16x16x4xf32>, vector<16x16x4xf32>, vector<16x16x4xf32>, vector<16x16x4xf32>, vector<16x16x4xf32>, vector<16x16x4xf32>, vector<16x16x4xf32>, vector<16x16x4xf32>, vector<16x16x4xf32> -> vector<16x16x36xf32>
    %15 = vector.shape_cast %14 : vector<16x16x36xf32> to vector<256x36xf32>
    %c0_34 = arith.constant 0 : index
    %c0_35 = arith.constant 0 : index
    %16 = vector.load %arg2[%c0_34, %c0_35] : memref<36x8xf32, #tpu.memory_space<vmem>>, vector<36x8xf32>
    %cst_36 = arith.constant dense<0.000000e+00> : vector<256x8xf32>
    %17 = tpu.matmul %15, %16, %cst_36 {dimension_numbers = #tpu.dot_dimension_numbers<[1], [0], [0], [1], [0, 0, 1, 1], [], []>} : vector<256x36xf32>, vector<36x8xf32>, vector<256x8xf32> -> vector<256x8xf32>
    %18 = vector.shape_cast %17 : vector<256x8xf32> to vector<16x16x8xf32>
    %c0_37 = arith.constant 0 : index
    %c0_38 = arith.constant 0 : index
    %c0_39 = arith.constant 0 : index
    %c0_40 = arith.constant 0 : index
    %19 = vector.load %arg3[%c0_37, %c0_38, %c0_39, %c0_40] : memref<1x16x16x8xf32, #tpu.memory_space<vmem>>, vector<1x16x16x8xf32>
    %20 = vector.shape_cast %19 : vector<1x16x16x8xf32> to vector<16x16x8xf32>
    %21 = vector.shape_cast %18 : vector<16x16x8xf32> to vector<1x16x16x8xf32>
    tpu.vector_store %arg3[%c0_37, %c0_38, %c0_39, %c0_40], %21 {strides = array<i32>} : memref<1x16x16x8xf32, #tpu.memory_space<vmem>>, vector<1x16x16x8xf32>,
    %cst_41 = arith.constant dense<0.000000e+00> : vector<8xf32>
    %22 = vector.multi_reduction <add>, %17, %cst_41 [0] : vector<256x8xf32> to vector<8xf32>
    %23 = vector.shape_cast %22 : vector<8xf32> to vector<1x8xf32>
    %24 = arith.mulf %17, %17 : vector<256x8xf32>
    %cst_42 = arith.constant dense<0.000000e+00> : vector<8xf32>
    %25 = vector.multi_reduction <add>, %24, %cst_42 [0] : vector<256x8xf32> to vector<8xf32>
    %26 = vector.shape_cast %25 : vector<8xf32> to vector<1x8xf32>
    %27 = tpu.concatenate %23, %26 in 0 : vector<1x8xf32>, vector<1x8xf32> -> vector<2x8xf32>
    %c0_43 = arith.constant 0 : index
    %c0_44 = arith.constant 0 : index
    %c0_45 = arith.constant 0 : index
    %28 = vector.load %arg4[%c0_43, %c0_44, %c0_45] : memref<1x2x8xf32, #tpu.memory_space<vmem>>, vector<1x2x8xf32>
    %29 = vector.shape_cast %28 : vector<1x2x8xf32> to vector<2x8xf32>
    %30 = vector.shape_cast %27 : vector<2x8xf32> to vector<1x2x8xf32>
    tpu.vector_store %arg4[%c0_43, %c0_44, %c0_45], %30 {strides = array<i32>} : memref<1x2x8xf32, #tpu.memory_space<vmem>>, vector<1x2x8xf32>,
    return
  }
  func.func @transform_0(%arg0: i32) -> (i32, i32, i32, i32) {
    %c0_i32 = arith.constant 0 : i32
    %c0_i32_0 = arith.constant 0 : i32
    %c0_i32_1 = arith.constant 0 : i32
    %c0_i32_2 = arith.constant 0 : i32
    return %arg0, %c0_i32, %c0_i32_0, %c0_i32_1 : i32, i32, i32, i32
  }
  func.func @transform_1(%arg0: i32) -> (i32, i32) {
    %c0_i32 = arith.constant 0 : i32
    %c0_i32_0 = arith.constant 0 : i32
    %c0_i32_1 = arith.constant 0 : i32
    return %c0_i32, %c0_i32_0 : i32, i32
  }
  func.func @transform_2(%arg0: i32) -> (i32, i32, i32, i32) {
    %c0_i32 = arith.constant 0 : i32
    %c0_i32_0 = arith.constant 0 : i32
    %c0_i32_1 = arith.constant 0 : i32
    %c0_i32_2 = arith.constant 0 : i32
    return %arg0, %c0_i32, %c0_i32_0, %c0_i32_1 : i32, i32, i32, i32
  }
  func.func @transform_3(%arg0: i32) -> (i32, i32, i32) {
    %c0_i32 = arith.constant 0 : i32
    %c0_i32_0 = arith.constant 0 : i32
    %c0_i32_1 = arith.constant 0 : i32
    return %arg0, %c0_i32, %c0_i32_0 : i32, i32, i32
  }
}

module attributes {stable_mosaic.version = 11 : i64} {
  func.func @kernel(%arg0: i32, %arg1: memref<1x16x16x8xf32, #tpu.memory_space<vmem>>, %arg2: memref<1x1x1x8xf32, #tpu.memory_space<vmem>>, %arg3: memref<1x1x1x8xf32, #tpu.memory_space<vmem>>, %arg4: memref<72x8xf32, #tpu.memory_space<vmem>>, %arg5: memref<1x16x16x8xf32, #tpu.memory_space<vmem>>, %arg6: memref<1x2x8xf32, #tpu.memory_space<vmem>>, %arg7: memref<18x18x8xf32, #tpu.memory_space<vmem>>) attributes {dimension_semantics = [#tpu.dimension_semantics<parallel>], iteration_bounds = array<i64: 2>, scalar_prefetch = 0 : i64, scratch_operands = 1 : i64, tpu.core_type = #tpu.core_type<tc>, window_params = [{transform_indices = @transform_0, window_bounds = array<i64: 1, 16, 16, 8>}, {pipeline_mode = #tpu.pipeline_mode<synchronous>, transform_indices = @transform_1, window_bounds = array<i64: 1, 1, 1, 8>}, {pipeline_mode = #tpu.pipeline_mode<synchronous>, transform_indices = @transform_2, window_bounds = array<i64: 1, 1, 1, 8>}, {pipeline_mode = #tpu.pipeline_mode<synchronous>, transform_indices = @transform_3, window_bounds = array<i64: 72, 8>}, {transform_indices = @transform_4, window_bounds = array<i64: 1, 16, 16, 8>}, {transform_indices = @transform_5, window_bounds = array<i64: 1, 2, 8>}]} {
    %c0 = arith.constant 0 : index
    %c0_0 = arith.constant 0 : index
    %c0_1 = arith.constant 0 : index
    %c0_2 = arith.constant 0 : index
    %0 = vector.load %arg1[%c0, %c0_0, %c0_1, %c0_2] : memref<1x16x16x8xf32, #tpu.memory_space<vmem>>, vector<1x16x16x8xf32>
    %1 = vector.shape_cast %0 : vector<1x16x16x8xf32> to vector<16x16x8xf32>
    %c0_3 = arith.constant 0 : index
    %c0_4 = arith.constant 0 : index
    %c0_5 = arith.constant 0 : index
    %c0_6 = arith.constant 0 : index
    %2 = vector.load %arg2[%c0_3, %c0_4, %c0_5, %c0_6] : memref<1x1x1x8xf32, #tpu.memory_space<vmem>>, vector<1x1x1x8xf32>
    %3 = vector.shape_cast %2 : vector<1x1x1x8xf32> to vector<1x8xf32>
    %4 = vector.shape_cast %3 : vector<1x8xf32> to vector<1x1x8xf32>
    %5 = vector.broadcast %4 : vector<1x1x8xf32> to vector<16x16x8xf32>
    %6 = arith.mulf %1, %5 : vector<16x16x8xf32>
    %c0_7 = arith.constant 0 : index
    %c0_8 = arith.constant 0 : index
    %c0_9 = arith.constant 0 : index
    %c0_10 = arith.constant 0 : index
    %7 = vector.load %arg3[%c0_7, %c0_8, %c0_9, %c0_10] : memref<1x1x1x8xf32, #tpu.memory_space<vmem>>, vector<1x1x1x8xf32>
    %8 = vector.shape_cast %7 : vector<1x1x1x8xf32> to vector<1x8xf32>
    %9 = vector.shape_cast %8 : vector<1x8xf32> to vector<1x1x8xf32>
    %10 = vector.broadcast %9 : vector<1x1x8xf32> to vector<16x16x8xf32>
    %11 = arith.addf %6, %10 : vector<16x16x8xf32>
    %cst = arith.constant 0.000000e+00 : f32
    %12 = vector.broadcast %cst : f32 to vector<16x16x8xf32>
    %13 = arith.maximumf %11, %12 : vector<16x16x8xf32>
    %cst_11 = arith.constant 0.000000e+00 : f32
    %14 = vector.broadcast %cst_11 : f32 to vector<18x18x8xf32>
    %c0_12 = arith.constant 0 : index
    %c0_13 = arith.constant 0 : index
    %c0_14 = arith.constant 0 : index
    %15 = vector.load %arg7[%c0_12, %c0_13, %c0_14] : memref<18x18x8xf32, #tpu.memory_space<vmem>>, vector<18x18x8xf32>
    tpu.vector_store %arg7[%c0_12, %c0_13, %c0_14], %14 {strides = array<i32>} : memref<18x18x8xf32, #tpu.memory_space<vmem>>, vector<18x18x8xf32>,
    %c1 = arith.constant 1 : index
    %c1_15 = arith.constant 1 : index
    %c0_16 = arith.constant 0 : index
    %16 = vector.load %arg7[%c1, %c1_15, %c0_16] : memref<18x18x8xf32, #tpu.memory_space<vmem>>, vector<16x16x8xf32>
    tpu.vector_store %arg7[%c1, %c1_15, %c0_16], %13 {strides = array<i32>} : memref<18x18x8xf32, #tpu.memory_space<vmem>>, vector<16x16x8xf32>,
    %c0_17 = arith.constant 0 : index
    %c0_18 = arith.constant 0 : index
    %c0_19 = arith.constant 0 : index
    %17 = vector.load %arg7[%c0_17, %c0_18, %c0_19] : memref<18x18x8xf32, #tpu.memory_space<vmem>>, vector<16x16x8xf32>
    %c0_20 = arith.constant 0 : index
    %c1_21 = arith.constant 1 : index
    %c0_22 = arith.constant 0 : index
    %18 = vector.load %arg7[%c0_20, %c1_21, %c0_22] : memref<18x18x8xf32, #tpu.memory_space<vmem>>, vector<16x16x8xf32>
    %c0_23 = arith.constant 0 : index
    %c2 = arith.constant 2 : index
    %c0_24 = arith.constant 0 : index
    %19 = vector.load %arg7[%c0_23, %c2, %c0_24] : memref<18x18x8xf32, #tpu.memory_space<vmem>>, vector<16x16x8xf32>
    %c1_25 = arith.constant 1 : index
    %c0_26 = arith.constant 0 : index
    %c0_27 = arith.constant 0 : index
    %20 = vector.load %arg7[%c1_25, %c0_26, %c0_27] : memref<18x18x8xf32, #tpu.memory_space<vmem>>, vector<16x16x8xf32>
    %c1_28 = arith.constant 1 : index
    %c1_29 = arith.constant 1 : index
    %c0_30 = arith.constant 0 : index
    %21 = vector.load %arg7[%c1_28, %c1_29, %c0_30] : memref<18x18x8xf32, #tpu.memory_space<vmem>>, vector<16x16x8xf32>
    %c1_31 = arith.constant 1 : index
    %c2_32 = arith.constant 2 : index
    %c0_33 = arith.constant 0 : index
    %22 = vector.load %arg7[%c1_31, %c2_32, %c0_33] : memref<18x18x8xf32, #tpu.memory_space<vmem>>, vector<16x16x8xf32>
    %c2_34 = arith.constant 2 : index
    %c0_35 = arith.constant 0 : index
    %c0_36 = arith.constant 0 : index
    %23 = vector.load %arg7[%c2_34, %c0_35, %c0_36] : memref<18x18x8xf32, #tpu.memory_space<vmem>>, vector<16x16x8xf32>
    %c2_37 = arith.constant 2 : index
    %c1_38 = arith.constant 1 : index
    %c0_39 = arith.constant 0 : index
    %24 = vector.load %arg7[%c2_37, %c1_38, %c0_39] : memref<18x18x8xf32, #tpu.memory_space<vmem>>, vector<16x16x8xf32>
    %c2_40 = arith.constant 2 : index
    %c2_41 = arith.constant 2 : index
    %c0_42 = arith.constant 0 : index
    %25 = vector.load %arg7[%c2_40, %c2_41, %c0_42] : memref<18x18x8xf32, #tpu.memory_space<vmem>>, vector<16x16x8xf32>
    %26 = tpu.concatenate %17, %18, %19, %20, %21, %22, %23, %24, %25 in 2 : vector<16x16x8xf32>, vector<16x16x8xf32>, vector<16x16x8xf32>, vector<16x16x8xf32>, vector<16x16x8xf32>, vector<16x16x8xf32>, vector<16x16x8xf32>, vector<16x16x8xf32>, vector<16x16x8xf32> -> vector<16x16x72xf32>
    %27 = vector.shape_cast %26 : vector<16x16x72xf32> to vector<256x72xf32>
    %c0_43 = arith.constant 0 : index
    %c0_44 = arith.constant 0 : index
    %28 = vector.load %arg4[%c0_43, %c0_44] : memref<72x8xf32, #tpu.memory_space<vmem>>, vector<72x8xf32>
    %cst_45 = arith.constant dense<0.000000e+00> : vector<256x8xf32>
    %29 = tpu.matmul %27, %28, %cst_45 {dimension_numbers = #tpu.dot_dimension_numbers<[1], [0], [0], [1], [0, 0, 1, 1], [], []>} : vector<256x72xf32>, vector<72x8xf32>, vector<256x8xf32> -> vector<256x8xf32>
    %30 = vector.shape_cast %29 : vector<256x8xf32> to vector<16x16x8xf32>
    %c0_46 = arith.constant 0 : index
    %c0_47 = arith.constant 0 : index
    %c0_48 = arith.constant 0 : index
    %c0_49 = arith.constant 0 : index
    %31 = vector.load %arg5[%c0_46, %c0_47, %c0_48, %c0_49] : memref<1x16x16x8xf32, #tpu.memory_space<vmem>>, vector<1x16x16x8xf32>
    %32 = vector.shape_cast %31 : vector<1x16x16x8xf32> to vector<16x16x8xf32>
    %33 = vector.shape_cast %30 : vector<16x16x8xf32> to vector<1x16x16x8xf32>
    tpu.vector_store %arg5[%c0_46, %c0_47, %c0_48, %c0_49], %33 {strides = array<i32>} : memref<1x16x16x8xf32, #tpu.memory_space<vmem>>, vector<1x16x16x8xf32>,
    %cst_50 = arith.constant dense<0.000000e+00> : vector<8xf32>
    %34 = vector.multi_reduction <add>, %29, %cst_50 [0] : vector<256x8xf32> to vector<8xf32>
    %35 = vector.shape_cast %34 : vector<8xf32> to vector<1x8xf32>
    %36 = arith.mulf %29, %29 : vector<256x8xf32>
    %cst_51 = arith.constant dense<0.000000e+00> : vector<8xf32>
    %37 = vector.multi_reduction <add>, %36, %cst_51 [0] : vector<256x8xf32> to vector<8xf32>
    %38 = vector.shape_cast %37 : vector<8xf32> to vector<1x8xf32>
    %39 = tpu.concatenate %35, %38 in 0 : vector<1x8xf32>, vector<1x8xf32> -> vector<2x8xf32>
    %c0_52 = arith.constant 0 : index
    %c0_53 = arith.constant 0 : index
    %c0_54 = arith.constant 0 : index
    %40 = vector.load %arg6[%c0_52, %c0_53, %c0_54] : memref<1x2x8xf32, #tpu.memory_space<vmem>>, vector<1x2x8xf32>
    %41 = vector.shape_cast %40 : vector<1x2x8xf32> to vector<2x8xf32>
    %42 = vector.shape_cast %39 : vector<2x8xf32> to vector<1x2x8xf32>
    tpu.vector_store %arg6[%c0_52, %c0_53, %c0_54], %42 {strides = array<i32>} : memref<1x2x8xf32, #tpu.memory_space<vmem>>, vector<1x2x8xf32>,
    return
  }
  func.func @transform_0(%arg0: i32) -> (i32, i32, i32, i32) {
    %c0_i32 = arith.constant 0 : i32
    %c0_i32_0 = arith.constant 0 : i32
    %c0_i32_1 = arith.constant 0 : i32
    %c0_i32_2 = arith.constant 0 : i32
    return %arg0, %c0_i32, %c0_i32_0, %c0_i32_1 : i32, i32, i32, i32
  }
  func.func @transform_1(%arg0: i32) -> (i32, i32, i32, i32) {
    %c0_i32 = arith.constant 0 : i32
    %c0_i32_0 = arith.constant 0 : i32
    %c0_i32_1 = arith.constant 0 : i32
    %c0_i32_2 = arith.constant 0 : i32
    %c0_i32_3 = arith.constant 0 : i32
    return %c0_i32, %c0_i32_0, %c0_i32_1, %c0_i32_2 : i32, i32, i32, i32
  }
  func.func @transform_2(%arg0: i32) -> (i32, i32, i32, i32) {
    %c0_i32 = arith.constant 0 : i32
    %c0_i32_0 = arith.constant 0 : i32
    %c0_i32_1 = arith.constant 0 : i32
    %c0_i32_2 = arith.constant 0 : i32
    %c0_i32_3 = arith.constant 0 : i32
    return %c0_i32, %c0_i32_0, %c0_i32_1, %c0_i32_2 : i32, i32, i32, i32
  }
  func.func @transform_3(%arg0: i32) -> (i32, i32) {
    %c0_i32 = arith.constant 0 : i32
    %c0_i32_0 = arith.constant 0 : i32
    %c0_i32_1 = arith.constant 0 : i32
    return %c0_i32, %c0_i32_0 : i32, i32
  }
  func.func @transform_4(%arg0: i32) -> (i32, i32, i32, i32) {
    %c0_i32 = arith.constant 0 : i32
    %c0_i32_0 = arith.constant 0 : i32
    %c0_i32_1 = arith.constant 0 : i32
    %c0_i32_2 = arith.constant 0 : i32
    return %arg0, %c0_i32, %c0_i32_0, %c0_i32_1 : i32, i32, i32, i32
  }
  func.func @transform_5(%arg0: i32) -> (i32, i32, i32) {
    %c0_i32 = arith.constant 0 : i32
    %c0_i32_0 = arith.constant 0 : i32
    %c0_i32_1 = arith.constant 0 : i32
    return %arg0, %c0_i32, %c0_i32_0 : i32, i32, i32
  }
}

module attributes {stable_mosaic.version = 11 : i64} {
  func.func @_norm_relu_kernel(%arg0: i32, %arg1: memref<1x16x16x8xf32, #tpu.memory_space<vmem>>, %arg2: memref<1x1x1x8xf32, #tpu.memory_space<vmem>>, %arg3: memref<1x1x1x8xf32, #tpu.memory_space<vmem>>, %arg4: memref<1x16x16x8xf32, #tpu.memory_space<vmem>>) attributes {dimension_semantics = [#tpu.dimension_semantics<parallel>], iteration_bounds = array<i64: 2>, scalar_prefetch = 0 : i64, scratch_operands = 0 : i64, tpu.core_type = #tpu.core_type<tc>, window_params = [{transform_indices = @transform_0, window_bounds = array<i64: 1, 16, 16, 8>}, {pipeline_mode = #tpu.pipeline_mode<synchronous>, transform_indices = @transform_1, window_bounds = array<i64: 1, 1, 1, 8>}, {pipeline_mode = #tpu.pipeline_mode<synchronous>, transform_indices = @transform_2, window_bounds = array<i64: 1, 1, 1, 8>}, {transform_indices = @transform_3, window_bounds = array<i64: 1, 16, 16, 8>}]} {
    %c0 = arith.constant 0 : index
    %c0_0 = arith.constant 0 : index
    %c0_1 = arith.constant 0 : index
    %c0_2 = arith.constant 0 : index
    %0 = vector.load %arg1[%c0, %c0_0, %c0_1, %c0_2] : memref<1x16x16x8xf32, #tpu.memory_space<vmem>>, vector<1x16x16x8xf32>
    %c0_3 = arith.constant 0 : index
    %c0_4 = arith.constant 0 : index
    %c0_5 = arith.constant 0 : index
    %c0_6 = arith.constant 0 : index
    %1 = vector.load %arg2[%c0_3, %c0_4, %c0_5, %c0_6] : memref<1x1x1x8xf32, #tpu.memory_space<vmem>>, vector<1x1x1x8xf32>
    %2 = vector.broadcast %1 : vector<1x1x1x8xf32> to vector<1x16x16x8xf32>
    %3 = arith.mulf %0, %2 : vector<1x16x16x8xf32>
    %c0_7 = arith.constant 0 : index
    %c0_8 = arith.constant 0 : index
    %c0_9 = arith.constant 0 : index
    %c0_10 = arith.constant 0 : index
    %4 = vector.load %arg3[%c0_7, %c0_8, %c0_9, %c0_10] : memref<1x1x1x8xf32, #tpu.memory_space<vmem>>, vector<1x1x1x8xf32>
    %5 = vector.broadcast %4 : vector<1x1x1x8xf32> to vector<1x16x16x8xf32>
    %6 = arith.addf %3, %5 : vector<1x16x16x8xf32>
    %cst = arith.constant 0.000000e+00 : f32
    %7 = vector.broadcast %cst : f32 to vector<1x16x16x8xf32>
    %8 = arith.maximumf %6, %7 : vector<1x16x16x8xf32>
    %c0_11 = arith.constant 0 : index
    %c0_12 = arith.constant 0 : index
    %c0_13 = arith.constant 0 : index
    %c0_14 = arith.constant 0 : index
    %9 = vector.load %arg4[%c0_11, %c0_12, %c0_13, %c0_14] : memref<1x16x16x8xf32, #tpu.memory_space<vmem>>, vector<1x16x16x8xf32>
    tpu.vector_store %arg4[%c0_11, %c0_12, %c0_13, %c0_14], %8 {strides = array<i32>} : memref<1x16x16x8xf32, #tpu.memory_space<vmem>>, vector<1x16x16x8xf32>,
    return
  }
  func.func @transform_0(%arg0: i32) -> (i32, i32, i32, i32) {
    %c0_i32 = arith.constant 0 : i32
    %c0_i32_0 = arith.constant 0 : i32
    %c0_i32_1 = arith.constant 0 : i32
    %c0_i32_2 = arith.constant 0 : i32
    return %arg0, %c0_i32, %c0_i32_0, %c0_i32_1 : i32, i32, i32, i32
  }
  func.func @transform_1(%arg0: i32) -> (i32, i32, i32, i32) {
    %c0_i32 = arith.constant 0 : i32
    %c0_i32_0 = arith.constant 0 : i32
    %c0_i32_1 = arith.constant 0 : i32
    %c0_i32_2 = arith.constant 0 : i32
    %c0_i32_3 = arith.constant 0 : i32
    return %c0_i32, %c0_i32_0, %c0_i32_1, %c0_i32_2 : i32, i32, i32, i32
  }
  func.func @transform_2(%arg0: i32) -> (i32, i32, i32, i32) {
    %c0_i32 = arith.constant 0 : i32
    %c0_i32_0 = arith.constant 0 : i32
    %c0_i32_1 = arith.constant 0 : i32
    %c0_i32_2 = arith.constant 0 : i32
    %c0_i32_3 = arith.constant 0 : i32
    return %c0_i32, %c0_i32_0, %c0_i32_1, %c0_i32_2 : i32, i32, i32, i32
  }
  func.func @transform_3(%arg0: i32) -> (i32, i32, i32, i32) {
    %c0_i32 = arith.constant 0 : i32
    %c0_i32_0 = arith.constant 0 : i32
    %c0_i32_1 = arith.constant 0 : i32
    %c0_i32_2 = arith.constant 0 : i32
    return %arg0, %c0_i32, %c0_i32_0, %c0_i32_1 : i32, i32, i32, i32
  }
}

</mosaic_0001>

<bundles_post_ra>
// kernel: double_conv.5
= control target key start
LH: loop header
LB: loop body
LE: loop exit
PB: predicated region body
PF: predicated region fallthrough
CT: control target
= control target key end

     0   :  { %8 = vsyncpa [#allocation3], 0  ;;  %s1179_s0 = inlined_call_operand.hbm [shape: f32[2,16,16,8], index: 0, kind: input, shape index: {}]   ;;  %s1180_s1 = inlined_call_operand.hbm [shape: f32[1,1,1,8], index: 1, kind: input, shape index: {}]   ;;  %s1181_s2 = inlined_call_operand.hbm [shape: f32[1,1,1,8], index: 2, kind: input, shape index: {}]   ;;  %s1182_s3 = inlined_call_operand.hbm [shape: f32[2,16,16,8], index: 3, kind: output, shape index: {}]  }
   0x1   :  { %10 = vsyncpa [#allocation3 + $0x1], 0 }
   0x2   :  { %11 = vsyncpa [#allocation6], 0 }
   0x3   :  { %12 = vsyncpa [#allocation4], 0 }
   0x4   :  { %14 = vsyncpa [#allocation4 + $0x1], 0  ;;  %s774_s12 = smov 0   ;;  %s776_s13 = smov 0  }
   0x5   :  { %s778_s14 = smov 0   ;;  %s780_s15 = smov 0  }
   0x6 LB: > { %s795_s16 = sadd.s32 4294967295, %s744_s15   ;;  %s495_s17 = sadd.s32 4294967294, %s744_s15   ;;  %s744_s15 = sphi %s780_s15, %s1207_s15   ;;  %s740_s14 = sphi %s778_s14, %s1206_s14   ;;  %s736_s13 = sphi %s776_s13, %s1205_s13   ;;  %s732_s12 = sphi %s774_s12, %s1204_s12  }
   0x7   : > { %s799_s18 = sadd.s32 1, %s744_s15   ;;  %s27_s19 = sadd.s32 1, %s740_s14 }
   0x8   : > { %s24_s20 = ssub.s32 %s744_s15, %s799_s18  ;;  %p34_p0 = scmp.ne.s32.totalorder %s740_s14, %s736_s13 }
   0x9   : > { %p25_p1 = scmp.eq.s32.totalorder %s24_s20, 0  ;;  %p35_p2 = scmp.eq.s32.totalorder %s744_s15, 0 }
   0xa   : > { %p40_p3 = scmp.ne.s32.totalorder %s736_s13, %s732_s12  ;;  %p1183_p4 = scmp.eq.s32.totalorder %s795_s16, 0 }
   0xb   : > { %s811_s21 = scalar_select %p25_p1, %s740_s14, %s27_s19  }
   0xc   : > { %p813_p5 = por %p35_p2, %p34_p0  ;;  %p819_p6 = por %p1183_p4, %p40_p3 }
   0xd   : > { %p106_p7 = scmp.eq.s32.totalorder %s795_s16, 1  ;;  %p112_p8 = scmp.eq.s32.totalorder %s495_s17, 1 }
   0xe   : > { %s1189_s23 = scalar_select %p819_p6, 1, 0 }
   0xf   : > { %p496_p9 = scmp.ge.s32.totalorder %s744_s15, 1  ;;  %p119_p10 = scmp.lt.s32.totalorder %s744_s15, 3 }
  0x10   : > { %p826_p11 = por %p106_p7, %p34_p0  ;;  %p830_p12 = por %p112_p8, %p40_p3 }
  0x11   : > { %p834_p13 = pnand %p496_p9, %p119_p10  ;;  %s746_s27 = smov [#allocation5]  }
  0x12   : > { %s1190_s24 = scalar_select %p826_p11, 1, 0 }
  0x13   : > { %s1191_s25 = scalar_select %p830_p12, 1, 0 }
  0x14   : > { %s1192_s26 = scalar_select %p834_p13, 1, 0 }
  0x15   : > { %p529_p2 = pneg %p834_p13  ;;  %s132_s28 = sshll.u32 %s746_s27, 4  ;;  %s133_s28 = int_to_ptr.vmem [resolvable:$true] %s132_s28 }
  0x16   : > { %p546_p4 = scmp.lt.s32.totalorder %s744_s15, 2  ;;  %p1193_p0 = scmp.eq.s32.totalorder %s795_s16, 0 }
  0x17   : > { %s747_s4 = smov [#allocation7]   ;;  %s588_s8 = scalar_lea.hbm %s1180_s1, 16 }
  0x18   : > { %p844_p7 = pnand %p529_p2, %p1193_p0  ;;  %p850_p3 = pnand %p546_p4, %p813_p5 }
  0x19   : > { %s143_s5 = sshll.u32 %s747_s4, 4  ;;  %p589_p8 = scmp.ne.s32.totalorder %s1180_s1, %s588_s8  ;;  %s854_s5 = int_to_ptr.vmem [resolvable:$true] %s143_s5 }
  0x1a   : > { %s1195_s30 = scalar_select %p850_p3, 1, 0 }
  0x1b   : > { %p590_p9 = pneg %p844_p7  ;;  %p595_p10 = scmp.lt.u32.totalorder %s588_s8, %s1180_s1 }
  0x1d   : > { %p591_p4 = pnand %p590_p9, %p589_p8 }
  0x1f   : > { %p592_p5 = pneg %p591_p4 }
  0x21   : > { %p597_p2 = pnand %p595_p10, %p592_p5 }
  0x23   : > { %600 = shalt.err (!%p597_p2)
}
  0x24   : > { %s601_s19 = scalar_lea.vmem %s133_s28, 16  ;;  %s608_s20 = scalar_lea.vmem %s133_s28, 32 }
  0x25   : > { %p602_p0 = scmp.ne.s32.totalorder %s133_s28, %s601_s19  ;;  %p609_p11 = scmp.lt.s32.totalorder %s133_s28, %s133_s28 }
  0x26   : > { %p610_p6 = scmp.lt.s32.totalorder %s608_s20, %s601_s19 }
  0x27   : > { %p604_p1 = pnand %p602_p0, %p590_p9 }
  0x28   : > { %p611_p13 = por %p610_p6, %p609_p11 }
  0x29   : > { %p605_p12 = pneg %p604_p1 }
  0x2b   : > { %p612_p3 = pnand %p611_p13, %p605_p12 }
  0x2d   : > { %615 = shalt.err (!%p612_p3)
}
  0x2e   : > { %532 = dma.hbm_to_vmem [thread:$0]  (!%p844_p7), %s1180_s1, 16, %s133_s28, [#allocation6]  }
  0x2f   : > { %s154_s4 = sand.u32 1, %s740_s14   ;;  %s616_s8 = scalar_lea.hbm %s1181_s2, 16 }
  0x30   : > { %p617_p1 = scmp.ne.s32.totalorder %s1181_s2, %s616_s8  ;;  %p623_p12 = scmp.lt.u32.totalorder %s616_s8, %s1181_s2 }
  0x32   : > { %p619_p6 = pnand %p617_p1, %p590_p9 }
  0x34   : > { %p620_p11 = pneg %p619_p6 }
  0x36   : > { %p625_p13 = pnand %p623_p12, %p620_p11 }
  0x38   : > { %628 = shalt.err (!%p625_p13)
}
  0x39   : > { %s629_s28 = scalar_lea.vmem %s854_s5, 16  ;;  %s636_s19 = scalar_lea.vmem %s854_s5, 32 }
  0x3a   : > { %p630_p3 = scmp.ne.s32.totalorder %s854_s5, %s629_s28  ;;  %p637_p5 = scmp.lt.s32.totalorder %s854_s5, %s854_s5 }
  0x3b   : > { %p638_p10 = scmp.lt.s32.totalorder %s636_s19, %s629_s28 }
  0x3c   : > { %p632_p8 = pnand %p630_p3, %p590_p9 }
  0x3d   : > { %p639_p2 = por %p638_p10, %p637_p5 }
  0x3e   : > { %p633_p4 = pneg %p632_p8 }
  0x40   : > { %p640_p0 = pnand %p639_p2, %p633_p4 }
  0x42   : > { %643 = shalt.err (!%p640_p0)
}
  0x43   : > { %535 = dma.hbm_to_vmem [thread:$0]  (!%p844_p7), %s1181_s2, 16, %s854_s5, [#allocation6]  }
  0x44   : > { %s500_s27 = sshll.u32 %s154_s4, 8  ;;  %s515_s6 = sshll.u32 %s744_s15, 12 }
  0x45   : > { %s909_s9 = scalar_lea.hbm %s1179_s0, %s515_s6  ;;  %s158_s29 = scalar_lea.vmem [#allocation2], %s500_s27 }
  0x46   : > { %s165_s10 = sshll.u32 %s158_s29, 4  ;;  %s913_s11 = scalar_lea.sflag [#allocation3], %s154_s4  ;;  %s911_s10 = int_to_ptr.vmem [resolvable:$true] %s165_s10 }
  0x47   : > { %s644_s17 = scalar_lea.hbm %s909_s9, 4096  ;;  %p1196_p7 = scmp.ne.s32.totalorder %s1195_s30, 0 }
  0x48   : > { %p645_p9 = scmp.ne.s32.totalorder %s909_s9, %s644_s17  ;;  %s649_s19 = scalar_lea.hbm %s1179_s0, 8192 }
  0x49   : > { %p646_p1 = pneg %p1196_p7  ;;  %p650_p12 = scmp.lt.u32.totalorder %s909_s9, %s1179_s0 }
  0x4a   : > { %p651_p13 = scmp.lt.u32.totalorder %s649_s19, %s644_s17  ;;  %p653_p8 = scmp.lt.u32.totalorder %s644_s17, %s909_s9 }
  0x4b   : > { %p647_p6 = pnand %p646_p1, %p645_p9 }
  0x4c   : > { %p652_p3 = por %p651_p13, %p650_p12 }
  0x4d   : > { %p648_p11 = pneg %p647_p6 }
  0x4e   : > { %p654_p4 = por %p653_p8, %p652_p3 }
  0x50   : > { %p655_p5 = pnand %p654_p4, %p648_p11 }
  0x52   : > { %658 = shalt.err (!%p655_p5)
}
  0x53   : > { %s659_s4 = scalar_lea.vmem %s911_s10, 4096  ;;  %s748_s27 = smov [#allocation2]  }
  0x54   : > { %p660_p10 = scmp.ne.s32.totalorder %s911_s10, %s659_s4  ;;  %s664_s6 = sshll.u32 %s748_s27, 4  ;;  %s665_s6 = int_to_ptr.vmem [resolvable:$false] %s664_s6 }
  0x55   : > { %s666_s7 = scalar_lea.vmem %s665_s6, 8192  ;;  %p667_p9 = scmp.lt.s32.totalorder %s911_s10, %s665_s6 }
  0x56   : > { %p662_p2 = pnand %p660_p10, %p646_p1  ;;  %p668_p6 = scmp.lt.s32.totalorder %s666_s7, %s659_s4 }
  0x58   : > { %p663_p0 = pneg %p662_p2  ;;  %p669_p12 = por %p668_p6, %p667_p9 }
  0x5a   : > { %p670_p13 = pnand %p669_p12, %p663_p0 }
  0x5c   : > { %673 = shalt.err (!%p670_p13)
}
  0x5d   : > { %s749_s8 = smov 128   ;;  %s750_s29 = smov 8  }
  0x5e   : > { %539 = dma.hbm_to_vmem [thread:$0]  (!%p1196_p7), %s909_s9, 4096, %s911_s10, %s913_s11, %s749_s8, %s749_s8, %s750_s29  }
  0x5f   : > { %p1197_p1 = scmp.ne.s32.totalorder %s1192_s26, 0 }
  0x60   : > { %s944_s17 = sand.u32 (!%p1197_p1), 1, %s736_s13   ;;  %p1198_p11 = scmp.ne.s32.totalorder (!%p1197_p1), %s1189_s23, 0 }
  0x61   : > { %177 = sbr.rel (%p1197_p1) target bundleno = 153 (0x99), region = 32  ;;  %s504_s5 = sshll.u32 (!%p1197_p1), %s944_s17, 8 }
  0x62   : > { %s180_s28 = scalar_lea.sflag (!%p1197_p1), [#allocation3], %s944_s17  ;;  %s950_s19 = scalar_lea.vmem (!%p1197_p1), [#allocation2], %s504_s5 }
  0x68   : > { %719 = dma.done.wait (%p1198_p11), %s180_s28, 4096  }
  0x69   : > { %721 = vsyncadd (%p1198_p11), %s180_s28, 4294963200  ;;  %p1199_p7 = scmp.eq.s32.totalorder %s795_s16, 0 }
  0x6b   : > { %723 = dma.done.wait (%p1199_p7), [#allocation6], 32   ;;  %p1200_p3 = pmov %p1199_p7 }
  0x6c   : > { %v214_v0 = vld [vmem:[%s950_s19] sm:$0xff]  ;;  %v215_v4 = vld [vmem:[%s950_s19 + $0x8] sm:$0xff]  ;;  %v216_v5 = vld [vmem:[%s950_s19 + $0x10] sm:$0xff]  ;;  %vm356_vm0 = vcmask 64512   ;;  %s997_s23 = scalar_lea.vmem [#allocation8], %s504_s5  ;;  %s516_s26 = sshll.u32 %s795_s16, 12 }
  0x6d   : > { %725 = vsyncadd (%p1200_p3), [#allocation6], 4294967264  ;;  %v961_v1 = vld [vmem:[#allocation5] ss:$0 sm:$0xff]  ;;  %v963_v2 = vld [vmem:[#allocation7] ss:$0 sm:$0xff]  ;;  %s1119_s10 = scalar_lea.hbm %s1182_s3, %s516_s26 }
  0x6e   : > { %v253_v3 = vmul.f32 %v961_v1, %v214_v0  ;;  %v217_v6 = vld [vmem:[%s950_s19 + $0x18] sm:$0xff]  ;;  %v254_v7 = vmul.f32 %v961_v1, %v215_v4  ;;  %v255_v8 = vmul.f32 %v961_v1, %v216_v5  ;;  %v218_v10 = vld [vmem:[%s950_s19 + $0x20] sm:$0xff]  ;;  %v219_v11 = vld [vmem:[%s950_s19 + $0x28] sm:$0xff]  ;;  %s403_s30 = sshll.u32 %s997_s23, 4  ;;  %s390_s11 = scalar_lea.sflag [#allocation4], %s944_s17  ;;  %s1121_s30 = int_to_ptr.vmem [resolvable:$true] %s403_s30 }
  0x6f   : > { %v256_v9 = vmul.f32 %v961_v1, %v217_v6  ;;  %v220_v12 = vld [vmem:[%s950_s19 + $0x30] sm:$0xff]  ;;  %v257_v14 = vmul.f32 %v961_v1, %v218_v10  ;;  %v258_v15 = vmul.f32 %v961_v1, %v219_v11  ;;  %v221_v17 = vld [vmem:[%s950_s19 + $0x38] sm:$0xff]  ;;  %v222_v22 = vld [vmem:[%s950_s19 + $0x40] sm:$0xff]  ;;  %s674_s20 = scalar_lea.vmem %s1121_s30, 4096  ;;  %p1201_p4 = scmp.ne.s32.totalorder %s1190_s24, 0 }
  0x70   : > { %v292_v13 = vadd.f32 %v963_v2, %v253_v3  ;;  %v259_v16 = vmul.f32 %v961_v1, %v220_v12  ;;  %v293_v18 = vadd.f32 %v963_v2, %v254_v7  ;;  %v294_v19 = vadd.f32 %v963_v2, %v255_v8  ;;  %v223_v27 = vld [vmem:[%s950_s19 + $0x48] sm:$0xff]  ;;  %v224_v28 = vld [vmem:[%s950_s19 + $0x50] sm:$0xff]  ;;  %v225_v29 = vld [vmem:[%s950_s19 + $0x58] sm:$0xff]  ;;  %p675_p8 = scmp.ne.s32.totalorder %s1121_s30, %s674_s20  ;;  %s751_s22 = smov [#allocation8]  }
  0x71   : > { %v295_v20 = vadd.f32 %v963_v2, %v256_v9  ;;  %v260_v21 = vmul.f32 %v961_v1, %v221_v17  ;;  %v296_v24 = vadd.f32 %v963_v2, %v257_v14  ;;  %v297_v25 = vadd.f32 %v963_v2, %v258_v15  ;;  %v226_v34 = vld [vmem:[%s950_s19 + $0x60] sm:$0xff]  ;;  %v227_v35 = vld [vmem:[%s950_s19 + $0x68] sm:$0xff]  ;;  %v228_v36 = vld [vmem:[%s950_s19 + $0x70] sm:$0xff]  ;;  %s678_s4 = sshll.u32 %s751_s22, 4  ;;  %s679_s4 = int_to_ptr.vmem [resolvable:$false] %s678_s4 }
  0x72   : > { %v324_v23 = vmax.f32 %v292_v13, 0.0  ;;  %v298_v26 = vadd.f32 %v963_v2, %v259_v16  ;;  %v325_v30 = vmax.f32 %v293_v18, 0.0  ;;  %v326_v31 = vmax.f32 %v294_v19, 0.0  ;;  %v229_v41 = vld [vmem:[%s950_s19 + $0x78] sm:$0xff]  ;;  %v230_v54 = vld [vmem:[%s950_s19 + $0x80] sm:$0xff]  ;;  %v231_v59 = vld [vmem:[%s950_s19 + $0x88] sm:$0xff]  ;;  %p676_p5 = pnand %p675_p8, %p1201_p4  ;;  %p681_p2 = scmp.lt.s32.totalorder %s1121_s30, %s679_s4 }
  0x73   : > { %v327_v32 = vmax.f32 %v295_v20, 0.0  ;;  %v299_v33 = vadd.f32 %v963_v2, %v260_v21  ;;  %v328_v37 = vmax.f32 %v296_v24, 0.0  ;;  %v329_v38 = vmax.f32 %v297_v25, 0.0  ;;  %v232_v60 = vld [vmem:[%s950_s19 + $0x90] sm:$0xff]  ;;  %v233_v61 = vld [vmem:[%s950_s19 + $0x98] sm:$0xff]  ;;  %v234_v4 = vld [vmem:[%s950_s19 + $0xa0] sm:$0xff] }
  0x74   : > { %357 = vst.msk [vmem:[%s997_s23] sm:$0xff] %vm356_vm0, %v324_v23  ;;  %v330_v39 = vmax.f32 %v298_v26, 0.0  ;;  %v261_v40 = vmul.f32 %v961_v1, %v222_v22  ;;  %358 = vst.msk [vmem:[%s997_s23 + $0x8] sm:$0xff] %vm356_vm0, %v325_v30  ;;  %v262_v43 = vmul.f32 %v961_v1, %v223_v27  ;;  %v263_v44 = vmul.f32 %v961_v1, %v224_v28  ;;  %v235_v5 = vld [vmem:[%s950_s19 + $0xa8] sm:$0xff]  ;;  %v236_v6 = vld [vmem:[%s950_s19 + $0xb0] sm:$0xff]  ;;  %p677_p10 = pneg %p676_p5  ;;  %s680_s27 = scalar_lea.vmem %s679_s4, 8192 }
  0x75   : > { %359 = vst.msk [vmem:[%s997_s23 + $0x10] sm:$0xff] %vm356_vm0, %v326_v31  ;;  %360 = vst.msk [vmem:[%s997_s23 + $0x18] sm:$0xff] %vm356_vm0, %v327_v32  ;;  %v331_v42 = vmax.f32 %v299_v33, 0.0  ;;  %v264_v45 = vmul.f32 %v961_v1, %v225_v29  ;;  %v265_v47 = vmul.f32 %v961_v1, %v226_v34  ;;  %v266_v48 = vmul.f32 %v961_v1, %v227_v35  ;;  %v237_v11 = vld [vmem:[%s950_s19 + $0xb8] sm:$0xff]  ;;  %v238_v24 = vld [vmem:[%s950_s19 + $0xc0] sm:$0xff]  ;;  %p682_p0 = scmp.lt.s32.totalorder %s680_s27, %s674_s20 }
  0x76   : > { %361 = vst.msk [vmem:[%s997_s23 + $0x20] sm:$0xff] %vm356_vm0, %v328_v37  ;;  %362 = vst.msk [vmem:[%s997_s23 + $0x28] sm:$0xff] %vm356_vm0, %v329_v38  ;;  %v300_v46 = vadd.f32 %v963_v2, %v261_v40  ;;  %v267_v49 = vmul.f32 %v961_v1, %v228_v36  ;;  %v301_v50 = vadd.f32 %v963_v2, %v262_v43  ;;  %v239_v29 = vld [vmem:[%s950_s19 + $0xc8] sm:$0xff]  ;;  %v240_v30 = vld [vmem:[%s950_s19 + $0xd0] sm:$0xff] }
  0x77   : > { %363 = vst.msk [vmem:[%s997_s23 + $0x30] sm:$0xff] %vm356_vm0, %v330_v39  ;;  %364 = vst.msk [vmem:[%s997_s23 + $0x38] sm:$0xff] %vm356_vm0, %v331_v42  ;;  %v302_v51 = vadd.f32 %v963_v2, %v263_v44  ;;  %v303_v52 = vadd.f32 %v963_v2, %v264_v45  ;;  %v268_v53 = vmul.f32 %v961_v1, %v229_v41  ;;  %v241_v31 = vld [vmem:[%s950_s19 + $0xd8] sm:$0xff]  ;;  %v242_v36 = vld [vmem:[%s950_s19 + $0xe0] sm:$0xff]  ;;  %p683_p9 = por %p682_p0, %p681_p2 }
  0x78   : > { %v332_v55 = vmax.f32 %v300_v46, 0.0  ;;  %v304_v56 = vadd.f32 %v963_v2, %v265_v47  ;;  %v305_v57 = vadd.f32 %v963_v2, %v266_v48  ;;  %v306_v58 = vadd.f32 %v963_v2, %v267_v49  ;;  %v243_v37 = vld [vmem:[%s950_s19 + $0xe8] sm:$0xff]  ;;  %v244_v38 = vld [vmem:[%s950_s19 + $0xf0] sm:$0xff]  ;;  %v245_v43 = vld [vmem:[%s950_s19 + $0xf8] sm:$0xff] }
  0x79   : > { %v333_v62 = vmax.f32 %v301_v50, 0.0  ;;  %v334_v63 = vmax.f32 %v302_v51, 0.0  ;;  %v335_v0 = vmax.f32 %v303_v52, 0.0  ;;  %v307_v3 = vadd.f32 %v963_v2, %v268_v53  ;;  %p684_p6 = pnand %p683_p9, %p677_p10 }
  0x7a   : > { %365 = vst.msk [vmem:[%s997_s23 + $0x40] sm:$0xff] %vm356_vm0, %v332_v55  ;;  %v336_v7 = vmax.f32 %v304_v56, 0.0  ;;  %v337_v8 = vmax.f32 %v305_v57, 0.0  ;;  %v338_v9 = vmax.f32 %v306_v58, 0.0  ;;  %v269_v10 = vmul.f32 %v961_v1, %v230_v54 }
  0x7b   : > { %366 = vst.msk [vmem:[%s997_s23 + $0x48] sm:$0xff] %vm356_vm0, %v333_v62  ;;  %367 = vst.msk [vmem:[%s997_s23 + $0x50] sm:$0xff] %vm356_vm0, %v334_v63  ;;  %v339_v12 = vmax.f32 %v307_v3, 0.0  ;;  %v270_v13 = vmul.f32 %v961_v1, %v231_v59  ;;  %v271_v14 = vmul.f32 %v961_v1, %v232_v60  ;;  %v272_v15 = vmul.f32 %v961_v1, %v233_v61 }
  0x7c   : > { %368 = vst.msk [vmem:[%s997_s23 + $0x58] sm:$0xff] %vm356_vm0, %v335_v0  ;;  %369 = vst.msk [vmem:[%s997_s23 + $0x60] sm:$0xff] %vm356_vm0, %v336_v7  ;;  %v308_v16 = vadd.f32 %v963_v2, %v269_v10  ;;  %v273_v17 = vmul.f32 %v961_v1, %v234_v4  ;;  %v274_v18 = vmul.f32 %v961_v1, %v235_v5 }
  0x7d   : > { %370 = vst.msk [vmem:[%s997_s23 + $0x68] sm:$0xff] %vm356_vm0, %v337_v8  ;;  %371 = vst.msk [vmem:[%s997_s23 + $0x70] sm:$0xff] %vm356_vm0, %v338_v9  ;;  %v275_v19 = vmul.f32 %v961_v1, %v236_v6  ;;  %v309_v20 = vadd.f32 %v963_v2, %v270_v13  ;;  %v310_v21 = vadd.f32 %v963_v2, %v271_v14 }
  0x7e   : > { %372 = vst.msk [vmem:[%s997_s23 + $0x78] sm:$0xff] %vm356_vm0, %v339_v12  ;;  %v311_v22 = vadd.f32 %v963_v2, %v272_v15  ;;  %v276_v23 = vmul.f32 %v961_v1, %v237_v11  ;;  %v340_v25 = vmax.f32 %v308_v16, 0.0  ;;  %v312_v26 = vadd.f32 %v963_v2, %v273_v17 }
  0x7f   : > { %v313_v27 = vadd.f32 %v963_v2, %v274_v18  ;;  %v314_v28 = vadd.f32 %v963_v2, %v275_v19  ;;  %v341_v32 = vmax.f32 %v309_v20, 0.0  ;;  %v342_v33 = vmax.f32 %v310_v21, 0.0 }
  0x80   : > { %v343_v34 = vmax.f32 %v311_v22, 0.0  ;;  %v315_v35 = vadd.f32 %v963_v2, %v276_v23  ;;  %373 = vst.msk [vmem:[%s997_s23 + $0x80] sm:$0xff] %vm356_vm0, %v340_v25  ;;  %v344_v39 = vmax.f32 %v312_v26, 0.0  ;;  %v277_v42 = vmul.f32 %v961_v1, %v238_v24 }
  0x81   : > { %v345_v40 = vmax.f32 %v313_v27, 0.0  ;;  %v346_v41 = vmax.f32 %v314_v28, 0.0  ;;  %374 = vst.msk [vmem:[%s997_s23 + $0x88] sm:$0xff] %vm356_vm0, %v341_v32  ;;  %375 = vst.msk [vmem:[%s997_s23 + $0x90] sm:$0xff] %vm356_vm0, %v342_v33  ;;  %v278_v45 = vmul.f32 %v961_v1, %v239_v29  ;;  %v279_v46 = vmul.f32 %v961_v1, %v240_v30 }
  0x82   : > { %376 = vst.msk [vmem:[%s997_s23 + $0x98] sm:$0xff] %vm356_vm0, %v343_v34  ;;  %v347_v44 = vmax.f32 %v315_v35, 0.0  ;;  %v280_v47 = vmul.f32 %v961_v1, %v241_v31  ;;  %377 = vst.msk [vmem:[%s997_s23 + $0xa0] sm:$0xff] %vm356_vm0, %v344_v39  ;;  %v316_v48 = vadd.f32 %v963_v2, %v277_v42  ;;  %v281_v49 = vmul.f32 %v961_v1, %v242_v36 }
  0x83   : > { %378 = vst.msk [vmem:[%s997_s23 + $0xa8] sm:$0xff] %vm356_vm0, %v345_v40  ;;  %379 = vst.msk [vmem:[%s997_s23 + $0xb0] sm:$0xff] %vm356_vm0, %v346_v41  ;;  %v282_v50 = vmul.f32 %v961_v1, %v243_v37  ;;  %v283_v51 = vmul.f32 %v961_v1, %v244_v38  ;;  %v317_v52 = vadd.f32 %v963_v2, %v278_v45 }
  0x84   : > { %380 = vst.msk [vmem:[%s997_s23 + $0xb8] sm:$0xff] %vm356_vm0, %v347_v44  ;;  %v318_v53 = vadd.f32 %v963_v2, %v279_v46  ;;  %v319_v54 = vadd.f32 %v963_v2, %v280_v47  ;;  %v284_v55 = vmul.f32 %v961_v1, %v245_v43  ;;  %v348_v56 = vmax.f32 %v316_v48, 0.0 }
  0x85   : > { %v320_v57 = vadd.f32 %v963_v2, %v281_v49  ;;  %v321_v58 = vadd.f32 %v963_v2, %v282_v50  ;;  %v322_v59 = vadd.f32 %v963_v2, %v283_v51  ;;  %v349_v60 = vmax.f32 %v317_v52, 0.0 }
  0x86   : > { %v350_v61 = vmax.f32 %v318_v53, 0.0  ;;  %v351_v62 = vmax.f32 %v319_v54, 0.0  ;;  %v323_v1 = vadd.f32 %v963_v2, %v284_v55  ;;  %381 = vst.msk [vmem:[%s997_s23 + $0xc0] sm:$0xff] %vm356_vm0, %v348_v56 }
  0x87   : > { %v352_v63 = vmax.f32 %v320_v57, 0.0  ;;  %v353_v0 = vmax.f32 %v321_v58, 0.0  ;;  %v354_v3 = vmax.f32 %v322_v59, 0.0  ;;  %382 = vst.msk [vmem:[%s997_s23 + $0xc8] sm:$0xff] %vm356_vm0, %v349_v60 }
  0x88   : > { %383 = vst.msk [vmem:[%s997_s23 + $0xd0] sm:$0xff] %vm356_vm0, %v350_v61  ;;  %384 = vst.msk [vmem:[%s997_s23 + $0xd8] sm:$0xff] %vm356_vm0, %v351_v62  ;;  %v355_v2 = vmax.f32 %v323_v1, 0.0 }
  0x89   : > { %385 = vst.msk [vmem:[%s997_s23 + $0xe0] sm:$0xff] %vm356_vm0, %v352_v63  ;;  %386 = vst.msk [vmem:[%s997_s23 + $0xe8] sm:$0xff] %vm356_vm0, %v353_v0 }
  0x8a   : > { %387 = vst.msk [vmem:[%s997_s23 + $0xf0] sm:$0xff] %vm356_vm0, %v354_v3  ;;  %388 = vst.msk [vmem:[%s997_s23 + $0xf8] sm:$0xff] %vm356_vm0, %v355_v2 }
  0x8b   : > { %687 = shalt.err (!%p684_p6)
}
  0x8c   : > { %s688_s6 = scalar_lea.hbm %s1119_s10, 4096  ;;  %s692_s29 = scalar_lea.hbm %s1182_s3, 8192 }
  0x8d   : > { %p689_p12 = scmp.ne.s32.totalorder %s1119_s10, %s688_s6  ;;  %p693_p11 = scmp.lt.u32.totalorder %s1119_s10, %s1182_s3 }
  0x8e   : > { %p694_p7 = scmp.lt.u32.totalorder %s692_s29, %s688_s6  ;;  %p696_p8 = scmp.lt.u32.totalorder %s688_s6, %s1119_s10 }
  0x8f   : > { %p690_p13 = pnand %p689_p12, %p1201_p4 }
  0x90   : > { %p695_p3 = por %p694_p7, %p693_p11 }
  0x91   : > { %p691_p1 = pneg %p690_p13 }
  0x92   : > { %p697_p5 = por %p696_p8, %p695_p3 }
  0x94   : > { %p698_p10 = pnand %p697_p5, %p691_p1 }
  0x96   : > { %701 = shalt.err (!%p698_p10)
}
  0x97   : > { %s752_s19 = smov 128   ;;  %s753_s23 = smov 8  }
  0x98   : > { %527 = dma.vmem_to_hbm [thread:$0]  (%p1201_p4), %s1121_s30, 4096, %s1119_s10, %s390_s11, %s752_s19, %s752_s19, %s753_s23  }
  0x99 PF: > { %s418_s26 = sand.u32 1, %s732_s12   ;;  %p1202_p2 = scmp.ne.s32.totalorder %s1191_s25, 0 }
  0x9a   : > { %p1203_p0 = scmp.ge.s32.totalorder %s744_s15, 2  ;;  %s419_s16 = scalar_lea.sflag [#allocation4], %s418_s26 }
  0x9c   : > { %p541_p9 = pnand %p1203_p0, %p1202_p2 }
  0x9e   : > { %727 = dma.done.wait (!%p541_p9), %s419_s16, 4096  }
  0x9f   : > { %729 = vsyncadd (!%p541_p9), %s419_s16, 4294963200  ;;  %p17_p6 = scmp.ge.s32.totalorder %s799_s18, 4   ;;  %s1204_s12 = smov %s736_s13 }
  0xa0   : > { %s1205_s13 = smov %s740_s14  ;;  %s1206_s14 = smov %s811_s21 }
  0xa1   : > { %s1207_s15 = smov %s799_s18  ;;  %19 = sbr.rel (!%p17_p6) target bundleno = 6 (0x6), region = 85 }
  0xa8   :  { %424 = vsyncpa [#allocation3], 1 }
  0xa9   :  { %426 = vsyncpa [#allocation3 + $0x1], 1 }
  0xaa   :  { %427 = vsyncpa [#allocation6], 1 }
  0xab   :  { %428 = vsyncpa [#allocation4], 1 }
  0xac   :  { %430 = vsyncpa [#allocation4 + $0x1], 1 }

// kernel: double_conv.3
= control target key start
LH: loop header
LB: loop body
LE: loop exit
PB: predicated region body
PF: predicated region fallthrough
CT: control target
= control target key end

     0   :  { %9 = vsyncpa [#allocation4], 0  ;;  %s4592_s0 = inlined_call_operand.hbm [shape: f32[2,16,16,4], index: 0, kind: input, shape index: {}]   ;;  %s4593_s1 = inlined_call_operand.hbm [shape: f32[36,8], index: 1, kind: input, shape index: {}]   ;;  %s4594_s2 = inlined_call_operand.hbm [shape: f32[2,16,16,8], index: 2, kind: output, shape index: {0}]   ;;  %s4595_s3 = inlined_call_operand.hbm [shape: f32[2,2,8], index: 3, kind: output, shape index: {1}]  }
   0x1   :  { %11 = vsyncpa [#allocation4 + $0x1], 0 }
   0x2   :  { %12 = vsyncpa [#allocation7], 0 }
   0x3   :  { %13 = vsyncpa [#allocation5], 0 }
   0x4   :  { %15 = vsyncpa [#allocation5 + $0x1], 0 }
   0x5   :  { %16 = vsyncpa [#allocation10], 0 }
   0x6   :  { %18 = vsyncpa [#allocation10 + $0x1], 0  ;;  %s3031_s12 = smov 0   ;;  %s3033_s13 = smov 0  }
   0x7   :  { %s3035_s14 = smov 0   ;;  %s3037_s15 = smov 0  }
   0x8 LB: > { %s3052_s16 = sadd.s32 4294967295, %s2993_s15   ;;  %s2596_s17 = sadd.s32 4294967294, %s2993_s15   ;;  %s2993_s15 = sphi %s3037_s15, %s4714_s15   ;;  %s2989_s14 = sphi %s3035_s14, %s4713_s14   ;;  %s2985_s13 = sphi %s3033_s13, %s4712_s13   ;;  %s2981_s12 = sphi %s3031_s12, %s4711_s12  }
   0x9   : > { %p44_p0 = scmp.ne.s32.totalorder %s2985_s13, %s2981_s12  ;;  %p4596_p1 = scmp.eq.s32.totalorder %s3052_s16, 0 }
   0xa   : > { %p95_p3 = scmp.eq.s32.totalorder %s2596_s17, 1  ;;  %p2597_p5 = scmp.ge.s32.totalorder %s2993_s15, 1 }
   0xb   : > { %p3061_p4 = por %p4596_p1, %p44_p0  ;;  %p128_p7 = scmp.lt.s32.totalorder %s2993_s15, 3 }
   0xc   : > { %p3066_p6 = por %p95_p3, %p44_p0  ;;  %s2995_s21 = smov [#allocation6]  }
   0xd   : > { %s4604_s18 = scalar_select %p3061_p4, 1, 0 }
   0xe   : > { %s4605_s19 = scalar_select %p3066_p6, 1, 0 }
   0xf   : > { %p3071_p8 = pnand %p2597_p5, %p128_p7  ;;  %s140_s22 = sshll.u32 %s2995_s21, 4  ;;  %s3075_s22 = int_to_ptr.vmem [resolvable:$true] %s140_s22 }
  0x10   : > { %s3087_s24 = sadd.s32 1, %s2993_s15   ;;  %s31_s25 = sadd.s32 1, %s2989_s14 }
  0x11   : > { %s4606_s20 = scalar_select %p3071_p8, 1, 0 }
  0x12   : > { %p2769_p9 = pneg %p3071_p8  ;;  %s28_s26 = ssub.s32 %s2993_s15, %s3087_s24 }
  0x13   : > { %s2833_s29 = scalar_lea.hbm %s4593_s1, 640 }
  0x14   : > { %p3082_p11 = pnand %p2769_p9, %p4596_p1  ;;  %p2834_p12 = scmp.ne.s32.totalorder %s4593_s1, %s2833_s29 }
  0x15   : > { %p2840_p5 = scmp.lt.u32.totalorder %s2833_s29, %s4593_s1 }
  0x16   : > { %p2835_p13 = pneg %p3082_p11 }
  0x18   : > { %p2836_p0 = pnand %p2835_p13, %p2834_p12 }
  0x1a   : > { %p2837_p3 = pneg %p2836_p0 }
  0x1c   : > { %p2842_p7 = pnand %p2840_p5, %p2837_p3 }
  0x1e   : > { %2845 = shalt.err (!%p2842_p7)
}
  0x1f   : > { %s2846_s7 = scalar_lea.vmem %s3075_s22, 640  ;;  %p2854_p2 = scmp.lt.s32.totalorder %s3075_s22, %s3075_s22 }
  0x20   : > { %p2847_p9 = scmp.ne.s32.totalorder %s3075_s22, %s2846_s7  ;;  %p2855_p6 = scmp.lt.s32.totalorder %s2846_s7, %s2846_s7 }
  0x22   : > { %p2849_p10 = pnand %p2847_p9, %p2835_p13  ;;  %p2856_p4 = por %p2855_p6, %p2854_p2 }
  0x24   : > { %p2850_p1 = pneg %p2849_p10 }
  0x26   : > { %p2857_p8 = pnand %p2856_p4, %p2850_p1 }
  0x28   : > { %2860 = shalt.err (!%p2857_p8)
}
  0x29   : > { %s2996_s8 = smov 128   ;;  %s2997_s9 = smov 8  }
  0x2a   : > { %2772 = dma.hbm_to_vmem [thread:$0]  (!%p3082_p11), %s4593_s1, 640, %s3075_s22, [#allocation7], %s2996_s8, %s2996_s8, %s2997_s9  }
  0x2b   : > { %p29_p1 = scmp.eq.s32.totalorder %s28_s26, 0  ;;  %p38_p2 = scmp.ne.s32.totalorder %s2989_s14, %s2985_s13 }
  0x2c   : > { %p39_p4 = scmp.eq.s32.totalorder %s2993_s15, 0  ;;  %p2785_p6 = scmp.lt.s32.totalorder %s2993_s15, 2 }
  0x2d   : > { %s3121_s17 = scalar_select %p29_p1, %s2989_s14, %s31_s25  }
  0x2e   : > { %p40_p8 = por %p39_p4, %p38_p2  ;;  %p4608_p10 = scmp.eq.s32.totalorder %s3052_s16, 1 }
  0x2f   : > { %s154_s23 = sand.u32 1, %s2989_s14   ;;  %s2648_s27 = sshll.u32 %s2993_s15, 12 }
  0x30   : > { %p3125_p12 = por %p4608_p10, %p38_p2  ;;  %s2600_s28 = sshll.u32 %s154_s23, 8 }
  0x31   : > { %s3134_s4 = scalar_lea.hbm %s4592_s0, %s2648_s27  ;;  %s158_s22 = scalar_lea.vmem [#allocation3], %s2600_s28 }
  0x32   : > { %s165_s25 = sshll.u32 %s158_s22, 4  ;;  %p3136_p11 = pnand %p2785_p6, %p40_p8  ;;  %s3140_s25 = int_to_ptr.vmem [resolvable:$true] %s165_s25 }
  0x33   : > { %s3142_s5 = scalar_lea.sflag [#allocation4], %s154_s23  ;;  %s2861_s6 = scalar_lea.hbm %s3134_s4, 4096 }
  0x34   : > { %p2862_p13 = scmp.ne.s32.totalorder %s3134_s4, %s2861_s6  ;;  %p2863_p0 = pneg %p3136_p11 }
  0x35   : > { %s2866_s11 = scalar_lea.hbm %s4592_s0, 8192  ;;  %p2867_p7 = scmp.lt.u32.totalorder %s3134_s4, %s4592_s0 }
  0x36   : > { %p2864_p3 = pnand %p2863_p0, %p2862_p13  ;;  %p2868_p9 = scmp.lt.u32.totalorder %s2866_s11, %s2861_s6 }
  0x37   : > { %p2870_p2 = scmp.lt.u32.totalorder %s2861_s6, %s3134_s4 }
  0x38   : > { %p2865_p5 = pneg %p2864_p3  ;;  %p2869_p1 = por %p2868_p9, %p2867_p7 }
  0x3a   : > { %p2871_p4 = por %p2870_p2, %p2869_p1 }
  0x3c   : > { %p2872_p6 = pnand %p2871_p4, %p2865_p5 }
  0x3e   : > { %2875 = shalt.err (!%p2872_p6)
}
  0x3f   : > { %s2876_s23 = scalar_lea.vmem %s3140_s25, 4096  ;;  %s2998_s29 = smov [#allocation3]  }
  0x40   : > { %p2877_p8 = scmp.ne.s32.totalorder %s3140_s25, %s2876_s23  ;;  %s2881_s30 = sshll.u32 %s2998_s29, 4  ;;  %s2882_s30 = int_to_ptr.vmem [resolvable:$false] %s2881_s30 }
  0x41   : > { %s2883_s22 = scalar_lea.vmem %s2882_s30, 8192  ;;  %p2884_p3 = scmp.lt.s32.totalorder %s3140_s25, %s2882_s30 }
  0x42   : > { %p2879_p10 = pnand %p2877_p8, %p2863_p0  ;;  %p2885_p7 = scmp.lt.s32.totalorder %s2883_s22, %s2876_s23 }
  0x44   : > { %p2880_p13 = pneg %p2879_p10  ;;  %p2886_p9 = por %p2885_p7, %p2884_p3 }
  0x46   : > { %p2887_p1 = pnand %p2886_p9, %p2880_p13 }
  0x48   : > { %2890 = shalt.err (!%p2887_p1)
}
  0x49   : > { %2776 = dma.hbm_to_vmem [thread:$0]  (!%p3136_p11), %s3134_s4, 4096, %s3140_s25, %s3142_s5, %s2996_s8, %s2996_s8, %s2997_s9  }
  0x4a   : > { %p4611_p0 = scmp.ne.s32.totalorder %s4606_s20, 0 }
  0x4c   : > { %177 = sbr.rel (%p4611_p0) target bundleno = 1007 (0x3ef), region = 28 }
  0x53   : > { %s3176_s6 = sand.u32 1, %s2985_s13   ;;  %p4612_p5 = scmp.ne.s32.totalorder %s4604_s18, 0 }
  0x54   : > { %s2604_s7 = sshll.u32 %s3176_s6, 8  ;;  %s180_s10 = scalar_lea.sflag [#allocation4], %s3176_s6 }
  0x55   : > { %s3182_s26 = scalar_lea.vmem [#allocation3], %s2604_s7 }
  0x56   : > { %2964 = dma.done.wait (%p4612_p5), %s180_s10, 4096  }
  0x57   : > { %2966 = vsyncadd (%p4612_p5), %s180_s10, 4294963200  ;;  %p4613_p11 = scmp.eq.s32.totalorder %s3052_s16, 0 }
  0x59   : > { %2968 = dma.done.wait (%p4613_p11), [#allocation7], 640   ;;  %p4614_p2 = pmov %p4613_p11 }
  0x5a   : > { %vm247_vm0 = vcmask 31744   ;;  %vm250_vm1 = vcmask 25600   ;;  %v2999_v0 = vmov 0.0   ;;  %v215_v1 = vld [vmem:[%s3182_s26] sm:$0xff]  ;;  %v217_v2 = vld [vmem:[%s3182_s26 + $0x10] sm:$0xff]  ;;  %v216_v3 = vld [vmem:[%s3182_s26 + $0x8] sm:$0xff] }
  0x5b   : > { %2970 = vsyncadd (%p4614_p2), [#allocation7], 4294966656  ;;  %248 = vst.msk [vmem:[#allocation2] sm:$0xff] %vm247_vm0, %v2999_v0  ;;  %v219_v6 = vld [vmem:[%s3182_s26 + $0x20] sm:$0xff]  ;;  %s3000_s18 = smov 4   ;;  %v218_v7 = vld [vmem:[%s3182_s26 + $0x18] sm:$0xff] }
  0x5c   : > { %249 = vst.msk [vmem:[#allocation2 + $0x8] sm:$0xff] %vm247_vm0, %v2999_v0  ;;  %252 = vst.msk [vmem:[#allocation2 + $0x18] sm:$0xff] %vm247_vm0, %v2999_v0  ;;  %v221_v8 = vld [vmem:[%s3182_s26 + $0x30] sm:$0xff]  ;;  %v220_v9 = vld [vmem:[%s3182_s26 + $0x28] sm:$0xff]  ;;  %s3001_s20 = smov 8   ;;  %s3002_s8 = smov 12  }
  0x5d   : > { %253 = vst.msk [vmem:[#allocation2 + $0x20] sm:$0xff] %vm247_vm0, %v2999_v0  ;;  %255 = vst.msk [vmem:[#allocation2 + $0x30] sm:$0xff] %vm247_vm0, %v2999_v0  ;;  %v223_v10 = vld [vmem:[%s3182_s26 + $0x40] sm:$0xff]  ;;  %v222_v11 = vld [vmem:[%s3182_s26 + $0x38] sm:$0xff]  ;;  %s3003_s9 = smov 16   ;;  %s3004_s4 = smov 20  }
  0x5e   : > { %256 = vst.msk [vmem:[#allocation2 + $0x38] sm:$0xff] %vm247_vm0, %v2999_v0  ;;  %258 = vst.msk [vmem:[#allocation2 + $0x48] sm:$0xff] %vm247_vm0, %v2999_v0  ;;  %v225_v12 = vld [vmem:[%s3182_s26 + $0x50] sm:$0xff]  ;;  %v224_v13 = vld [vmem:[%s3182_s26 + $0x48] sm:$0xff]  ;;  %s3005_s25 = smov 24   ;;  %vm2014_vm2 = vcmask 1043456  }
  0x5f   : > { %259 = vst.msk [vmem:[#allocation2 + $0x50] sm:$0xff] %vm247_vm0, %v2999_v0  ;;  %261 = vst.msk [vmem:[#allocation2 + $0x60] sm:$0xff] %vm247_vm0, %v2999_v0  ;;  %v227_v14 = vld [vmem:[%s3182_s26 + $0x60] sm:$0xff]  ;;  %v226_v15 = vld [vmem:[%s3182_s26 + $0x58] sm:$0xff]  ;;  %s3006_s5 = smov 28   ;;  %s3007_s11 = smov 32  }
  0x60   : > { %262 = vst.msk [vmem:[#allocation2 + $0x68] sm:$0xff] %vm247_vm0, %v2999_v0  ;;  %264 = vst.msk [vmem:[#allocation2 + $0x78] sm:$0xff] %vm247_vm0, %v2999_v0  ;;  %v229_v16 = vld [vmem:[%s3182_s26 + $0x70] sm:$0xff]  ;;  %v228_v17 = vld [vmem:[%s3182_s26 + $0x68] sm:$0xff]  ;;  %vm1681_vm3 = vcmask 64512   ;;  %vm1714_vm4 = vcmask 97280  }
  0x61   : > { %265 = vst.msk [vmem:[#allocation2 + $0x80] sm:$0xff] %vm247_vm0, %v2999_v0  ;;  %267 = vst.msk [vmem:[#allocation2 + $0x90] sm:$0xff] %vm247_vm0, %v2999_v0  ;;  %v231_v18 = vld [vmem:[%s3182_s26 + $0x80] sm:$0xff]  ;;  %v230_v19 = vld [vmem:[%s3182_s26 + $0x78] sm:$0xff]  ;;  %vm1747_vm5 = vcmask 130048   ;;  %vm1780_vm6 = vcmask 162816  }
  0x62   : > { %268 = vst.msk [vmem:[#allocation2 + $0x98] sm:$0xff] %vm247_vm0, %v2999_v0  ;;  %270 = vst.msk [vmem:[#allocation2 + $0xa8] sm:$0xff] %vm247_vm0, %v2999_v0  ;;  %v233_v20 = vld [vmem:[%s3182_s26 + $0x90] sm:$0xff]  ;;  %v232_v21 = vld [vmem:[%s3182_s26 + $0x88] sm:$0xff]  ;;  %vm1846_vm7 = vcmask 228352   ;;  %vm1813_vm8 = vcmask 195584  }
  0x63   : > { %271 = vst.msk [vmem:[#allocation2 + $0xb0] sm:$0xff] %vm247_vm0, %v2999_v0  ;;  %273 = vst.msk [vmem:[#allocation2 + $0xc0] sm:$0xff] %vm247_vm0, %v2999_v0  ;;  %v368_v4 = vld [vmem:[#allocation2 + $0x1] sm:$0xff]  ;;  %v235_v22 = vld [vmem:[%s3182_s26 + $0xa0] sm:$0xff]  ;;  %vm1879_vm9 = vcmask 261120   ;;  %vm1917_vm10 = vcmask 293888  }
  0x64   : > { %274 = vst.msk [vmem:[#allocation2 + $0xc8] sm:$0xff] %vm247_vm0, %v2999_v0  ;;  %276 = vst.msk [vmem:[#allocation2 + $0xd8] sm:$0xff] %vm247_vm0, %v2999_v0  ;;  %657 = vrot.lane.b32.xlu0 %v368_v4, %s3000_s18  ;;  %v234_v23 = vld [vmem:[%s3182_s26 + $0x98] sm:$0xff]  ;;  %v237_v24 = vld [vmem:[%s3182_s26 + $0xb0] sm:$0xff]  ;;  %s4240_s27 = scalar_lea.vmem [#allocation8], %s2604_s7  ;;  %s2649_s28 = sshll.u32 %s3052_s16, 12 }
  0x65   : > { %277 = vst.msk [vmem:[#allocation2 + $0xe0] sm:$0xff] %vm247_vm0, %v2999_v0  ;;  %279 = vst.msk [vmem:[#allocation2 + $0xf0] sm:$0xff] %vm247_vm0, %v2999_v0  ;;  %v236_v27 = vld [vmem:[%s3182_s26 + $0xa8] sm:$0xff]  ;;  %v239_v28 = vld [vmem:[%s3182_s26 + $0xc0] sm:$0xff]  ;;  %s2468_s23 = sshll.u32 %s4240_s27, 4  ;;  %s4506_s22 = scalar_lea.hbm %s4594_s2, %s2649_s28  ;;  %s4508_s23 = int_to_ptr.vmem [resolvable:$true] %s2468_s23 }
  0x66   : > { %280 = vst.msk [vmem:[#allocation2 + $0xf8] sm:$0xff] %vm247_vm0, %v2999_v0  ;;  %282 = vst.msk [vmem:[#allocation2 + $0x108] sm:$0xff] %vm247_vm0, %v2999_v0  ;;  %v238_v33 = vld [vmem:[%s3182_s26 + $0xb8] sm:$0xff]  ;;  %v241_v34 = vld [vmem:[%s3182_s26 + $0xd0] sm:$0xff]  ;;  %s2450_s7 = scalar_lea.sflag [#allocation5], %s3176_s6  ;;  %s2891_s10 = scalar_lea.vmem %s4508_s23, 4096 }
  0x67   : > { %283 = vst.msk [vmem:[#allocation2 + $0x110] sm:$0xff] %vm247_vm0, %v2999_v0  ;;  %285 = vst.msk [vmem:[#allocation2 + $0x120] sm:$0xff] %vm247_vm0, %v2999_v0  ;;  %v240_v35 = vld [vmem:[%s3182_s26 + $0xc8] sm:$0xff]  ;;  %v243_v36 = vld [vmem:[%s3182_s26 + $0xe0] sm:$0xff]  ;;  %p2892_p4 = scmp.ne.s32.totalorder %s4508_s23, %s2891_s10 }
  0x68   : > { %286 = vst.msk [vmem:[#allocation2 + $0x128] sm:$0xff] %vm247_vm0, %v2999_v0  ;;  %288 = vst.msk [vmem:[#allocation2 + $0x138] sm:$0xff] %vm247_vm0, %v2999_v0  ;;  %v242_v38 = vld [vmem:[%s3182_s26 + $0xd8] sm:$0xff]  ;;  %v244_v39 = vld [vmem:[%s3182_s26 + $0xe8] sm:$0xff] }
  0x69   : > { %289 = vst.msk [vmem:[#allocation2 + $0x140] sm:$0xff] %vm247_vm0, %v2999_v0  ;;  %291 = vst.msk [vmem:[#allocation2 + $0x150] sm:$0xff] %vm247_vm0, %v2999_v0  ;;  %v400_v62 = vld [vmem:[#allocation2 + $0x2] sm:$0xff]  ;;  %p2893_p6 = pnand %p2892_p4, %p3125_p12 }
  0x6a   : > { %292 = vst.msk [vmem:[#allocation2 + $0x158] sm:$0xff] %vm247_vm0, %v2999_v0  ;;  %294 = vst.msk [vmem:[#allocation2 + $0x168] sm:$0xff] %vm247_vm0, %v2999_v0 }
  0x6b   : > { %295 = vst.msk [vmem:[#allocation2 + $0x170] sm:$0xff] %vm247_vm0, %v2999_v0  ;;  %297 = vst.msk [vmem:[#allocation2 + $0x180] sm:$0xff] %vm247_vm0, %v2999_v0  ;;  %p2894_p8 = pneg %p2893_p6 }
  0x6c   : > { %298 = vst.msk [vmem:[#allocation2 + $0x188] sm:$0xff] %vm247_vm0, %v2999_v0  ;;  %300 = vst.msk [vmem:[#allocation2 + $0x198] sm:$0xff] %vm247_vm0, %v2999_v0 }
  0x6d   : > { %301 = vst.msk [vmem:[#allocation2 + $0x1a0] sm:$0xff] %vm247_vm0, %v2999_v0  ;;  %304 = vst.msk [vmem:[#allocation2 + $0x19] sm:$0xff] %vm247_vm0, %v215_v1 }
  0x6e   : > { %251 = vst.msk [vmem:[#allocation2 + $0x10] sm:$0x3] %vm250_vm1, %v2999_v0  ;;  %254 = vst.msk [vmem:[#allocation2 + $0x28] sm:$0x3] %vm250_vm1, %v2999_v0 }
  0x6f   : > { %257 = vst.msk [vmem:[#allocation2 + $0x40] sm:$0x3] %vm250_vm1, %v2999_v0  ;;  %260 = vst.msk [vmem:[#allocation2 + $0x58] sm:$0x3] %vm250_vm1, %v2999_v0 }
  0x70   : > { %263 = vst.msk [vmem:[#allocation2 + $0x70] sm:$0x3] %vm250_vm1, %v2999_v0  ;;  %266 = vst.msk [vmem:[#allocation2 + $0x88] sm:$0x3] %vm250_vm1, %v2999_v0 }
  0x71   : > { %269 = vst.msk [vmem:[#allocation2 + $0xa0] sm:$0x3] %vm250_vm1, %v2999_v0  ;;  %272 = vst.msk [vmem:[#allocation2 + $0xb8] sm:$0x3] %vm250_vm1, %v2999_v0 }
  0x72   : > { %275 = vst.msk [vmem:[#allocation2 + $0xd0] sm:$0x3] %vm250_vm1, %v2999_v0  ;;  %278 = vst.msk [vmem:[#allocation2 + $0xe8] sm:$0x3] %vm250_vm1, %v2999_v0 }
  0x73   : > { %281 = vst.msk [vmem:[#allocation2 + $0x100] sm:$0x3] %vm250_vm1, %v2999_v0  ;;  %284 = vst.msk [vmem:[#allocation2 + $0x118] sm:$0x3] %vm250_vm1, %v2999_v0 }
  0x74   : > { %287 = vst.msk [vmem:[#allocation2 + $0x130] sm:$0x3] %vm250_vm1, %v2999_v0  ;;  %290 = vst.msk [vmem:[#allocation2 + $0x148] sm:$0x3] %vm250_vm1, %v2999_v0  ;;  %v3289_v25 = vld [vmem:[#allocation2 + $0x19] sm:$0xff] }
  0x75   : > { %293 = vst.msk [vmem:[#allocation2 + $0x160] sm:$0x3] %vm250_vm1, %v2999_v0  ;;  %296 = vst.msk [vmem:[#allocation2 + $0x178] sm:$0x3] %vm250_vm1, %v2999_v0  ;;  %v369_v5 = vld [vmem:[#allocation2 + $0x9] sm:$0xff]  ;;  %661 = vrot.lane.b32.xlu1 %v3289_v25, %s3000_s18 }
  0x76   : > { %299 = vst.msk [vmem:[#allocation2 + $0x190] sm:$0x3] %vm250_vm1, %v2999_v0  ;;  %302 = vst.msk [vmem:[#allocation2 + $0x1a8] sm:$0x3] %vm250_vm1, %v2999_v0  ;;  %659 = vrot.lane.b32.xlu0 %v369_v5, %s3000_s18  ;;  %v401_v1 = vld [vmem:[#allocation2 + $0xa] sm:$0xff] }
  0x77   : > { %306 = vst.msk [vmem:[#allocation2 + $0x31] sm:$0xff] %vm247_vm0, %v217_v2  ;;  %305 = vst.msk [vmem:[#allocation2 + $0x21] sm:$0xff] %vm247_vm0, %v216_v3 }
  0x78   : > { %308 = vst.msk [vmem:[#allocation2 + $0x49] sm:$0xff] %vm247_vm0, %v219_v6  ;;  %307 = vst.msk [vmem:[#allocation2 + $0x39] sm:$0xff] %vm247_vm0, %v218_v7 }
  0x79   : > { %310 = vst.msk [vmem:[#allocation2 + $0x61] sm:$0xff] %vm247_vm0, %v221_v8  ;;  %309 = vst.msk [vmem:[#allocation2 + $0x51] sm:$0xff] %vm247_vm0, %v220_v9 }
  0x7a   : > { %312 = vst.msk [vmem:[#allocation2 + $0x79] sm:$0xff] %vm247_vm0, %v223_v10  ;;  %311 = vst.msk [vmem:[#allocation2 + $0x69] sm:$0xff] %vm247_vm0, %v222_v11 }
  0x7b   : > { %314 = vst.msk [vmem:[#allocation2 + $0x91] sm:$0xff] %vm247_vm0, %v225_v12  ;;  %313 = vst.msk [vmem:[#allocation2 + $0x81] sm:$0xff] %vm247_vm0, %v224_v13 }
  0x7c   : > { %316 = vst.msk [vmem:[#allocation2 + $0xa9] sm:$0xff] %vm247_vm0, %v227_v14  ;;  %315 = vst.msk [vmem:[#allocation2 + $0x99] sm:$0xff] %vm247_vm0, %v226_v15 }
  0x7d   : > { %318 = vst.msk [vmem:[#allocation2 + $0xc1] sm:$0xff] %vm247_vm0, %v229_v16  ;;  %317 = vst.msk [vmem:[#allocation2 + $0xb1] sm:$0xff] %vm247_vm0, %v228_v17 }
  0x7e   : > { %320 = vst.msk [vmem:[#allocation2 + $0xd9] sm:$0xff] %vm247_vm0, %v231_v18  ;;  %319 = vst.msk [vmem:[#allocation2 + $0xc9] sm:$0xff] %vm247_vm0, %v230_v19  ;;  %v3291_v26 = vld [vmem:[#allocation2 + $0x31] sm:$0xff]  ;;  %v3302_v29 = vld [vmem:[#allocation2 + $0x21] sm:$0xff] }
  0x7f   : > { %322 = vst.msk [vmem:[#allocation2 + $0xf1] sm:$0xff] %vm247_vm0, %v233_v20  ;;  %321 = vst.msk [vmem:[#allocation2 + $0xe1] sm:$0xff] %vm247_vm0, %v232_v21  ;;  %665 = vrot.lane.b32.xlu0 %v3291_v26, %s3000_s18  ;;  %v3306_v30 = vld [vmem:[#allocation2 + $0x49] sm:$0xff]  ;;  %663 = vrot.lane.b32.xlu1 %v3302_v29, %s3000_s18  ;;  %v3312_v31 = vld [vmem:[#allocation2 + $0x39] sm:$0xff] }
  0x80   : > { %324 = vst.msk [vmem:[#allocation2 + $0x109] sm:$0xff] %vm247_vm0, %v235_v22  ;;  %323 = vst.msk [vmem:[#allocation2 + $0xf9] sm:$0xff] %vm247_vm0, %v234_v23  ;;  %v3314_v32 = vld [vmem:[#allocation2 + $0x61] sm:$0xff]  ;;  %v3327_v37 = vld [vmem:[#allocation2 + $0x51] sm:$0xff] }
  0x81   : > { %326 = vst.msk [vmem:[#allocation2 + $0x121] sm:$0xff] %vm247_vm0, %v237_v24  ;;  %325 = vst.msk [vmem:[#allocation2 + $0x111] sm:$0xff] %vm247_vm0, %v236_v27  ;;  %v3332_v40 = vld [vmem:[#allocation2 + $0x79] sm:$0xff]  ;;  %v3340_v41 = vld [vmem:[#allocation2 + $0x69] sm:$0xff] }
  0x82   : > { %328 = vst.msk [vmem:[#allocation2 + $0x139] sm:$0xff] %vm247_vm0, %v239_v28  ;;  %327 = vst.msk [vmem:[#allocation2 + $0x129] sm:$0xff] %vm247_vm0, %v238_v33  ;;  %v3342_v42 = vld [vmem:[#allocation2 + $0x91] sm:$0xff]  ;;  %v3348_v43 = vld [vmem:[#allocation2 + $0x81] sm:$0xff] }
  0x83   : > { %669 = vrot.lane.b32.xlu0 %v3306_v30, %s3000_s18  ;;  %667 = vrot.lane.b32.xlu1 %v3312_v31, %s3000_s18  ;;  %330 = vst.msk [vmem:[#allocation2 + $0x151] sm:$0xff] %vm247_vm0, %v241_v34  ;;  %329 = vst.msk [vmem:[#allocation2 + $0x141] sm:$0xff] %vm247_vm0, %v240_v35  ;;  %v3350_v44 = vld [vmem:[#allocation2 + $0xa9] sm:$0xff]  ;;  %v3356_v45 = vld [vmem:[#allocation2 + $0x99] sm:$0xff] }
  0x84   : > { %332 = vst.msk [vmem:[#allocation2 + $0x169] sm:$0xff] %vm247_vm0, %v243_v36  ;;  %331 = vst.msk [vmem:[#allocation2 + $0x159] sm:$0xff] %vm247_vm0, %v242_v38  ;;  %v384_v46 = vld [vmem:[#allocation2 + $0xc1] sm:$0xff]  ;;  %v3361_v47 = vld [vmem:[#allocation2 + $0xb1] sm:$0xff] }
  0x85   : > { %333 = vst.msk [vmem:[#allocation2 + $0x171] sm:$0xff] %vm247_vm0, %v244_v39  ;;  %v386_v48 = vld [vmem:[#allocation2 + $0xd9] sm:$0xff]  ;;  %v385_v49 = vld [vmem:[#allocation2 + $0xc9] sm:$0xff] }
  0x86   : > { %v388_v50 = vld [vmem:[#allocation2 + $0xf1] sm:$0xff]  ;;  %v387_v51 = vld [vmem:[#allocation2 + $0xe1] sm:$0xff] }
  0x87   : > { %673 = vrot.lane.b32.xlu0 %v3314_v32, %s3000_s18  ;;  %671 = vrot.lane.b32.xlu1 %v3327_v37, %s3000_s18  ;;  %v390_v52 = vld [vmem:[#allocation2 + $0x109] sm:$0xff]  ;;  %v389_v53 = vld [vmem:[#allocation2 + $0xf9] sm:$0xff] }
  0x88   : > { %v392_v54 = vld [vmem:[#allocation2 + $0x121] sm:$0xff]  ;;  %v391_v55 = vld [vmem:[#allocation2 + $0x111] sm:$0xff] }
  0x89   : > { %v394_v56 = vld [vmem:[#allocation2 + $0x139] sm:$0xff]  ;;  %v393_v57 = vld [vmem:[#allocation2 + $0x129] sm:$0xff] }
  0x8a   : > { %v396_v58 = vld [vmem:[#allocation2 + $0x151] sm:$0xff]  ;;  %v395_v59 = vld [vmem:[#allocation2 + $0x141] sm:$0xff] }
  0x8b   : > { %677 = vrot.lane.b32.xlu0 %v3332_v40, %s3000_s18  ;;  %675 = vrot.lane.b32.xlu1 %v3340_v41, %s3000_s18  ;;  %v398_v60 = vld [vmem:[#allocation2 + $0x169] sm:$0xff]  ;;  %v397_v61 = vld [vmem:[#allocation2 + $0x159] sm:$0xff] }
  0x8c   : > { %v399_v63 = vld [vmem:[#allocation2 + $0x171] sm:$0xff]  ;;  %v3380_v0 = vld [vmem:[#allocation2 + $0x1a] sm:$0xff]  ;;  %v3390_v3 = vld [vmem:[#allocation2 + $0x22] sm:$0xff] }
  0x8d   : > { %v3385_v2 = vld [vmem:[#allocation2 + $0x32] sm:$0xff]  ;;  %v3392_v4 = vld [vmem:[#allocation2 + $0x4a] sm:$0xff]  ;;  %v3398_v5 = vld [vmem:[#allocation2 + $0x3a] sm:$0xff] }
  0x8e   : > { %v3400_v6 = vld [vmem:[#allocation2 + $0x62] sm:$0xff]  ;;  %v3406_v7 = vld [vmem:[#allocation2 + $0x52] sm:$0xff]  ;;  %v3408_v8 = vld [vmem:[#allocation2 + $0x7a] sm:$0xff] }
  0x8f   : > { %681 = vrot.lane.b32.xlu0 %v3342_v42, %s3000_s18  ;;  %679 = vrot.lane.b32.xlu1 %v3348_v43, %s3000_s18  ;;  %v3414_v9 = vld [vmem:[#allocation2 + $0x6a] sm:$0xff]  ;;  %v3416_v10 = vld [vmem:[#allocation2 + $0x92] sm:$0xff]  ;;  %v3422_v11 = vld [vmem:[#allocation2 + $0x82] sm:$0xff] }
  0x90   : > { %v3424_v12 = vld [vmem:[#allocation2 + $0xaa] sm:$0xff]  ;;  %v3430_v13 = vld [vmem:[#allocation2 + $0x9a] sm:$0xff]  ;;  %v3432_v14 = vld [vmem:[#allocation2 + $0xc2] sm:$0xff] }
  0x91   : > { %v3438_v15 = vld [vmem:[#allocation2 + $0xb2] sm:$0xff]  ;;  %v3440_v16 = vld [vmem:[#allocation2 + $0xda] sm:$0xff]  ;;  %v3446_v17 = vld [vmem:[#allocation2 + $0xca] sm:$0xff] }
  0x92   : > { %v420_v18 = vld [vmem:[#allocation2 + $0xf2] sm:$0xff]  ;;  %v3451_v19 = vld [vmem:[#allocation2 + $0xe2] sm:$0xff]  ;;  %v422_v20 = vld [vmem:[#allocation2 + $0x10a] sm:$0xff] }
  0x93   : > { %685 = vrot.lane.b32.xlu0 %v3350_v44, %s3000_s18  ;;  %683 = vrot.lane.b32.xlu1 %v3356_v45, %s3000_s18  ;;  %v421_v21 = vld [vmem:[#allocation2 + $0xfa] sm:$0xff]  ;;  %v424_v22 = vld [vmem:[#allocation2 + $0x122] sm:$0xff]  ;;  %v423_v23 = vld [vmem:[#allocation2 + $0x112] sm:$0xff] }
  0x94   : > { %v426_v24 = vld [vmem:[#allocation2 + $0x13a] sm:$0xff]  ;;  %v425_v28 = vld [vmem:[#allocation2 + $0x12a] sm:$0xff]  ;;  %v428_v33 = vld [vmem:[#allocation2 + $0x152] sm:$0xff] }
  0x95   : > { %v427_v35 = vld [vmem:[#allocation2 + $0x142] sm:$0xff]  ;;  %v430_v38 = vld [vmem:[#allocation2 + $0x16a] sm:$0xff] }
  0x97   : > { %689 = vrot.lane.b32.xlu0 %v384_v46, %s3000_s18  ;;  %687 = vrot.lane.b32.xlu1 %v3361_v47, %s3000_s18  ;;  %v429_v46 = vld [vmem:[#allocation2 + $0x15a] sm:$0xff] }
  0x9b   : > { %693 = vrot.lane.b32.xlu0 %v386_v48, %s3000_s18  ;;  %691 = vrot.lane.b32.xlu1 %v385_v49, %s3000_s18 }
  0x9f   : > { %697 = vrot.lane.b32.xlu0 %v388_v50, %s3000_s18  ;;  %695 = vrot.lane.b32.xlu1 %v387_v51, %s3000_s18  ;;  %v3476_v50 = vld [vmem:[#allocation2 + $0x18] sm:$0xff] }
  0xa0   : > { %v431_v51 = vld [vmem:[#allocation2 + $0x172] sm:$0xff] }
  0xa3   : > { %701 = vrot.lane.b32.xlu0 %v390_v52, %s3000_s18  ;;  %699 = vrot.lane.b32.xlu1 %v389_v53, %s3000_s18 }
  0xa7   : > { %705 = vrot.lane.b32.xlu0 %v392_v54, %s3000_s18  ;;  %703 = vrot.lane.b32.xlu1 %v391_v55, %s3000_s18  ;;  %v3485_v54 = vld [vmem:[#allocation2 + $0x30] sm:$0xff] }
  0xab   : > { %709 = vrot.lane.b32.xlu0 %v394_v56, %s3000_s18  ;;  %707 = vrot.lane.b32.xlu1 %v393_v57, %s3000_s18  ;;  %v3492_v56 = vld [vmem:[#allocation2 + $0x20] sm:$0xff] }
  0xaf   : > { %713 = vrot.lane.b32.xlu0 %v396_v58, %s3000_s18  ;;  %711 = vrot.lane.b32.xlu1 %v395_v59, %s3000_s18  ;;  %v3496_v58 = vld [vmem:[#allocation2 + $0x48] sm:$0xff] }
  0xb3   : > { %717 = vrot.lane.b32.xlu0 %v398_v60, %s3000_s18  ;;  %715 = vrot.lane.b32.xlu1 %v397_v61, %s3000_s18  ;;  %v3504_v60 = vld [vmem:[#allocation2 + $0x38] sm:$0xff] }
  0xb7   : > { %785 = vrot.lane.b32.xlu0 %v400_v62, %s3001_s20  ;;  %719 = vrot.lane.b32.xlu1 %v399_v63, %s3000_s18  ;;  %v3508_v62 = vld [vmem:[#allocation2 + $0x60] sm:$0xff] }
  0xbb   : > { %789 = vrot.lane.b32.xlu0 %v3380_v0, %s3001_s20  ;;  %787 = vrot.lane.b32.xlu1 %v401_v1, %s3001_s20  ;;  %v3516_v1 = vld [vmem:[#allocation2 + $0x50] sm:$0xff] }
  0xbf   : > { %793 = vrot.lane.b32.xlu0 %v3385_v2, %s3001_s20  ;;  %791 = vrot.lane.b32.xlu1 %v3390_v3, %s3001_s20 }
  0xc3   : > { %797 = vrot.lane.b32.xlu0 %v3392_v4, %s3001_s20  ;;  %795 = vrot.lane.b32.xlu1 %v3398_v5, %s3001_s20 }
  0xc7   : > { %801 = vrot.lane.b32.xlu0 %v3400_v6, %s3001_s20  ;;  %799 = vrot.lane.b32.xlu1 %v3406_v7, %s3001_s20 }
  0xcb   : > { %805 = vrot.lane.b32.xlu0 %v3408_v8, %s3001_s20  ;;  %803 = vrot.lane.b32.xlu1 %v3414_v9, %s3001_s20 }
  0xcf   : > { %809 = vrot.lane.b32.xlu0 %v3416_v10, %s3001_s20  ;;  %807 = vrot.lane.b32.xlu1 %v3422_v11, %s3001_s20 }
  0xd3   : > { %813 = vrot.lane.b32.xlu0 %v3424_v12, %s3001_s20  ;;  %811 = vrot.lane.b32.xlu1 %v3430_v13, %s3001_s20 }
  0xd6   : > { %v3458_v27 = vpop.permute.xlu0 %657 }
  0xd7   : > { %817 = vrot.lane.b32.xlu0 %v3432_v14, %s3001_s20  ;;  %815 = vrot.lane.b32.xlu1 %v3438_v15, %s3001_s20 }
  0xdb   : > { %821 = vrot.lane.b32.xlu0 %v3440_v16, %s3001_s20  ;;  %819 = vrot.lane.b32.xlu1 %v3446_v17, %s3001_s20 }
  0xdf   : > { %825 = vrot.lane.b32.xlu0 %v420_v18, %s3001_s20  ;;  %823 = vrot.lane.b32.xlu1 %v3451_v19, %s3001_s20 }
  0xe3   : > { %829 = vrot.lane.b32.xlu0 %v422_v20, %s3001_s20  ;;  %827 = vrot.lane.b32.xlu1 %v421_v21, %s3001_s20  ;;  %v3520_v20 = vld [vmem:[#allocation2 + $0x78] sm:$0xff] }
  0xe7   : > { %833 = vrot.lane.b32.xlu0 %v424_v22, %s3001_s20  ;;  %831 = vrot.lane.b32.xlu1 %v423_v23, %s3001_s20  ;;  %v3466_v36 = vpop.permute.xlu1 %661  ;;  %v3528_v22 = vld [vmem:[#allocation2 + $0x68] sm:$0xff] }
  0xe8   : > { %v3462_v34 = vpop.permute.xlu0 %659 }
  0xeb   : > { %837 = vrot.lane.b32.xlu0 %v426_v24, %s3001_s20  ;;  %835 = vrot.lane.b32.xlu1 %v425_v28, %s3001_s20  ;;  %v3532_v24 = vld [vmem:[#allocation2 + $0x90] sm:$0xff] }
  0xec   : > { %4619 = vst [vmem:[#allocation19_spill] sm:$0xff] %v3532_v24 }
  0xef   : > { %841 = vrot.lane.b32.xlu0 %v428_v33, %s3001_s20  ;;  %839 = vrot.lane.b32.xlu1 %v427_v35, %s3001_s20  ;;  %v3540_v33 = vld [vmem:[#allocation2 + $0x80] sm:$0xff] }
  0xf1   : > { %v3468_v39 = vpop.permute.xlu0 %665  ;;  %v3472_v48 = vpop.permute.xlu1 %663 }
  0xf3   : > { %845 = vrot.lane.b32.xlu0 %v430_v38, %s3001_s20  ;;  %843 = vrot.lane.b32.xlu1 %v429_v46, %s3001_s20  ;;  %v3544_v38 = vld [vmem:[#allocation2 + $0xa8] sm:$0xff] }
  0xf4   : > { %4622 = vst [vmem:[#allocation22_spill] sm:$0xff] %v3544_v38 }
  0xf5   : > { %v3474_v49 = vpop.permute.xlu0 %669  ;;  %v3481_v52 = vpop.permute.xlu1 %667 }
  0xf7   : > { %913 = vrot.lane.b32.xlu0 %v3476_v50, %s3002_s8  ;;  %847 = vrot.lane.b32.xlu1 %v431_v51, %s3001_s20  ;;  %v3552_v51 = vld [vmem:[#allocation2 + $0x98] sm:$0xff] }
  0xf8   : > { %4624 = vst [vmem:[#allocation24_spill] sm:$0xff] %v3552_v51 }
  0xf9   : > { %v3483_v53 = vpop.permute.xlu0 %673  ;;  %v3490_v55 = vpop.permute.xlu1 %671 }
  0xfb   : > { %917 = vrot.lane.b32.xlu0 %v3485_v54, %s3002_s8  ;;  %915 = vrot.lane.b32.xlu1 %v3492_v56, %s3002_s8 }
  0xfd   : > { %v3494_v57 = vpop.permute.xlu0 %677  ;;  %v3502_v59 = vpop.permute.xlu1 %675 }
  0xff   : > { %921 = vrot.lane.b32.xlu0 %v3496_v58, %s3002_s8  ;;  %919 = vrot.lane.b32.xlu1 %v3504_v60, %s3002_s8 }
 0x101   : > { %v3506_v61 = vpop.permute.xlu0 %681  ;;  %v3514_v63 = vpop.permute.xlu1 %679 }
 0x102   : > { %4615 = vst [vmem:[#allocation15_spill] sm:$0xff] %v3506_v61 }
 0x103   : > { %925 = vrot.lane.b32.xlu0 %v3508_v62, %s3002_s8  ;;  %923 = vrot.lane.b32.xlu1 %v3516_v1, %s3002_s8 }
 0x105   : > { %v3518_v18 = vpop.permute.xlu0 %685  ;;  %v3526_v21 = vpop.permute.xlu1 %683 }
 0x106   : > { %4616 = vst [vmem:[#allocation16_spill] sm:$0xff] %v3518_v18  ;;  %4617 = vst [vmem:[#allocation17_spill] sm:$0xff] %v3526_v21  ;;  %v1912_v18 = vld [vmem:[#allocation6] sm:$0xff]  ;;  %v1913_v21 = vld [vmem:[#allocation6 + $0x8] sm:$0xff] }
 0x107   : > { %929 = vrot.lane.b32.xlu0 %v3520_v20, %s3002_s8  ;;  %927 = vrot.lane.b32.xlu1 %v3528_v22, %s3002_s8 }
 0x109   : > { %v3530_v23 = vpop.permute.xlu0 %689  ;;  %v3538_v28 = vpop.permute.xlu1 %687 }
 0x10a   : > { %4618 = vst [vmem:[#allocation18_spill] sm:$0xff] %v3530_v23  ;;  %4620 = vst [vmem:[#allocation20_spill] sm:$0xff] %v3538_v28 }
 0x10b   : > { %933 = vrot.lane.b32.xlu0 %v3532_v24, %s3002_s8  ;;  %931 = vrot.lane.b32.xlu1 %v3540_v33, %s3002_s8 }
 0x10d   : > { %v3542_v35 = vpop.permute.xlu0 %693  ;;  %v3550_v46 = vpop.permute.xlu1 %691 }
 0x10e   : > { %4621 = vst [vmem:[#allocation21_spill] sm:$0xff] %v3542_v35  ;;  %4623 = vst [vmem:[#allocation23_spill] sm:$0xff] %v3550_v46  ;;  %v2745_v46 = vpack.c.bf16 %v1913_v21, %v1912_v18 }
 0x10f   : > { %937 = vrot.lane.b32.xlu0 %v3544_v38, %s3002_s8  ;;  %935 = vrot.lane.b32.xlu1 %v3552_v51, %s3002_s8 }
 0x110   : > { %2746 = vmatprep.subr.bf16.mxu0 %v2745_v46  ;;  %2753 = vmatprep.subr.bf16.mxu1 %v2745_v46 }
 0x111   : > { %v3554_v23 = vpop.permute.xlu0 %697  ;;  %v3560_v35 = vpop.permute.xlu1 %695  ;;  %2748 = vmatpush3.bf16.msra.mxu0 %v2745_v46  ;;  %2756 = vmatpush3.bf16.msra.mxu1 %v2745_v46 }
 0x112   : > { %4625 = vst [vmem:[#allocation25_spill] sm:$0xff] %v3554_v23  ;;  %4626 = vst [vmem:[#allocation26_spill] sm:$0xff] %v3560_v35  ;;  %v1915_v35 = vld [vmem:[#allocation6 + $0x18] sm:$0xff] }
 0x113   : > { %1043 = vrot.lane.b32.xlu0 %v3302_v29, %s3003_s9  ;;  %1041 = vrot.lane.b32.xlu1 %v3289_v25, %s3003_s9  ;;  %v1914_v29 = vld [vmem:[#allocation6 + $0x10] sm:$0xff] }
 0x115   : > { %v3562_v28 = vpop.permute.xlu0 %701  ;;  %v3568_v23 = vpop.permute.xlu1 %699 }
 0x116   : > { %4627 = vst [vmem:[#allocation27_spill] sm:$0xff] %v3562_v28  ;;  %4628 = vst [vmem:[#allocation28_spill] sm:$0xff] %v3568_v23  ;;  %v2749_v28 = vpack.c.bf16 %v1915_v35, %v1914_v29 }
 0x117   : > { %1171 = vrot.lane.b32.xlu0 %v3390_v3, %s3004_s4  ;;  %1169 = vrot.lane.b32.xlu1 %v3380_v0, %s3004_s4  ;;  %v1916_v0 = vld [vmem:[#allocation6 + $0x20] sm:$0xf] }
 0x118   : > { %2750 = vmatprep.subr.bf16.mxu0 %v2749_v28  ;;  %2754 = vmatprep.subr.bf16.mxu1 %v2749_v28 }
 0x119   : > { %v3570_v61 = vpop.permute.xlu0 %705  ;;  %v3576_v25 = vpop.permute.xlu1 %703  ;;  %2752 = vmatpush3.bf16.msra.mxu0 %v2749_v28  ;;  %2757 = vmatpush3.bf16.msra.mxu1 %v2749_v28 }
 0x11a   : > { %4629 = vst [vmem:[#allocation29_spill] sm:$0xff] %v3570_v61  ;;  %4630 = vst [vmem:[#allocation30_spill] sm:$0xff] %v3576_v25  ;;  %2695 = vmatprep.subr.msk.mxu0 %vm2014_vm2, %v1916_v0  ;;  %2755 = vmatprep.subr.msk.mxu1 %vm2014_vm2, %v1916_v0 }
 0x11b   : > { %1299 = vrot.lane.b32.xlu0 %v3504_v60, %s3005_s25  ;;  %1297 = vrot.lane.b32.xlu1 %v3485_v54, %s3005_s25 }
 0x11d   : > { %v3578_v3 = vpop.permute.xlu0 %709  ;;  %v3584_v18 = vpop.permute.xlu1 %707  ;;  %2696 = vmatpush3.msk.msra.mxu0 %vm2014_vm2, %v1916_v0  ;;  %2758 = vmatpush3.msk.msra.mxu1 %vm2014_vm2, %v1916_v0 }
 0x11e   : > { %4631 = vst [vmem:[#allocation31_spill] sm:$0xff] %v3578_v3  ;;  %4632 = vst [vmem:[#allocation32_spill] sm:$0xff] %v3584_v18 }
 0x11f   : > { %1045 = vrot.lane.b32.xlu0 %v3291_v26, %s3003_s9  ;;  %1425 = vrot.lane.b32.xlu1 %v3291_v26, %s3006_s5 }
 0x121   : > { %v3586_v21 = vpop.permute.xlu0 %713  ;;  %v3592_v28 = vpop.permute.xlu1 %711 }
 0x122   : > { %4633 = vst [vmem:[#allocation33_spill] sm:$0xff] %v3586_v21  ;;  %4634 = vst [vmem:[#allocation34_spill] sm:$0xff] %v3592_v28 }
 0x123   : > { %1553 = vrot.lane.b32.xlu0 %v3385_v2, %s3007_s11  ;;  %1427 = vrot.lane.b32.xlu1 %v3312_v31, %s3006_s5 }
 0x125   : > { %v3594_v35 = vpop.permute.xlu0 %717  ;;  %v3600_v46 = vpop.permute.xlu1 %715 }
 0x126   : > { %4635 = vst [vmem:[#allocation35_spill] sm:$0xff] %v3594_v35  ;;  %4636 = vst [vmem:[#allocation36_spill] sm:$0xff] %v3600_v46 }
 0x127   : > { %1173 = vrot.lane.b32.xlu0 %v3385_v2, %s3004_s4  ;;  %1047 = vrot.lane.b32.xlu1 %v3312_v31, %s3003_s9 }
 0x129   : > { %v3602_v29 = vpop.permute.xlu0 %785  ;;  %v3608_v26 = vpop.permute.xlu1 %719 }
 0x12a   : > { %4637 = vst [vmem:[#allocation37_spill] sm:$0xff] %v3608_v26 }
 0x12b   : > { %1175 = vrot.lane.b32.xlu0 %v3398_v5, %s3004_s4  ;;  %1555 = vrot.lane.b32.xlu1 %v3398_v5, %s3007_s11 }
 0x12d   : > { %v3610_v0 = vpop.permute.xlu0 %789  ;;  %v3616_v2 = vpop.permute.xlu1 %787 }
 0x12f   : > { %1303 = vrot.lane.b32.xlu0 %v3516_v1, %s3005_s25  ;;  %1301 = vrot.lane.b32.xlu1 %v3496_v58, %s3005_s25 }
 0x131   : > { %v3618_v35 = vpop.permute.xlu0 %793  ;;  %v3624_v31 = vpop.permute.xlu1 %791 }
 0x133   : > { %1049 = vrot.lane.b32.xlu0 %v3306_v30, %s3003_s9  ;;  %1429 = vrot.lane.b32.xlu1 %v3306_v30, %s3006_s5 }
 0x135   : > { %v3626_v26 = vpop.permute.xlu0 %797  ;;  %v3632_v5 = vpop.permute.xlu1 %795 }
 0x137   : > { %1557 = vrot.lane.b32.xlu0 %v3392_v4, %s3007_s11  ;;  %1431 = vrot.lane.b32.xlu1 %v3327_v37, %s3006_s5 }
 0x139   : > { %v3634_v46 = vpop.permute.xlu0 %801  ;;  %v3640_v21 = vpop.permute.xlu1 %799 }
 0x13b   : > { %1177 = vrot.lane.b32.xlu0 %v3392_v4, %s3004_s4  ;;  %1051 = vrot.lane.b32.xlu1 %v3327_v37, %s3003_s9 }
 0x13d   : > { %v3642_v28 = vpop.permute.xlu0 %805  ;;  %v3648_v30 = vpop.permute.xlu1 %803 }
 0x13f   : > { %1179 = vrot.lane.b32.xlu0 %v3406_v7, %s3004_s4  ;;  %1559 = vrot.lane.b32.xlu1 %v3406_v7, %s3007_s11 }
 0x141   : > { %v3650_v3 = vpop.permute.xlu0 %809  ;;  %v3656_v4 = vpop.permute.xlu1 %807 }
 0x142   : > { %4638 = vst [vmem:[#allocation38_spill] sm:$0xff] %v3650_v3 }
 0x143   : > { %1307 = vrot.lane.b32.xlu0 %v3528_v22, %s3005_s25  ;;  %1305 = vrot.lane.b32.xlu1 %v3508_v62, %s3005_s25 }
 0x145   : > { %v3658_v18 = vpop.permute.xlu0 %813  ;;  %v3664_v37 = vpop.permute.xlu1 %811 }
 0x146   : > { %4639 = vst [vmem:[#allocation39_spill] sm:$0xff] %v3658_v18  ;;  %4640 = vst [vmem:[#allocation40_spill] sm:$0xff] %v3664_v37 }
 0x147   : > { %1053 = vrot.lane.b32.xlu0 %v3314_v32, %s3003_s9  ;;  %1433 = vrot.lane.b32.xlu1 %v3314_v32, %s3006_s5 }
 0x149   : > { %v3666_v61 = vpop.permute.xlu0 %817  ;;  %v3672_v7 = vpop.permute.xlu1 %815 }
 0x14a   : > { %4641 = vst [vmem:[#allocation41_spill] sm:$0xff] %v3666_v61  ;;  %4642 = vst [vmem:[#allocation42_spill] sm:$0xff] %v3672_v7 }
 0x14b   : > { %1561 = vrot.lane.b32.xlu0 %v3400_v6, %s3007_s11  ;;  %1435 = vrot.lane.b32.xlu1 %v3340_v41, %s3006_s5 }
 0x14d   : > { %v3674_v25 = vpop.permute.xlu0 %821  ;;  %v3680_v23 = vpop.permute.xlu1 %819 }
 0x14e   : > { %4643 = vst [vmem:[#allocation43_spill] sm:$0xff] %v3674_v25  ;;  %4644 = vst [vmem:[#allocation44_spill] sm:$0xff] %v3680_v23 }
 0x14f   : > { %1181 = vrot.lane.b32.xlu0 %v3400_v6, %s3004_s4  ;;  %1055 = vrot.lane.b32.xlu1 %v3340_v41, %s3003_s9 }
 0x151   : > { %v3682_v18 = vpop.permute.xlu0 %825  ;;  %v3688_v32 = vpop.permute.xlu1 %823 }
 0x152   : > { %4645 = vst [vmem:[#allocation45_spill] sm:$0xff] %v3682_v18  ;;  %4646 = vst [vmem:[#allocation46_spill] sm:$0xff] %v3688_v32 }
 0x153   : > { %1183 = vrot.lane.b32.xlu0 %v3414_v9, %s3004_s4  ;;  %1563 = vrot.lane.b32.xlu1 %v3414_v9, %s3007_s11 }
 0x155   : > { %v3690_v61 = vpop.permute.xlu0 %829  ;;  %v3696_v6 = vpop.permute.xlu1 %827 }
 0x156   : > { %4647 = vst [vmem:[#allocation47_spill] sm:$0xff] %v3690_v61  ;;  %4648 = vst [vmem:[#allocation48_spill] sm:$0xff] %v3696_v6  ;;  %v3770_v6 = vld [vmem:[#allocation2 + $0xb0] sm:$0xff] }
 0x157   : > { %1311 = vrot.lane.b32.xlu0 %v3540_v33, %s3005_s25  ;;  %1309 = vrot.lane.b32.xlu1 %v3520_v20, %s3005_s25  ;;  %4659 = vst [vmem:[#allocation59_spill] sm:$0xff] %v3770_v6 }
 0x159   : > { %v3698_v25 = vpop.permute.xlu0 %833  ;;  %v3704_v41 = vpop.permute.xlu1 %831 }
 0x15a   : > { %4649 = vst [vmem:[#allocation49_spill] sm:$0xff] %v3698_v25  ;;  %4650 = vst [vmem:[#allocation50_spill] sm:$0xff] %v3704_v41 }
 0x15b   : > { %1057 = vrot.lane.b32.xlu0 %v3332_v40, %s3003_s9  ;;  %1437 = vrot.lane.b32.xlu1 %v3332_v40, %s3006_s5 }
 0x15d   : > { %v3706_v18 = vpop.permute.xlu0 %837  ;;  %v3712_v9 = vpop.permute.xlu1 %835 }
 0x15e   : > { %4651 = vst [vmem:[#allocation51_spill] sm:$0xff] %v3706_v18  ;;  %4652 = vst [vmem:[#allocation52_spill] sm:$0xff] %v3712_v9 }
 0x15f   : > { %1565 = vrot.lane.b32.xlu0 %v3408_v8, %s3007_s11  ;;  %1439 = vrot.lane.b32.xlu1 %v3348_v43, %s3006_s5 }
 0x161   : > { %v3714_v61 = vpop.permute.xlu0 %841  ;;  %v3720_v25 = vpop.permute.xlu1 %839 }
 0x162   : > { %4653 = vst [vmem:[#allocation53_spill] sm:$0xff] %v3714_v61  ;;  %4654 = vst [vmem:[#allocation54_spill] sm:$0xff] %v3720_v25 }
 0x163   : > { %1185 = vrot.lane.b32.xlu0 %v3408_v8, %s3004_s4  ;;  %1059 = vrot.lane.b32.xlu1 %v3348_v43, %s3003_s9 }
 0x165   : > { %v3722_v41 = vpop.permute.xlu0 %845  ;;  %v3728_v40 = vpop.permute.xlu1 %843 }
 0x166   : > { %4655 = vst [vmem:[#allocation55_spill] sm:$0xff] %v3722_v41  ;;  %4656 = vst [vmem:[#allocation56_spill] sm:$0xff] %v3728_v40 }
 0x167   : > { %1187 = vrot.lane.b32.xlu0 %v3422_v11, %s3004_s4  ;;  %1567 = vrot.lane.b32.xlu1 %v3422_v11, %s3007_s11 }
 0x169   : > { %v914_v18 = vpop.permute.xlu0 %913  ;;  %v3734_v8 = vpop.permute.xlu1 %847 }
 0x16a   : > { %4657 = vst [vmem:[#allocation57_spill] sm:$0xff] %v3734_v8 }
 0x16b   : > { %1315 = vrot.lane.b32.xlu0 %v3552_v51, %s3005_s25  ;;  %1313 = vrot.lane.b32.xlu1 %v3532_v24, %s3005_s25  ;;  %v3803_v24 = vld [vmem:[#allocation2 + $0xc0] sm:$0xff] }
 0x16d   : > { %v3736_v61 = vpop.permute.xlu0 %917  ;;  %v3742_v43 = vpop.permute.xlu1 %915 }
 0x16f   : > { %1061 = vrot.lane.b32.xlu0 %v3342_v42, %s3003_s9  ;;  %1441 = vrot.lane.b32.xlu1 %v3342_v42, %s3006_s5 }
 0x171   : > { %v3744_v41 = vpop.permute.xlu0 %921  ;;  %v3750_v11 = vpop.permute.xlu1 %919 }
 0x173   : > { %1569 = vrot.lane.b32.xlu0 %v3416_v10, %s3007_s11  ;;  %1443 = vrot.lane.b32.xlu1 %v3356_v45, %s3006_s5 }
 0x175   : > { %v3752_v8 = vpop.permute.xlu0 %925  ;;  %v3758_v40 = vpop.permute.xlu1 %923 }
 0x177   : > { %1189 = vrot.lane.b32.xlu0 %v3416_v10, %s3004_s4  ;;  %1063 = vrot.lane.b32.xlu1 %v3356_v45, %s3003_s9 }
 0x179   : > { %v3760_v25 = vpop.permute.xlu0 %929  ;;  %v3766_v42 = vpop.permute.xlu1 %927 }
 0x17b   : > { %1191 = vrot.lane.b32.xlu0 %v3430_v13, %s3004_s4  ;;  %1571 = vrot.lane.b32.xlu1 %v3430_v13, %s3007_s11 }
 0x17d   : > { %v3768_v9 = vpop.permute.xlu0 %933  ;;  %v3776_v10 = vpop.permute.xlu1 %931 }
 0x17e   : > { %4658 = vst [vmem:[#allocation58_spill] sm:$0xff] %v3768_v9 }
 0x17f   : > { %1319 = vrot.lane.b32.xlu0 %v3770_v6, %s3005_s25  ;;  %1317 = vrot.lane.b32.xlu1 %v3544_v38, %s3005_s25  ;;  %v336_v38 = vld [vmem:[#allocation2] sm:$0xff] }
 0x180   : > { %v1649_v37 = vsel %vm247_vm0, %v336_v38, %v3458_v27 }
 0x181   : > { %v3778_v32 = vpop.permute.xlu0 %937  ;;  %v3784_v45 = vpop.permute.xlu1 %935 }
 0x182   : > { %4660 = vst [vmem:[#allocation60_spill] sm:$0xff] %v3778_v32 }
 0x183   : > { %939 = vrot.lane.b32.xlu0 %v3770_v6, %s3002_s8  ;;  %1445 = vrot.lane.b32.xlu1 %v3350_v44, %s3006_s5 }
 0x185   : > { %v1044_v23 = vpop.permute.xlu0 %1043  ;;  %v1042_v13 = vpop.permute.xlu1 %1041 }
 0x187   : > { %1447 = vrot.lane.b32.xlu0 %v3361_v47, %s3006_s5  ;;  %1065 = vrot.lane.b32.xlu1 %v3350_v44, %s3003_s9  ;;  %v1682_v44 = vsel %vm1681_vm3, %v1649_v37, %v3602_v29 }
 0x189   : > { %v1172_v7 = vpop.permute.xlu0 %1171  ;;  %v1170_v32 = vpop.permute.xlu1 %1169 }
 0x18b   : > { %1067 = vrot.lane.b32.xlu0 %v3361_v47, %s3003_s9  ;;  %1573 = vrot.lane.b32.xlu1 %v3424_v12, %s3007_s11  ;;  %v1715_v47 = vsel %vm1714_vm4, %v1682_v44, %v914_v18 }
 0x18c   : > { %v1748_v9 = vsel %vm1747_vm5, %v1715_v47, %v1042_v13  ;;  %v3813_v13 = vld [vmem:[#allocation2 + $0xc8] sm:$0xff] }
 0x18d   : > { %v1300_v6 = vpop.permute.xlu0 %1299  ;;  %v1298_v3 = vpop.permute.xlu1 %1297  ;;  %v1781_v27 = vsel %vm1780_vm6, %v1748_v9, %v1170_v32  ;;  %4661 = vst [vmem:[#allocation61_spill] sm:$0xff] %v3813_v13  ;;  %v337_v32 = vld [vmem:[#allocation2 + $0x8] sm:$0xff] }
 0x18e   : > { %v1814_v38 = vsel %vm1813_vm8, %v1781_v27, %v1298_v3  ;;  %v1650_v44 = vsel %vm247_vm0, %v337_v32, %v3462_v34 }
 0x18f   : > { %1575 = vrot.lane.b32.xlu0 %v3438_v15, %s3007_s11  ;;  %1193 = vrot.lane.b32.xlu1 %v3424_v12, %s3004_s4  ;;  %v1683_v47 = vsel %vm1681_vm3, %v1650_v44, %v3616_v2 }
 0x190   : > { %v1716_v27 = vsel %vm1714_vm4, %v1683_v47, %v3742_v43 }
 0x191   : > { %v1046_v51 = vpop.permute.xlu0 %1045  ;;  %v1426_v18 = vpop.permute.xlu1 %1425 }
 0x192   : > { %v1847_v29 = vsel %vm1846_vm7, %v1814_v38, %v1426_v18  ;;  %v574_v18 = vld [vmem:[#allocation2 + $0xc9] sm:$0xff] }
 0x193   : > { %1321 = vrot.lane.b32.xlu0 %v3803_v24, %s3005_s25  ;;  %1195 = vrot.lane.b32.xlu1 %v3438_v15, %s3004_s4  ;;  %v573_v15 = vld [vmem:[#allocation2 + $0xc1] sm:$0xff] }
 0x195   : > { %v1554_v37 = vpop.permute.xlu0 %1553  ;;  %v1428_v9 = vpop.permute.xlu1 %1427 }
 0x196   : > { %v1880_v12 = vsel %vm1879_vm9, %v1847_v29, %v1554_v37  ;;  %v1749_v29 = vsel %vm1747_vm5, %v1716_v27, %v1044_v23  ;;  %v1651_v23 = vsel %vm247_vm0, %v3476_v50, %v3466_v36 }
 0x197   : > { %1323 = vrot.lane.b32.xlu0 %v3813_v13, %s3005_s25  ;;  %2697 = vmatprep.mubr.msk.f32.mxu0 %vm1917_vm10, %v1880_v12  ;;  %v1782_v34 = vsel %vm1780_vm6, %v1749_v29, %v1172_v7  ;;  %v1684_v7 = vsel %vm1681_vm3, %v1651_v23, %v3610_v0 }
 0x198   : > { %941 = vrot.lane.b32.xlu1 %v3803_v24, %s3002_s8  ;;  %v1815_v12 = vsel %vm1813_vm8, %v1782_v34, %v1300_v6  ;;  %v1717_v43 = vsel %vm1714_vm4, %v1684_v7, %v3736_v61 }
 0x199   : > { %v1174_v3 = vpop.permute.xlu0 %1173  ;;  %v1048_v38 = vpop.permute.xlu1 %1047  ;;  %v1848_v2 = vsel %vm1846_vm7, %v1815_v12, %v1428_v9  ;;  %v1750_v47 = vsel %vm1747_vm5, %v1717_v43, %v1046_v51  ;;  %v1652_v51 = vsel %vm247_vm0, %v3492_v56, %v3472_v48  ;;  %v3869_v12 = vld [vmem:[#allocation2 + $0xe0] sm:$0xff] }
 0x19a   : > { %v1685_v29 = vsel %vm1681_vm3, %v1652_v51, %v3624_v31  ;;  %v3913_v51 = vld [vmem:[#allocation2 + $0xf0] sm:$0xff] }
 0x19b   : > { %943 = vrot.lane.b32.xlu0 %v3813_v13, %s3002_s8 }
 0x19c   : > { %1449 = vrot.lane.b32.xlu1 %v573_v15, %s3006_s5 }
 0x19d   : > { %v1176_v37 = vpop.permute.xlu0 %1175  ;;  %v1556_v32 = vpop.permute.xlu1 %1555 }
 0x19e   : > { %v1881_v44 = vsel %vm1879_vm9, %v1848_v2, %v1556_v32  ;;  %v1718_v2 = vsel %vm1714_vm4, %v1685_v29, %v3750_v11  ;;  %v575_v11 = vld [vmem:[#allocation2 + $0xd9] sm:$0xff] }
 0x19f   : > { %1451 = vrot.lane.b32.xlu0 %v574_v18, %s3006_s5  ;;  %2698 = vmatmul.mubr.msk.f32.vlgmr.msra.gmra.mrb[0].mxu0 %vm1917_vm10, %v1881_v44 }
 0x1a0   : > { %1069 = vrot.lane.b32.xlu1 %v573_v15, %s3003_s9  ;;  %v1783_v15 = vsel %vm1780_vm6, %v1750_v47, %v1174_v3 }
 0x1a1   : > { %v1304_v13 = vpop.permute.xlu0 %1303  ;;  %v1302_v6 = vpop.permute.xlu1 %1301 }
 0x1a2   : > { %v1816_v36 = vsel %vm1813_vm8, %v1783_v15, %v1302_v6 }
 0x1a3   : > { %1071 = vrot.lane.b32.xlu0 %v574_v18, %s3003_s9  ;;  %v3856_v18 = vld [vmem:[#allocation2 + $0xd8] sm:$0xff] }
 0x1a4   : > { %1577 = vrot.lane.b32.xlu1 %v3432_v14, %s3007_s11 }
 0x1a5   : > { %v1050_v9 = vpop.permute.xlu0 %1049  ;;  %v1430_v50 = vpop.permute.xlu1 %1429 }
 0x1a6   : > { %v1849_v0 = vsel %vm1846_vm7, %v1816_v36, %v1430_v50 }
 0x1a7   : > { %1579 = vrot.lane.b32.xlu0 %v3446_v17, %s3007_s11 }
 0x1a8   : > { %1197 = vrot.lane.b32.xlu1 %v3432_v14, %s3004_s4  ;;  %v1751_v14 = vsel %vm1747_vm5, %v1718_v2, %v1048_v38  ;;  %v576_v38 = vld [vmem:[#allocation2 + $0xe1] sm:$0xff] }
 0x1a9   : > { %v1558_v27 = vpop.permute.xlu0 %1557  ;;  %v1432_v3 = vpop.permute.xlu1 %1431  ;;  %v1784_v56 = vsel %vm1780_vm6, %v1751_v14, %v1176_v37  ;;  %v1653_v37 = vsel %vm247_vm0, %v3485_v54, %v3468_v39 }
 0x1aa   : > { %v1882_v61 = vsel %vm1879_vm9, %v1849_v0, %v1558_v27  ;;  %v1817_v31 = vsel %vm1813_vm8, %v1784_v56, %v1304_v13  ;;  %v1686_v13 = vsel %vm1681_vm3, %v1653_v37, %v3618_v35  ;;  %v1655_v56 = vsel %vm247_vm0, %v3496_v58, %v3474_v49  ;;  %v246_v49 = vld [vmem:[%s3182_s26 + $0xf8] sm:$0xff] }
 0x1ab   : > { %1325 = vrot.lane.b32.xlu0 %v3856_v18, %s3005_s25  ;;  %2700 = vmatprep.mubr.msk.f32.mxu0 %vm1917_vm10, %v1882_v61  ;;  %v1719_v43 = vsel %vm1714_vm4, %v1686_v13, %v3744_v41  ;;  %v1654_v41 = vsel %vm247_vm0, %v3504_v60, %v3481_v52  ;;  %v513_v52 = vld [vmem:[#allocation2 + $0xe2] sm:$0xff]  ;;  %335 = vst.msk [vmem:[#allocation2 + $0x189] sm:$0xff] %vm247_vm0, %v246_v49 }
 0x1ac   : > { %1199 = vrot.lane.b32.xlu1 %v3446_v17, %s3004_s4  ;;  %v1850_v17 = vsel %vm1846_vm7, %v1817_v31, %v1432_v3  ;;  %v1752_v15 = vsel %vm1747_vm5, %v1719_v43, %v1050_v9  ;;  %v1687_v27 = vsel %vm1681_vm3, %v1654_v41, %v3632_v5  ;;  %v577_v31 = vld [vmem:[#allocation2 + $0xf1] sm:$0xff] }
 0x1ad   : > { %v1178_v34 = vpop.permute.xlu0 %1177  ;;  %v1052_v32 = vpop.permute.xlu1 %1051  ;;  %v1720_v3 = vsel %vm1714_vm4, %v1687_v27, %v3758_v40  ;;  %v609_v43 = vld [vmem:[#allocation2 + $0xf2] sm:$0xff] }
 0x1ae   : > { %v1785_v36 = vsel %vm1780_vm6, %v1752_v15, %v1178_v34  ;;  %v3922_v34 = vld [vmem:[#allocation2 + $0xf8] sm:$0xff] }
 0x1af   : > { %1327 = vrot.lane.b32.xlu0 %v3869_v12, %s3005_s25 }
 0x1b0   : > { %945 = vrot.lane.b32.xlu1 %v3856_v18, %s3002_s8 }
 0x1b1   : > { %v1180_v48 = vpop.permute.xlu0 %1179  ;;  %v1560_v44 = vpop.permute.xlu1 %1559 }
 0x1b2   : > { %v1883_v23 = vsel %vm1879_vm9, %v1850_v17, %v1560_v44  ;;  %v578_v44 = vld [vmem:[#allocation2 + $0xf9] sm:$0xff] }
 0x1b3   : > { %947 = vrot.lane.b32.xlu0 %v3869_v12, %s3002_s8  ;;  %2701 = vmatmul.mubr.msk.f32.gmra.mrb[2].mxu0 %vm1917_vm10, %v1883_v23 }
 0x1b4   : > { %1453 = vrot.lane.b32.xlu1 %v575_v11, %s3006_s5 }
 0x1b5   : > { %v1308_v7 = vpop.permute.xlu0 %1307  ;;  %v1306_v6 = vpop.permute.xlu1 %1305 }
 0x1b6   : > { %v1818_v39 = vsel %vm1813_vm8, %v1785_v36, %v1306_v6  ;;  %v610_v36 = vld [vmem:[#allocation2 + $0xfa] sm:$0xff] }
 0x1b7   : > { %1455 = vrot.lane.b32.xlu0 %v576_v38, %s3006_s5 }
 0x1b8   : > { %1073 = vrot.lane.b32.xlu1 %v575_v11, %s3003_s9  ;;  %v1688_v11 = vsel %vm1681_vm3, %v1655_v56, %v3626_v26 }
 0x1b9   : > { %v1054_v47 = vpop.permute.xlu0 %1053  ;;  %v1434_v54 = vpop.permute.xlu1 %1433 }
 0x1ba   : > { %v1851_v50 = vsel %vm1846_vm7, %v1818_v39, %v1434_v54 }
 0x1bb   : > { %1075 = vrot.lane.b32.xlu0 %v576_v38, %s3003_s9  ;;  %v1721_v38 = vsel %vm1714_vm4, %v1688_v11, %v3752_v8 }
 0x1bc   : > { %1581 = vrot.lane.b32.xlu1 %v3440_v16, %s3007_s11 }
 0x1bd   : > { %v1562_v0 = vpop.permute.xlu0 %1561  ;;  %v1436_v9 = vpop.permute.xlu1 %1435 }
 0x1be   : > { %v1884_v35 = vsel %vm1879_vm9, %v1851_v50, %v1562_v0 }
 0x1bf   : > { %1583 = vrot.lane.b32.xlu0 %v3451_v19, %s3007_s11  ;;  %2703 = vmatprep.mubr.msk.f32.mxu0 %vm1917_vm10, %v1884_v35  ;;  %v1753_v19 = vsel %vm1747_vm5, %v1720_v3, %v1052_v32  ;;  %v3976_v3 = vld [vmem:[#allocation2 + $0x110] sm:$0xff] }
 0x1c0   : > { %1201 = vrot.lane.b32.xlu1 %v3440_v16, %s3004_s4  ;;  %v1786_v5 = vsel %vm1780_vm6, %v1753_v19, %v1180_v48  ;;  %v245_v48 = vld [vmem:[%s3182_s26 + $0xf0] sm:$0xff]  ;;  %v1657_v19 = vsel %vm247_vm0, %v3508_v62, %v3483_v53  ;;  %v579_v53 = vld [vmem:[#allocation2 + $0x109] sm:$0xff]  ;;  %s3008_s26 = smov [#allocation8]  }
 0x1c1   : > { %v1182_v61 = vpop.permute.xlu0 %1181  ;;  %v1056_v60 = vpop.permute.xlu1 %1055  ;;  %v1819_v40 = vsel %vm1813_vm8, %v1786_v5, %v1308_v7  ;;  %334 = vst.msk [vmem:[#allocation2 + $0x181] sm:$0xff] %vm247_vm0, %v245_v48  ;;  %v1754_v7 = vsel %vm1747_vm5, %v1721_v38, %v1054_v47  ;;  %v1656_v47 = vsel %vm247_vm0, %v3516_v1, %v3490_v55  ;;  %v1658_v48 = vsel %vm247_vm0, %v3528_v22, %v3502_v59  ;;  %v611_v38 = vld [vmem:[#allocation2 + $0x10a] sm:$0xff]  ;;  %s2895_s18 = sshll.u32 %s3008_s26, 4  ;;  %s2896_s18 = int_to_ptr.vmem [resolvable:$false] %s2895_s18 }
 0x1c2   : > { %v1852_v16 = vsel %vm1846_vm7, %v1819_v40, %v1436_v9  ;;  %v1787_v58 = vsel %vm1780_vm6, %v1754_v7, %v1182_v61  ;;  %v1689_v39 = vsel %vm1681_vm3, %v1656_v47, %v3640_v21  ;;  %v3967_v9 = vld [vmem:[#allocation2 + $0x108] sm:$0xff]  ;;  %v612_v7 = vld [vmem:[#allocation2 + $0x112] sm:$0xff]  ;;  %v1660_v47 = vsel %vm247_vm0, %v3540_v33, %v3514_v63  ;;  %p2898_p10 = scmp.lt.s32.totalorder %s4508_s23, %s2896_s18 }
 0x1c3   : > { %1329 = vrot.lane.b32.xlu0 %v3913_v51, %s3005_s25  ;;  %v1722_v50 = vsel %vm1714_vm4, %v1689_v39, %v3766_v42  ;;  %v1693_v39 = vsel %vm1681_vm3, %v1660_v47, %v3656_v4  ;;  %v581_v63 = vld [vmem:[#allocation2 + $0x121] sm:$0xff]  ;;  %v4662_v33 = vld [vmem:[#allocation58_spill] sm:$0xff]  ;;  %v582_v4 = vld [vmem:[#allocation2 + $0x129] sm:$0xff] }
 0x1c4   : > { %1203 = vrot.lane.b32.xlu1 %v513_v52, %s3004_s4  ;;  %v1755_v0 = vsel %vm1747_vm5, %v1722_v50, %v1056_v60  ;;  %v1690_v52 = vsel %vm1681_vm3, %v1657_v19, %v3634_v46  ;;  %v580_v46 = vld [vmem:[#allocation2 + $0x111] sm:$0xff]  ;;  %v1726_v50 = vsel %vm1714_vm4, %v1693_v39, %v3784_v45 }
 0x1c5   : > { %v1184_v29 = vpop.permute.xlu0 %1183  ;;  %v1564_v2 = vpop.permute.xlu1 %1563 }
 0x1c6   : > { %v1885_v14 = vsel %vm1879_vm9, %v1852_v16, %v1564_v2  ;;  %v1788_v55 = vsel %vm1780_vm6, %v1755_v0, %v1184_v29  ;;  %v1723_v29 = vsel %vm1714_vm4, %v1690_v52, %v3760_v25 }
 0x1c7   : > { %1331 = vrot.lane.b32.xlu0 %v3922_v34, %s3005_s25  ;;  %2704 = vmatmul.mubr.msk.f32.gmra.mrb[4].mxu0 %vm1917_vm10, %v1885_v14 }
 0x1c8   : > { %949 = vrot.lane.b32.xlu1 %v3913_v51, %s3002_s8 }
 0x1c9   : > { %v1312_v32 = vpop.permute.xlu0 %1311  ;;  %v1310_v17 = vpop.permute.xlu1 %1309 }
 0x1ca   : > { %v1820_v37 = vsel %vm1813_vm8, %v1787_v58, %v1310_v17  ;;  %v1821_v1 = vsel %vm1813_vm8, %v1788_v55, %v1312_v32 }
 0x1cb   : > { %951 = vrot.lane.b32.xlu0 %v3922_v34, %s3002_s8 }
 0x1cc   : > { %1457 = vrot.lane.b32.xlu1 %v577_v31, %s3006_s5 }
 0x1cd   : > { %v1058_v23 = vpop.permute.xlu0 %1057  ;;  %v1438_v26 = vpop.permute.xlu1 %1437 }
 0x1ce   : > { %v1853_v13 = vsel %vm1846_vm7, %v1820_v37, %v1438_v26  ;;  %v1756_v40 = vsel %vm1747_vm5, %v1723_v29, %v1058_v23  ;;  %v4017_v26 = vld [vmem:[#allocation2 + $0x120] sm:$0xff] }
 0x1cf   : > { %1459 = vrot.lane.b32.xlu0 %v578_v44, %s3006_s5 }
 0x1d0   : > { %1077 = vrot.lane.b32.xlu1 %v577_v31, %s3003_s9  ;;  %v1691_v31 = vsel %vm1681_vm3, %v1658_v48, %v3648_v30 }
 0x1d1   : > { %v1566_v6 = vpop.permute.xlu0 %1565  ;;  %v1440_v15 = vpop.permute.xlu1 %1439  ;;  %v1724_v17 = vsel %vm1714_vm4, %v1691_v31, %v3776_v10  ;;  %v457_v31 = vld [vmem:[#allocation2 + $0x140] sm:$0xff] }
 0x1d2   : > { %v1886_v8 = vsel %vm1879_vm9, %v1853_v13, %v1566_v6  ;;  %v1854_v21 = vsel %vm1846_vm7, %v1821_v1, %v1440_v15 }
 0x1d3   : > { %1079 = vrot.lane.b32.xlu0 %v578_v44, %s3003_s9  ;;  %2706 = vmatprep.mubr.msk.f32.mxu0 %vm1917_vm10, %v1886_v8  ;;  %v4023_v8 = vld [vmem:[#allocation2 + $0x128] sm:$0xff] }
 0x1d4   : > { %1585 = vrot.lane.b32.xlu1 %v609_v43, %s3007_s11 }
 0x1d5   : > { %v1186_v54 = vpop.permute.xlu0 %1185  ;;  %v1060_v35 = vpop.permute.xlu1 %1059 }
 0x1d6   : > { %v1789_v16 = vsel %vm1780_vm6, %v1756_v40, %v1186_v54  ;;  %v1757_v44 = vsel %vm1747_vm5, %v1724_v17, %v1060_v35  ;;  %v4666_v17 = vld [vmem:[#allocation24_spill] sm:$0xff] }
 0x1d7   : > { %1587 = vrot.lane.b32.xlu0 %v610_v36, %s3007_s11 }
 0x1d8   : > { %1205 = vrot.lane.b32.xlu1 %v609_v43, %s3004_s4 }
 0x1d9   : > { %v1188_v41 = vpop.permute.xlu0 %1187  ;;  %v1568_v42 = vpop.permute.xlu1 %1567 }
 0x1da   : > { %v1887_v27 = vsel %vm1879_vm9, %v1854_v21, %v1568_v42  ;;  %v1790_v59 = vsel %vm1780_vm6, %v1757_v44, %v1188_v41 }
 0x1db   : > { %1333 = vrot.lane.b32.xlu0 %v3967_v9, %s3005_s25  ;;  %2707 = vmatmul.mubr.msk.f32.gmra.mrb[6].mxu0 %vm1917_vm10, %v1887_v27 }
 0x1dc   : > { %1207 = vrot.lane.b32.xlu1 %v610_v36, %s3004_s4  ;;  %v1659_v36 = vsel %vm247_vm0, %v3520_v20, %v3494_v57 }
 0x1dd   : > { %v1316_v61 = vpop.permute.xlu0 %1315  ;;  %v1314_v60 = vpop.permute.xlu1 %1313  ;;  %v1692_v54 = vsel %vm1681_vm3, %v1659_v36, %v3642_v28 }
 0x1de   : > { %v1822_v62 = vsel %vm1813_vm8, %v1789_v16, %v1314_v60  ;;  %v1823_v22 = vsel %vm1813_vm8, %v1790_v59, %v1316_v61  ;;  %v1725_v0 = vsel %vm1714_vm4, %v1692_v54, %v4662_v33  ;;  %v613_v60 = vld [vmem:[#allocation2 + $0x122] sm:$0xff] }
 0x1df   : > { %1335 = vrot.lane.b32.xlu0 %v3976_v3, %s3005_s25 }
 0x1e0   : > { %953 = vrot.lane.b32.xlu1 %v3967_v9, %s3002_s8 }
 0x1e1   : > { %v1062_v5 = vpop.permute.xlu0 %1061  ;;  %v1442_v2 = vpop.permute.xlu1 %1441 }
 0x1e2   : > { %v1855_v14 = vsel %vm1846_vm7, %v1822_v62, %v1442_v2  ;;  %v1758_v35 = vsel %vm1747_vm5, %v1725_v0, %v1062_v5  ;;  %v614_v5 = vld [vmem:[#allocation2 + $0x12a] sm:$0xff] }
 0x1e3   : > { %955 = vrot.lane.b32.xlu0 %v3976_v3, %s3002_s8 }
 0x1e4   : > { %1461 = vrot.lane.b32.xlu1 %v579_v53, %s3006_s5 }
 0x1e5   : > { %v1570_v32 = vpop.permute.xlu0 %1569  ;;  %v1444_v56 = vpop.permute.xlu1 %1443 }
 0x1e6   : > { %v1888_v25 = vsel %vm1879_vm9, %v1855_v14, %v1570_v32  ;;  %v1856_v30 = vsel %vm1846_vm7, %v1823_v22, %v1444_v56  ;;  %v4066_v14 = vld [vmem:[#allocation2 + $0x140] sm:$0xff] }
 0x1e7   : > { %1463 = vrot.lane.b32.xlu0 %v580_v46, %s3006_s5  ;;  %2709 = vmatprep.mubr.msk.f32.mxu0 %vm1917_vm10, %v1888_v25  ;;  %v4663_v32 = vld [vmem:[#allocation15_spill] sm:$0xff]  ;;  %v4669_v22 = vld [vmem:[#allocation60_spill] sm:$0xff] }
 0x1e8   : > { %1081 = vrot.lane.b32.xlu1 %v579_v53, %s3003_s9  ;;  %v551_v53 = vld [vmem:[#allocation2 + $0x138] sm:$0xff] }
 0x1e9   : > { %v1190_v11 = vpop.permute.xlu0 %1189  ;;  %v1064_v23 = vpop.permute.xlu1 %1063  ;;  %v4664_v25 = vld [vmem:[#allocation19_spill] sm:$0xff] }
 0x1ea   : > { %v1759_v57 = vsel %vm1747_vm5, %v1726_v50, %v1064_v23  ;;  %v1791_v55 = vsel %vm1780_vm6, %v1758_v35, %v1190_v11  ;;  %v1661_v48 = vsel %vm247_vm0, %v4664_v25, %v4663_v32  ;;  %v4665_v11 = vld [vmem:[#allocation17_spill] sm:$0xff]  ;;  %v4675_v32 = vld [vmem:[#allocation42_spill] sm:$0xff] }
 0x1eb   : > { %1083 = vrot.lane.b32.xlu0 %v580_v46, %s3003_s9  ;;  %v1662_v44 = vsel %vm247_vm0, %v4666_v17, %v4665_v11  ;;  %v585_v11 = vld [vmem:[#allocation2 + $0x151] sm:$0xff] }
 0x1ec   : > { %1589 = vrot.lane.b32.xlu1 %v611_v38, %s3007_s11 }
 0x1ed   : > { %v1192_v49 = vpop.permute.xlu0 %1191  ;;  %v1572_v10 = vpop.permute.xlu1 %1571 }
 0x1ee   : > { %v1889_v58 = vsel %vm1879_vm9, %v1856_v30, %v1572_v10  ;;  %v1792_v28 = vsel %vm1780_vm6, %v1759_v57, %v1192_v49  ;;  %v4668_v49 = vld [vmem:[#allocation40_spill] sm:$0xff] }
 0x1ef   : > { %1591 = vrot.lane.b32.xlu0 %v612_v7, %s3007_s11  ;;  %2710 = vmatmul.mubr.msk.f32.gmra.mrb[8].mxu0 %vm1917_vm10, %v1889_v58  ;;  %v1695_v59 = vsel %vm1681_vm3, %v1662_v44, %v4668_v49 }
 0x1f0   : > { %1209 = vrot.lane.b32.xlu1 %v611_v38, %s3004_s4  ;;  %v4667_v38 = vld [vmem:[#allocation38_spill] sm:$0xff] }
 0x1f1   : > { %v1320_v37 = vpop.permute.xlu0 %1319  ;;  %v1318_v13 = vpop.permute.xlu1 %1317  ;;  %v1694_v23 = vsel %vm1681_vm3, %v1661_v48, %v4667_v38 }
 0x1f2   : > { %v1824_v45 = vsel %vm1813_vm8, %v1791_v55, %v1318_v13  ;;  %v1825_v1 = vsel %vm1813_vm8, %v1792_v28, %v1320_v37  ;;  %v1727_v30 = vsel %vm1714_vm4, %v1694_v23, %v4669_v22  ;;  %v583_v37 = vld [vmem:[#allocation2 + $0x139] sm:$0xff] }
 0x1f3   : > { %1337 = vrot.lane.b32.xlu0 %v4017_v26, %s3005_s25  ;;  %v586_v23 = vld [vmem:[#allocation2 + $0x159] sm:$0xff] }
 0x1f4   : > { %1211 = vrot.lane.b32.xlu1 %v612_v7, %s3004_s4 }
 0x1f5   : > { %v940_v6 = vpop.permute.xlu0 %939  ;;  %v1446_v43 = vpop.permute.xlu1 %1445 }
 0x1f6   : > { %v1857_v21 = vsel %vm1846_vm7, %v1824_v45, %v1446_v43  ;;  %v1728_v10 = vsel %vm1714_vm4, %v1695_v59, %v940_v6  ;;  %v553_v45 = vld [vmem:[#allocation2 + $0x150] sm:$0xff] }
 0x1f7   : > { %1339 = vrot.lane.b32.xlu0 %v4023_v8, %s3005_s25 }
 0x1f8   : > { %957 = vrot.lane.b32.xlu1 %v4017_v26, %s3002_s8 }
 0x1f9   : > { %v1448_v15 = vpop.permute.xlu0 %1447  ;;  %v1066_v20 = vpop.permute.xlu1 %1065 }
 0x1fa   : > { %v1858_v27 = vsel %vm1846_vm7, %v1825_v1, %v1448_v15  ;;  %v1760_v58 = vsel %vm1747_vm5, %v1727_v30, %v1066_v20  ;;  %v584_v15 = vld [vmem:[#allocation2 + $0x141] sm:$0xff] }
 0x1fb   : > { %959 = vrot.lane.b32.xlu0 %v4023_v8, %s3002_s8 }
 0x1fc   : > { %1465 = vrot.lane.b32.xlu1 %v581_v63, %s3006_s5 }
 0x1fd   : > { %v1068_v41 = vpop.permute.xlu0 %1067  ;;  %v1574_v42 = vpop.permute.xlu1 %1573 }
 0x1fe   : > { %v1890_v61 = vsel %vm1879_vm9, %v1857_v21, %v1574_v42  ;;  %v1761_v13 = vsel %vm1747_vm5, %v1728_v10, %v1068_v41  ;;  %v616_v41 = vld [vmem:[#allocation2 + $0x142] sm:$0xff]  ;;  %v554_v42 = vld [vmem:[#allocation2 + $0x158] sm:$0xff] }
 0x1ff   : > { %1467 = vrot.lane.b32.xlu0 %v582_v4, %s3006_s5  ;;  %2712 = vmatprep.mubr.msk.f32.mxu0 %vm1917_vm10, %v1890_v61  ;;  %v4670_v61 = vld [vmem:[#allocation16_spill] sm:$0xff] }
 0x200   : > { %1085 = vrot.lane.b32.xlu1 %v581_v63, %s3003_s9 }
 0x201   : > { %v1576_v19 = vpop.permute.xlu0 %1575  ;;  %v1194_v29 = vpop.permute.xlu1 %1193 }
 0x202   : > { %v1891_v52 = vsel %vm1879_vm9, %v1858_v27, %v1576_v19  ;;  %v1793_v43 = vsel %vm1780_vm6, %v1760_v58, %v1194_v29  ;;  %v4671_v19 = vld [vmem:[#allocation22_spill] sm:$0xff]  ;;  %v4672_v29 = vld [vmem:[#allocation20_spill] sm:$0xff] }
 0x203   : > { %1087 = vrot.lane.b32.xlu0 %v582_v4, %s3003_s9  ;;  %2713 = vmatmul.mubr.msk.f32.gmra.mrb[10].mxu0 %vm1917_vm10, %v1891_v52  ;;  %v615_v4 = vld [vmem:[#allocation2 + $0x13a] sm:$0xff]  ;;  %v1663_v52 = vsel %vm247_vm0, %v4671_v19, %v4670_v61  ;;  %v587_v19 = vld [vmem:[#allocation2 + $0x169] sm:$0xff] }
 0x204   : > { %1593 = vrot.lane.b32.xlu1 %v613_v60, %s3007_s11 }
 0x205   : > { %v1322_v40 = vpop.permute.xlu0 %1321  ;;  %v1196_v16 = vpop.permute.xlu1 %1195 }
 0x206   : > { %v1794_v36 = vsel %vm1780_vm6, %v1761_v13, %v1196_v16  ;;  %v1826_v54 = vsel %vm1813_vm8, %v1793_v43, %v1322_v40  ;;  %v4674_v16 = vld [vmem:[#allocation39_spill] sm:$0xff]  ;;  %v617_v13 = vld [vmem:[#allocation2 + $0x152] sm:$0xff] }
 0x207   : > { %1595 = vrot.lane.b32.xlu0 %v614_v5, %s3007_s11 }
 0x208   : > { %1213 = vrot.lane.b32.xlu1 %v613_v60, %s3004_s4 }
 0x209   : > { %v1324_v62 = vpop.permute.xlu0 %1323 }
 0x20a   : > { %v942_v2 = vpop.permute.xlu1 %941  ;;  %v1827_v6 = vsel %vm1813_vm8, %v1794_v36, %v1324_v62 }
 0x20b   : > { %1341 = vrot.lane.b32.xlu0 %v551_v53, %s3005_s25 }
 0x20c   : > { %1215 = vrot.lane.b32.xlu1 %v614_v5, %s3004_s4  ;;  %v4673_v5 = vld [vmem:[#allocation59_spill] sm:$0xff] }
 0x20d   : > { %v944_v46 = vpop.permute.xlu0 %943  ;;  %v1664_v40 = vsel %vm247_vm0, %v4673_v5, %v4672_v29  ;;  %v588_v5 = vld [vmem:[#allocation2 + $0x171] sm:$0xff] }
 0x20e   : > { %v1450_v56 = vpop.permute.xlu1 %1449  ;;  %v1697_v25 = vsel %vm1681_vm3, %v1664_v40, %v4675_v32 }
 0x20f   : > { %1343 = vrot.lane.b32.xlu0 %v4066_v14, %s3005_s25  ;;  %v1859_v50 = vsel %vm1846_vm7, %v1826_v54, %v1450_v56  ;;  %v1730_v56 = vsel %vm1714_vm4, %v1697_v25, %v944_v46 }
 0x210   : > { %961 = vrot.lane.b32.xlu1 %v551_v53, %s3002_s8  ;;  %v1696_v53 = vsel %vm1681_vm3, %v1663_v52, %v4674_v16 }
 0x211   : > { %v1452_v7 = vpop.permute.xlu0 %1451  ;;  %v1729_v48 = vsel %vm1714_vm4, %v1696_v53, %v942_v2 }
 0x212   : > { %v1070_v47 = vpop.permute.xlu1 %1069  ;;  %v1860_v33 = vsel %vm1846_vm7, %v1827_v6, %v1452_v7 }
 0x213   : > { %963 = vrot.lane.b32.xlu0 %v457_v31, %s3002_s8  ;;  %v1762_v31 = vsel %vm1747_vm5, %v1729_v48, %v1070_v47  ;;  %v618_v47 = vld [vmem:[#allocation2 + $0x15a] sm:$0xff] }
 0x214   : > { %1469 = vrot.lane.b32.xlu1 %v583_v37, %s3006_s5 }
 0x215   : > { %v1072_v39 = vpop.permute.xlu0 %1071 }
 0x216   : > { %v1578_v63 = vpop.permute.xlu1 %1577  ;;  %v1763_v17 = vsel %vm1747_vm5, %v1730_v56, %v1072_v39  ;;  %v555_v39 = vld [vmem:[#allocation2 + $0x168] sm:$0xff] }
 0x217   : > { %1471 = vrot.lane.b32.xlu0 %v584_v15, %s3006_s5  ;;  %v1892_v0 = vsel %vm1879_vm9, %v1859_v50, %v1578_v63  ;;  %v556_v50 = vld [vmem:[#allocation2 + $0x170] sm:$0xff] }
 0x218   : > { %1089 = vrot.lane.b32.xlu1 %v583_v37, %s3003_s9  ;;  %2715 = vmatprep.mubr.msk.f32.mxu0 %vm1917_vm10, %v1892_v0 }
 0x219   : > { %v1580_v57 = vpop.permute.xlu0 %1579 }
 0x21a   : > { %v1893_v20 = vsel %vm1879_vm9, %v1860_v33, %v1580_v57  ;;  %v1198_v35 = vpop.permute.xlu1 %1197  ;;  %v4676_v33 = vld [vmem:[#allocation18_spill] sm:$0xff] }
 0x21b   : > { %1091 = vrot.lane.b32.xlu0 %v584_v15, %s3003_s9  ;;  %2716 = vmatmul.mubr.msk.f32.gmra.mrb[12].mxu0 %vm1917_vm10, %v1893_v20  ;;  %v1795_v44 = vsel %vm1780_vm6, %v1762_v31, %v1198_v35  ;;  %v1665_v0 = vsel %vm247_vm0, %v3803_v24, %v4676_v33  ;;  %v4677_v20 = vld [vmem:[#allocation23_spill] sm:$0xff]  ;;  %v619_v31 = vld [vmem:[#allocation2 + $0x16a] sm:$0xff] }
 0x21c   : > { %1597 = vrot.lane.b32.xlu1 %v615_v4, %s3007_s11 }
 0x21d   : > { %v1326_v55 = vpop.permute.xlu0 %1325 }
 0x21e   : > { %v1200_v28 = vpop.permute.xlu1 %1199  ;;  %v1828_v2 = vsel %vm1813_vm8, %v1795_v44, %v1326_v55 }
 0x21f   : > { %1599 = vrot.lane.b32.xlu0 %v616_v41, %s3007_s11  ;;  %v1796_v7 = vsel %vm1780_vm6, %v1763_v17, %v1200_v28  ;;  %v620_v17 = vld [vmem:[#allocation2 + $0x172] sm:$0xff] }
 0x220   : > { %1217 = vrot.lane.b32.xlu1 %v615_v4, %s3004_s4  ;;  %v4678_v4 = vld [vmem:[#allocation61_spill] sm:$0xff] }
 0x221   : > { %v1328_v1 = vpop.permute.xlu0 %1327  ;;  %v1666_v35 = vsel %vm247_vm0, %v4678_v4, %v4677_v20 }
 0x222   : > { %v946_v21 = vpop.permute.xlu1 %945  ;;  %v1829_v46 = vsel %vm1813_vm8, %v1796_v7, %v1328_v1 }
 0x223   : > { %1345 = vrot.lane.b32.xlu0 %v553_v45, %s3005_s25 }
 0x224   : > { %1219 = vrot.lane.b32.xlu1 %v616_v41, %s3004_s4  ;;  %v4679_v41 = vld [vmem:[#allocation41_spill] sm:$0xff] }
 0x225   : > { %v948_v27 = vpop.permute.xlu0 %947  ;;  %v1698_v55 = vsel %vm1681_vm3, %v1665_v0, %v4679_v41  ;;  %v590_v0 = vld [vmem:[#allocation2 + $0x189] sm:$0xff] }
 0x226   : > { %v1454_v60 = vpop.permute.xlu1 %1453 }
 0x227   : > { %1347 = vrot.lane.b32.xlu0 %v554_v42, %s3005_s25  ;;  %v1861_v59 = vsel %vm1846_vm7, %v1828_v2, %v1454_v60  ;;  %v558_v2 = vld [vmem:[#allocation2 + $0x188] sm:$0xff] }
 0x228   : > { %965 = vrot.lane.b32.xlu1 %v553_v45, %s3002_s8  ;;  %v4680_v45 = vld [vmem:[#allocation44_spill] sm:$0xff] }
 0x229   : > { %v1456_v62 = vpop.permute.xlu0 %1455  ;;  %v1699_v1 = vsel %vm1681_vm3, %v1666_v35, %v4680_v45 }
 0x22a   : > { %v1074_v38 = vpop.permute.xlu1 %1073  ;;  %v1862_v30 = vsel %vm1846_vm7, %v1829_v46, %v1456_v62  ;;  %v1732_v61 = vsel %vm1714_vm4, %v1699_v1, %v948_v27  ;;  %v621_v1 = vld [vmem:[#allocation2 + $0x182] sm:$0xff] }
 0x22b   : > { %967 = vrot.lane.b32.xlu0 %v554_v42, %s3002_s8  ;;  %v1731_v42 = vsel %vm1714_vm4, %v1698_v55, %v946_v21 }
 0x22c   : > { %1473 = vrot.lane.b32.xlu1 %v585_v11, %s3006_s5  ;;  %v1764_v24 = vsel %vm1747_vm5, %v1731_v42, %v1074_v38 }
 0x22d   : > { %v1076_v49 = vpop.permute.xlu0 %1075 }
 0x22e   : > { %v1582_v22 = vpop.permute.xlu1 %1581  ;;  %v1765_v52 = vsel %vm1747_vm5, %v1732_v61, %v1076_v49  ;;  %v622_v61 = vld [vmem:[#allocation2 + $0x18a] sm:$0xff] }
 0x22f   : > { %1475 = vrot.lane.b32.xlu0 %v586_v23, %s3006_s5  ;;  %v1894_v10 = vsel %vm1879_vm9, %v1861_v59, %v1582_v22  ;;  %v4681_v59 = vld [vmem:[#allocation21_spill] sm:$0xff] }
 0x230   : > { %1093 = vrot.lane.b32.xlu1 %v585_v11, %s3003_s9  ;;  %2718 = vmatprep.mubr.msk.f32.mxu0 %vm1917_vm10, %v1894_v10  ;;  %v1667_v22 = vsel %vm247_vm0, %v3856_v18, %v4681_v59  ;;  %v4682_v10 = vld [vmem:[#allocation26_spill] sm:$0xff] }
 0x231   : > { %v1584_v58 = vpop.permute.xlu0 %1583 }
 0x232   : > { %v1895_v37 = vsel %vm1879_vm9, %v1862_v30, %v1584_v58  ;;  %v1202_v43 = vpop.permute.xlu1 %1201  ;;  %v1668_v58 = vsel %vm247_vm0, %v3869_v12, %v4682_v10 }
 0x233   : > { %1095 = vrot.lane.b32.xlu0 %v586_v23, %s3003_s9  ;;  %2719 = vmatmul.mubr.msk.f32.gmra.mrb[14].mxu0 %vm1917_vm10, %v1895_v37  ;;  %v1797_v60 = vsel %vm1780_vm6, %v1764_v24, %v1202_v43  ;;  %v557_v23 = vld [vmem:[#allocation2 + $0x180] sm:$0xff] }
 0x234   : > { %1601 = vrot.lane.b32.xlu1 %v617_v13, %s3007_s11  ;;  %v4683_v37 = vld [vmem:[#allocation43_spill] sm:$0xff] }
 0x235   : > { %v1330_v15 = vpop.permute.xlu0 %1329 }
 0x236   : > { %v1204_v36 = vpop.permute.xlu1 %1203  ;;  %v1830_v21 = vsel %vm1813_vm8, %v1797_v60, %v1330_v15 }
 0x237   : > { %1603 = vrot.lane.b32.xlu0 %v618_v47, %s3007_s11  ;;  %v1798_v40 = vsel %vm1780_vm6, %v1765_v52, %v1204_v36  ;;  %v559_v52 = vld [vmem:[#allocation2 + $0x198] sm:$0xff] }
 0x238   : > { %1221 = vrot.lane.b32.xlu1 %v617_v13, %s3004_s4  ;;  %v1700_v13 = vsel %vm1681_vm3, %v1667_v22, %v4683_v37 }
 0x239   : > { %v1332_v54 = vpop.permute.xlu0 %1331 }
 0x23a   : > { %v950_v6 = vpop.permute.xlu1 %949  ;;  %v1831_v27 = vsel %vm1813_vm8, %v1798_v40, %v1332_v54  ;;  %v589_v54 = vld [vmem:[#allocation2 + $0x181] sm:$0xff] }
 0x23b   : > { %1349 = vrot.lane.b32.xlu0 %v555_v39, %s3005_s25  ;;  %v1733_v36 = vsel %vm1714_vm4, %v1700_v13, %v950_v6 }
 0x23c   : > { %1223 = vrot.lane.b32.xlu1 %v618_v47, %s3004_s4  ;;  %v4684_v47 = vld [vmem:[#allocation46_spill] sm:$0xff] }
 0x23d   : > { %v952_v63 = vpop.permute.xlu0 %951  ;;  %v1701_v15 = vsel %vm1681_vm3, %v1668_v58, %v4684_v47 }
 0x23e   : > { %v1458_v57 = vpop.permute.xlu1 %1457 }
 0x23f   : > { %1351 = vrot.lane.b32.xlu0 %v556_v50, %s3005_s25  ;;  %v1863_v53 = vsel %vm1846_vm7, %v1830_v21, %v1458_v57  ;;  %v4685_v21 = vld [vmem:[#allocation25_spill] sm:$0xff] }
 0x240   : > { %969 = vrot.lane.b32.xlu1 %v555_v39, %s3002_s8  ;;  %v1734_v39 = vsel %vm1714_vm4, %v1701_v15, %v952_v63 }
 0x241   : > { %v1460_v28 = vpop.permute.xlu0 %1459 }
 0x242   : > { %v1078_v29 = vpop.permute.xlu1 %1077  ;;  %v1864_v32 = vsel %vm1846_vm7, %v1831_v27, %v1460_v28  ;;  %v1669_v27 = vsel %vm247_vm0, %v3913_v51, %v4685_v21 }
 0x243   : > { %971 = vrot.lane.b32.xlu0 %v556_v50, %s3002_s8  ;;  %v1766_v18 = vsel %vm1747_vm5, %v1733_v36, %v1078_v29 }
 0x244   : > { %1477 = vrot.lane.b32.xlu1 %v587_v19, %s3006_s5 }
 0x245   : > { %v1080_v16 = vpop.permute.xlu0 %1079 }
 0x246   : > { %v1586_v62 = vpop.permute.xlu1 %1585  ;;  %v1767_v12 = vsel %vm1747_vm5, %v1734_v39, %v1080_v16  ;;  %v560_v16 = vld [vmem:[#allocation2 + $0x1a0] sm:$0xff] }
 0x247   : > { %1479 = vrot.lane.b32.xlu0 %v588_v5, %s3006_s5  ;;  %v1896_v48 = vsel %vm1879_vm9, %v1863_v53, %v1586_v62  ;;  %v623_v62 = vld [vmem:[#allocation2 + $0x19a] sm:$0xff] }
 0x248   : > { %1097 = vrot.lane.b32.xlu1 %v587_v19, %s3003_s9  ;;  %2721 = vmatprep.mubr.msk.f32.mxu1 %vm1917_vm10, %v1896_v48  ;;  %v4687_v48 = vld [vmem:[#allocation45_spill] sm:$0xff] }
 0x249   : > { %v1588_v25 = vpop.permute.xlu0 %1587 }
 0x24a   : > { %v1897_v56 = vsel %vm1879_vm9, %v1864_v32, %v1588_v25  ;;  %v1206_v11 = vpop.permute.xlu1 %1205  ;;  %v4686_v32 = vld [vmem:[#allocation28_spill] sm:$0xff] }
 0x24b   : > { %1099 = vrot.lane.b32.xlu0 %v588_v5, %s3003_s9  ;;  %2722 = vmatmul.mubr.msk.f32.vlgmr.msra.gmra.mrb[0].mxu1 %vm1917_vm10, %v1897_v56  ;;  %v1799_v50 = vsel %vm1780_vm6, %v1766_v18, %v1206_v11  ;;  %v591_v5 = vld [vmem:[#allocation2 + $0x199] sm:$0xff]  ;;  %v1670_v25 = vsel %vm247_vm0, %v3922_v34, %v4686_v32  ;;  %v1702_v56 = vsel %vm1681_vm3, %v1669_v27, %v4687_v48  ;;  %v4688_v11 = vld [vmem:[#allocation48_spill] sm:$0xff] }
 0x24c   : > { %1605 = vrot.lane.b32.xlu1 %v619_v31, %s3007_s11 }
 0x24d   : > { %v1334_v44 = vpop.permute.xlu0 %1333 }
 0x24e   : > { %v1208_v38 = vpop.permute.xlu1 %1207  ;;  %v1832_v6 = vsel %vm1813_vm8, %v1799_v50, %v1334_v44 }
 0x24f   : > { %1607 = vrot.lane.b32.xlu0 %v620_v17, %s3007_s11  ;;  %v1800_v57 = vsel %vm1780_vm6, %v1767_v12, %v1208_v38 }
 0x250   : > { %1225 = vrot.lane.b32.xlu1 %v619_v31, %s3004_s4 }
 0x251   : > { %v1336_v7 = vpop.permute.xlu0 %1335 }
 0x252   : > { %v954_v49 = vpop.permute.xlu1 %953  ;;  %v1833_v63 = vsel %vm1813_vm8, %v1800_v57, %v1336_v7 }
 0x253   : > { %1353 = vrot.lane.b32.xlu0 %v557_v23, %s3005_s25  ;;  %v1735_v44 = vsel %vm1714_vm4, %v1702_v56, %v954_v49 }
 0x254   : > { %1227 = vrot.lane.b32.xlu1 %v620_v17, %s3004_s4  ;;  %v1703_v17 = vsel %vm1681_vm3, %v1670_v25, %v4688_v11 }
 0x255   : > { %v956_v46 = vpop.permute.xlu0 %955 }
 0x256   : > { %v1462_v30 = vpop.permute.xlu1 %1461  ;;  %v1736_v51 = vsel %vm1714_vm4, %v1703_v17, %v956_v46 }
 0x257   : > { %1355 = vrot.lane.b32.xlu0 %v558_v2, %s3005_s25  ;;  %v1865_v4 = vsel %vm1846_vm7, %v1832_v6, %v1462_v30 }
 0x258   : > { %973 = vrot.lane.b32.xlu1 %v557_v23, %s3002_s8  ;;  %v592_v23 = vld [vmem:[#allocation2 + $0x1a1] sm:$0xff] }
 0x259   : > { %v1464_v43 = vpop.permute.xlu0 %1463 }
 0x25a   : > { %v1082_v33 = vpop.permute.xlu1 %1081  ;;  %v1866_v41 = vsel %vm1846_vm7, %v1833_v63, %v1464_v43  ;;  %v624_v43 = vld [vmem:[#allocation2 + $0x1a2] sm:$0xff] }
 0x25b   : > { %975 = vrot.lane.b32.xlu0 %v558_v2, %s3002_s8  ;;  %v1768_v38 = vsel %vm1747_vm5, %v1735_v44, %v1082_v33  ;;  %s2897_s8 = scalar_lea.vmem %s2896_s18, 8192 }
 0x25c   : > { %1481 = vrot.lane.b32.xlu1 %v589_v54, %s3006_s5  ;;  %p2899_p13 = scmp.lt.s32.totalorder %s2897_s8, %s2891_s10 }
 0x25d   : > { %v1084_v20 = vpop.permute.xlu0 %1083 }
 0x25e   : > { %v1590_v35 = vpop.permute.xlu1 %1589  ;;  %v1769_v34 = vsel %vm1747_vm5, %v1736_v51, %v1084_v20  ;;  %p2900_p3 = por %p2899_p13, %p2898_p10 }
 0x25f   : > { %1483 = vrot.lane.b32.xlu0 %v590_v0, %s3006_s5  ;;  %v1898_v55 = vsel %vm1879_vm9, %v1865_v4, %v1590_v35 }
 0x260   : > { %1101 = vrot.lane.b32.xlu1 %v589_v54, %s3003_s9  ;;  %2724 = vmatprep.mubr.msk.f32.mxu1 %vm1917_vm10, %v1898_v55  ;;  %v4689_v55 = vld [vmem:[#allocation27_spill] sm:$0xff]  ;;  %p2901_p7 = pnand %p2900_p3, %p2894_p8 }
 0x261   : > { %v1592_v28 = vpop.permute.xlu0 %1591 }
 0x262   : > { %v1899_v45 = vsel %vm1879_vm9, %v1866_v41, %v1592_v28  ;;  %v1210_v42 = vpop.permute.xlu1 %1209  ;;  %v1671_v28 = vsel %vm247_vm0, %v3967_v9, %v4689_v55 }
 0x263   : > { %1103 = vrot.lane.b32.xlu0 %v590_v0, %s3003_s9  ;;  %2725 = vmatmul.mubr.msk.f32.gmra.mrb[2].mxu1 %vm1917_vm10, %v1899_v45  ;;  %v1801_v7 = vsel %vm1780_vm6, %v1768_v38, %v1210_v42  ;;  %v4690_v45 = vld [vmem:[#allocation30_spill] sm:$0xff] }
 0x264   : > { %1609 = vrot.lane.b32.xlu1 %v621_v1, %s3007_s11 }
 0x265   : > { %v1338_v24 = vpop.permute.xlu0 %1337 }
 0x266   : > { %v1212_v19 = vpop.permute.xlu1 %1211  ;;  %v1834_v58 = vsel %vm1813_vm8, %v1801_v7, %v1338_v24 }
 0x267   : > { %1611 = vrot.lane.b32.xlu0 %v622_v61, %s3007_s11  ;;  %v1802_v59 = vsel %vm1780_vm6, %v1769_v34, %v1212_v19  ;;  %v4692_v19 = vld [vmem:[#allocation50_spill] sm:$0xff] }
 0x268   : > { %1229 = vrot.lane.b32.xlu1 %v621_v1, %s3004_s4  ;;  %v1672_v1 = vsel %vm247_vm0, %v3976_v3, %v4690_v45 }
 0x269   : > { %v1340_v60 = vpop.permute.xlu0 %1339 }
 0x26a   : > { %v4214_v29 = vpop.permute.xlu1 %957  ;;  %v1835_v47 = vsel %vm1813_vm8, %v1802_v59, %v1340_v60 }
 0x26b   : > { %1357 = vrot.lane.b32.xlu0 %v559_v52, %s3005_s25  ;;  %v1705_v52 = vsel %vm1681_vm3, %v1672_v1, %v4692_v19 }
 0x26c   : > { %1231 = vrot.lane.b32.xlu1 %v622_v61, %s3004_s4  ;;  %v4691_v61 = vld [vmem:[#allocation47_spill] sm:$0xff] }
 0x26d   : > { %v4216_v40 = vpop.permute.xlu0 %959  ;;  %v1704_v24 = vsel %vm1681_vm3, %v1671_v28, %v4691_v61  ;;  %v4696_v28 = vld [vmem:[#allocation52_spill] sm:$0xff] }
 0x26e   : > { %v1466_v53 = vpop.permute.xlu1 %1465  ;;  %v1738_v21 = vsel %vm1714_vm4, %v1705_v52, %v4216_v40 }
 0x26f   : > { %1485 = vrot.lane.b32.xlu0 %v591_v5, %s3006_s5  ;;  %v1867_v15 = vsel %vm1846_vm7, %v1834_v58, %v1466_v53 }
 0x270   : > { %1359 = vrot.lane.b32.xlu1 %v560_v16, %s3005_s25  ;;  %v1737_v16 = vsel %vm1714_vm4, %v1704_v24, %v4214_v29 }
 0x271   : > { %v1468_v31 = vpop.permute.xlu0 %1467 }
 0x272   : > { %v1086_v2 = vpop.permute.xlu1 %1085  ;;  %v2699_v30 = vpop.f32.mrb[0].mxu0  ;;  %v1868_v54 = vsel %vm1846_vm7, %v1835_v47, %v1468_v31 }
 0x273   : > { %1613 = vrot.lane.b32.xlu0 %v623_v62, %s3007_s11  ;;  %2244 = vst.msk [vmem:[%s4240_s27 + $0x8] sm:$0xff] %vm1681_vm3, %v2699_v30  ;;  %v2276_v49 = vsel %vm1681_vm3, %v2699_v30, 0.0  ;;  %v2345_v46 = vmul.f32 %v2699_v30, %v2699_v30  ;;  %v2084_v10 = vpop.f32.mrb[1].mxu0  ;;  %v1770_v3 = vsel %vm1747_vm5, %v1737_v16, %v1086_v2 }
 0x274   : > { %1487 = vrot.lane.b32.xlu1 %v592_v23, %s3006_s5  ;;  %2243 = vst.msk [vmem:[%s4240_s27] sm:$0xff] %vm1681_vm3, %v2084_v10  ;;  %v2275_v37 = vsel %vm1681_vm3, %v2084_v10, 0.0  ;;  %v2344_v13 = vmul.f32 %v2084_v10, %v2084_v10 }
 0x275   : > { %v1088_v22 = vpop.permute.xlu0 %1087  ;;  %v2377_v36 = vsel %vm1681_vm3, %v2345_v46, 0.0  ;;  %v2277_v39 = vadd.f32 %v2276_v49, %v2275_v37 }
 0x276   : > { %v1594_v18 = vpop.permute.xlu1 %1593  ;;  %v2376_v12 = vsel %vm1681_vm3, %v2344_v13, 0.0  ;;  %v1771_v32 = vsel %vm1747_vm5, %v1738_v21, %v1088_v22 }
 0x277   : > { %v1900_v50 = vsel %vm1879_vm9, %v1867_v15, %v1594_v18  ;;  %v2378_v0 = vadd.f32 %v2377_v36, %v2376_v12 }
 0x278   : > { %1615 = vrot.lane.b32.xlu1 %v624_v43, %s3007_s11  ;;  %2727 = vmatprep.mubr.msk.f32.mxu1 %vm1917_vm10, %v1900_v50 }
 0x279   : > { %v1596_v33 = vpop.permute.xlu0 %1595 }
 0x27a   : > { %v1901_v57 = vsel %vm1879_vm9, %v1868_v54, %v1596_v33  ;;  %v1214_v20 = vpop.permute.xlu1 %1213  ;;  %v4693_v54 = vld [vmem:[#allocation29_spill] sm:$0xff] }
 0x27b   : > { %2728 = vmatmul.mubr.msk.f32.gmra.mrb[4].mxu1 %vm1917_vm10, %v1901_v57  ;;  %v1803_v25 = vsel %vm1780_vm6, %v1770_v3, %v1214_v20  ;;  %v1673_v12 = vsel %vm247_vm0, %v4017_v26, %v4693_v54  ;;  %v4695_v20 = vld [vmem:[#allocation49_spill] sm:$0xff] }
 0x27d   : > { %v1342_v6 = vpop.permute.xlu0 %1341 }
 0x27e   : > { %v1216_v63 = vpop.permute.xlu1 %1215  ;;  %v1836_v51 = vsel %vm1813_vm8, %v1803_v25, %v1342_v6  ;;  %v1706_v6 = vsel %vm1681_vm3, %v1673_v12, %v4695_v20 }
 0x27f   : > { %v1804_v56 = vsel %vm1780_vm6, %v1771_v32, %v1216_v63 }
 0x281   : > { %v1344_v4 = vpop.permute.xlu0 %1343 }
 0x282   : > { %v4260_v35 = vpop.permute.xlu1 %961  ;;  %v1837_v23 = vsel %vm1813_vm8, %v1804_v56, %v1344_v4 }
 0x283   : > { %v1739_v26 = vsel %vm1714_vm4, %v1706_v6, %v4260_v35 }
 0x285   : > { %v4262_v41 = vpop.permute.xlu0 %963 }
 0x286   : > { %v1470_v42 = vpop.permute.xlu1 %1469  ;;  %v2702_v5 = vpop.f32.mrb[2].mxu0 }
 0x287   : > { %2246 = vst.msk [vmem:[%s4240_s27 + $0x18] sm:$0xff] %vm1681_vm3, %v2702_v5  ;;  %v2094_v9 = vpop.f32.mrb[3].mxu0  ;;  %v2347_v27 = vmul.f32 %v2702_v5, %v2702_v5  ;;  %v2280_v40 = vsel %vm1681_vm3, %v2702_v5, 0.0  ;;  %v1869_v34 = vsel %vm1846_vm7, %v1836_v51, %v1470_v42 }
 0x288   : > { %2245 = vst.msk [vmem:[%s4240_s27 + $0x10] sm:$0xff] %vm1681_vm3, %v2094_v9  ;;  %v2278_v53 = vsel %vm1681_vm3, %v2094_v9, 0.0  ;;  %v2346_v62 = vmul.f32 %v2094_v9, %v2094_v9 }
 0x289   : > { %v1472_v60 = vpop.permute.xlu0 %1471  ;;  %v2279_v48 = vadd.f32 %v2278_v53, %v2277_v39  ;;  %v2381_v38 = vsel %vm1681_vm3, %v2347_v27, 0.0 }
 0x28a   : > { %v1090_v29 = vpop.permute.xlu1 %1089  ;;  %v2379_v31 = vsel %vm1681_vm3, %v2346_v62, 0.0  ;;  %v1870_v59 = vsel %vm1846_vm7, %v1837_v23, %v1472_v60  ;;  %v362_v23 = vld [vmem:[#allocation2 + $0x138] sm:$0xff] }
 0x28b   : > { %v2380_v17 = vadd.f32 %v2379_v31, %v2378_v0  ;;  %v2281_v44 = vadd.f32 %v2280_v40, %v2279_v48  ;;  %v4694_v0 = vld [vmem:[#allocation32_spill] sm:$0xff] }
 0x28c   : > { %v1674_v57 = vsel %vm247_vm0, %v4023_v8, %v4694_v0  ;;  %v1772_v8 = vsel %vm1747_vm5, %v1739_v26, %v1090_v29 }
 0x28d   : > { %v1092_v11 = vpop.permute.xlu0 %1091  ;;  %v2382_v2 = vadd.f32 %v2381_v38, %v2380_v17  ;;  %v1707_v45 = vsel %vm1681_vm3, %v1674_v57, %v4696_v28 }
 0x28e   : > { %v1598_v7 = vpop.permute.xlu1 %1597  ;;  %v1740_v61 = vsel %vm1714_vm4, %v1707_v45, %v4262_v41 }
 0x28f   : > { %v1902_v22 = vsel %vm1879_vm9, %v1869_v34, %v1598_v7  ;;  %v1773_v19 = vsel %vm1747_vm5, %v1740_v61, %v1092_v11 }
 0x290   : > { %2730 = vmatprep.mubr.msk.f32.mxu1 %vm1917_vm10, %v1902_v22 }
 0x291   : > { %v1600_v30 = vpop.permute.xlu0 %1599 }
 0x292   : > { %v1903_v49 = vsel %vm1879_vm9, %v1870_v59, %v1600_v30  ;;  %v1218_v46 = vpop.permute.xlu1 %1217 }
 0x293   : > { %2731 = vmatmul.mubr.msk.f32.gmra.mrb[6].mxu1 %vm1917_vm10, %v1903_v49  ;;  %v1805_v52 = vsel %vm1780_vm6, %v1772_v8, %v1218_v46  ;;  %v4697_v49 = vld [vmem:[#allocation31_spill] sm:$0xff] }
 0x294   : > { %v1675_v46 = vsel %vm247_vm0, %v362_v23, %v4697_v49 }
 0x295   : > { %v1346_v10 = vpop.permute.xlu0 %1345 }
 0x296   : > { %v1220_v58 = vpop.permute.xlu1 %1219  ;;  %v1838_v35 = vsel %vm1813_vm8, %v1805_v52, %v1346_v10 }
 0x297   : > { %v1806_v16 = vsel %vm1780_vm6, %v1773_v19, %v1220_v58 }
 0x299   : > { %v1348_v37 = vpop.permute.xlu0 %1347 }
 0x29a   : > { %v4298_v13 = vpop.permute.xlu1 %965  ;;  %v2705_v47 = vpop.f32.mrb[4].mxu0  ;;  %v1839_v9 = vsel %vm1813_vm8, %v1806_v16, %v1348_v37  ;;  %v4698_v37 = vld [vmem:[#allocation34_spill] sm:$0xff] }
 0x29b   : > { %2248 = vst.msk [vmem:[%s4240_s27 + $0x28] sm:$0xff] %vm1681_vm3, %v2705_v47  ;;  %v2104_v15 = vpop.f32.mrb[5].mxu0  ;;  %v2349_v36 = vmul.f32 %v2705_v47, %v2705_v47  ;;  %v2284_v63 = vsel %vm1681_vm3, %v2705_v47, 0.0  ;;  %v1676_v47 = vsel %vm247_vm0, %v4066_v14, %v4698_v37 }
 0x29c   : > { %2247 = vst.msk [vmem:[%s4240_s27 + $0x20] sm:$0xff] %vm1681_vm3, %v2104_v15  ;;  %v2282_v39 = vsel %vm1681_vm3, %v2104_v15, 0.0  ;;  %v2348_v18 = vmul.f32 %v2104_v15, %v2104_v15  ;;  %v4699_v15 = vld [vmem:[#allocation51_spill] sm:$0xff] }
 0x29d   : > { %v4300_v43 = vpop.permute.xlu0 %967  ;;  %v2283_v50 = vadd.f32 %v2282_v39, %v2281_v44  ;;  %v2385_v24 = vsel %vm1681_vm3, %v2349_v36, 0.0  ;;  %v1708_v36 = vsel %vm1681_vm3, %v1675_v46, %v4699_v15 }
 0x29e   : > { %v1474_v33 = vpop.permute.xlu1 %1473  ;;  %v2383_v4 = vsel %vm1681_vm3, %v2348_v18, 0.0  ;;  %v4700_v18 = vld [vmem:[#allocation54_spill] sm:$0xff]  ;;  %v1741_v12 = vsel %vm1714_vm4, %v1708_v36, %v4298_v13 }
 0x29f   : > { %v2384_v1 = vadd.f32 %v2383_v4, %v2382_v2  ;;  %v2285_v42 = vadd.f32 %v2284_v63, %v2283_v50  ;;  %v1871_v41 = vsel %vm1846_vm7, %v1838_v35, %v1474_v33  ;;  %v1709_v54 = vsel %vm1681_vm3, %v1676_v47, %v4700_v18 }
 0x2a0   : > { %v1742_v50 = vsel %vm1714_vm4, %v1709_v54, %v4300_v43 }
 0x2a1   : > { %v1476_v55 = vpop.permute.xlu0 %1475  ;;  %v2386_v5 = vadd.f32 %v2385_v24, %v2384_v1 }
 0x2a2   : > { %v1094_v60 = vpop.permute.xlu1 %1093  ;;  %v1872_v27 = vsel %vm1846_vm7, %v1839_v9, %v1476_v55 }
 0x2a3   : > { %v1774_v33 = vsel %vm1747_vm5, %v1741_v12, %v1094_v60 }
 0x2a5   : > { %v1096_v21 = vpop.permute.xlu0 %1095 }
 0x2a6   : > { %v1602_v3 = vpop.permute.xlu1 %1601  ;;  %v1775_v0 = vsel %vm1747_vm5, %v1742_v50, %v1096_v21 }
 0x2a7   : > { %v1904_v53 = vsel %vm1879_vm9, %v1871_v41, %v1602_v3 }
 0x2a8   : > { %2733 = vmatprep.mubr.msk.f32.mxu1 %vm1917_vm10, %v1904_v53 }
 0x2a9   : > { %v1604_v62 = vpop.permute.xlu0 %1603 }
 0x2aa   : > { %v1905_v32 = vsel %vm1879_vm9, %v1872_v27, %v1604_v62  ;;  %v1222_v25 = vpop.permute.xlu1 %1221  ;;  %v364_v62 = vld [vmem:[#allocation2 + $0x150] sm:$0xff] }
 0x2ab   : > { %2734 = vmatmul.mubr.msk.f32.gmra.mrb[8].mxu1 %vm1917_vm10, %v1905_v32  ;;  %v1807_v57 = vsel %vm1780_vm6, %v1774_v33, %v1222_v25  ;;  %v365_v32 = vld [vmem:[#allocation2 + $0x158] sm:$0xff] }
 0x2ad   : > { %v1350_v48 = vpop.permute.xlu0 %1349 }
 0x2ae   : > { %v1224_v29 = vpop.permute.xlu1 %1223  ;;  %v2708_v40 = vpop.f32.mrb[6].mxu0  ;;  %v1840_v63 = vsel %vm1813_vm8, %v1807_v57, %v1350_v48  ;;  %v4701_v48 = vld [vmem:[#allocation33_spill] sm:$0xff] }
 0x2af   : > { %2250 = vst.msk [vmem:[%s4240_s27 + $0x38] sm:$0xff] %vm1681_vm3, %v2708_v40  ;;  %v2114_v31 = vpop.f32.mrb[7].mxu0  ;;  %v2351_v11 = vmul.f32 %v2708_v40, %v2708_v40  ;;  %v2288_v34 = vsel %vm1681_vm3, %v2708_v40, 0.0  ;;  %v1808_v20 = vsel %vm1780_vm6, %v1775_v0, %v1224_v29  ;;  %v1677_v29 = vsel %vm247_vm0, %v364_v62, %v4701_v48  ;;  %v366_v0 = vld [vmem:[#allocation2 + $0x168] sm:$0xff] }
 0x2b0   : > { %2249 = vst.msk [vmem:[%s4240_s27 + $0x30] sm:$0xff] %vm1681_vm3, %v2114_v31  ;;  %v2286_v17 = vsel %vm1681_vm3, %v2114_v31, 0.0  ;;  %v2350_v44 = vmul.f32 %v2114_v31, %v2114_v31 }
 0x2b1   : > { %v1352_v56 = vpop.permute.xlu0 %1351  ;;  %v2287_v51 = vadd.f32 %v2286_v17, %v2285_v42  ;;  %v2389_v30 = vsel %vm1681_vm3, %v2351_v11, 0.0  ;;  %v4703_v11 = vld [vmem:[#allocation53_spill] sm:$0xff] }
 0x2b2   : > { %v970_v38 = vpop.permute.xlu1 %969  ;;  %v2387_v7 = vsel %vm1681_vm3, %v2350_v44, 0.0  ;;  %v1841_v4 = vsel %vm1813_vm8, %v1808_v20, %v1352_v56  ;;  %v4702_v56 = vld [vmem:[#allocation36_spill] sm:$0xff]  ;;  %v1710_v17 = vsel %vm1681_vm3, %v1677_v29, %v4703_v11 }
 0x2b3   : > { %v2388_v59 = vadd.f32 %v2387_v7, %v2386_v5  ;;  %v2289_v22 = vadd.f32 %v2288_v34, %v2287_v51  ;;  %v1678_v40 = vsel %vm247_vm0, %v365_v32, %v4702_v56  ;;  %v4704_v44 = vld [vmem:[#allocation56_spill] sm:$0xff]  ;;  %v1743_v34 = vsel %vm1714_vm4, %v1710_v17, %v970_v38 }
 0x2b4   : > { %v1711_v51 = vsel %vm1681_vm3, %v1678_v40, %v4704_v44 }
 0x2b5   : > { %v972_v2 = vpop.permute.xlu0 %971  ;;  %v2390_v58 = vadd.f32 %v2389_v30, %v2388_v59 }
 0x2b6   : > { %v1478_v10 = vpop.permute.xlu1 %1477  ;;  %v1744_v7 = vsel %vm1714_vm4, %v1711_v51, %v972_v2 }
 0x2b7   : > { %v1873_v13 = vsel %vm1846_vm7, %v1840_v63, %v1478_v10 }
 0x2b9   : > { %v1480_v39 = vpop.permute.xlu0 %1479 }
 0x2ba   : > { %v1098_v14 = vpop.permute.xlu1 %1097  ;;  %v1874_v43 = vsel %vm1846_vm7, %v1841_v4, %v1480_v39 }
 0x2bb   : > { %v1776_v59 = vsel %vm1747_vm5, %v1743_v34, %v1098_v14 }
 0x2bd   : > { %v1100_v6 = vpop.permute.xlu0 %1099 }
 0x2be   : > { %v1606_v55 = vpop.permute.xlu1 %1605 }
 0x2bf   : > { %v1906_v28 = vsel %vm1879_vm9, %v1873_v13, %v1606_v55  ;;  %v4705_v55 = vld [vmem:[#allocation35_spill] sm:$0xff] }
 0x2c0   : > { %2736 = vmatprep.mubr.msk.f32.mxu1 %vm1917_vm10, %v1906_v28 }
 0x2c1   : > { %v1608_v45 = vpop.permute.xlu0 %1607 }
 0x2c2   : > { %v1907_v26 = vsel %vm1879_vm9, %v1874_v43, %v1608_v45  ;;  %v1226_v1 = vpop.permute.xlu1 %1225  ;;  %v2711_v61 = vpop.f32.mrb[8].mxu0  ;;  %v1679_v43 = vsel %vm247_vm0, %v366_v0, %v4705_v55 }
 0x2c3   : > { %2737 = vmatmul.mubr.msk.f32.gmra.mrb[10].mxu1 %vm1917_vm10, %v1907_v26  ;;  %2252 = vst.msk [vmem:[%s4240_s27 + $0x48] sm:$0xff] %vm1681_vm3, %v2711_v61  ;;  %v2124_v8 = vpop.f32.mrb[9].mxu0  ;;  %v2353_v24 = vmul.f32 %v2711_v61, %v2711_v61  ;;  %v2292_v16 = vsel %vm1681_vm3, %v2711_v61, 0.0  ;;  %v1809_v30 = vsel %vm1780_vm6, %v1776_v59, %v1226_v1  ;;  %v4706_v26 = vld [vmem:[#allocation55_spill] sm:$0xff] }
 0x2c4   : > { %2251 = vst.msk [vmem:[%s4240_s27 + $0x40] sm:$0xff] %vm1681_vm3, %v2124_v8  ;;  %v2290_v19 = vsel %vm1681_vm3, %v2124_v8, 0.0  ;;  %v2352_v52 = vmul.f32 %v2124_v8, %v2124_v8  ;;  %v1712_v1 = vsel %vm1681_vm3, %v1679_v43, %v4706_v26 }
 0x2c5   : > { %v1354_v42 = vpop.permute.xlu0 %1353  ;;  %v2291_v60 = vadd.f32 %v2290_v19, %v2289_v22  ;;  %v2393_v3 = vsel %vm1681_vm3, %v2353_v24, 0.0  ;;  %v1777_v22 = vsel %vm1747_vm5, %v1744_v7, %v1100_v6 }
 0x2c6   : > { %v1228_v5 = vpop.permute.xlu1 %1227  ;;  %v2391_v21 = vsel %vm1681_vm3, %v2352_v52, 0.0  ;;  %v1842_v37 = vsel %vm1813_vm8, %v1809_v30, %v1354_v42  ;;  %v367_v52 = vld [vmem:[#allocation2 + $0x170] sm:$0xff] }
 0x2c7   : > { %v2392_v9 = vadd.f32 %v2391_v21, %v2390_v58  ;;  %v2293_v41 = vadd.f32 %v2292_v16, %v2291_v60  ;;  %v1810_v49 = vsel %vm1780_vm6, %v1777_v22, %v1228_v5 }
 0x2c9   : > { %v1356_v35 = vpop.permute.xlu0 %1355  ;;  %v2394_v53 = vadd.f32 %v2393_v3, %v2392_v9  ;;  %v4708_v3 = vld [vmem:[#allocation57_spill] sm:$0xff] }
 0x2ca   : > { %v974_v27 = vpop.permute.xlu1 %973  ;;  %v1843_v47 = vsel %vm1813_vm8, %v1810_v49, %v1356_v35  ;;  %v4707_v35 = vld [vmem:[#allocation37_spill] sm:$0xff] }
 0x2cb   : > { %v1745_v42 = vsel %vm1714_vm4, %v1712_v1, %v974_v27  ;;  %v1680_v9 = vsel %vm247_vm0, %v367_v52, %v4707_v35 }
 0x2cc   : > { %v1713_v27 = vsel %vm1681_vm3, %v1680_v9, %v4708_v3 }
 0x2cd   : > { %v976_v25 = vpop.permute.xlu0 %975 }
 0x2ce   : > { %v1482_v31 = vpop.permute.xlu1 %1481 }
 0x2cf   : > { %v1875_v2 = vsel %vm1846_vm7, %v1842_v37, %v1482_v31 }
 0x2d1   : > { %v1484_v23 = vpop.permute.xlu0 %1483 }
 0x2d2   : > { %v1102_v46 = vpop.permute.xlu1 %1101  ;;  %v1876_v54 = vsel %vm1846_vm7, %v1843_v47, %v1484_v23 }
 0x2d3   : > { %v1778_v61 = vsel %vm1747_vm5, %v1745_v42, %v1102_v46 }
 0x2d5   : > { %v1104_v10 = vpop.permute.xlu0 %1103 }
 0x2d6   : > { %v2714_v58 = vpop.f32.mrb[10].mxu0  ;;  %v1610_v18 = vpop.permute.xlu1 %1609 }
 0x2d7   : > { %2254 = vst.msk [vmem:[%s4240_s27 + $0x58] sm:$0xff] %vm1681_vm3, %v2714_v58  ;;  %v2134_v38 = vpop.f32.mrb[11].mxu0  ;;  %v2355_v15 = vmul.f32 %v2714_v58, %v2714_v58  ;;  %v1908_v50 = vsel %vm1879_vm9, %v1875_v2, %v1610_v18  ;;  %v2296_v57 = vsel %vm1681_vm3, %v2714_v58, 0.0 }
 0x2d8   : > { %2253 = vst.msk [vmem:[%s4240_s27 + $0x50] sm:$0xff] %vm1681_vm3, %v2134_v38  ;;  %v2294_v36 = vsel %vm1681_vm3, %v2134_v38, 0.0  ;;  %v2354_v39 = vmul.f32 %v2134_v38, %v2134_v38  ;;  %2739 = vmatprep.mubr.msk.f32.mxu1 %vm1917_vm10, %v1908_v50 }
 0x2d9   : > { %v2295_v12 = vadd.f32 %v2294_v36, %v2293_v41  ;;  %v1612_v33 = vpop.permute.xlu0 %1611  ;;  %v2397_v4 = vsel %vm1681_vm3, %v2355_v15, 0.0 }
 0x2da   : > { %v2395_v14 = vsel %vm1681_vm3, %v2354_v39, 0.0  ;;  %v1909_v20 = vsel %vm1879_vm9, %v1876_v54, %v1612_v33  ;;  %v1230_v13 = vpop.permute.xlu1 %1229 }
 0x2db   : > { %v2396_v6 = vadd.f32 %v2395_v14, %v2394_v53  ;;  %2740 = vmatmul.mubr.msk.f32.gmra.mrb[12].mxu1 %vm1917_vm10, %v1909_v20  ;;  %v2297_v63 = vadd.f32 %v2296_v57, %v2295_v12  ;;  %v1811_v24 = vsel %vm1780_vm6, %v1778_v61, %v1230_v13  ;;  %v1746_v53 = vsel %vm1714_vm4, %v1713_v27, %v976_v25 }
 0x2dc   : > { %v1779_v32 = vsel %vm1747_vm5, %v1746_v53, %v1104_v10 }
 0x2dd   : > { %v1358_v28 = vpop.permute.xlu0 %1357  ;;  %v2398_v45 = vadd.f32 %v2397_v4, %v2396_v6 }
 0x2de   : > { %v1232_v8 = vpop.permute.xlu1 %1231  ;;  %v1844_v60 = vsel %vm1813_vm8, %v1811_v24, %v1358_v28 }
 0x2df   : > { %v1812_v48 = vsel %vm1780_vm6, %v1779_v32, %v1232_v8 }
 0x2e1   : > { %v1486_v19 = vpop.permute.xlu0 %1485 }
 0x2e2   : > { %v1360_v5 = vpop.permute.xlu1 %1359  ;;  %v1877_v16 = vsel %vm1846_vm7, %v1844_v60, %v1486_v19 }
 0x2e3   : > { %v1845_v29 = vsel %vm1813_vm8, %v1812_v48, %v1360_v5 }
 0x2e5   : > { %v1614_v21 = vpop.permute.xlu0 %1613 }
 0x2e6   : > { %v1910_v41 = vsel %vm1879_vm9, %v1877_v16, %v1614_v21  ;;  %v1488_v62 = vpop.permute.xlu1 %1487 }
 0x2e7   : > { %2742 = vmatprep.mubr.msk.f32.mxu1 %vm1917_vm10, %v1910_v41  ;;  %v1878_v56 = vsel %vm1846_vm7, %v1845_v29, %v1488_v62 }
 0x2ea   : > { %v1616_v40 = vpop.permute.xlu1 %1615 }
 0x2eb   : > { %v1911_v31 = vsel %vm1879_vm9, %v1878_v56, %v1616_v40 }
 0x2ec   : > { %2743 = vmatmul.mubr.msk.f32.gmra.mrb[14].mxu1 %vm1917_vm10, %v1911_v31 }
 0x2ee   : > { %v2717_v11 = vpop.f32.mrb[12].mxu0 }
 0x2ef   : > { %2256 = vst.msk [vmem:[%s4240_s27 + $0x68] sm:$0xff] %vm1681_vm3, %v2717_v11  ;;  %v2144_v17 = vpop.f32.mrb[13].mxu0  ;;  %v2357_v25 = vmul.f32 %v2717_v11, %v2717_v11  ;;  %v2300_v34 = vsel %vm1681_vm3, %v2717_v11, 0.0 }
 0x2f0   : > { %2255 = vst.msk [vmem:[%s4240_s27 + $0x60] sm:$0xff] %vm1681_vm3, %v2144_v17  ;;  %v2298_v44 = vsel %vm1681_vm3, %v2144_v17, 0.0  ;;  %v2356_v51 = vmul.f32 %v2144_v17, %v2144_v17 }
 0x2f1   : > { %v2299_v23 = vadd.f32 %v2298_v44, %v2297_v63  ;;  %v2401_v30 = vsel %vm1681_vm3, %v2357_v25, 0.0 }
 0x2f2   : > { %v2399_v7 = vsel %vm1681_vm3, %v2356_v51, 0.0 }
 0x2f3   : > { %v2400_v59 = vadd.f32 %v2399_v7, %v2398_v45  ;;  %v2301_v22 = vadd.f32 %v2300_v34, %v2299_v23 }
 0x2f5   : > { %v2402_v49 = vadd.f32 %v2401_v30, %v2400_v59 }
 0x306   : > { %v2720_v46 = vpop.f32.mrb[14].mxu0 }
 0x307   : > { %2258 = vst.msk [vmem:[%s4240_s27 + $0x78] sm:$0xff] %vm1681_vm3, %v2720_v46  ;;  %v2154_v10 = vpop.f32.mrb[15].mxu0  ;;  %v2359_v58 = vmul.f32 %v2720_v46, %v2720_v46  ;;  %v2304_v2 = vsel %vm1681_vm3, %v2720_v46, 0.0 }
 0x308   : > { %2257 = vst.msk [vmem:[%s4240_s27 + $0x70] sm:$0xff] %vm1681_vm3, %v2154_v10  ;;  %v2302_v37 = vsel %vm1681_vm3, %v2154_v10, 0.0  ;;  %v2358_v47 = vmul.f32 %v2154_v10, %v2154_v10 }
 0x309   : > { %v2303_v38 = vadd.f32 %v2302_v37, %v2301_v22  ;;  %v2405_v18 = vsel %vm1681_vm3, %v2359_v58, 0.0 }
 0x30a   : > { %v2403_v15 = vsel %vm1681_vm3, %v2358_v47, 0.0 }
 0x30b   : > { %v2305_v36 = vadd.f32 %v2304_v2, %v2303_v38  ;;  %v2404_v39 = vadd.f32 %v2403_v15, %v2402_v49 }
 0x30d   : > { %v2406_v54 = vadd.f32 %v2405_v18, %v2404_v39 }
 0x31e   : > { %v2723_v12 = vpop.f32.mrb[0].mxu1 }
 0x31f   : > { %2260 = vst.msk [vmem:[%s4240_s27 + $0x88] sm:$0xff] %vm1681_vm3, %v2723_v12  ;;  %v2164_v50 = vpop.f32.mrb[1].mxu1  ;;  %v2361_v33 = vmul.f32 %v2723_v12, %v2723_v12  ;;  %v2308_v20 = vsel %vm1681_vm3, %v2723_v12, 0.0 }
 0x320   : > { %2259 = vst.msk [vmem:[%s4240_s27 + $0x80] sm:$0xff] %vm1681_vm3, %v2164_v50  ;;  %v2306_v0 = vsel %vm1681_vm3, %v2164_v50, 0.0  ;;  %v2360_v57 = vmul.f32 %v2164_v50, %v2164_v50 }
 0x321   : > { %v2307_v14 = vadd.f32 %v2306_v0, %v2305_v36  ;;  %v2409_v13 = vsel %vm1681_vm3, %v2361_v33, 0.0 }
 0x322   : > { %v2407_v6 = vsel %vm1681_vm3, %v2360_v57, 0.0 }
 0x323   : > { %v2408_v63 = vadd.f32 %v2407_v6, %v2406_v54  ;;  %v2309_v4 = vadd.f32 %v2308_v20, %v2307_v14 }
 0x325   : > { %v2410_v55 = vadd.f32 %v2409_v13, %v2408_v63 }
 0x336   : > { %v2726_v43 = vpop.f32.mrb[2].mxu1 }
 0x337   : > { %2262 = vst.msk [vmem:[%s4240_s27 + $0x98] sm:$0xff] %vm1681_vm3, %v2726_v43  ;;  %v2174_v28 = vpop.f32.mrb[3].mxu1  ;;  %v2363_v45 = vmul.f32 %v2726_v43, %v2726_v43  ;;  %v2312_v61 = vsel %vm1681_vm3, %v2726_v43, 0.0 }
 0x338   : > { %2261 = vst.msk [vmem:[%s4240_s27 + $0x90] sm:$0xff] %vm1681_vm3, %v2174_v28  ;;  %v2310_v26 = vsel %vm1681_vm3, %v2174_v28, 0.0  ;;  %v2362_v1 = vmul.f32 %v2174_v28, %v2174_v28 }
 0x339   : > { %v2311_v42 = vadd.f32 %v2310_v26, %v2309_v4  ;;  %v2413_v52 = vsel %vm1681_vm3, %v2363_v45, 0.0 }
 0x33a   : > { %v2411_v8 = vsel %vm1681_vm3, %v2362_v1, 0.0 }
 0x33b   : > { %v2412_v24 = vadd.f32 %v2411_v8, %v2410_v55  ;;  %v2313_v19 = vadd.f32 %v2312_v61, %v2311_v42 }
 0x33d   : > { %v2414_v60 = vadd.f32 %v2413_v52, %v2412_v24 }
 0x34e   : > { %v2729_v5 = vpop.f32.mrb[4].mxu1 }
 0x34f   : > { %2264 = vst.msk [vmem:[%s4240_s27 + $0xa8] sm:$0xff] %vm1681_vm3, %v2729_v5  ;;  %v2184_v16 = vpop.f32.mrb[5].mxu1  ;;  %v2365_v21 = vmul.f32 %v2729_v5, %v2729_v5  ;;  %v2316_v3 = vsel %vm1681_vm3, %v2729_v5, 0.0 }
 0x350   : > { %2263 = vst.msk [vmem:[%s4240_s27 + $0xa0] sm:$0xff] %vm1681_vm3, %v2184_v16  ;;  %v2314_v35 = vsel %vm1681_vm3, %v2184_v16, 0.0  ;;  %v2364_v9 = vmul.f32 %v2184_v16, %v2184_v16 }
 0x351   : > { %v2315_v41 = vadd.f32 %v2314_v35, %v2313_v19  ;;  %v2417_v32 = vsel %vm1681_vm3, %v2365_v21, 0.0 }
 0x352   : > { %v2415_v27 = vsel %vm1681_vm3, %v2364_v9, 0.0 }
 0x353   : > { %v2416_v53 = vadd.f32 %v2415_v27, %v2414_v60  ;;  %v2317_v62 = vadd.f32 %v2316_v3, %v2315_v41 }
 0x355   : > { %v2418_v48 = vadd.f32 %v2417_v32, %v2416_v53 }
 0x366   : > { %v2732_v29 = vpop.f32.mrb[6].mxu1 }
 0x367   : > { %2266 = vst.msk [vmem:[%s4240_s27 + $0xb8] sm:$0xff] %vm1681_vm3, %v2732_v29  ;;  %v2194_v56 = vpop.f32.mrb[7].mxu1  ;;  %v2367_v40 = vmul.f32 %v2732_v29, %v2732_v29  ;;  %v2320_v25 = vsel %vm1681_vm3, %v2732_v29, 0.0 }
 0x368   : > { %2265 = vst.msk [vmem:[%s4240_s27 + $0xb0] sm:$0xff] %vm1681_vm3, %v2194_v56  ;;  %v2318_v31 = vsel %vm1681_vm3, %v2194_v56, 0.0  ;;  %v2366_v11 = vmul.f32 %v2194_v56, %v2194_v56 }
 0x369   : > { %v2319_v17 = vadd.f32 %v2318_v31, %v2317_v62  ;;  %v2421_v34 = vsel %vm1681_vm3, %v2367_v40, 0.0 }
 0x36a   : > { %v2419_v44 = vsel %vm1681_vm3, %v2366_v11, 0.0 }
 0x36b   : > { %v2420_v51 = vadd.f32 %v2419_v44, %v2418_v48  ;;  %v2321_v23 = vadd.f32 %v2320_v25, %v2319_v17 }
 0x36d   : > { %v2422_v7 = vadd.f32 %v2421_v34, %v2420_v51 }
 0x37e   : > { %v2735_v59 = vpop.f32.mrb[8].mxu1 }
 0x37f   : > { %2268 = vst.msk [vmem:[%s4240_s27 + $0xc8] sm:$0xff] %vm1681_vm3, %v2735_v59  ;;  %v2204_v22 = vpop.f32.mrb[9].mxu1  ;;  %v2369_v30 = vmul.f32 %v2735_v59, %v2735_v59  ;;  %v2324_v58 = vsel %vm1681_vm3, %v2735_v59, 0.0 }
 0x380   : > { %2267 = vst.msk [vmem:[%s4240_s27 + $0xc0] sm:$0xff] %vm1681_vm3, %v2204_v22  ;;  %v2322_v49 = vsel %vm1681_vm3, %v2204_v22, 0.0  ;;  %v2368_v46 = vmul.f32 %v2204_v22, %v2204_v22 }
 0x381   : > { %v2323_v10 = vadd.f32 %v2322_v49, %v2321_v23  ;;  %v2425_v2 = vsel %vm1681_vm3, %v2369_v30, 0.0 }
 0x382   : > { %v2423_v37 = vsel %vm1681_vm3, %v2368_v46, 0.0 }
 0x383   : > { %v2424_v47 = vadd.f32 %v2423_v37, %v2422_v7  ;;  %v2325_v38 = vadd.f32 %v2324_v58, %v2323_v10 }
 0x385   : > { %v2426_v15 = vadd.f32 %v2425_v2, %v2424_v47 }
 0x396   : > { %v2738_v36 = vpop.f32.mrb[10].mxu1 }
 0x397   : > { %2270 = vst.msk [vmem:[%s4240_s27 + $0xd8] sm:$0xff] %vm1681_vm3, %v2738_v36  ;;  %v2214_v39 = vpop.f32.mrb[11].mxu1  ;;  %v2371_v18 = vmul.f32 %v2738_v36, %v2738_v36  ;;  %v2328_v33 = vsel %vm1681_vm3, %v2738_v36, 0.0 }
 0x398   : > { %2269 = vst.msk [vmem:[%s4240_s27 + $0xd0] sm:$0xff] %vm1681_vm3, %v2214_v39  ;;  %v2326_v54 = vsel %vm1681_vm3, %v2214_v39, 0.0  ;;  %v2370_v12 = vmul.f32 %v2214_v39, %v2214_v39 }
 0x399   : > { %v2327_v50 = vadd.f32 %v2326_v54, %v2325_v38  ;;  %v2429_v20 = vsel %vm1681_vm3, %v2371_v18, 0.0 }
 0x39a   : > { %v2427_v0 = vsel %vm1681_vm3, %v2370_v12, 0.0 }
 0x39b   : > { %v2428_v57 = vadd.f32 %v2427_v0, %v2426_v15  ;;  %v2329_v14 = vadd.f32 %v2328_v33, %v2327_v50 }
 0x39d   : > { %v2430_v6 = vadd.f32 %v2429_v20, %v2428_v57 }
 0x3ae   : > { %v2741_v63 = vpop.f32.mrb[12].mxu1 }
 0x3af   : > { %2272 = vst.msk [vmem:[%s4240_s27 + $0xe8] sm:$0xff] %vm1681_vm3, %v2741_v63  ;;  %v2224_v4 = vpop.f32.mrb[13].mxu1  ;;  %v2373_v13 = vmul.f32 %v2741_v63, %v2741_v63  ;;  %v2332_v45 = vsel %vm1681_vm3, %v2741_v63, 0.0 }
 0x3b0   : > { %2271 = vst.msk [vmem:[%s4240_s27 + $0xe0] sm:$0xff] %vm1681_vm3, %v2224_v4  ;;  %v2330_v55 = vsel %vm1681_vm3, %v2224_v4, 0.0  ;;  %v2372_v43 = vmul.f32 %v2224_v4, %v2224_v4 }
 0x3b1   : > { %v2331_v28 = vadd.f32 %v2330_v55, %v2329_v14  ;;  %v2433_v61 = vsel %vm1681_vm3, %v2373_v13, 0.0 }
 0x3b2   : > { %v2431_v26 = vsel %vm1681_vm3, %v2372_v43, 0.0 }
 0x3b3   : > { %v2432_v1 = vadd.f32 %v2431_v26, %v2430_v6  ;;  %v2333_v42 = vadd.f32 %v2332_v45, %v2331_v28 }
 0x3b5   : > { %v2434_v8 = vadd.f32 %v2433_v61, %v2432_v1 }
 0x3bf   : > { %v2744_v24 = vpop.f32.mrb[14].mxu1 }
 0x3c0   : > { %2274 = vst.msk [vmem:[%s4240_s27 + $0xf8] sm:$0xff] %vm1681_vm3, %v2744_v24  ;;  %v2234_v19 = vpop.f32.mrb[15].mxu1  ;;  %v2375_v52 = vmul.f32 %v2744_v24, %v2744_v24 }
 0x3c1   : > { %2273 = vst.msk [vmem:[%s4240_s27 + $0xf0] sm:$0xff] %vm1681_vm3, %v2234_v19  ;;  %v2334_v60 = vsel %vm1681_vm3, %v2234_v19, 0.0  ;;  %v2374_v5 = vmul.f32 %v2234_v19, %v2234_v19 }
 0x3c2   : > { %v2335_v16 = vadd.f32 %v2334_v60, %v2333_v42 }
 0x3c3   : > { %2904 = shalt.err (!%p2901_p7)
}
 0x3c4   : > { %s2905_s9 = scalar_lea.hbm %s4506_s22, 4096  ;;  %s2909_s5 = scalar_lea.hbm %s4594_s2, 8192 }
 0x3c5   : > { %p2906_p9 = scmp.ne.s32.totalorder %s4506_s22, %s2905_s9  ;;  %p2910_p5 = scmp.lt.u32.totalorder %s4506_s22, %s4594_s2 }
 0x3c6   : > { %p2911_p11 = scmp.lt.u32.totalorder %s2909_s5, %s2905_s9  ;;  %p2913_p4 = scmp.lt.u32.totalorder %s2905_s9, %s4506_s22 }
 0x3c7   : > { %p2907_p1 = pnand %p2906_p9, %p3125_p12 }
 0x3c8   : > { %p2912_p2 = por %p2911_p11, %p2910_p5 }
 0x3c9   : > { %p2908_p0 = pneg %p2907_p1 }
 0x3ca   : > { %p2914_p6 = por %p2913_p4, %p2912_p2 }
 0x3cc   : > { %p2915_p8 = pnand %p2914_p6, %p2908_p0 }
 0x3ce   : > { %2918 = shalt.err (!%p2915_p8)
}
 0x3cf   : > { %s3009_s28 = smov 128   ;;  %v2336_v21 = vsel %vm1681_vm3, %v2744_v24, 0.0  ;;  %v2435_v35 = vsel %vm1681_vm3, %v2374_v5, 0.0  ;;  %v2437_v3 = vsel %vm1681_vm3, %v2375_v52, 0.0  ;;  %s2607_s29 = sshll.u32 %s3176_s6, 1  ;;  %vm2445_vm11 = vcmask 1040384  }
 0x3d0   : > { %2765 = dma.vmem_to_hbm [thread:$0]  (%p3125_p12), %s4508_s23, 4096, %s4506_s22, %s2450_s7, %s3009_s28, %s3009_s28, %s3001_s20   ;;  %v2337_v9 = vadd.f32 %v2336_v21, %v2335_v16  ;;  %v2436_v41 = vadd.f32 %v2435_v35, %v2434_v8  ;;  %vm2447_vm12 = vcmask 58368  }
 0x3d1   : > { %s2645_s20 = sshll.u32 %s3052_s16, 5  ;;  %s214_s23 = scalar_lea.vmem [#allocation9], %s2607_s29 }
 0x3d2   : > { %v2338_v27 = vrot.slane %v2337_v9, 4  ;;  %v2438_v53 = vadd.f32 %v2437_v3, %v2436_v41  ;;  %s2484_s30 = sshll.u32 %s214_s23, 4  ;;  %s4548_s10 = scalar_lea.hbm %s4595_s3, %s2645_s20  ;;  %s4550_s30 = int_to_ptr.vmem [resolvable:$true] %s2484_s30 }
 0x3d3   : > { %s2455_s26 = scalar_lea.sflag [#allocation10], %s3176_s6  ;;  %s2919_s16 = scalar_lea.vmem %s4550_s30, 32 }
 0x3d4   : > { %v2339_v62 = vadd.f32 %v2338_v27, %v2337_v9  ;;  %v2439_v32 = vrot.slane %v2438_v53, 4  ;;  %p2920_p10 = scmp.ne.s32.totalorder %s4550_s30, %s2919_s16  ;;  %s3010_s18 = smov [#allocation9]  }
 0x3d5   : > { %s2923_s8 = sshll.u32 %s3010_s18, 4  ;;  %s2924_s8 = int_to_ptr.vmem [resolvable:$false] %s2923_s8 }
 0x3d6   : > { %v2340_v48 = vrot.slane %v2339_v62, 2  ;;  %v2440_v29 = vadd.f32 %v2439_v32, %v2438_v53  ;;  %p2921_p13 = pnand %p2920_p10, %p3125_p12  ;;  %s2925_s9 = scalar_lea.vmem %s2924_s8, 64 }
 0x3d7   : > { %p2926_p7 = scmp.lt.s32.totalorder %s4550_s30, %s2924_s8  ;;  %p2927_p9 = scmp.lt.s32.totalorder %s2925_s9, %s2919_s16 }
 0x3d8   : > { %v2341_v56 = vadd.f32 %v2340_v48, %v2339_v62  ;;  %v2441_v40 = vrot.slane %v2440_v29, 2  ;;  %p2922_p3 = pneg %p2921_p13 }
 0x3d9   : > { %p2928_p1 = por %p2927_p9, %p2926_p7 }
 0x3da   : > { %v2342_v31 = vrot.slane %v2341_v56, 1  ;;  %v2442_v11 = vadd.f32 %v2441_v40, %v2440_v29 }
 0x3db   : > { %p2929_p0 = pnand %p2928_p1, %p2922_p3 }
 0x3dc   : > { %v2443_v17 = vrot.slane %v2442_v11, 1  ;;  %v2343_v25 = vadd.f32 %v2342_v31, %v2341_v56 }
 0x3de   : > { %v2444_v44 = vadd.f32 %v2443_v17, %v2442_v11 }
 0x3e0   : > { %v2446_v51 = vsel %vm2445_vm11, %v2343_v25, %v2444_v44 }
 0x3e1   : > { %2448 = vst.msk [vmem:[%s214_s23] sm:$0x3] %vm2447_vm12, %v2446_v51 }
 0x3e2   : > { %2932 = shalt.err (!%p2929_p0)
}
 0x3e3   : > { %s2933_s6 = scalar_lea.hbm %s4548_s10, 32  ;;  %s2937_s5 = scalar_lea.hbm %s4595_s3, 64 }
 0x3e4   : > { %p2934_p5 = scmp.ne.s32.totalorder %s4548_s10, %s2933_s6  ;;  %p2938_p4 = scmp.lt.u32.totalorder %s4548_s10, %s4595_s3 }
 0x3e5   : > { %p2939_p6 = scmp.lt.u32.totalorder %s2937_s5, %s2933_s6  ;;  %p2941_p10 = scmp.lt.u32.totalorder %s2933_s6, %s4548_s10 }
 0x3e6   : > { %p2935_p11 = pnand %p2934_p5, %p3125_p12 }
 0x3e7   : > { %p2940_p8 = por %p2939_p6, %p2938_p4 }
 0x3e8   : > { %p2936_p2 = pneg %p2935_p11 }
 0x3e9   : > { %p2942_p13 = por %p2941_p10, %p2940_p8 }
 0x3eb   : > { %p2943_p3 = pnand %p2942_p13, %p2936_p2 }
 0x3ed   : > { %2946 = shalt.err (!%p2943_p3)
}
 0x3ee   : > { %2766 = dma.vmem_to_hbm [thread:$0]  (%p3125_p12), %s4550_s30, 32, %s4548_s10, %s2455_s26  }
 0x3ef PF: > { %s2496_s28 = sand.u32 1, %s2981_s12   ;;  %p4709_p7 = scmp.ne.s32.totalorder %s4605_s19, 0 }
 0x3f0   : > { %p4710_p9 = scmp.ge.s32.totalorder %s2993_s15, 2  ;;  %s2497_s29 = scalar_lea.sflag [#allocation5], %s2496_s28 }
 0x3f2   : > { %p2778_p1 = pnand %p4710_p9, %p4709_p7 }
 0x3f4   : > { %2972 = dma.done.wait (!%p2778_p1), %s2497_s29, 4096  }
 0x3f5   : > { %2974 = vsyncadd (!%p2778_p1), %s2497_s29, 4294963200  ;;  %s2506_s20 = scalar_lea.sflag [#allocation10], %s2496_s28 }
 0x3f6   : > { %2976 = dma.done.wait (!%p2778_p1), %s2506_s20, 32  }
 0x3f7   : > { %2978 = vsyncadd (!%p2778_p1), %s2506_s20, 4294967264  ;;  %p21_p12 = scmp.ge.s32.totalorder %s3087_s24, 4   ;;  %s4711_s12 = smov %s2985_s13 }
 0x3f8   : > { %s4712_s13 = smov %s2989_s14  ;;  %s4713_s14 = smov %s3121_s17 }
 0x3f9   : > { %s4714_s15 = smov %s3087_s24  ;;  %23 = sbr.rel (!%p21_p12) target bundleno = 8 (0x8), region = 96 }
 0x400   :  { %2511 = vsyncpa [#allocation4], 1 }
 0x401   :  { %2513 = vsyncpa [#allocation4 + $0x1], 1 }
 0x402   :  { %2514 = vsyncpa [#allocation7], 1 }
 0x403   :  { %2515 = vsyncpa [#allocation5], 1 }
 0x404   :  { %2517 = vsyncpa [#allocation5 + $0x1], 1 }
 0x405   :  { %2518 = vsyncpa [#allocation10], 1 }
 0x406   :  { %2520 = vsyncpa [#allocation10 + $0x1], 1 }

// kernel: double_conv.4
= control target key start
LH: loop header
LB: loop body
LE: loop exit
PB: predicated region body
PF: predicated region fallthrough
CT: control target
= control target key end

     0   :  { %11 = vsyncpa [#allocation4], 0  ;;  %s5033_s0 = inlined_call_operand.hbm [shape: f32[2,16,16,8], index: 0, kind: input, shape index: {}]   ;;  %s5034_s1 = inlined_call_operand.hbm [shape: f32[1,1,1,8], index: 1, kind: input, shape index: {}]   ;;  %s5035_s2 = inlined_call_operand.hbm [shape: f32[1,1,1,8], index: 2, kind: input, shape index: {}]   ;;  %s5036_s3 = inlined_call_operand.hbm [shape: f32[72,8], index: 3, kind: input, shape index: {}]   ;;  %s5037_s4 = inlined_call_operand.hbm [shape: f32[2,16,16,8], index: 4, kind: output, shape index: {0}]   ;;  %s5038_s5 = inlined_call_operand.hbm [shape: f32[2,2,8], index: 5, kind: output, shape index: {1}]  }
   0x1   :  { %13 = vsyncpa [#allocation4 + $0x1], 0 }
   0x2   :  { %14 = vsyncpa [#allocation7], 0 }
   0x3   :  { %15 = vsyncpa [#allocation10], 0 }
   0x4   :  { %16 = vsyncpa [#allocation5], 0 }
   0x5   :  { %18 = vsyncpa [#allocation5 + $0x1], 0 }
   0x6   :  { %19 = vsyncpa [#allocation13], 0 }
   0x7   :  { %21 = vsyncpa [#allocation13 + $0x1], 0  ;;  %s3361_s18 = smov 0   ;;  %s3363_s19 = smov 0  }
   0x8   :  { %s3365_s20 = smov 0   ;;  %s3367_s21 = smov 0  }
   0x9 LB: > { %s3382_s22 = sadd.s32 4294967295, %s3311_s21   ;;  %s2803_s23 = sadd.s32 4294967294, %s3311_s21   ;;  %s3311_s21 = sphi %s3367_s21, %s5158_s21   ;;  %s3307_s20 = sphi %s3365_s20, %s5157_s20   ;;  %s3303_s19 = sphi %s3363_s19, %s5156_s19   ;;  %s3299_s18 = sphi %s3361_s18, %s5155_s18  }
   0xa   : > { %p47_p0 = scmp.ne.s32.totalorder %s3303_s19, %s3299_s18  ;;  %p5039_p1 = scmp.eq.s32.totalorder %s3382_s22, 0 }
   0xb   : > { %p140_p3 = scmp.eq.s32.totalorder %s2803_s23, 1  ;;  %p2804_p5 = scmp.ge.s32.totalorder %s3311_s21, 1 }
   0xc   : > { %p3391_p4 = por %p5039_p1, %p47_p0  ;;  %p173_p7 = scmp.lt.s32.totalorder %s3311_s21, 3 }
   0xd   : > { %p3396_p6 = por %p140_p3, %p47_p0  ;;  %s3313_s27 = smov [#allocation6]  }
   0xe   : > { %s5047_s24 = scalar_select %p3391_p4, 1, 0 }
   0xf   : > { %s5048_s25 = scalar_select %p3396_p6, 1, 0 }
  0x10   : > { %p3401_p8 = pnand %p2804_p5, %p173_p7  ;;  %s186_s28 = sshll.u32 %s3313_s27, 4  ;;  %s187_s28 = int_to_ptr.vmem [resolvable:$true] %s186_s28 }
  0x11   : > { %s3314_s29 = smov [#allocation8]   ;;  %s3315_s7 = smov [#allocation9]  }
  0x12   : > { %s5049_s26 = scalar_select %p3401_p8, 1, 0 }
  0x13   : > { %p3013_p10 = pneg %p3401_p8  ;;  %s197_s30 = sshll.u32 %s3314_s29, 4  ;;  %s3414_s30 = int_to_ptr.vmem [resolvable:$true] %s197_s30 }
  0x14   : > { %s207_s8 = sshll.u32 %s3315_s7, 4  ;;  %s3091_s11 = scalar_lea.hbm %s5034_s1, 16  ;;  %s3416_s8 = int_to_ptr.vmem [resolvable:$true] %s207_s8 }
  0x15   : > { %p3410_p11 = pnand %p3013_p10, %p5039_p1  ;;  %p3092_p12 = scmp.ne.s32.totalorder %s5034_s1, %s3091_s11 }
  0x16   : > { %p3098_p5 = scmp.lt.u32.totalorder %s3091_s11, %s5034_s1 }
  0x17   : > { %p3426_p13 = pneg %p3410_p11 }
  0x19   : > { %p3094_p0 = pnand %p3426_p13, %p3092_p12 }
  0x1b   : > { %p3095_p3 = pneg %p3094_p0 }
  0x1d   : > { %p3100_p7 = pnand %p3098_p5, %p3095_p3 }
  0x1f   : > { %3103 = shalt.err (!%p3100_p7)
}
  0x20   : > { %s3104_s17 = scalar_lea.vmem %s187_s28, 16  ;;  %s3111_s23 = scalar_lea.vmem %s187_s28, 32 }
  0x21   : > { %p3105_p10 = scmp.ne.s32.totalorder %s187_s28, %s3104_s17  ;;  %p3112_p2 = scmp.lt.s32.totalorder %s187_s28, %s187_s28 }
  0x22   : > { %p3113_p6 = scmp.lt.s32.totalorder %s3111_s23, %s3104_s17 }
  0x23   : > { %p3107_p9 = pnand %p3105_p10, %p3426_p13 }
  0x24   : > { %p3114_p4 = por %p3113_p6, %p3112_p2 }
  0x25   : > { %p3108_p1 = pneg %p3107_p9 }
  0x27   : > { %p3115_p8 = pnand %p3114_p4, %p3108_p1 }
  0x29   : > { %3118 = shalt.err (!%p3115_p8)
}
  0x2a   : > { %3016 = dma.hbm_to_vmem [thread:$0]  (!%p3410_p11), %s5034_s1, 16, %s187_s28, [#allocation7]  }
  0x2b   : > { %s3119_s10 = scalar_lea.hbm %s5035_s2, 16 }
  0x2c   : > { %p3120_p9 = scmp.ne.s32.totalorder %s5035_s2, %s3119_s10  ;;  %p3126_p1 = scmp.lt.u32.totalorder %s3119_s10, %s5035_s2 }
  0x2e   : > { %p3122_p12 = pnand %p3120_p9, %p3426_p13 }
  0x30   : > { %p3123_p2 = pneg %p3122_p12 }
  0x32   : > { %p3128_p4 = pnand %p3126_p1, %p3123_p2 }
  0x34   : > { %3131 = shalt.err (!%p3128_p4)
}
  0x35   : > { %s3132_s28 = scalar_lea.vmem %s3414_s30, 16  ;;  %s3139_s16 = scalar_lea.vmem %s3414_s30, 32 }
  0x36   : > { %p3133_p6 = scmp.ne.s32.totalorder %s3414_s30, %s3132_s28  ;;  %p3140_p3 = scmp.lt.s32.totalorder %s3414_s30, %s3414_s30 }
  0x37   : > { %p3141_p5 = scmp.lt.s32.totalorder %s3139_s16, %s3132_s28 }
  0x38   : > { %p3135_p8 = pnand %p3133_p6, %p3426_p13 }
  0x39   : > { %p3142_p7 = por %p3141_p5, %p3140_p3 }
  0x3a   : > { %p3136_p0 = pneg %p3135_p8 }
  0x3c   : > { %p3143_p10 = pnand %p3142_p7, %p3136_p0 }
  0x3e   : > { %3146 = shalt.err (!%p3143_p10)
}
  0x3f   : > { %3019 = dma.hbm_to_vmem [thread:$0]  (!%p3410_p11), %s5035_s2, 16, %s3414_s30, [#allocation7]  }
  0x40   : > { %s3147_s7 = scalar_lea.hbm %s5036_s3, 1152 }
  0x41   : > { %p3148_p9 = scmp.ne.s32.totalorder %s5036_s3, %s3147_s7  ;;  %p3154_p1 = scmp.lt.u32.totalorder %s3147_s7, %s5036_s3 }
  0x43   : > { %p3150_p12 = pnand %p3148_p9, %p3426_p13 }
  0x45   : > { %p3151_p2 = pneg %p3150_p12 }
  0x47   : > { %p3156_p4 = pnand %p3154_p1, %p3151_p2 }
  0x49   : > { %3159 = shalt.err (!%p3156_p4)
}
  0x4a   : > { %s3160_s30 = scalar_lea.vmem %s3416_s8, 1152  ;;  %p3168_p3 = scmp.lt.s32.totalorder %s3416_s8, %s3416_s8 }
  0x4b   : > { %p3161_p6 = scmp.ne.s32.totalorder %s3416_s8, %s3160_s30  ;;  %p3169_p5 = scmp.lt.s32.totalorder %s3160_s30, %s3160_s30 }
  0x4d   : > { %p3163_p8 = pnand %p3161_p6, %p3426_p13  ;;  %p3170_p7 = por %p3169_p5, %p3168_p3 }
  0x4f   : > { %p3164_p0 = pneg %p3163_p8 }
  0x51   : > { %p3171_p10 = pnand %p3170_p7, %p3164_p0 }
  0x53   : > { %3174 = shalt.err (!%p3171_p10)
}
  0x54   : > { %s3316_s13 = smov 128   ;;  %s3317_s14 = smov 8  }
  0x55   : > { %3022 = dma.hbm_to_vmem [thread:$0]  (!%p3410_p11), %s5036_s3, 1152, %s3416_s8, [#allocation10], %s3316_s13, %s3316_s13, %s3317_s14  }
  0x56   : > { %s3493_s16 = sadd.s32 1, %s3311_s21   ;;  %s34_s23 = sadd.s32 1, %s3307_s20 }
  0x57   : > { %s31_s17 = ssub.s32 %s3311_s21, %s3493_s16  ;;  %p41_p9 = scmp.ne.s32.totalorder %s3307_s20, %s3303_s19 }
  0x58   : > { %p32_p13 = scmp.eq.s32.totalorder %s31_s17, 0  ;;  %p42_p12 = scmp.eq.s32.totalorder %s3311_s21, 0 }
  0x59   : > { %p3037_p2 = scmp.lt.s32.totalorder %s3311_s21, 2  ;;  %p5052_p4 = scmp.eq.s32.totalorder %s3382_s22, 1 }
  0x5a   : > { %s3503_s27 = scalar_select %p32_p13, %s3307_s20, %s34_s23  }
  0x5b   : > { %p43_p1 = por %p42_p12, %p41_p9  ;;  %p3507_p6 = por %p5052_p4, %p41_p9 }
  0x5c   : > { %s221_s29 = sand.u32 1, %s3307_s20   ;;  %s2860_s7 = sshll.u32 %s3311_s21, 12 }
  0x5d   : > { %s2809_s8 = sshll.u32 %s221_s29, 8  ;;  %s3516_s11 = scalar_lea.hbm %s5033_s0, %s2860_s7 }
  0x5e   : > { %s225_s12 = scalar_lea.vmem [#allocation3], %s2809_s8  ;;  %p3518_p11 = pnand %p3037_p2, %p43_p1 }
  0x5f   : > { %s232_s30 = sshll.u32 %s225_s12, 4  ;;  %s3524_s28 = scalar_lea.sflag [#allocation4], %s221_s29  ;;  %s3522_s30 = int_to_ptr.vmem [resolvable:$true] %s232_s30 }
  0x60   : > { %s3175_s17 = scalar_lea.hbm %s3516_s11, 4096  ;;  %p3177_p0 = pneg %p3518_p11 }
  0x61   : > { %p3176_p8 = scmp.ne.s32.totalorder %s3516_s11, %s3175_s17  ;;  %s3180_s8 = scalar_lea.hbm %s5033_s0, 8192 }
  0x62   : > { %p3181_p7 = scmp.lt.u32.totalorder %s3516_s11, %s5033_s0  ;;  %p3182_p10 = scmp.lt.u32.totalorder %s3180_s8, %s3175_s17 }
  0x63   : > { %p3178_p3 = pnand %p3177_p0, %p3176_p8  ;;  %p3184_p9 = scmp.lt.u32.totalorder %s3175_s17, %s3516_s11 }
  0x64   : > { %p3183_p13 = por %p3182_p10, %p3181_p7 }
  0x65   : > { %p3179_p5 = pneg %p3178_p3 }
  0x66   : > { %p3185_p12 = por %p3184_p9, %p3183_p13 }
  0x68   : > { %p3186_p2 = pnand %p3185_p12, %p3179_p5 }
  0x6a   : > { %3189 = shalt.err (!%p3186_p2)
}
  0x6b   : > { %s3190_s29 = scalar_lea.vmem %s3522_s30, 4096  ;;  %s3318_s12 = smov [#allocation3]  }
  0x6c   : > { %p3191_p1 = scmp.ne.s32.totalorder %s3522_s30, %s3190_s29  ;;  %s3195_s23 = sshll.u32 %s3318_s12, 4  ;;  %s3196_s23 = int_to_ptr.vmem [resolvable:$false] %s3195_s23 }
  0x6d   : > { %s3197_s7 = scalar_lea.vmem %s3196_s23, 8192  ;;  %p3198_p3 = scmp.lt.s32.totalorder %s3522_s30, %s3196_s23 }
  0x6e   : > { %p3193_p4 = pnand %p3191_p1, %p3177_p0  ;;  %p3199_p7 = scmp.lt.s32.totalorder %s3197_s7, %s3190_s29 }
  0x70   : > { %p3194_p8 = pneg %p3193_p4  ;;  %p3200_p10 = por %p3199_p7, %p3198_p3 }
  0x72   : > { %p3201_p13 = pnand %p3200_p10, %p3194_p8 }
  0x74   : > { %3204 = shalt.err (!%p3201_p13)
}
  0x75   : > { %3026 = dma.hbm_to_vmem [thread:$0]  (!%p3518_p11), %s3516_s11, 4096, %s3522_s30, %s3524_s28, %s3316_s13, %s3316_s13, %s3317_s14  }
  0x76   : > { %p5055_p0 = scmp.ne.s32.totalorder %s5049_s26, 0 }
  0x78   : > { %244 = sbr.rel (%p5055_p0) target bundleno = 1058 (0x422), region = 36 }
  0x7f   : > { %s3558_s17 = sand.u32 1, %s3303_s19   ;;  %p5056_p5 = scmp.ne.s32.totalorder %s5047_s24, 0 }
  0x80   : > { %s2813_s8 = sshll.u32 %s3558_s17, 8  ;;  %s247_s9 = scalar_lea.sflag [#allocation4], %s3558_s17 }
  0x81   : > { %s3564_s15 = scalar_lea.vmem [#allocation3], %s2813_s8 }
  0x82   : > { %3278 = dma.done.wait (%p5056_p5), %s247_s9, 4096  }
  0x83   : > { %3280 = vsyncadd (%p5056_p5), %s247_s9, 4294963200  ;;  %p5057_p11 = scmp.eq.s32.totalorder %s3382_s22, 0 }
  0x85   : > { %3282 = dma.done.wait (%p5057_p11), [#allocation7], 32   ;;  %p5058_p9 = pmov %p5057_p11 }
  0x87   : > { %3284 = vsyncadd (%p5058_p9), [#allocation7], 4294967264  ;;  %p5059_p12 = pmov %p5058_p9 }
  0x88   : > { %p5060_p2 = pmov %p5058_p9 }
  0x89   : > { %3286 = dma.done.wait (%p5059_p12), [#allocation10], 1152  }
  0x8a   : > { %3288 = vsyncadd (%p5060_p2), [#allocation10], 4294966144  ;;  %vm436_vm0 = vcmask 64512   ;;  %vm439_vm1 = vcmask 58368   ;;  %v3319_v0 = vmov 0.0   ;;  %v296_v1 = vld [vmem:[%s3564_s15 + $0x10] sm:$0xff] }
  0x8b   : > { %437 = vst.msk [vmem:[#allocation2] sm:$0xff] %vm436_vm0, %v3319_v0  ;;  %438 = vst.msk [vmem:[#allocation2 + $0x8] sm:$0xff] %vm436_vm0, %v3319_v0  ;;  %v3633_v2 = vld [vmem:[#allocation6] ss:$0 sm:$0xff]  ;;  %v3635_v3 = vld [vmem:[#allocation8] ss:$0 sm:$0xff] }
  0x8c   : > { %441 = vst.msk [vmem:[#allocation2 + $0x18] sm:$0xff] %vm436_vm0, %v3319_v0  ;;  %442 = vst.msk [vmem:[#allocation2 + $0x20] sm:$0xff] %vm436_vm0, %v3319_v0  ;;  %v335_v6 = vmul.f32 %v3633_v2, %v296_v1  ;;  %v294_v7 = vld [vmem:[%s3564_s15] sm:$0xff]  ;;  %s3320_s24 = smov 8   ;;  %v295_v10 = vld [vmem:[%s3564_s15 + $0x8] sm:$0xff]  ;;  %s3321_s26 = smov 16  }
  0x8d   : > { %444 = vst.msk [vmem:[#allocation2 + $0x30] sm:$0xff] %vm436_vm0, %v3319_v0  ;;  %445 = vst.msk [vmem:[#allocation2 + $0x38] sm:$0xff] %vm436_vm0, %v3319_v0  ;;  %v333_v8 = vmul.f32 %v3633_v2, %v294_v7  ;;  %v298_v9 = vld [vmem:[%s3564_s15 + $0x20] sm:$0xff]  ;;  %v300_v11 = vld [vmem:[%s3564_s15 + $0x30] sm:$0xff]  ;;  %v334_v14 = vmul.f32 %v3633_v2, %v295_v10  ;;  %s3322_s13 = smov 24   ;;  %s3323_s14 = smov 32  }
  0x8e   : > { %447 = vst.msk [vmem:[#allocation2 + $0x48] sm:$0xff] %vm436_vm0, %v3319_v0  ;;  %448 = vst.msk [vmem:[#allocation2 + $0x50] sm:$0xff] %vm436_vm0, %v3319_v0  ;;  %v374_v12 = vadd.f32 %v3635_v3, %v335_v6  ;;  %v337_v13 = vmul.f32 %v3633_v2, %v298_v9  ;;  %v339_v15 = vmul.f32 %v3633_v2, %v300_v11  ;;  %v297_v16 = vld [vmem:[%s3564_s15 + $0x18] sm:$0xff]  ;;  %v302_v17 = vld [vmem:[%s3564_s15 + $0x40] sm:$0xff]  ;;  %s3324_s11 = smov 40   ;;  %s3325_s30 = smov 48  }
  0x8f   : > { %450 = vst.msk [vmem:[#allocation2 + $0x60] sm:$0xff] %vm436_vm0, %v3319_v0  ;;  %451 = vst.msk [vmem:[#allocation2 + $0x68] sm:$0xff] %vm436_vm0, %v3319_v0  ;;  %v299_v18 = vld [vmem:[%s3564_s15 + $0x28] sm:$0xff]  ;;  %v372_v19 = vadd.f32 %v3635_v3, %v333_v8  ;;  %v336_v20 = vmul.f32 %v3633_v2, %v297_v16  ;;  %v341_v21 = vmul.f32 %v3633_v2, %v302_v17  ;;  %v304_v23 = vld [vmem:[%s3564_s15 + $0x50] sm:$0xff]  ;;  %s3326_s28 = smov 64   ;;  %s3327_s10 = smov 56  }
  0x90   : > { %453 = vst.msk [vmem:[#allocation2 + $0x78] sm:$0xff] %vm436_vm0, %v3319_v0  ;;  %454 = vst.msk [vmem:[#allocation2 + $0x80] sm:$0xff] %vm436_vm0, %v3319_v0  ;;  %v338_v22 = vmul.f32 %v3633_v2, %v299_v18  ;;  %v406_v24 = vmax.f32 %v374_v12, 0.0  ;;  %v376_v25 = vadd.f32 %v3635_v3, %v337_v13  ;;  %v373_v26 = vadd.f32 %v3635_v3, %v334_v14  ;;  %v301_v28 = vld [vmem:[%s3564_s15 + $0x38] sm:$0xff]  ;;  %v306_v33 = vld [vmem:[%s3564_s15 + $0x60] sm:$0xff]  ;;  %s4680_s29 = scalar_lea.vmem [#allocation11], %s2813_s8 }
  0x91   : > { %456 = vst.msk [vmem:[#allocation2 + $0x90] sm:$0xff] %vm436_vm0, %v3319_v0  ;;  %457 = vst.msk [vmem:[#allocation2 + $0x98] sm:$0xff] %vm436_vm0, %v3319_v0  ;;  %v378_v27 = vadd.f32 %v3635_v3, %v339_v15  ;;  %v404_v29 = vmax.f32 %v372_v19, 0.0  ;;  %v375_v30 = vadd.f32 %v3635_v3, %v336_v20  ;;  %v380_v31 = vadd.f32 %v3635_v3, %v341_v21  ;;  %v303_v34 = vld [vmem:[%s3564_s15 + $0x48] sm:$0xff]  ;;  %v308_v35 = vld [vmem:[%s3564_s15 + $0x70] sm:$0xff]  ;;  %s2861_s12 = sshll.u32 %s3382_s22, 12 }
  0x92   : > { %459 = vst.msk [vmem:[#allocation2 + $0xa8] sm:$0xff] %vm436_vm0, %v3319_v0  ;;  %460 = vst.msk [vmem:[#allocation2 + $0xb0] sm:$0xff] %vm436_vm0, %v3319_v0  ;;  %v557_v4 = vld [vmem:[#allocation2 + $0x1] sm:$0xff]  ;;  %v377_v32 = vadd.f32 %v3635_v3, %v338_v22  ;;  %v408_v36 = vmax.f32 %v376_v25, 0.0  ;;  %v405_v37 = vmax.f32 %v373_v26, 0.0  ;;  %v343_v39 = vmul.f32 %v3633_v2, %v304_v23  ;;  %v310_v41 = vld [vmem:[%s3564_s15 + $0x80] sm:$0xff]  ;;  %s4946_s9 = scalar_lea.hbm %s5037_s4, %s2861_s12 }
  0x93   : > { %462 = vst.msk [vmem:[#allocation2 + $0xc0] sm:$0xff] %vm436_vm0, %v3319_v0  ;;  %463 = vst.msk [vmem:[#allocation2 + $0xc8] sm:$0xff] %vm436_vm0, %v3319_v0  ;;  %846 = vrot.lane.b32.xlu0 %v557_v4, %s3320_s24  ;;  %v410_v38 = vmax.f32 %v378_v27, 0.0  ;;  %v305_v40 = vld [vmem:[%s3564_s15 + $0x58] sm:$0xff]  ;;  %v307_v42 = vld [vmem:[%s3564_s15 + $0x68] sm:$0xff]  ;;  %v407_v43 = vmax.f32 %v375_v30, 0.0  ;;  %v340_v46 = vmul.f32 %v3633_v2, %v301_v28  ;;  %v345_v48 = vmul.f32 %v3633_v2, %v306_v33 }
  0x94   : > { %465 = vst.msk [vmem:[#allocation2 + $0xd8] sm:$0xff] %vm436_vm0, %v3319_v0  ;;  %466 = vst.msk [vmem:[#allocation2 + $0xe0] sm:$0xff] %vm436_vm0, %v3319_v0  ;;  %v412_v44 = vmax.f32 %v380_v31, 0.0  ;;  %v409_v45 = vmax.f32 %v377_v32, 0.0  ;;  %v382_v47 = vadd.f32 %v3635_v3, %v343_v39  ;;  %v342_v49 = vmul.f32 %v3633_v2, %v303_v34  ;;  %v312_v55 = vld [vmem:[%s3564_s15 + $0x90] sm:$0xff]  ;;  %v309_v60 = vld [vmem:[%s3564_s15 + $0x78] sm:$0xff] }
  0x95   : > { %468 = vst.msk [vmem:[#allocation2 + $0xf0] sm:$0xff] %vm436_vm0, %v3319_v0  ;;  %469 = vst.msk [vmem:[#allocation2 + $0xf8] sm:$0xff] %vm436_vm0, %v3319_v0  ;;  %v347_v50 = vmul.f32 %v3633_v2, %v308_v35  ;;  %v379_v51 = vadd.f32 %v3635_v3, %v340_v46  ;;  %v344_v52 = vmul.f32 %v3633_v2, %v305_v40  ;;  %v314_v1 = vld [vmem:[%s3564_s15 + $0xa0] sm:$0xff]  ;;  %v311_v4 = vld [vmem:[%s3564_s15 + $0x88] sm:$0xff]  ;;  %vm1870_vm2 = vcmask 130048   ;;  %s2656_s23 = sshll.u32 %s4680_s29, 4  ;;  %s4948_s23 = int_to_ptr.vmem [resolvable:$true] %s2656_s23 }
  0x96   : > { %471 = vst.msk [vmem:[#allocation2 + $0x108] sm:$0xff] %vm436_vm0, %v3319_v0  ;;  %472 = vst.msk [vmem:[#allocation2 + $0x110] sm:$0xff] %vm436_vm0, %v3319_v0  ;;  %v349_v53 = vmul.f32 %v3633_v2, %v310_v41  ;;  %v346_v54 = vmul.f32 %v3633_v2, %v307_v42  ;;  %v414_v56 = vmax.f32 %v382_v47, 0.0  ;;  %v384_v57 = vadd.f32 %v3635_v3, %v345_v48  ;;  %v313_v10 = vld [vmem:[%s3564_s15 + $0x98] sm:$0xff]  ;;  %v318_v11 = vld [vmem:[%s3564_s15 + $0xc0] sm:$0xff] }
  0x97   : > { %474 = vst.msk [vmem:[#allocation2 + $0x120] sm:$0xff] %vm436_vm0, %v3319_v0  ;;  %475 = vst.msk [vmem:[#allocation2 + $0x128] sm:$0xff] %vm436_vm0, %v3319_v0  ;;  %v381_v58 = vadd.f32 %v3635_v3, %v342_v49  ;;  %v386_v59 = vadd.f32 %v3635_v3, %v347_v50  ;;  %v411_v61 = vmax.f32 %v379_v51, 0.0  ;;  %v383_v62 = vadd.f32 %v3635_v3, %v344_v52  ;;  %v315_v12 = vld [vmem:[%s3564_s15 + $0xa8] sm:$0xff]  ;;  %v320_v28 = vld [vmem:[%s3564_s15 + $0xd0] sm:$0xff] }
  0x98   : > { %477 = vst.msk [vmem:[#allocation2 + $0x138] sm:$0xff] %vm436_vm0, %v3319_v0  ;;  %478 = vst.msk [vmem:[#allocation2 + $0x140] sm:$0xff] %vm436_vm0, %v3319_v0  ;;  %v388_v63 = vadd.f32 %v3635_v3, %v349_v53  ;;  %v416_v6 = vmax.f32 %v384_v57, 0.0  ;;  %v351_v9 = vmul.f32 %v3633_v2, %v312_v55  ;;  %v348_v17 = vmul.f32 %v3633_v2, %v309_v60  ;;  %v317_v34 = vld [vmem:[%s3564_s15 + $0xb8] sm:$0xff]  ;;  %v322_v39 = vld [vmem:[%s3564_s15 + $0xe0] sm:$0xff] }
  0x99   : > { %480 = vst.msk [vmem:[#allocation2 + $0x150] sm:$0xff] %vm436_vm0, %v3319_v0  ;;  %481 = vst.msk [vmem:[#allocation2 + $0x158] sm:$0xff] %vm436_vm0, %v3319_v0  ;;  %v413_v7 = vmax.f32 %v381_v58, 0.0  ;;  %v418_v8 = vmax.f32 %v386_v59, 0.0  ;;  %v415_v14 = vmax.f32 %v383_v62, 0.0  ;;  %v353_v20 = vmul.f32 %v3633_v2, %v314_v1  ;;  %v319_v40 = vld [vmem:[%s3564_s15 + $0xc8] sm:$0xff] }
  0x9a   : > { %483 = vst.msk [vmem:[#allocation2 + $0x168] sm:$0xff] %vm436_vm0, %v3319_v0  ;;  %484 = vst.msk [vmem:[#allocation2 + $0x170] sm:$0xff] %vm436_vm0, %v3319_v0  ;;  %v420_v15 = vmax.f32 %v388_v63, 0.0  ;;  %v390_v19 = vadd.f32 %v3635_v3, %v351_v9  ;;  %v350_v21 = vmul.f32 %v3633_v2, %v311_v4  ;;  %v352_v25 = vmul.f32 %v3633_v2, %v313_v10  ;;  %v321_v41 = vld [vmem:[%s3564_s15 + $0xd8] sm:$0xff]  ;;  %v323_v46 = vld [vmem:[%s3564_s15 + $0xe8] sm:$0xff] }
  0x9b   : > { %486 = vst.msk [vmem:[#allocation2 + $0x180] sm:$0xff] %vm436_vm0, %v3319_v0  ;;  %487 = vst.msk [vmem:[#allocation2 + $0x188] sm:$0xff] %vm436_vm0, %v3319_v0  ;;  %v357_v26 = vmul.f32 %v3633_v2, %v318_v11  ;;  %v354_v27 = vmul.f32 %v3633_v2, %v315_v12  ;;  %v392_v31 = vadd.f32 %v3635_v3, %v353_v20  ;;  %vm1903_vm3 = vcmask 195584  }
  0x9c   : > { %489 = vst.msk [vmem:[#allocation2 + $0x198] sm:$0xff] %vm436_vm0, %v3319_v0  ;;  %490 = vst.msk [vmem:[#allocation2 + $0x1a0] sm:$0xff] %vm436_vm0, %v3319_v0  ;;  %v422_v30 = vmax.f32 %v390_v19, 0.0  ;;  %v389_v32 = vadd.f32 %v3635_v3, %v350_v21  ;;  %v356_v51 = vmul.f32 %v3633_v2, %v317_v34  ;;  %v358_v55 = vmul.f32 %v3633_v2, %v319_v40 }
  0x9d   : > { %440 = vst.msk [vmem:[#allocation2 + $0x10] sm:$0x3] %vm439_vm1, %v3319_v0  ;;  %443 = vst.msk [vmem:[#allocation2 + $0x28] sm:$0x3] %vm439_vm1, %v3319_v0  ;;  %v424_v42 = vmax.f32 %v392_v31, 0.0  ;;  %v362_v58 = vmul.f32 %v3633_v2, %v323_v46  ;;  %v589_v31 = vld [vmem:[#allocation2 + $0x2] sm:$0xff] }
  0x9e   : > { %446 = vst.msk [vmem:[#allocation2 + $0x40] sm:$0x3] %vm439_vm1, %v3319_v0  ;;  %449 = vst.msk [vmem:[#allocation2 + $0x58] sm:$0x3] %vm439_vm1, %v3319_v0  ;;  %v395_v57 = vadd.f32 %v3635_v3, %v356_v51  ;;  %vm1936_vm4 = vcmask 261120   ;;  %vm1969_vm5 = vcmask 326656  }
  0x9f   : > { %452 = vst.msk [vmem:[#allocation2 + $0x70] sm:$0x3] %vm439_vm1, %v3319_v0  ;;  %455 = vst.msk [vmem:[#allocation2 + $0x88] sm:$0x3] %vm439_vm1, %v3319_v0  ;;  %v401_v1 = vadd.f32 %v3635_v3, %v362_v58  ;;  %vm2035_vm6 = vcmask 457728   ;;  %vm2002_vm7 = vcmask 392192  }
  0xa0   : > { %458 = vst.msk [vmem:[#allocation2 + $0xa0] sm:$0x3] %vm439_vm1, %v3319_v0  ;;  %461 = vst.msk [vmem:[#allocation2 + $0xb8] sm:$0x3] %vm439_vm1, %v3319_v0  ;;  %vm2068_vm8 = vcmask 523264   ;;  %vm2110_vm9 = vcmask 588800  }
  0xa1   : > { %464 = vst.msk [vmem:[#allocation2 + $0xd0] sm:$0x3] %vm439_vm1, %v3319_v0  ;;  %467 = vst.msk [vmem:[#allocation2 + $0xe8] sm:$0x3] %vm439_vm1, %v3319_v0 }
  0xa2   : > { %470 = vst.msk [vmem:[#allocation2 + $0x100] sm:$0x3] %vm439_vm1, %v3319_v0  ;;  %473 = vst.msk [vmem:[#allocation2 + $0x118] sm:$0x3] %vm439_vm1, %v3319_v0 }
  0xa3   : > { %476 = vst.msk [vmem:[#allocation2 + $0x130] sm:$0x3] %vm439_vm1, %v3319_v0  ;;  %479 = vst.msk [vmem:[#allocation2 + $0x148] sm:$0x3] %vm439_vm1, %v3319_v0 }
  0xa4   : > { %482 = vst.msk [vmem:[#allocation2 + $0x160] sm:$0x3] %vm439_vm1, %v3319_v0  ;;  %485 = vst.msk [vmem:[#allocation2 + $0x178] sm:$0x3] %vm439_vm1, %v3319_v0  ;;  %v558_v5 = vld [vmem:[#allocation2 + $0x9] sm:$0xff] }
  0xa5   : > { %488 = vst.msk [vmem:[#allocation2 + $0x190] sm:$0x3] %vm439_vm1, %v3319_v0  ;;  %491 = vst.msk [vmem:[#allocation2 + $0x1a8] sm:$0x3] %vm439_vm1, %v3319_v0  ;;  %848 = vrot.lane.b32.xlu0 %v558_v5, %s3320_s24  ;;  %v385_v0 = vadd.f32 %v3635_v3, %v346_v54  ;;  %v316_v5 = vld [vmem:[%s3564_s15 + $0xb0] sm:$0xff]  ;;  %v361_v54 = vmul.f32 %v3633_v2, %v322_v39 }
  0xa6   : > { %495 = vst.msk [vmem:[#allocation2 + $0x31] sm:$0xff] %vm436_vm0, %v406_v24  ;;  %493 = vst.msk [vmem:[#allocation2 + $0x19] sm:$0xff] %vm436_vm0, %v404_v29  ;;  %v355_v22 = vmul.f32 %v3633_v2, %v316_v5  ;;  %v387_v24 = vadd.f32 %v3635_v3, %v348_v17 }
  0xa7   : > { %497 = vst.msk [vmem:[#allocation2 + $0x49] sm:$0xff] %vm436_vm0, %v408_v36  ;;  %494 = vst.msk [vmem:[#allocation2 + $0x21] sm:$0xff] %vm436_vm0, %v405_v37  ;;  %v417_v16 = vmax.f32 %v385_v0, 0.0  ;;  %v391_v36 = vadd.f32 %v3635_v3, %v352_v25  ;;  %v396_v37 = vadd.f32 %v3635_v3, %v357_v26  ;;  %v400_v60 = vadd.f32 %v3635_v3, %v361_v54 }
  0xa8   : > { %499 = vst.msk [vmem:[#allocation2 + $0x61] sm:$0xff] %vm436_vm0, %v410_v38  ;;  %496 = vst.msk [vmem:[#allocation2 + $0x39] sm:$0xff] %vm436_vm0, %v407_v43  ;;  %v394_v33 = vadd.f32 %v3635_v3, %v355_v22  ;;  %v419_v35 = vmax.f32 %v387_v24, 0.0  ;;  %v393_v38 = vadd.f32 %v3635_v3, %v354_v27  ;;  %v421_v43 = vmax.f32 %v389_v32, 0.0 }
  0xa9   : > { %501 = vst.msk [vmem:[#allocation2 + $0x79] sm:$0xff] %vm436_vm0, %v412_v44  ;;  %498 = vst.msk [vmem:[#allocation2 + $0x51] sm:$0xff] %vm436_vm0, %v409_v45  ;;  %v359_v45 = vmul.f32 %v3633_v2, %v320_v28  ;;  %v423_v48 = vmax.f32 %v391_v36, 0.0  ;;  %v428_v49 = vmax.f32 %v396_v37, 0.0  ;;  %v427_v0 = vmax.f32 %v395_v57, 0.0  ;;  %v590_v36 = vld [vmem:[#allocation2 + $0xa] sm:$0xff] }
  0xaa   : > { %503 = vst.msk [vmem:[#allocation2 + $0x91] sm:$0xff] %vm436_vm0, %v414_v56  ;;  %500 = vst.msk [vmem:[#allocation2 + $0x69] sm:$0xff] %vm436_vm0, %v411_v61  ;;  %v426_v44 = vmax.f32 %v394_v33, 0.0  ;;  %v425_v50 = vmax.f32 %v393_v38, 0.0  ;;  %v360_v56 = vmul.f32 %v3633_v2, %v321_v41  ;;  %v397_v61 = vadd.f32 %v3635_v3, %v358_v55 }
  0xab   : > { %505 = vst.msk [vmem:[#allocation2 + $0xa9] sm:$0xff] %vm436_vm0, %v416_v6  ;;  %502 = vst.msk [vmem:[#allocation2 + $0x81] sm:$0xff] %vm436_vm0, %v413_v7  ;;  %v398_v53 = vadd.f32 %v3635_v3, %v359_v45  ;;  %v432_v2 = vmax.f32 %v400_v60, 0.0  ;;  %v433_v7 = vmax.f32 %v401_v1, 0.0 }
  0xac   : > { %507 = vst.msk [vmem:[#allocation2 + $0xc1] sm:$0xff] %vm436_vm0, %v418_v8  ;;  %504 = vst.msk [vmem:[#allocation2 + $0x99] sm:$0xff] %vm436_vm0, %v415_v14  ;;  %v399_v62 = vadd.f32 %v3635_v3, %v360_v56  ;;  %v429_v5 = vmax.f32 %v397_v61, 0.0 }
  0xad   : > { %v3704_v13 = vld [vmem:[#allocation2 + $0x31] sm:$0xff]  ;;  %v3710_v18 = vld [vmem:[#allocation2 + $0x19] sm:$0xff]  ;;  %509 = vst.msk [vmem:[#allocation2 + $0xd9] sm:$0xff] %vm436_vm0, %v420_v15  ;;  %506 = vst.msk [vmem:[#allocation2 + $0xb1] sm:$0xff] %vm436_vm0, %v417_v16  ;;  %v430_v59 = vmax.f32 %v398_v53, 0.0 }
  0xae   : > { %854 = vrot.lane.b32.xlu0 %v3704_v13, %s3320_s24  ;;  %850 = vrot.lane.b32.xlu1 %v3710_v18, %s3320_s24  ;;  %v3721_v23 = vld [vmem:[#allocation2 + $0x49] sm:$0xff]  ;;  %v3731_v29 = vld [vmem:[#allocation2 + $0x21] sm:$0xff]  ;;  %511 = vst.msk [vmem:[#allocation2 + $0xf1] sm:$0xff] %vm436_vm0, %v422_v30  ;;  %508 = vst.msk [vmem:[#allocation2 + $0xc9] sm:$0xff] %vm436_vm0, %v419_v35  ;;  %v431_v6 = vmax.f32 %v399_v62, 0.0 }
  0xaf   : > { %v3750_v47 = vld [vmem:[#allocation2 + $0x61] sm:$0xff]  ;;  %v3754_v52 = vld [vmem:[#allocation2 + $0x39] sm:$0xff]  ;;  %513 = vst.msk [vmem:[#allocation2 + $0x109] sm:$0xff] %vm436_vm0, %v424_v42  ;;  %510 = vst.msk [vmem:[#allocation2 + $0xe1] sm:$0xff] %vm436_vm0, %v421_v43 }
  0xb0   : > { %515 = vst.msk [vmem:[#allocation2 + $0x121] sm:$0xff] %vm436_vm0, %v426_v44  ;;  %512 = vst.msk [vmem:[#allocation2 + $0xf9] sm:$0xff] %vm436_vm0, %v423_v48  ;;  %v3775_v63 = vld [vmem:[#allocation2 + $0x79] sm:$0xff]  ;;  %v3778_v4 = vld [vmem:[#allocation2 + $0x51] sm:$0xff] }
  0xb1   : > { %517 = vst.msk [vmem:[#allocation2 + $0x139] sm:$0xff] %vm436_vm0, %v428_v49  ;;  %514 = vst.msk [vmem:[#allocation2 + $0x111] sm:$0xff] %vm436_vm0, %v425_v50  ;;  %v3789_v3 = vld [vmem:[#allocation2 + $0x91] sm:$0xff]  ;;  %v3792_v8 = vld [vmem:[#allocation2 + $0x69] sm:$0xff] }
  0xb2   : > { %858 = vrot.lane.b32.xlu0 %v3721_v23, %s3320_s24  ;;  %852 = vrot.lane.b32.xlu1 %v3731_v29, %s3320_s24  ;;  %519 = vst.msk [vmem:[#allocation2 + $0x151] sm:$0xff] %vm436_vm0, %v430_v59  ;;  %516 = vst.msk [vmem:[#allocation2 + $0x129] sm:$0xff] %vm436_vm0, %v427_v0  ;;  %v571_v9 = vld [vmem:[#allocation2 + $0xa9] sm:$0xff]  ;;  %v3798_v10 = vld [vmem:[#allocation2 + $0x81] sm:$0xff] }
  0xb3   : > { %521 = vst.msk [vmem:[#allocation2 + $0x169] sm:$0xff] %vm436_vm0, %v432_v2  ;;  %518 = vst.msk [vmem:[#allocation2 + $0x141] sm:$0xff] %vm436_vm0, %v429_v5  ;;  %v573_v11 = vld [vmem:[#allocation2 + $0xc1] sm:$0xff]  ;;  %v3803_v12 = vld [vmem:[#allocation2 + $0x99] sm:$0xff] }
  0xb4   : > { %520 = vst.msk [vmem:[#allocation2 + $0x159] sm:$0xff] %vm436_vm0, %v431_v6  ;;  %522 = vst.msk [vmem:[#allocation2 + $0x171] sm:$0xff] %vm436_vm0, %v433_v7  ;;  %v575_v14 = vld [vmem:[#allocation2 + $0xd9] sm:$0xff]  ;;  %v3808_v15 = vld [vmem:[#allocation2 + $0xb1] sm:$0xff] }
  0xb5   : > { %v577_v16 = vld [vmem:[#allocation2 + $0xf1] sm:$0xff]  ;;  %v574_v17 = vld [vmem:[#allocation2 + $0xc9] sm:$0xff]  ;;  %v3827_v33 = vld [vmem:[#allocation2 + $0x1a] sm:$0xff] }
  0xb6   : > { %862 = vrot.lane.b32.xlu0 %v3750_v47, %s3320_s24  ;;  %856 = vrot.lane.b32.xlu1 %v3754_v52, %s3320_s24  ;;  %v579_v19 = vld [vmem:[#allocation2 + $0x109] sm:$0xff]  ;;  %v576_v20 = vld [vmem:[#allocation2 + $0xe1] sm:$0xff]  ;;  %v3832_v35 = vld [vmem:[#allocation2 + $0x32] sm:$0xff] }
  0xb7   : > { %v581_v21 = vld [vmem:[#allocation2 + $0x121] sm:$0xff]  ;;  %v578_v22 = vld [vmem:[#allocation2 + $0xf9] sm:$0xff]  ;;  %v3837_v37 = vld [vmem:[#allocation2 + $0x4a] sm:$0xff] }
  0xb8   : > { %v583_v24 = vld [vmem:[#allocation2 + $0x139] sm:$0xff]  ;;  %v580_v25 = vld [vmem:[#allocation2 + $0x111] sm:$0xff]  ;;  %v3839_v38 = vld [vmem:[#allocation2 + $0x22] sm:$0xff] }
  0xb9   : > { %v585_v26 = vld [vmem:[#allocation2 + $0x151] sm:$0xff]  ;;  %v582_v27 = vld [vmem:[#allocation2 + $0x129] sm:$0xff]  ;;  %v3847_v40 = vld [vmem:[#allocation2 + $0x3a] sm:$0xff] }
  0xba   : > { %866 = vrot.lane.b32.xlu0 %v3775_v63, %s3320_s24  ;;  %860 = vrot.lane.b32.xlu1 %v3778_v4, %s3320_s24  ;;  %v587_v28 = vld [vmem:[#allocation2 + $0x169] sm:$0xff]  ;;  %v584_v30 = vld [vmem:[#allocation2 + $0x141] sm:$0xff]  ;;  %v3855_v42 = vld [vmem:[#allocation2 + $0x52] sm:$0xff] }
  0xbb   : > { %v586_v32 = vld [vmem:[#allocation2 + $0x159] sm:$0xff]  ;;  %v588_v34 = vld [vmem:[#allocation2 + $0x171] sm:$0xff]  ;;  %v3845_v39 = vld [vmem:[#allocation2 + $0x62] sm:$0xff] }
  0xbc   : > { %v3853_v41 = vld [vmem:[#allocation2 + $0x7a] sm:$0xff]  ;;  %v3861_v43 = vld [vmem:[#allocation2 + $0x92] sm:$0xff]  ;;  %v3863_v44 = vld [vmem:[#allocation2 + $0x6a] sm:$0xff] }
  0xbd   : > { %v3869_v45 = vld [vmem:[#allocation2 + $0xaa] sm:$0xff]  ;;  %v3871_v46 = vld [vmem:[#allocation2 + $0x82] sm:$0xff]  ;;  %v3879_v49 = vld [vmem:[#allocation2 + $0x9a] sm:$0xff] }
  0xbe   : > { %870 = vrot.lane.b32.xlu0 %v3789_v3, %s3320_s24  ;;  %864 = vrot.lane.b32.xlu1 %v3792_v8, %s3320_s24  ;;  %v3877_v48 = vld [vmem:[#allocation2 + $0xc2] sm:$0xff]  ;;  %v607_v50 = vld [vmem:[#allocation2 + $0xda] sm:$0xff]  ;;  %v3885_v51 = vld [vmem:[#allocation2 + $0xb2] sm:$0xff] }
  0xbf   : > { %v609_v53 = vld [vmem:[#allocation2 + $0xf2] sm:$0xff]  ;;  %v3890_v54 = vld [vmem:[#allocation2 + $0xca] sm:$0xff]  ;;  %v3895_v56 = vld [vmem:[#allocation2 + $0xe2] sm:$0xff] }
  0xc0   : > { %v611_v55 = vld [vmem:[#allocation2 + $0x10a] sm:$0xff]  ;;  %v613_v57 = vld [vmem:[#allocation2 + $0x122] sm:$0xff]  ;;  %v610_v58 = vld [vmem:[#allocation2 + $0xfa] sm:$0xff] }
  0xc1   : > { %v615_v60 = vld [vmem:[#allocation2 + $0x13a] sm:$0xff]  ;;  %v612_v61 = vld [vmem:[#allocation2 + $0x112] sm:$0xff]  ;;  %v614_v1 = vld [vmem:[#allocation2 + $0x12a] sm:$0xff] }
  0xc2   : > { %874 = vrot.lane.b32.xlu0 %v571_v9, %s3320_s24  ;;  %868 = vrot.lane.b32.xlu1 %v3798_v10, %s3320_s24  ;;  %v617_v0 = vld [vmem:[#allocation2 + $0x152] sm:$0xff]  ;;  %v619_v2 = vld [vmem:[#allocation2 + $0x16a] sm:$0xff]  ;;  %v616_v6 = vld [vmem:[#allocation2 + $0x142] sm:$0xff] }
  0xc6   : > { %878 = vrot.lane.b32.xlu0 %v573_v11, %s3320_s24  ;;  %872 = vrot.lane.b32.xlu1 %v3803_v12, %s3320_s24  ;;  %v618_v11 = vld [vmem:[#allocation2 + $0x15a] sm:$0xff] }
  0xca   : > { %882 = vrot.lane.b32.xlu0 %v575_v14, %s3320_s24  ;;  %876 = vrot.lane.b32.xlu1 %v3808_v15, %s3320_s24  ;;  %v3918_v14 = vld [vmem:[#allocation2 + $0x18] sm:$0xff] }
  0xce   : > { %886 = vrot.lane.b32.xlu0 %v577_v16, %s3320_s24  ;;  %880 = vrot.lane.b32.xlu1 %v574_v17, %s3320_s24 }
  0xd2   : > { %890 = vrot.lane.b32.xlu0 %v579_v19, %s3320_s24  ;;  %884 = vrot.lane.b32.xlu1 %v576_v20, %s3320_s24  ;;  %v620_v19 = vld [vmem:[#allocation2 + $0x172] sm:$0xff] }
  0xd3   : > { %v3927_v20 = vld [vmem:[#allocation2 + $0x30] sm:$0xff] }
  0xd6   : > { %894 = vrot.lane.b32.xlu0 %v581_v21, %s3320_s24  ;;  %888 = vrot.lane.b32.xlu1 %v578_v22, %s3320_s24 }
  0xda   : > { %898 = vrot.lane.b32.xlu0 %v583_v24, %s3320_s24  ;;  %892 = vrot.lane.b32.xlu1 %v580_v25, %s3320_s24  ;;  %v3936_v24 = vld [vmem:[#allocation2 + $0x48] sm:$0xff] }
  0xde   : > { %902 = vrot.lane.b32.xlu0 %v585_v26, %s3320_s24  ;;  %896 = vrot.lane.b32.xlu1 %v582_v27, %s3320_s24  ;;  %v3940_v26 = vld [vmem:[#allocation2 + $0x20] sm:$0xff] }
  0xe2   : > { %906 = vrot.lane.b32.xlu0 %v587_v28, %s3320_s24  ;;  %900 = vrot.lane.b32.xlu1 %v584_v30, %s3320_s24  ;;  %v3948_v28 = vld [vmem:[#allocation2 + $0x60] sm:$0xff] }
  0xe6   : > { %974 = vrot.lane.b32.xlu0 %v589_v31, %s3321_s26  ;;  %904 = vrot.lane.b32.xlu1 %v586_v32, %s3320_s24  ;;  %v3952_v31 = vld [vmem:[#allocation2 + $0x38] sm:$0xff] }
  0xea   : > { %978 = vrot.lane.b32.xlu0 %v3827_v33, %s3321_s26  ;;  %908 = vrot.lane.b32.xlu1 %v588_v34, %s3320_s24  ;;  %v3960_v34 = vld [vmem:[#allocation2 + $0x78] sm:$0xff] }
  0xee   : > { %982 = vrot.lane.b32.xlu0 %v3832_v35, %s3321_s26  ;;  %976 = vrot.lane.b32.xlu1 %v590_v36, %s3321_s26 }
  0xf2   : > { %986 = vrot.lane.b32.xlu0 %v3837_v37, %s3321_s26  ;;  %980 = vrot.lane.b32.xlu1 %v3839_v38, %s3321_s26 }
  0xf6   : > { %990 = vrot.lane.b32.xlu0 %v3845_v39, %s3321_s26  ;;  %984 = vrot.lane.b32.xlu1 %v3847_v40, %s3321_s26 }
  0xfa   : > { %994 = vrot.lane.b32.xlu0 %v3853_v41, %s3321_s26  ;;  %988 = vrot.lane.b32.xlu1 %v3855_v42, %s3321_s26 }
  0xfe   : > { %998 = vrot.lane.b32.xlu0 %v3861_v43, %s3321_s26  ;;  %992 = vrot.lane.b32.xlu1 %v3863_v44, %s3321_s26 }
 0x102   : > { %1002 = vrot.lane.b32.xlu0 %v3869_v45, %s3321_s26  ;;  %996 = vrot.lane.b32.xlu1 %v3871_v46, %s3321_s26 }
 0x105   : > { %v3900_v59 = vpop.permute.xlu0 %846 }
 0x106   : > { %1006 = vrot.lane.b32.xlu0 %v3877_v48, %s3321_s26  ;;  %1000 = vrot.lane.b32.xlu1 %v3879_v49, %s3321_s26 }
 0x10a   : > { %1010 = vrot.lane.b32.xlu0 %v607_v50, %s3321_s26  ;;  %1004 = vrot.lane.b32.xlu1 %v3885_v51, %s3321_s26  ;;  %v3964_v50 = vld [vmem:[#allocation2 + $0x50] sm:$0xff] }
 0x10e   : > { %1014 = vrot.lane.b32.xlu0 %v609_v53, %s3321_s26  ;;  %1008 = vrot.lane.b32.xlu1 %v3890_v54, %s3321_s26 }
 0x112   : > { %1018 = vrot.lane.b32.xlu0 %v611_v55, %s3321_s26  ;;  %1012 = vrot.lane.b32.xlu1 %v3895_v56, %s3321_s26  ;;  %v3972_v55 = vld [vmem:[#allocation2 + $0x90] sm:$0xff] }
 0x113   : > { %5064 = vst [vmem:[#allocation22_spill] sm:$0xff] %v3972_v55 }
 0x116   : > { %1022 = vrot.lane.b32.xlu0 %v613_v57, %s3321_s26  ;;  %1016 = vrot.lane.b32.xlu1 %v610_v58, %s3321_s26  ;;  %v3976_v58 = vld [vmem:[#allocation2 + $0x68] sm:$0xff] }
 0x117   : > { %v3905_v62 = vpop.permute.xlu0 %848 }
 0x11a   : > { %1026 = vrot.lane.b32.xlu0 %v615_v60, %s3321_s26  ;;  %1020 = vrot.lane.b32.xlu1 %v612_v61, %s3321_s26  ;;  %v3984_v61 = vld [vmem:[#allocation2 + $0xa8] sm:$0xff] }
 0x11b   : > { %5067 = vst [vmem:[#allocation25_spill] sm:$0xff] %v3984_v61 }
 0x11e   : > { %1030 = vrot.lane.b32.xlu0 %v617_v0, %s3321_s26  ;;  %1024 = vrot.lane.b32.xlu1 %v614_v1, %s3321_s26  ;;  %v3988_v1 = vld [vmem:[#allocation2 + $0x80] sm:$0xff] }
 0x120   : > { %v3910_v5 = vpop.permute.xlu0 %854  ;;  %v3912_v7 = vpop.permute.xlu1 %850 }
 0x122   : > { %1034 = vrot.lane.b32.xlu0 %v619_v2, %s3321_s26  ;;  %1028 = vrot.lane.b32.xlu1 %v616_v6, %s3321_s26  ;;  %v2101_v2 = vld [vmem:[#allocation9] sm:$0xff]  ;;  %v2102_v6 = vld [vmem:[#allocation9 + $0x8] sm:$0xff] }
 0x124   : > { %v3916_v9 = vpop.permute.xlu0 %858  ;;  %v3920_v16 = vpop.permute.xlu1 %852 }
 0x126   : > { %1102 = vrot.lane.b32.xlu0 %v3918_v14, %s3322_s13  ;;  %1032 = vrot.lane.b32.xlu1 %v618_v11, %s3321_s26  ;;  %v2969_v11 = vpack.c.bf16 %v2102_v6, %v2101_v2 }
 0x128   : > { %v3925_v17 = vpop.permute.xlu0 %862  ;;  %v3929_v21 = vpop.permute.xlu1 %856  ;;  %2970 = vmatprep.subr.bf16.mxu0 %v2969_v11  ;;  %2985 = vmatprep.subr.bf16.mxu1 %v2969_v11 }
 0x129   : > { %2972 = vmatpush3.bf16.msra.mxu0 %v2969_v11  ;;  %2990 = vmatpush3.bf16.msra.mxu1 %v2969_v11  ;;  %v2108_v11 = vld [vmem:[#allocation9 + $0x38] sm:$0xff] }
 0x12a   : > { %1106 = vrot.lane.b32.xlu0 %v3927_v20, %s3322_s13  ;;  %1036 = vrot.lane.b32.xlu1 %v620_v19, %s3321_s26  ;;  %s3205_s26 = scalar_lea.vmem %s4948_s23, 4096 }
 0x12b   : > { %p3206_p1 = scmp.ne.s32.totalorder %s4948_s23, %s3205_s26 }
 0x12c   : > { %v3934_v22 = vpop.permute.xlu0 %866  ;;  %v3938_v25 = vpop.permute.xlu1 %860 }
 0x12d   : > { %p3207_p4 = pnand %p3206_p1, %p3507_p6 }
 0x12e   : > { %1110 = vrot.lane.b32.xlu0 %v3936_v24, %s3322_s13  ;;  %1104 = vrot.lane.b32.xlu1 %v3940_v26, %s3322_s13 }
 0x12f   : > { %p3208_p8 = pneg %p3207_p4 }
 0x130   : > { %v3946_v27 = vpop.permute.xlu0 %870  ;;  %v3950_v30 = vpop.permute.xlu1 %864 }
 0x131   : > { %5061 = vst [vmem:[#allocation19_spill] sm:$0xff] %v3946_v27 }
 0x132   : > { %1114 = vrot.lane.b32.xlu0 %v3948_v28, %s3322_s13  ;;  %1108 = vrot.lane.b32.xlu1 %v3952_v31, %s3322_s13 }
 0x134   : > { %v3958_v32 = vpop.permute.xlu0 %874  ;;  %v3962_v36 = vpop.permute.xlu1 %868 }
 0x135   : > { %5062 = vst [vmem:[#allocation20_spill] sm:$0xff] %v3958_v32  ;;  %v2103_v32 = vld [vmem:[#allocation9 + $0x10] sm:$0xff] }
 0x136   : > { %1118 = vrot.lane.b32.xlu0 %v3960_v34, %s3322_s13  ;;  %1112 = vrot.lane.b32.xlu1 %v3964_v50, %s3322_s13 }
 0x138   : > { %v3970_v53 = vpop.permute.xlu0 %878  ;;  %v3974_v57 = vpop.permute.xlu1 %872 }
 0x139   : > { %5063 = vst [vmem:[#allocation21_spill] sm:$0xff] %v3970_v53  ;;  %5065 = vst [vmem:[#allocation23_spill] sm:$0xff] %v3974_v57 }
 0x13a   : > { %1122 = vrot.lane.b32.xlu0 %v3972_v55, %s3322_s13  ;;  %1116 = vrot.lane.b32.xlu1 %v3976_v58, %s3322_s13 }
 0x13c   : > { %v3982_v60 = vpop.permute.xlu0 %882  ;;  %v3986_v0 = vpop.permute.xlu1 %876 }
 0x13d   : > { %5066 = vst [vmem:[#allocation24_spill] sm:$0xff] %v3982_v60  ;;  %5068 = vst [vmem:[#allocation26_spill] sm:$0xff] %v3986_v0  ;;  %v3998_v60 = vld [vmem:[#allocation2 + $0x98] sm:$0xff]  ;;  %v2104_v0 = vld [vmem:[#allocation9 + $0x18] sm:$0xff] }
 0x13e   : > { %1126 = vrot.lane.b32.xlu0 %v3984_v61, %s3322_s13  ;;  %1120 = vrot.lane.b32.xlu1 %v3988_v1, %s3322_s13  ;;  %5071 = vst [vmem:[#allocation29_spill] sm:$0xff] %v3998_v60  ;;  %v2973_v27 = vpack.c.bf16 %v2104_v0, %v2103_v32 }
 0x140   : > { %v3994_v19 = vpop.permute.xlu0 %886  ;;  %v3996_v53 = vpop.permute.xlu1 %880  ;;  %2974 = vmatprep.subr.bf16.mxu0 %v2973_v27  ;;  %2986 = vmatprep.subr.bf16.mxu1 %v2973_v27 }
 0x141   : > { %5069 = vst [vmem:[#allocation27_spill] sm:$0xff] %v3994_v19  ;;  %5070 = vst [vmem:[#allocation28_spill] sm:$0xff] %v3996_v53  ;;  %2976 = vmatpush3.bf16.msra.mxu0 %v2973_v27  ;;  %v2106_v19 = vld [vmem:[#allocation9 + $0x28] sm:$0xff]  ;;  %2991 = vmatpush3.bf16.msra.mxu1 %v2973_v27 }
 0x142   : > { %1232 = vrot.lane.b32.xlu0 %v3731_v29, %s3323_s14  ;;  %1124 = vrot.lane.b32.xlu1 %v3998_v60, %s3322_s13  ;;  %v2105_v29 = vld [vmem:[#allocation9 + $0x20] sm:$0xff] }
 0x143   : > { %v2977_v53 = vpack.c.bf16 %v2106_v19, %v2105_v29  ;;  %v2109_v19 = vld [vmem:[#allocation9 + $0x40] sm:$0xff] }
 0x144   : > { %v4004_v2 = vpop.permute.xlu0 %890  ;;  %v4006_v6 = vpop.permute.xlu1 %884 }
 0x145   : > { %5072 = vst [vmem:[#allocation30_spill] sm:$0xff] %v4004_v2  ;;  %5073 = vst [vmem:[#allocation31_spill] sm:$0xff] %v4006_v6  ;;  %2978 = vmatprep.subr.bf16.mxu0 %v2977_v53  ;;  %2987 = vmatprep.subr.bf16.mxu1 %v2977_v53 }
 0x146   : > { %1360 = vrot.lane.b32.xlu0 %v3839_v38, %s3324_s11  ;;  %1230 = vrot.lane.b32.xlu1 %v3710_v18, %s3323_s14  ;;  %v2107_v38 = vld [vmem:[#allocation9 + $0x30] sm:$0xff] }
 0x147   : > { %2980 = vmatpush3.bf16.msra.mxu0 %v2977_v53  ;;  %v2981_v2 = vpack.c.bf16 %v2108_v11, %v2107_v38  ;;  %2992 = vmatpush3.bf16.msra.mxu1 %v2977_v53 }
 0x148   : > { %v4012_v32 = vpop.permute.xlu0 %894  ;;  %v4014_v0 = vpop.permute.xlu1 %888 }
 0x149   : > { %5074 = vst [vmem:[#allocation32_spill] sm:$0xff] %v4012_v32  ;;  %5075 = vst [vmem:[#allocation33_spill] sm:$0xff] %v4014_v0  ;;  %2982 = vmatprep.subr.bf16.mxu0 %v2981_v2  ;;  %2988 = vmatprep.subr.bf16.mxu1 %v2981_v2 }
 0x14a   : > { %1488 = vrot.lane.b32.xlu0 %v3952_v31, %s3325_s30  ;;  %1358 = vrot.lane.b32.xlu1 %v3827_v33, %s3324_s11 }
 0x14b   : > { %2984 = vmatpush3.bf16.msra.mxu0 %v2981_v2  ;;  %2993 = vmatpush3.bf16.msra.mxu1 %v2981_v2 }
 0x14c   : > { %v4020_v18 = vpop.permute.xlu0 %898  ;;  %v4022_v27 = vpop.permute.xlu1 %892  ;;  %2919 = vmatprep.subr.mxu0 %v2109_v19  ;;  %2989 = vmatprep.subr.mxu1 %v2109_v19 }
 0x14d   : > { %5076 = vst [vmem:[#allocation34_spill] sm:$0xff] %v4020_v18  ;;  %5077 = vst [vmem:[#allocation35_spill] sm:$0xff] %v4022_v27 }
 0x14e   : > { %1234 = vrot.lane.b32.xlu0 %v3704_v13, %s3323_s14  ;;  %1486 = vrot.lane.b32.xlu1 %v3927_v20, %s3325_s30 }
 0x14f   : > { %2920 = vmatpush3.msra.mxu0 %v2109_v19  ;;  %2994 = vmatpush3.msra.mxu1 %v2109_v19 }
 0x150   : > { %v4028_v29 = vpop.permute.xlu0 %902  ;;  %v4030_v33 = vpop.permute.xlu1 %896 }
 0x151   : > { %5078 = vst [vmem:[#allocation36_spill] sm:$0xff] %v4028_v29  ;;  %5079 = vst [vmem:[#allocation37_spill] sm:$0xff] %v4030_v33 }
 0x152   : > { %1742 = vrot.lane.b32.xlu0 %v3832_v35, %s3326_s28  ;;  %1614 = vrot.lane.b32.xlu1 %v3704_v13, %s3327_s10 }
 0x154   : > { %v4036_v53 = vpop.permute.xlu0 %906  ;;  %v4038_v38 = vpop.permute.xlu1 %900 }
 0x155   : > { %5080 = vst [vmem:[#allocation38_spill] sm:$0xff] %v4036_v53  ;;  %5081 = vst [vmem:[#allocation39_spill] sm:$0xff] %v4038_v38 }
 0x156   : > { %1362 = vrot.lane.b32.xlu0 %v3832_v35, %s3324_s11  ;;  %1616 = vrot.lane.b32.xlu1 %v3754_v52, %s3327_s10 }
 0x158   : > { %v4044_v2 = vpop.permute.xlu0 %974  ;;  %v4046_v11 = vpop.permute.xlu1 %904 }
 0x159   : > { %5082 = vst [vmem:[#allocation40_spill] sm:$0xff] %v4046_v11 }
 0x15a   : > { %1364 = vrot.lane.b32.xlu0 %v3847_v40, %s3324_s11  ;;  %1236 = vrot.lane.b32.xlu1 %v3754_v52, %s3323_s14 }
 0x15c   : > { %v4052_v13 = vpop.permute.xlu0 %978  ;;  %v4054_v19 = vpop.permute.xlu1 %908 }
 0x15d   : > { %5083 = vst [vmem:[#allocation41_spill] sm:$0xff] %v4054_v19 }
 0x15e   : > { %1492 = vrot.lane.b32.xlu0 %v3964_v50, %s3325_s30  ;;  %1744 = vrot.lane.b32.xlu1 %v3847_v40, %s3326_s28 }
 0x160   : > { %v4060_v35 = vpop.permute.xlu0 %982  ;;  %v4062_v53 = vpop.permute.xlu1 %976 }
 0x162   : > { %1238 = vrot.lane.b32.xlu0 %v3721_v23, %s3323_s14  ;;  %1490 = vrot.lane.b32.xlu1 %v3936_v24, %s3325_s30 }
 0x164   : > { %v4068_v52 = vpop.permute.xlu0 %986  ;;  %v4070_v11 = vpop.permute.xlu1 %980 }
 0x166   : > { %1746 = vrot.lane.b32.xlu0 %v3837_v37, %s3326_s28  ;;  %1618 = vrot.lane.b32.xlu1 %v3721_v23, %s3327_s10 }
 0x168   : > { %v4076_v40 = vpop.permute.xlu0 %990  ;;  %v4078_v19 = vpop.permute.xlu1 %984 }
 0x16a   : > { %1366 = vrot.lane.b32.xlu0 %v3837_v37, %s3324_s11  ;;  %1620 = vrot.lane.b32.xlu1 %v3778_v4, %s3327_s10 }
 0x16c   : > { %v4084_v29 = vpop.permute.xlu0 %994  ;;  %v4086_v18 = vpop.permute.xlu1 %988 }
 0x16e   : > { %1368 = vrot.lane.b32.xlu0 %v3855_v42, %s3324_s11  ;;  %1240 = vrot.lane.b32.xlu1 %v3778_v4, %s3323_s14 }
 0x170   : > { %v4092_v23 = vpop.permute.xlu0 %998  ;;  %v4094_v38 = vpop.permute.xlu1 %992 }
 0x171   : > { %5084 = vst [vmem:[#allocation42_spill] sm:$0xff] %v4092_v23 }
 0x172   : > { %1496 = vrot.lane.b32.xlu0 %v3976_v58, %s3325_s30  ;;  %1748 = vrot.lane.b32.xlu1 %v3855_v42, %s3326_s28 }
 0x174   : > { %v4100_v37 = vpop.permute.xlu0 %1002  ;;  %v4102_v32 = vpop.permute.xlu1 %996 }
 0x175   : > { %5085 = vst [vmem:[#allocation43_spill] sm:$0xff] %v4100_v37 }
 0x176   : > { %1242 = vrot.lane.b32.xlu0 %v3750_v47, %s3323_s14  ;;  %1494 = vrot.lane.b32.xlu1 %v3948_v28, %s3325_s30 }
 0x178   : > { %v4108_v4 = vpop.permute.xlu0 %1006  ;;  %v4110_v33 = vpop.permute.xlu1 %1000 }
 0x179   : > { %5086 = vst [vmem:[#allocation44_spill] sm:$0xff] %v4108_v4  ;;  %5087 = vst [vmem:[#allocation45_spill] sm:$0xff] %v4110_v33 }
 0x17a   : > { %1750 = vrot.lane.b32.xlu0 %v3845_v39, %s3326_s28  ;;  %1622 = vrot.lane.b32.xlu1 %v3750_v47, %s3327_s10 }
 0x17c   : > { %v4116_v42 = vpop.permute.xlu0 %1010  ;;  %v4118_v27 = vpop.permute.xlu1 %1004 }
 0x17d   : > { %5088 = vst [vmem:[#allocation46_spill] sm:$0xff] %v4116_v42  ;;  %5089 = vst [vmem:[#allocation47_spill] sm:$0xff] %v4118_v27 }
 0x17e   : > { %1370 = vrot.lane.b32.xlu0 %v3845_v39, %s3324_s11  ;;  %1624 = vrot.lane.b32.xlu1 %v3792_v8, %s3327_s10 }
 0x180   : > { %v4124_v0 = vpop.permute.xlu0 %1014  ;;  %v4126_v6 = vpop.permute.xlu1 %1008 }
 0x181   : > { %5090 = vst [vmem:[#allocation48_spill] sm:$0xff] %v4124_v0  ;;  %5091 = vst [vmem:[#allocation49_spill] sm:$0xff] %v4126_v6  ;;  %v760_v6 = vld [vmem:[#allocation2 + $0xa9] sm:$0xff] }
 0x182   : > { %1372 = vrot.lane.b32.xlu0 %v3863_v44, %s3324_s11  ;;  %1244 = vrot.lane.b32.xlu1 %v3792_v8, %s3323_s14 }
 0x184   : > { %v4132_v47 = vpop.permute.xlu0 %1018  ;;  %v4134_v42 = vpop.permute.xlu1 %1012 }
 0x185   : > { %5092 = vst [vmem:[#allocation50_spill] sm:$0xff] %v4132_v47  ;;  %5093 = vst [vmem:[#allocation51_spill] sm:$0xff] %v4134_v42 }
 0x186   : > { %1500 = vrot.lane.b32.xlu0 %v3988_v1, %s3325_s30  ;;  %1752 = vrot.lane.b32.xlu1 %v3863_v44, %s3326_s28 }
 0x188   : > { %v4140_v39 = vpop.permute.xlu0 %1022  ;;  %v4142_v0 = vpop.permute.xlu1 %1016 }
 0x189   : > { %5094 = vst [vmem:[#allocation52_spill] sm:$0xff] %v4140_v39  ;;  %5095 = vst [vmem:[#allocation53_spill] sm:$0xff] %v4142_v0 }
 0x18a   : > { %1246 = vrot.lane.b32.xlu0 %v3775_v63, %s3323_s14  ;;  %1498 = vrot.lane.b32.xlu1 %v3960_v34, %s3325_s30 }
 0x18c   : > { %v4148_v8 = vpop.permute.xlu0 %1026  ;;  %v4150_v47 = vpop.permute.xlu1 %1020 }
 0x18d   : > { %5096 = vst [vmem:[#allocation54_spill] sm:$0xff] %v4148_v8  ;;  %5097 = vst [vmem:[#allocation55_spill] sm:$0xff] %v4150_v47  ;;  %v4212_v47 = vld [vmem:[#allocation2 + $0xb0] sm:$0xff] }
 0x18e   : > { %1754 = vrot.lane.b32.xlu0 %v3853_v41, %s3326_s28  ;;  %1626 = vrot.lane.b32.xlu1 %v3775_v63, %s3327_s10  ;;  %5104 = vst [vmem:[#allocation62_spill] sm:$0xff] %v4212_v47 }
 0x190   : > { %v4156_v44 = vpop.permute.xlu0 %1030  ;;  %v4158_v39 = vpop.permute.xlu1 %1024 }
 0x191   : > { %5098 = vst [vmem:[#allocation56_spill] sm:$0xff] %v4156_v44  ;;  %5099 = vst [vmem:[#allocation57_spill] sm:$0xff] %v4158_v39 }
 0x192   : > { %1374 = vrot.lane.b32.xlu0 %v3853_v41, %s3324_s11  ;;  %1628 = vrot.lane.b32.xlu1 %v3798_v10, %s3327_s10 }
 0x194   : > { %v4164_v0 = vpop.permute.xlu0 %1034  ;;  %v4166_v8 = vpop.permute.xlu1 %1028 }
 0x195   : > { %5100 = vst [vmem:[#allocation58_spill] sm:$0xff] %v4164_v0  ;;  %5101 = vst [vmem:[#allocation59_spill] sm:$0xff] %v4166_v8 }
 0x196   : > { %1376 = vrot.lane.b32.xlu0 %v3871_v46, %s3324_s11  ;;  %1248 = vrot.lane.b32.xlu1 %v3798_v10, %s3323_s14 }
 0x198   : > { %v1103_v63 = vpop.permute.xlu0 %1102  ;;  %v4172_v44 = vpop.permute.xlu1 %1032 }
 0x199   : > { %5102 = vst [vmem:[#allocation60_spill] sm:$0xff] %v4172_v44 }
 0x19a   : > { %1504 = vrot.lane.b32.xlu0 %v3998_v60, %s3325_s30  ;;  %1756 = vrot.lane.b32.xlu1 %v3871_v46, %s3326_s28 }
 0x19c   : > { %v4178_v41 = vpop.permute.xlu0 %1106  ;;  %v4180_v0 = vpop.permute.xlu1 %1036 }
 0x19d   : > { %5103 = vst [vmem:[#allocation61_spill] sm:$0xff] %v4180_v0 }
 0x19e   : > { %1250 = vrot.lane.b32.xlu0 %v3789_v3, %s3323_s14  ;;  %1502 = vrot.lane.b32.xlu1 %v3972_v55, %s3325_s30  ;;  %v4242_v55 = vld [vmem:[#allocation2 + $0xc0] sm:$0xff] }
 0x19f   : > { %5106 = vst [vmem:[#allocation64_spill] sm:$0xff] %v4242_v55 }
 0x1a0   : > { %v4186_v10 = vpop.permute.xlu0 %1110  ;;  %v4188_v8 = vpop.permute.xlu1 %1104 }
 0x1a2   : > { %1758 = vrot.lane.b32.xlu0 %v3861_v43, %s3326_s28  ;;  %1630 = vrot.lane.b32.xlu1 %v3789_v3, %s3327_s10 }
 0x1a4   : > { %v4194_v46 = vpop.permute.xlu0 %1114  ;;  %v4196_v44 = vpop.permute.xlu1 %1108 }
 0x1a6   : > { %1378 = vrot.lane.b32.xlu0 %v3861_v43, %s3324_s11  ;;  %1632 = vrot.lane.b32.xlu1 %v3803_v12, %s3327_s10 }
 0x1a8   : > { %v4202_v0 = vpop.permute.xlu0 %1118  ;;  %v4204_v39 = vpop.permute.xlu1 %1112 }
 0x1aa   : > { %1380 = vrot.lane.b32.xlu0 %v3879_v49, %s3324_s11  ;;  %1252 = vrot.lane.b32.xlu1 %v3803_v12, %s3323_s14 }
 0x1ac   : > { %v4210_v3 = vpop.permute.xlu0 %1122  ;;  %v4214_v42 = vpop.permute.xlu1 %1116 }
 0x1ae   : > { %1508 = vrot.lane.b32.xlu0 %v4212_v47, %s3325_s30  ;;  %1760 = vrot.lane.b32.xlu1 %v3879_v49, %s3326_s28 }
 0x1b0   : > { %v4220_v43 = vpop.permute.xlu0 %1126  ;;  %v4222_v4 = vpop.permute.xlu1 %1120 }
 0x1b1   : > { %5105 = vst [vmem:[#allocation63_spill] sm:$0xff] %v4220_v43  ;;  %v525_v43 = vld [vmem:[#allocation2] sm:$0xff] }
 0x1b2   : > { %1128 = vrot.lane.b32.xlu0 %v4212_v47, %s3322_s13  ;;  %1506 = vrot.lane.b32.xlu1 %v3984_v61, %s3325_s30  ;;  %v1838_v61 = vsel %vm436_vm0, %v525_v43, %v3900_v59 }
 0x1b4   : > { %v1233_v12 = vpop.permute.xlu0 %1232  ;;  %v4228_v37 = vpop.permute.xlu1 %1124 }
 0x1b6   : > { %1636 = vrot.lane.b32.xlu0 %v3808_v15, %s3327_s10  ;;  %1634 = vrot.lane.b32.xlu1 %v760_v6, %s3327_s10 }
 0x1b8   : > { %v1361_v49 = vpop.permute.xlu0 %1360  ;;  %v1231_v27 = vpop.permute.xlu1 %1230 }
 0x1ba   : > { %1256 = vrot.lane.b32.xlu0 %v3808_v15, %s3323_s14  ;;  %1254 = vrot.lane.b32.xlu1 %v760_v6, %s3323_s14  ;;  %v1871_v15 = vsel %vm1870_vm2, %v1838_v61, %v4044_v2  ;;  %v4253_v61 = vld [vmem:[#allocation2 + $0xc8] sm:$0xff] }
 0x1bb   : > { %v1904_v60 = vsel %vm1903_vm3, %v1871_v15, %v1103_v63 }
 0x1bc   : > { %v1489_v47 = vpop.permute.xlu0 %1488  ;;  %v1359_v23 = vpop.permute.xlu1 %1358  ;;  %v1937_v57 = vsel %vm1936_vm4, %v1904_v60, %v1231_v27  ;;  %v526_v60 = vld [vmem:[#allocation2 + $0x8] sm:$0xff] }
 0x1bd   : > { %v1970_v59 = vsel %vm1969_vm5, %v1937_v57, %v1359_v23  ;;  %v1839_v23 = vsel %vm436_vm0, %v526_v60, %v3905_v62 }
 0x1be   : > { %1764 = vrot.lane.b32.xlu0 %v3885_v51, %s3326_s28  ;;  %1762 = vrot.lane.b32.xlu1 %v3869_v45, %s3326_s28 }
 0x1c0   : > { %v1235_v33 = vpop.permute.xlu0 %1234  ;;  %v1487_v6 = vpop.permute.xlu1 %1486 }
 0x1c1   : > { %v2003_v2 = vsel %vm2002_vm7, %v1970_v59, %v1487_v6  ;;  %v763_v6 = vld [vmem:[#allocation2 + $0xc9] sm:$0xff] }
 0x1c2   : > { %1510 = vrot.lane.b32.xlu0 %v4242_v55, %s3325_s30  ;;  %1382 = vrot.lane.b32.xlu1 %v3869_v45, %s3324_s11 }
 0x1c4   : > { %v1743_v43 = vpop.permute.xlu0 %1742  ;;  %v1615_v63 = vpop.permute.xlu1 %1614 }
 0x1c5   : > { %v2036_v15 = vsel %vm2035_vm6, %v2003_v2, %v1615_v63 }
 0x1c6   : > { %1512 = vrot.lane.b32.xlu0 %v4253_v61, %s3325_s30  ;;  %1384 = vrot.lane.b32.xlu1 %v3885_v51, %s3324_s11  ;;  %v2069_v45 = vsel %vm2068_vm8, %v2036_v15, %v1743_v43  ;;  %v1872_v51 = vsel %vm1870_vm2, %v1839_v23, %v4062_v53  ;;  %v762_v43 = vld [vmem:[#allocation2 + $0xc1] sm:$0xff] }
 0x1c7   : > { %2921 = vmatprep.mubr.msk.f32.mxu0 %vm2110_vm9, %v2069_v45  ;;  %v1905_v2 = vsel %vm1903_vm3, %v1872_v51, %v4188_v8  ;;  %v1840_v8 = vsel %vm436_vm0, %v3918_v14, %v3912_v7  ;;  %v4296_v7 = vld [vmem:[#allocation2 + $0xd8] sm:$0xff] }
 0x1c8   : > { %v1363_v57 = vpop.permute.xlu0 %1362  ;;  %v1617_v27 = vpop.permute.xlu1 %1616  ;;  %v1938_v15 = vsel %vm1936_vm4, %v1905_v2, %v1233_v12  ;;  %v4309_v2 = vld [vmem:[#allocation2 + $0xe0] sm:$0xff] }
 0x1c9   : > { %v1971_v45 = vsel %vm1969_vm5, %v1938_v15, %v1361_v49 }
 0x1ca   : > { %1132 = vrot.lane.b32.xlu0 %v4253_v61, %s3322_s13  ;;  %1130 = vrot.lane.b32.xlu1 %v4242_v55, %s3322_s13  ;;  %v2004_v62 = vsel %vm2002_vm7, %v1971_v45, %v1489_v47  ;;  %v1873_v47 = vsel %vm1870_vm2, %v1840_v8, %v4052_v13 }
 0x1cb   : > { %v2037_v55 = vsel %vm2035_vm6, %v2004_v62, %v1617_v27  ;;  %v1906_v27 = vsel %vm1903_vm3, %v1873_v47, %v4178_v41 }
 0x1cc   : > { %v1365_v59 = vpop.permute.xlu0 %1364  ;;  %v1237_v63 = vpop.permute.xlu1 %1236 }
 0x1ce   : > { %1640 = vrot.lane.b32.xlu0 %v763_v6, %s3327_s10  ;;  %1638 = vrot.lane.b32.xlu1 %v762_v43, %s3327_s10 }
 0x1d0   : > { %v1493_v60 = vpop.permute.xlu0 %1492  ;;  %v1745_v53 = vpop.permute.xlu1 %1744 }
 0x1d1   : > { %v2070_v23 = vsel %vm2068_vm8, %v2037_v55, %v1745_v53  ;;  %v1939_v55 = vsel %vm1936_vm4, %v1906_v27, %v1235_v33 }
 0x1d2   : > { %1260 = vrot.lane.b32.xlu0 %v763_v6, %s3323_s14  ;;  %1258 = vrot.lane.b32.xlu1 %v762_v43, %s3323_s14  ;;  %v1972_v6 = vsel %vm1969_vm5, %v1939_v55, %v1363_v57  ;;  %v1841_v57 = vsel %vm436_vm0, %v3940_v26, %v3920_v16  ;;  %v765_v26 = vld [vmem:[#allocation2 + $0xe1] sm:$0xff] }
 0x1d3   : > { %2922 = vmatmul.mubr.msk.f32.vlgmr.msra.gmra.mrb[0].mxu0 %vm2110_vm9, %v2070_v23  ;;  %v1874_v45 = vsel %vm1870_vm2, %v1841_v57, %v4070_v11 }
 0x1d4   : > { %v1239_v12 = vpop.permute.xlu0 %1238  ;;  %v1491_v49 = vpop.permute.xlu1 %1490 }
 0x1d5   : > { %v2005_v14 = vsel %vm2002_vm7, %v1972_v6, %v1491_v49 }
 0x1d6   : > { %1768 = vrot.lane.b32.xlu0 %v3890_v54, %s3326_s28  ;;  %1766 = vrot.lane.b32.xlu1 %v3877_v48, %s3326_s28 }
 0x1d8   : > { %v1747_v51 = vpop.permute.xlu0 %1746  ;;  %v1619_v13 = vpop.permute.xlu1 %1618 }
 0x1d9   : > { %v2038_v43 = vsel %vm2035_vm6, %v2005_v14, %v1619_v13  ;;  %v796_v13 = vld [vmem:[#allocation2 + $0xda] sm:$0xff] }
 0x1da   : > { %1514 = vrot.lane.b32.xlu0 %v4296_v7, %s3325_s30  ;;  %1386 = vrot.lane.b32.xlu1 %v3877_v48, %s3324_s11  ;;  %v2071_v33 = vsel %vm2068_vm8, %v2038_v43, %v1747_v51  ;;  %v1907_v48 = vsel %vm1903_vm3, %v1874_v45, %v4196_v44  ;;  %v764_v44 = vld [vmem:[#allocation2 + $0xd9] sm:$0xff] }
 0x1db   : > { %2924 = vmatprep.mubr.msk.f32.mxu0 %vm2110_vm9, %v2071_v33  ;;  %v1940_v62 = vsel %vm1936_vm4, %v1907_v48, %v1237_v63  ;;  %v4352_v33 = vld [vmem:[#allocation2 + $0xf0] sm:$0xff]  ;;  %v702_v48 = vld [vmem:[#allocation2 + $0xe2] sm:$0xff] }
 0x1dc   : > { %v1367_v41 = vpop.permute.xlu0 %1366  ;;  %v1621_v15 = vpop.permute.xlu1 %1620  ;;  %v1973_v16 = vsel %vm1969_vm5, %v1940_v62, %v1365_v59  ;;  %v1842_v59 = vsel %vm436_vm0, %v3927_v20, %v3910_v5 }
 0x1dd   : > { %v2006_v11 = vsel %vm2002_vm7, %v1973_v16, %v1493_v60  ;;  %v1875_v60 = vsel %vm1870_vm2, %v1842_v59, %v4060_v35  ;;  %v3089_v16 = vld [vmem:[#allocation6] ss:$0 sm:$0xff] }
 0x1de   : > { %1516 = vrot.lane.b32.xlu0 %v4309_v2, %s3325_s30  ;;  %1388 = vrot.lane.b32.xlu1 %v3890_v54, %s3324_s11  ;;  %v2039_v47 = vsel %vm2035_vm6, %v2006_v11, %v1621_v15  ;;  %v1908_v55 = vsel %vm1903_vm3, %v1875_v60, %v4186_v10 }
 0x1df   : > { %v1941_v6 = vsel %vm1936_vm4, %v1908_v55, %v1239_v12  ;;  %v1843_v12 = vsel %vm436_vm0, %v3952_v31, %v3929_v21  ;;  %v324_v21 = vld [vmem:[%s3564_s15 + $0xf0] sm:$0xff]  ;;  %v4363_v31 = vld [vmem:[#allocation2 + $0xf8] sm:$0xff]  ;;  %v1844_v55 = vsel %vm436_vm0, %v3936_v24, %v3916_v9 }
 0x1e0   : > { %v1369_v53 = vpop.permute.xlu0 %1368  ;;  %v1241_v23 = vpop.permute.xlu1 %1240  ;;  %v1974_v51 = vsel %vm1969_vm5, %v1941_v6, %v1367_v41  ;;  %v1876_v57 = vsel %vm1870_vm2, %v1843_v12, %v4078_v19 }
 0x1e2   : > { %1136 = vrot.lane.b32.xlu0 %v4309_v2, %s3322_s13  ;;  %1134 = vrot.lane.b32.xlu1 %v4296_v7, %s3322_s13 }
 0x1e4   : > { %v1497_v8 = vpop.permute.xlu0 %1496  ;;  %v1749_v54 = vpop.permute.xlu1 %1748 }
 0x1e5   : > { %v2072_v63 = vsel %vm2068_vm8, %v2039_v47, %v1749_v54  ;;  %v325_v47 = vld [vmem:[%s3564_s15 + $0xf8] sm:$0xff]  ;;  %s2638_s15 = scalar_lea.sflag [#allocation5], %s3558_s17 }
 0x1e6   : > { %1644 = vrot.lane.b32.xlu0 %v765_v26, %s3327_s10  ;;  %1642 = vrot.lane.b32.xlu1 %v764_v44, %s3327_s10  ;;  %v364_v60 = vmul.f32 %v3089_v16, %v325_v47 }
 0x1e7   : > { %2925 = vmatmul.mubr.msk.f32.gmra.mrb[2].mxu0 %vm2110_vm9, %v2072_v63 }
 0x1e8   : > { %v1243_v49 = vpop.permute.xlu0 %1242  ;;  %v1495_v27 = vpop.permute.xlu1 %1494 }
 0x1e9   : > { %v2007_v5 = vsel %vm2002_vm7, %v1974_v51, %v1495_v27  ;;  %v766_v51 = vld [vmem:[#allocation2 + $0xf1] sm:$0xff] }
 0x1ea   : > { %1264 = vrot.lane.b32.xlu0 %v765_v26, %s3323_s14  ;;  %1262 = vrot.lane.b32.xlu1 %v764_v44, %s3323_s14  ;;  %v363_v26 = vmul.f32 %v3089_v16, %v324_v21 }
 0x1ec   : > { %v1751_v14 = vpop.permute.xlu0 %1750  ;;  %v1623_v20 = vpop.permute.xlu1 %1622 }
 0x1ed   : > { %v2040_v43 = vsel %vm2035_vm6, %v2007_v5, %v1623_v20 }
 0x1ee   : > { %1772 = vrot.lane.b32.xlu0 %v3895_v56, %s3326_s28  ;;  %1770 = vrot.lane.b32.xlu1 %v796_v13, %s3326_s28  ;;  %v2073_v35 = vsel %vm2068_vm8, %v2040_v43, %v1751_v14  ;;  %v1909_v56 = vsel %vm1903_vm3, %v1876_v57, %v4204_v39  ;;  %v3090_v39 = vld [vmem:[#allocation8] ss:$0 sm:$0xff]  ;;  %v1877_v14 = vsel %vm1870_vm2, %v1844_v55, %v4068_v52 }
 0x1ef   : > { %2927 = vmatprep.mubr.msk.f32.mxu0 %vm2110_vm9, %v2073_v35  ;;  %v1942_v15 = vsel %vm1936_vm4, %v1909_v56, %v1241_v23  ;;  %v402_v11 = vadd.f32 %v3090_v39, %v363_v26  ;;  %v1910_v20 = vsel %vm1903_vm3, %v1877_v14, %v4194_v46  ;;  %v798_v57 = vld [vmem:[#allocation2 + $0xf2] sm:$0xff]  ;;  %v4407_v26 = vld [vmem:[#allocation2 + $0x108] sm:$0xff]  ;;  %v1847_v55 = vsel %vm436_vm0, %v3976_v58, %v3950_v30 }
 0x1f0   : > { %v1371_v10 = vpop.permute.xlu0 %1370  ;;  %v1625_v41 = vpop.permute.xlu1 %1624  ;;  %v1975_v19 = vsel %vm1969_vm5, %v1942_v15, %v1369_v53  ;;  %v767_v53 = vld [vmem:[#allocation2 + $0xf9] sm:$0xff]  ;;  %v1943_v43 = vsel %vm1936_vm4, %v1910_v20, %v1243_v49 }
 0x1f1   : > { %v2008_v44 = vsel %vm2002_vm7, %v1975_v19, %v1497_v8  ;;  %v434_v59 = vmax.f32 %v402_v11, 0.0  ;;  %v403_v8 = vadd.f32 %v3090_v39, %v364_v60  ;;  %v1976_v9 = vsel %vm1969_vm5, %v1943_v43, %v1371_v10  ;;  %v4414_v39 = vld [vmem:[#allocation2 + $0x110] sm:$0xff] }
 0x1f2   : > { %1518 = vrot.lane.b32.xlu0 %v4352_v33, %s3325_s30  ;;  %1390 = vrot.lane.b32.xlu1 %v796_v13, %s3324_s11  ;;  %v2041_v54 = vsel %vm2035_vm6, %v2008_v44, %v1625_v41  ;;  %v799_v41 = vld [vmem:[#allocation2 + $0xfa] sm:$0xff]  ;;  %v1845_v10 = vsel %vm436_vm0, %v3964_v50, %v3938_v25  ;;  %v768_v60 = vld [vmem:[#allocation2 + $0x109] sm:$0xff] }
 0x1f3   : > { %523 = vst.msk [vmem:[#allocation2 + $0x181] sm:$0xff] %vm436_vm0, %v434_v59  ;;  %v435_v5 = vmax.f32 %v403_v8, 0.0  ;;  %v1878_v15 = vsel %vm1870_vm2, %v1845_v10, %v4086_v18  ;;  %v769_v59 = vld [vmem:[#allocation2 + $0x111] sm:$0xff] }
 0x1f4   : > { %v1373_v45 = vpop.permute.xlu0 %1372  ;;  %v1245_v62 = vpop.permute.xlu1 %1244  ;;  %v800_v43 = vld [vmem:[#allocation2 + $0x10a] sm:$0xff] }
 0x1f5   : > { %524 = vst.msk [vmem:[#allocation2 + $0x189] sm:$0xff] %vm436_vm0, %v435_v5 }
 0x1f6   : > { %1520 = vrot.lane.b32.xlu0 %v4363_v31, %s3325_s30  ;;  %1392 = vrot.lane.b32.xlu1 %v702_v48, %s3324_s11  ;;  %v1911_v48 = vsel %vm1903_vm3, %v1878_v15, %v4214_v42 }
 0x1f7   : > { %v1944_v21 = vsel %vm1936_vm4, %v1911_v48, %v1245_v62  ;;  %v1848_v48 = vsel %vm436_vm0, %v3960_v34, %v3934_v22 }
 0x1f8   : > { %v1501_v23 = vpop.permute.xlu0 %1500  ;;  %v1753_v63 = vpop.permute.xlu1 %1752  ;;  %v1977_v25 = vsel %vm1969_vm5, %v1944_v21, %v1373_v45  ;;  %v1846_v45 = vsel %vm436_vm0, %v3948_v28, %v3925_v17 }
 0x1f9   : > { %v2074_v27 = vsel %vm2068_vm8, %v2041_v54, %v1753_v63  ;;  %v2010_v50 = vsel %vm2002_vm7, %v1977_v25, %v1501_v23  ;;  %v1879_v23 = vsel %vm1870_vm2, %v1846_v45, %v4076_v40 }
 0x1fa   : > { %1140 = vrot.lane.b32.xlu0 %v4363_v31, %s3322_s13  ;;  %1138 = vrot.lane.b32.xlu1 %v4352_v33, %s3322_s13  ;;  %v1912_v54 = vsel %vm1903_vm3, %v1879_v23, %v4202_v0 }
 0x1fb   : > { %2928 = vmatmul.mubr.msk.f32.gmra.mrb[4].mxu0 %vm2110_vm9, %v2074_v27 }
 0x1fc   : > { %v1247_v6 = vpop.permute.xlu0 %1246  ;;  %v1499_v13 = vpop.permute.xlu1 %1498 }
 0x1fd   : > { %v2009_v35 = vsel %vm2002_vm7, %v1976_v9, %v1499_v13  ;;  %v1945_v63 = vsel %vm1936_vm4, %v1912_v54, %v1247_v6  ;;  %v801_v13 = vld [vmem:[#allocation2 + $0x112] sm:$0xff] }
 0x1fe   : > { %1648 = vrot.lane.b32.xlu0 %v767_v53, %s3327_s10  ;;  %1646 = vrot.lane.b32.xlu1 %v766_v51, %s3327_s10 }
 0x200   : > { %v1755_v24 = vpop.permute.xlu0 %1754  ;;  %v1627_v12 = vpop.permute.xlu1 %1626 }
 0x201   : > { %v2042_v52 = vsel %vm2035_vm6, %v2009_v35, %v1627_v12 }
 0x202   : > { %1268 = vrot.lane.b32.xlu0 %v767_v53, %s3323_s14  ;;  %1266 = vrot.lane.b32.xlu1 %v766_v51, %s3323_s14  ;;  %v2075_v46 = vsel %vm2068_vm8, %v2042_v52, %v1755_v24  ;;  %v1880_v51 = vsel %vm1870_vm2, %v1847_v55, %v4094_v38  ;;  %v4457_v24 = vld [vmem:[#allocation2 + $0x120] sm:$0xff] }
 0x203   : > { %2930 = vmatprep.mubr.msk.f32.mxu0 %vm2110_vm9, %v2075_v46  ;;  %v1913_v14 = vsel %vm1903_vm3, %v1880_v51, %v4222_v4  ;;  %v4465_v46 = vld [vmem:[#allocation2 + $0x128] sm:$0xff]  ;;  %v5110_v51 = vld [vmem:[#allocation22_spill] sm:$0xff] }
 0x204   : > { %v1375_v49 = vpop.permute.xlu0 %1374  ;;  %v1629_v56 = vpop.permute.xlu1 %1628 }
 0x205   : > { %v2043_v42 = vsel %vm2035_vm6, %v2010_v50, %v1629_v56  ;;  %v1978_v17 = vsel %vm1969_vm5, %v1945_v63, %v1375_v49  ;;  %v1849_v49 = vsel %vm436_vm0, %v3988_v1, %v3962_v36  ;;  %v771_v36 = vld [vmem:[#allocation2 + $0x129] sm:$0xff]  ;;  %v1881_v1 = vsel %vm1870_vm2, %v1848_v48, %v4084_v29  ;;  %v740_v63 = vld [vmem:[#allocation2 + $0x138] sm:$0xff] }
 0x206   : > { %1776 = vrot.lane.b32.xlu0 %v799_v41, %s3326_s28  ;;  %1774 = vrot.lane.b32.xlu1 %v798_v57, %s3326_s28  ;;  %v1882_v10 = vsel %vm1870_vm2, %v1849_v49, %v4102_v32 }
 0x207   : > { %v1915_v15 = vsel %vm1903_vm3, %v1882_v10, %v4228_v37  ;;  %v1914_v37 = vsel %vm1903_vm3, %v1881_v1, %v4210_v3 }
 0x208   : > { %v1377_v16 = vpop.permute.xlu0 %1376  ;;  %v1249_v19 = vpop.permute.xlu1 %1248 }
 0x209   : > { %v1946_v5 = vsel %vm1936_vm4, %v1913_v14, %v1249_v19 }
 0x20a   : > { %1522 = vrot.lane.b32.xlu0 %v4407_v26, %s3325_s30  ;;  %1394 = vrot.lane.b32.xlu1 %v798_v57, %s3324_s11  ;;  %v1979_v30 = vsel %vm1969_vm5, %v1946_v5, %v1377_v16  ;;  %v770_v16 = vld [vmem:[#allocation2 + $0x121] sm:$0xff] }
 0x20c   : > { %v1505_v18 = vpop.permute.xlu0 %1504  ;;  %v1757_v11 = vpop.permute.xlu1 %1756 }
 0x20d   : > { %v2076_v62 = vsel %vm2068_vm8, %v2043_v42, %v1757_v11  ;;  %v2012_v58 = vsel %vm2002_vm7, %v1979_v30, %v1505_v18 }
 0x20e   : > { %1524 = vrot.lane.b32.xlu0 %v4414_v39, %s3325_s30  ;;  %1396 = vrot.lane.b32.xlu1 %v799_v41, %s3324_s11 }
 0x20f   : > { %2931 = vmatmul.mubr.msk.f32.gmra.mrb[6].mxu0 %vm2110_vm9, %v2076_v62 }
 0x210   : > { %v4425_v44 = vpop.permute.xlu0 %1250  ;;  %v1503_v47 = vpop.permute.xlu1 %1502 }
 0x211   : > { %v2011_v27 = vsel %vm2002_vm7, %v1978_v17, %v1503_v47  ;;  %v1947_v25 = vsel %vm1936_vm4, %v1914_v37, %v4425_v44  ;;  %v803_v44 = vld [vmem:[#allocation2 + $0x12a] sm:$0xff]  ;;  %v802_v47 = vld [vmem:[#allocation2 + $0x122] sm:$0xff] }
 0x212   : > { %1144 = vrot.lane.b32.xlu0 %v4414_v39, %s3322_s13  ;;  %1142 = vrot.lane.b32.xlu1 %v4407_v26, %s3322_s13  ;;  %v805_v37 = vld [vmem:[#allocation2 + $0x142] sm:$0xff] }
 0x214   : > { %v1759_v28 = vpop.permute.xlu0 %1758  ;;  %v1631_v40 = vpop.permute.xlu1 %1630 }
 0x215   : > { %v2044_v53 = vsel %vm2035_vm6, %v2011_v27, %v1631_v40  ;;  %v646_v40 = vld [vmem:[#allocation2 + $0x140] sm:$0xff] }
 0x216   : > { %1652 = vrot.lane.b32.xlu0 %v769_v59, %s3327_s10  ;;  %1650 = vrot.lane.b32.xlu1 %v768_v60, %s3327_s10  ;;  %v2077_v0 = vsel %vm2068_vm8, %v2044_v53, %v1759_v28  ;;  %v5107_v53 = vld [vmem:[#allocation23_spill] sm:$0xff] }
 0x217   : > { %2933 = vmatprep.mubr.msk.f32.mxu0 %vm2110_vm9, %v2077_v0  ;;  %v5108_v0 = vld [vmem:[#allocation29_spill] sm:$0xff] }
 0x218   : > { %v1379_v8 = vpop.permute.xlu0 %1378  ;;  %v1633_v6 = vpop.permute.xlu1 %1632 }
 0x219   : > { %v2045_v4 = vsel %vm2035_vm6, %v2012_v58, %v1633_v6  ;;  %v1980_v34 = vsel %vm1969_vm5, %v1947_v25, %v1379_v8  ;;  %v1851_v8 = vsel %vm436_vm0, %v5108_v0, %v5107_v53  ;;  %v5109_v6 = vld [vmem:[#allocation19_spill] sm:$0xff] }
 0x21a   : > { %1272 = vrot.lane.b32.xlu0 %v769_v59, %s3323_s14  ;;  %1270 = vrot.lane.b32.xlu1 %v768_v60, %s3323_s14  ;;  %v4509_v60 = vld [vmem:[#allocation2 + $0x140] sm:$0xff]  ;;  %v1850_v14 = vsel %vm436_vm0, %v5110_v51, %v5109_v6 }
 0x21b   : > { %v5113_v58 = vld [vmem:[#allocation63_spill] sm:$0xff] }
 0x21c   : > { %v1381_v20 = vpop.permute.xlu0 %1380  ;;  %v1253_v9 = vpop.permute.xlu1 %1252  ;;  %v804_v25 = vld [vmem:[#allocation2 + $0x13a] sm:$0xff] }
 0x21d   : > { %v1948_v21 = vsel %vm1936_vm4, %v1915_v15, %v1253_v9  ;;  %v775_v6 = vld [vmem:[#allocation2 + $0x159] sm:$0xff] }
 0x21e   : > { %1780 = vrot.lane.b32.xlu0 %v801_v13, %s3326_s28  ;;  %1778 = vrot.lane.b32.xlu1 %v800_v43, %s3326_s28  ;;  %v1981_v22 = vsel %vm1969_vm5, %v1948_v21, %v1381_v20 }
 0x220   : > { %v1509_v38 = vpop.permute.xlu0 %1508  ;;  %v1761_v35 = vpop.permute.xlu1 %1760 }
 0x221   : > { %v2078_v12 = vsel %vm2068_vm8, %v2045_v4, %v1761_v35  ;;  %v2014_v50 = vsel %vm2002_vm7, %v1981_v22, %v1509_v38  ;;  %v773_v35 = vld [vmem:[#allocation2 + $0x141] sm:$0xff] }
 0x222   : > { %1526 = vrot.lane.b32.xlu0 %v4457_v24, %s3325_s30  ;;  %1398 = vrot.lane.b32.xlu1 %v800_v43, %s3324_s11  ;;  %v5112_v43 = vld [vmem:[#allocation42_spill] sm:$0xff] }
 0x223   : > { %2934 = vmatmul.mubr.msk.f32.gmra.mrb[8].mxu0 %vm2110_vm9, %v2078_v12  ;;  %v1883_v9 = vsel %vm1870_vm2, %v1850_v14, %v5112_v43 }
 0x224   : > { %v1129_v52 = vpop.permute.xlu0 %1128  ;;  %v1507_v41 = vpop.permute.xlu1 %1506  ;;  %v1916_v38 = vsel %vm1903_vm3, %v1883_v9, %v5113_v58 }
 0x225   : > { %v2013_v29 = vsel %vm2002_vm7, %v1980_v34, %v1507_v41  ;;  %v742_v34 = vld [vmem:[#allocation2 + $0x150] sm:$0xff] }
 0x226   : > { %1528 = vrot.lane.b32.xlu0 %v4465_v46, %s3325_s30  ;;  %1400 = vrot.lane.b32.xlu1 %v801_v13, %s3324_s11  ;;  %v5111_v13 = vld [vmem:[#allocation45_spill] sm:$0xff] }
 0x227   : > { %v1884_v5 = vsel %vm1870_vm2, %v1851_v8, %v5111_v13 }
 0x228   : > { %v1637_v57 = vpop.permute.xlu0 %1636  ;;  %v1635_v56 = vpop.permute.xlu1 %1634  ;;  %v1917_v30 = vsel %vm1903_vm3, %v1884_v5, %v1129_v52  ;;  %v774_v5 = vld [vmem:[#allocation2 + $0x151] sm:$0xff] }
 0x229   : > { %v2047_v18 = vsel %vm2035_vm6, %v2014_v50, %v1637_v57  ;;  %v2046_v3 = vsel %vm2035_vm6, %v2013_v29, %v1635_v56  ;;  %v772_v57 = vld [vmem:[#allocation2 + $0x139] sm:$0xff] }
 0x22a   : > { %1148 = vrot.lane.b32.xlu0 %v4465_v46, %s3322_s13  ;;  %1146 = vrot.lane.b32.xlu1 %v4457_v24, %s3322_s13 }
 0x22c   : > { %v1257_v32 = vpop.permute.xlu0 %1256  ;;  %v1255_v19 = vpop.permute.xlu1 %1254 }
 0x22d   : > { %v1950_v4 = vsel %vm1936_vm4, %v1917_v30, %v1257_v32  ;;  %v1949_v12 = vsel %vm1936_vm4, %v1916_v38, %v1255_v19 }
 0x22e   : > { %1656 = vrot.lane.b32.xlu0 %v771_v36, %s3327_s10  ;;  %1654 = vrot.lane.b32.xlu1 %v770_v16, %s3327_s10 }
 0x230   : > { %v1765_v42 = vpop.permute.xlu0 %1764  ;;  %v1763_v62 = vpop.permute.xlu1 %1762 }
 0x231   : > { %v2080_v11 = vsel %vm2068_vm8, %v2047_v18, %v1765_v42  ;;  %v2079_v45 = vsel %vm2068_vm8, %v2046_v3, %v1763_v62  ;;  %v743_v18 = vld [vmem:[#allocation2 + $0x158] sm:$0xff] }
 0x232   : > { %1276 = vrot.lane.b32.xlu0 %v771_v36, %s3323_s14  ;;  %1274 = vrot.lane.b32.xlu1 %v770_v16, %s3323_s14  ;;  %v5115_v62 = vld [vmem:[#allocation62_spill] sm:$0xff] }
 0x233   : > { %2936 = vmatprep.mubr.msk.f32.mxu0 %vm2110_vm9, %v2079_v45 }
 0x234   : > { %2937 = vmatmul.mubr.msk.f32.gmra.mrb[10].mxu0 %vm2110_vm9, %v2080_v11  ;;  %v1511_v23 = vpop.permute.xlu0 %1510  ;;  %v1383_v54 = vpop.permute.xlu1 %1382  ;;  %v5114_v11 = vld [vmem:[#allocation26_spill] sm:$0xff] }
 0x235   : > { %v1982_v10 = vsel %vm1969_vm5, %v1949_v12, %v1383_v54  ;;  %v1853_v45 = vsel %vm436_vm0, %v5115_v62, %v5114_v11  ;;  %v807_v12 = vld [vmem:[#allocation2 + $0x15a] sm:$0xff]  ;;  %v777_v62 = vld [vmem:[#allocation2 + $0x171] sm:$0xff] }
 0x236   : > { %1784 = vrot.lane.b32.xlu0 %v803_v44, %s3326_s28  ;;  %1782 = vrot.lane.b32.xlu1 %v802_v47, %s3326_s28  ;;  %v2015_v48 = vsel %vm2002_vm7, %v1982_v10, %v1511_v23  ;;  %v5116_v23 = vld [vmem:[#allocation20_spill] sm:$0xff] }
 0x237   : > { %v744_v10 = vld [vmem:[#allocation2 + $0x168] sm:$0xff] }
 0x238   : > { %v1513_v59 = vpop.permute.xlu0 %1512  ;;  %v1385_v17 = vpop.permute.xlu1 %1384 }
 0x239   : > { %v1983_v41 = vsel %vm1969_vm5, %v1950_v4, %v1385_v17 }
 0x23a   : > { %1530 = vrot.lane.b32.xlu0 %v740_v63, %s3325_s30  ;;  %1402 = vrot.lane.b32.xlu1 %v802_v47, %s3324_s11  ;;  %v2016_v52 = vsel %vm2002_vm7, %v1983_v41, %v1513_v59  ;;  %v5117_v47 = vld [vmem:[#allocation25_spill] sm:$0xff] }
 0x23b   : > { %v1852_v54 = vsel %vm436_vm0, %v5117_v47, %v5116_v23  ;;  %v776_v47 = vld [vmem:[#allocation2 + $0x169] sm:$0xff] }
 0x23c   : > { %v1133_v28 = vpop.permute.xlu0 %1132  ;;  %v1131_v27 = vpop.permute.xlu1 %1130 }
 0x23e   : > { %1532 = vrot.lane.b32.xlu0 %v4509_v60, %s3325_s30  ;;  %1404 = vrot.lane.b32.xlu1 %v803_v44, %s3324_s11 }
 0x240   : > { %v1641_v55 = vpop.permute.xlu0 %1640  ;;  %v1639_v20 = vpop.permute.xlu1 %1638 }
 0x241   : > { %v2049_v15 = vsel %vm2035_vm6, %v2016_v52, %v1641_v55  ;;  %v2048_v36 = vsel %vm2035_vm6, %v2015_v48, %v1639_v20 }
 0x242   : > { %1152 = vrot.lane.b32.xlu0 %v646_v40, %s3322_s13  ;;  %1150 = vrot.lane.b32.xlu1 %v740_v63, %s3322_s13  ;;  %v5118_v63 = vld [vmem:[#allocation47_spill] sm:$0xff] }
 0x243   : > { %v1886_v59 = vsel %vm1870_vm2, %v1853_v45, %v5118_v63  ;;  %v5119_v40 = vld [vmem:[#allocation43_spill] sm:$0xff] }
 0x244   : > { %v1261_v49 = vpop.permute.xlu0 %1260  ;;  %v1259_v56 = vpop.permute.xlu1 %1258  ;;  %v1885_v53 = vsel %vm1870_vm2, %v1852_v54, %v5119_v40  ;;  %v1919_v0 = vsel %vm1903_vm3, %v1886_v59, %v1133_v28 }
 0x245   : > { %v1918_v8 = vsel %vm1903_vm3, %v1885_v53, %v1131_v27  ;;  %v1952_v55 = vsel %vm1936_vm4, %v1919_v0, %v1261_v49  ;;  %v806_v49 = vld [vmem:[#allocation2 + $0x152] sm:$0xff] }
 0x246   : > { %1660 = vrot.lane.b32.xlu0 %v773_v35, %s3327_s10  ;;  %1658 = vrot.lane.b32.xlu1 %v772_v57, %s3327_s10  ;;  %v1951_v51 = vsel %vm1936_vm4, %v1918_v8, %v1259_v56 }
 0x248   : > { %v1769_v21 = vpop.permute.xlu0 %1768  ;;  %v1767_v32 = vpop.permute.xlu1 %1766 }
 0x249   : > { %v2082_v1 = vsel %vm2068_vm8, %v2049_v15, %v1769_v21  ;;  %v2081_v16 = vsel %vm2068_vm8, %v2048_v36, %v1767_v32  ;;  %v745_v15 = vld [vmem:[#allocation2 + $0x170] sm:$0xff]  ;;  %v5120_v36 = vld [vmem:[#allocation28_spill] sm:$0xff] }
 0x24a   : > { %1280 = vrot.lane.b32.xlu0 %v773_v35, %s3323_s14  ;;  %1278 = vrot.lane.b32.xlu1 %v772_v57, %s3323_s14 }
 0x24b   : > { %2939 = vmatprep.mubr.msk.f32.mxu0 %vm2110_vm9, %v2081_v16  ;;  %v5121_v16 = vld [vmem:[#allocation21_spill] sm:$0xff] }
 0x24c   : > { %2940 = vmatmul.mubr.msk.f32.gmra.mrb[12].mxu0 %vm2110_vm9, %v2082_v1  ;;  %v1515_v19 = vpop.permute.xlu0 %1514  ;;  %v1387_v22 = vpop.permute.xlu1 %1386  ;;  %v1855_v1 = vsel %vm436_vm0, %v4253_v61, %v5120_v36 }
 0x24d   : > { %v1984_v20 = vsel %vm1969_vm5, %v1951_v51, %v1387_v22  ;;  %v808_v51 = vld [vmem:[#allocation2 + $0x16a] sm:$0xff] }
 0x24e   : > { %1788 = vrot.lane.b32.xlu0 %v805_v37, %s3326_s28  ;;  %1786 = vrot.lane.b32.xlu1 %v804_v25, %s3326_s28  ;;  %v2017_v9 = vsel %vm2002_vm7, %v1984_v20, %v1515_v19 }
 0x250   : > { %v1517_v50 = vpop.permute.xlu0 %1516  ;;  %v1389_v29 = vpop.permute.xlu1 %1388 }
 0x251   : > { %v1985_v14 = vsel %vm1969_vm5, %v1952_v55, %v1389_v29  ;;  %v809_v55 = vld [vmem:[#allocation2 + $0x172] sm:$0xff] }
 0x252   : > { %1534 = vrot.lane.b32.xlu0 %v742_v34, %s3325_s30  ;;  %1406 = vrot.lane.b32.xlu1 %v804_v25, %s3324_s11  ;;  %v2018_v28 = vsel %vm2002_vm7, %v1985_v14, %v1517_v50  ;;  %v5123_v25 = vld [vmem:[#allocation49_spill] sm:$0xff]  ;;  %v5124_v50 = vld [vmem:[#allocation44_spill] sm:$0xff] }
 0x253   : > { %v1888_v22 = vsel %vm1870_vm2, %v1855_v1, %v5123_v25  ;;  %v778_v1 = vld [vmem:[#allocation2 + $0x181] sm:$0xff] }
 0x254   : > { %v1137_v42 = vpop.permute.xlu0 %1136  ;;  %v1135_v3 = vpop.permute.xlu1 %1134 }
 0x256   : > { %1536 = vrot.lane.b32.xlu0 %v743_v18, %s3325_s30  ;;  %1408 = vrot.lane.b32.xlu1 %v805_v37, %s3324_s11  ;;  %v5122_v37 = vld [vmem:[#allocation64_spill] sm:$0xff] }
 0x257   : > { %v1854_v19 = vsel %vm436_vm0, %v5122_v37, %v5121_v16 }
 0x258   : > { %v1645_v44 = vpop.permute.xlu0 %1644  ;;  %v1643_v17 = vpop.permute.xlu1 %1642  ;;  %v1887_v29 = vsel %vm1870_vm2, %v1854_v19, %v5124_v50 }
 0x259   : > { %v2051_v27 = vsel %vm2035_vm6, %v2018_v28, %v1645_v44  ;;  %v2050_v58 = vsel %vm2035_vm6, %v2017_v9, %v1643_v17  ;;  %v1920_v11 = vsel %vm1903_vm3, %v1887_v29, %v1135_v3  ;;  %v5125_v9 = vld [vmem:[#allocation31_spill] sm:$0xff]  ;;  %v811_v29 = vld [vmem:[#allocation2 + $0x18a] sm:$0xff] }
 0x25a   : > { %1156 = vrot.lane.b32.xlu0 %v743_v18, %s3322_s13  ;;  %1154 = vrot.lane.b32.xlu1 %v742_v34, %s3322_s13  ;;  %v1921_v18 = vsel %vm1903_vm3, %v1888_v22, %v1137_v42 }
 0x25c   : > { %v1265_v13 = vpop.permute.xlu0 %1264  ;;  %v1263_v43 = vpop.permute.xlu1 %1262 }
 0x25d   : > { %v1954_v61 = vsel %vm1936_vm4, %v1921_v18, %v1265_v13  ;;  %v1953_v45 = vsel %vm1936_vm4, %v1920_v11, %v1263_v43  ;;  %v746_v13 = vld [vmem:[#allocation2 + $0x180] sm:$0xff]  ;;  %v747_v43 = vld [vmem:[#allocation2 + $0x188] sm:$0xff] }
 0x25e   : > { %1664 = vrot.lane.b32.xlu0 %v775_v6, %s3327_s10  ;;  %1662 = vrot.lane.b32.xlu1 %v774_v5, %s3327_s10  ;;  %v810_v11 = vld [vmem:[#allocation2 + $0x182] sm:$0xff] }
 0x260   : > { %v1773_v30 = vpop.permute.xlu0 %1772  ;;  %v1771_v4 = vpop.permute.xlu1 %1770 }
 0x261   : > { %v2084_v38 = vsel %vm2068_vm8, %v2051_v27, %v1773_v30  ;;  %v2083_v35 = vsel %vm2068_vm8, %v2050_v58, %v1771_v4  ;;  %v1857_v30 = vsel %vm436_vm0, %v4309_v2, %v5125_v9 }
 0x262   : > { %1284 = vrot.lane.b32.xlu0 %v775_v6, %s3323_s14  ;;  %1282 = vrot.lane.b32.xlu1 %v774_v5, %s3323_s14 }
 0x263   : > { %2942 = vmatprep.mubr.msk.f32.mxu0 %vm2110_vm9, %v2083_v35  ;;  %v5127_v35 = vld [vmem:[#allocation51_spill] sm:$0xff] }
 0x264   : > { %2943 = vmatmul.mubr.msk.f32.gmra.mrb[14].mxu0 %vm2110_vm9, %v2084_v38  ;;  %v1519_v41 = vpop.permute.xlu0 %1518  ;;  %v1391_v57 = vpop.permute.xlu1 %1390  ;;  %v5126_v38 = vld [vmem:[#allocation24_spill] sm:$0xff] }
 0x265   : > { %v1986_v54 = vsel %vm1969_vm5, %v1953_v45, %v1391_v57  ;;  %v1856_v4 = vsel %vm436_vm0, %v4296_v7, %v5126_v38 }
 0x266   : > { %1792 = vrot.lane.b32.xlu0 %v807_v12, %s3326_s28  ;;  %1790 = vrot.lane.b32.xlu1 %v806_v49, %s3326_s28  ;;  %v2019_v59 = vsel %vm2002_vm7, %v1986_v54, %v1519_v41 }
 0x268   : > { %v1521_v56 = vpop.permute.xlu0 %1520  ;;  %v1393_v52 = vpop.permute.xlu1 %1392 }
 0x269   : > { %v1987_v44 = vsel %vm1969_vm5, %v1954_v61, %v1393_v52  ;;  %v779_v52 = vld [vmem:[#allocation2 + $0x189] sm:$0xff] }
 0x26a   : > { %1538 = vrot.lane.b32.xlu0 %v744_v10, %s3325_s30  ;;  %1410 = vrot.lane.b32.xlu1 %v806_v49, %s3324_s11  ;;  %v2020_v42 = vsel %vm2002_vm7, %v1987_v44, %v1521_v56  ;;  %v5128_v49 = vld [vmem:[#allocation46_spill] sm:$0xff] }
 0x26b   : > { %v1889_v57 = vsel %vm1870_vm2, %v1856_v4, %v5128_v49 }
 0x26c   : > { %v1141_v48 = vpop.permute.xlu0 %1140  ;;  %v1139_v21 = vpop.permute.xlu1 %1138 }
 0x26d   : > { %v1922_v56 = vsel %vm1903_vm3, %v1889_v57, %v1139_v21 }
 0x26e   : > { %1540 = vrot.lane.b32.xlu0 %v745_v15, %s3325_s30  ;;  %1412 = vrot.lane.b32.xlu1 %v807_v12, %s3324_s11  ;;  %v1890_v12 = vsel %vm1870_vm2, %v1857_v30, %v5127_v35 }
 0x270   : > { %v1649_v32 = vpop.permute.xlu0 %1648  ;;  %v1647_v34 = vpop.permute.xlu1 %1646 }
 0x271   : > { %v2053_v3 = vsel %vm2035_vm6, %v2020_v42, %v1649_v32  ;;  %v2052_v40 = vsel %vm2035_vm6, %v2019_v59, %v1647_v34  ;;  %v5129_v42 = vld [vmem:[#allocation33_spill] sm:$0xff] }
 0x272   : > { %1160 = vrot.lane.b32.xlu0 %v745_v15, %s3322_s13  ;;  %1158 = vrot.lane.b32.xlu1 %v744_v10, %s3322_s13  ;;  %v1923_v10 = vsel %vm1903_vm3, %v1890_v12, %v1141_v48 }
 0x274   : > { %v1269_v23 = vpop.permute.xlu0 %1268  ;;  %v1267_v63 = vpop.permute.xlu1 %1266 }
 0x275   : > { %v1956_v2 = vsel %vm1936_vm4, %v1923_v10, %v1269_v23  ;;  %v1955_v7 = vsel %vm1936_vm4, %v1922_v56, %v1267_v63  ;;  %v780_v23 = vld [vmem:[#allocation2 + $0x199] sm:$0xff]  ;;  %v813_v10 = vld [vmem:[#allocation2 + $0x1a2] sm:$0xff] }
 0x276   : > { %1668 = vrot.lane.b32.xlu0 %v777_v62, %s3327_s10  ;;  %1666 = vrot.lane.b32.xlu1 %v776_v47, %s3327_s10  ;;  %v812_v63 = vld [vmem:[#allocation2 + $0x19a] sm:$0xff] }
 0x278   : > { %v1777_v17 = vpop.permute.xlu0 %1776  ;;  %v1775_v0 = vpop.permute.xlu1 %1774 }
 0x279   : > { %v2086_v53 = vsel %vm2068_vm8, %v2053_v3, %v1777_v17  ;;  %v2085_v8 = vsel %vm2068_vm8, %v2052_v40, %v1775_v0  ;;  %v1859_v3 = vsel %vm436_vm0, %v4363_v31, %v5129_v42  ;;  %v749_v17 = vld [vmem:[#allocation2 + $0x1a0] sm:$0xff]  ;;  %v5131_v0 = vld [vmem:[#allocation53_spill] sm:$0xff] }
 0x27a   : > { %1288 = vrot.lane.b32.xlu0 %v777_v62, %s3323_s14  ;;  %1286 = vrot.lane.b32.xlu1 %v776_v47, %s3323_s14  ;;  %v748_v62 = vld [vmem:[#allocation2 + $0x198] sm:$0xff]  ;;  %v5130_v40 = vld [vmem:[#allocation27_spill] sm:$0xff] }
 0x27b   : > { %2945 = vmatprep.mubr.msk.f32.mxu1 %vm2110_vm9, %v2085_v8  ;;  %v1892_v8 = vsel %vm1870_vm2, %v1859_v3, %v5131_v0 }
 0x27c   : > { %2946 = vmatmul.mubr.msk.f32.vlgmr.msra.gmra.mrb[0].mxu1 %vm2110_vm9, %v2086_v53  ;;  %v1523_v6 = vpop.permute.xlu0 %1522  ;;  %v1395_v14 = vpop.permute.xlu1 %1394  ;;  %v1858_v53 = vsel %vm436_vm0, %v4352_v33, %v5130_v40 }
 0x27d   : > { %v1988_v32 = vsel %vm1969_vm5, %v1955_v7, %v1395_v14 }
 0x27e   : > { %1796 = vrot.lane.b32.xlu0 %v809_v55, %s3326_s28  ;;  %1794 = vrot.lane.b32.xlu1 %v808_v51, %s3326_s28  ;;  %v2021_v37 = vsel %vm2002_vm7, %v1988_v32, %v1523_v6  ;;  %v5132_v6 = vld [vmem:[#allocation48_spill] sm:$0xff] }
 0x280   : > { %v1525_v5 = vpop.permute.xlu0 %1524  ;;  %v1397_v20 = vpop.permute.xlu1 %1396 }
 0x281   : > { %v1989_v15 = vsel %vm1969_vm5, %v1956_v2, %v1397_v20 }
 0x282   : > { %1542 = vrot.lane.b32.xlu0 %v746_v13, %s3325_s30  ;;  %1414 = vrot.lane.b32.xlu1 %v808_v51, %s3324_s11  ;;  %v2022_v48 = vsel %vm2002_vm7, %v1989_v15, %v1525_v5  ;;  %v1891_v51 = vsel %vm1870_vm2, %v1858_v53, %v5132_v6 }
 0x284   : > { %v1145_v28 = vpop.permute.xlu0 %1144  ;;  %v1143_v27 = vpop.permute.xlu1 %1142 }
 0x285   : > { %v1925_v14 = vsel %vm1903_vm3, %v1892_v8, %v1145_v28  ;;  %v1924_v31 = vsel %vm1903_vm3, %v1891_v51, %v1143_v27 }
 0x286   : > { %1544 = vrot.lane.b32.xlu0 %v747_v43, %s3325_s30  ;;  %1416 = vrot.lane.b32.xlu1 %v809_v55, %s3324_s11 }
 0x288   : > { %v1653_v58 = vpop.permute.xlu0 %1652  ;;  %v1651_v41 = vpop.permute.xlu1 %1650 }
 0x289   : > { %v2055_v21 = vsel %vm2035_vm6, %v2022_v48, %v1653_v58  ;;  %v2054_v25 = vsel %vm2035_vm6, %v2021_v37, %v1651_v41 }
 0x28a   : > { %1164 = vrot.lane.b32.xlu0 %v747_v43, %s3322_s13  ;;  %1162 = vrot.lane.b32.xlu1 %v746_v13, %s3322_s13  ;;  %v781_v43 = vld [vmem:[#allocation2 + $0x1a1] sm:$0xff]  ;;  %s3328_s13 = smov [#allocation11]  }
 0x28c   : > { %v1273_v36 = vpop.permute.xlu0 %1272  ;;  %v1271_v16 = vpop.permute.xlu1 %1270 }
 0x28d   : > { %v1958_v13 = vsel %vm1936_vm4, %v1925_v14, %v1273_v36  ;;  %v1957_v33 = vsel %vm1936_vm4, %v1924_v31, %v1271_v16 }
 0x28e   : > { %1672 = vrot.lane.b32.xlu0 %v779_v52, %s3327_s10  ;;  %1670 = vrot.lane.b32.xlu1 %v778_v1, %s3327_s10 }
 0x290   : > { %v1781_v19 = vpop.permute.xlu0 %1780  ;;  %v1779_v34 = vpop.permute.xlu1 %1778 }
 0x291   : > { %v2088_v22 = vsel %vm2068_vm8, %v2055_v21, %v1781_v19  ;;  %v2087_v50 = vsel %vm2068_vm8, %v2054_v25, %v1779_v34 }
 0x292   : > { %1292 = vrot.lane.b32.xlu0 %v779_v52, %s3323_s14  ;;  %1290 = vrot.lane.b32.xlu1 %v778_v1, %s3323_s14  ;;  %s3209_s14 = sshll.u32 %s3328_s13, 4  ;;  %s3210_s14 = int_to_ptr.vmem [resolvable:$false] %s3209_s14 }
 0x293   : > { %2948 = vmatprep.mubr.msk.f32.mxu1 %vm2110_vm9, %v2087_v50  ;;  %v5134_v50 = vld [vmem:[#allocation35_spill] sm:$0xff]  ;;  %p3212_p3 = scmp.lt.s32.totalorder %s4948_s23, %s3210_s14 }
 0x294   : > { %2949 = vmatmul.mubr.msk.f32.gmra.mrb[2].mxu1 %vm2110_vm9, %v2088_v22  ;;  %v1527_v18 = vpop.permute.xlu0 %1526  ;;  %v1399_v61 = vpop.permute.xlu1 %1398  ;;  %v5133_v22 = vld [vmem:[#allocation30_spill] sm:$0xff] }
 0x295   : > { %v1990_v9 = vsel %vm1969_vm5, %v1957_v33, %v1399_v61  ;;  %v1860_v34 = vsel %vm436_vm0, %v4407_v26, %v5133_v22 }
 0x296   : > { %1800 = vrot.lane.b32.xlu0 %v811_v29, %s3326_s28  ;;  %1798 = vrot.lane.b32.xlu1 %v810_v11, %s3326_s28  ;;  %v2023_v12 = vsel %vm2002_vm7, %v1990_v9, %v1527_v18 }
 0x298   : > { %v1529_v45 = vpop.permute.xlu0 %1528  ;;  %v1401_v44 = vpop.permute.xlu1 %1400 }
 0x299   : > { %v1991_v5 = vsel %vm1969_vm5, %v1958_v13, %v1401_v44 }
 0x29a   : > { %1546 = vrot.lane.b32.xlu0 %v748_v62, %s3325_s30  ;;  %1418 = vrot.lane.b32.xlu1 %v810_v11, %s3324_s11  ;;  %v2024_v28 = vsel %vm2002_vm7, %v1991_v5, %v1529_v45  ;;  %v5135_v11 = vld [vmem:[#allocation50_spill] sm:$0xff]  ;;  %v5136_v62 = vld [vmem:[#allocation55_spill] sm:$0xff] }
 0x29b   : > { %v1893_v61 = vsel %vm1870_vm2, %v1860_v34, %v5135_v11 }
 0x29c   : > { %v1149_v47 = vpop.permute.xlu0 %1148  ;;  %v1147_v54 = vpop.permute.xlu1 %1146 }
 0x29e   : > { %1674 = vrot.lane.b32.xlu0 %v780_v23, %s3327_s10  ;;  %1420 = vrot.lane.b32.xlu1 %v811_v29, %s3324_s11  ;;  %v1861_v29 = vsel %vm436_vm0, %v4414_v39, %v5134_v50  ;;  %s3211_s11 = scalar_lea.vmem %s3210_s14, 8192 }
 0x29f   : > { %v1894_v45 = vsel %vm1870_vm2, %v1861_v29, %v5136_v62  ;;  %p3213_p7 = scmp.lt.s32.totalorder %s3211_s11, %s3205_s26 }
 0x2a0   : > { %v1657_v59 = vpop.permute.xlu0 %1656  ;;  %v1655_v55 = vpop.permute.xlu1 %1654  ;;  %v1927_v23 = vsel %vm1903_vm3, %v1894_v45, %v1149_v47 }
 0x2a1   : > { %v2057_v35 = vsel %vm2035_vm6, %v2024_v28, %v1657_v59  ;;  %v2056_v56 = vsel %vm2035_vm6, %v2023_v12, %v1655_v55  ;;  %p3214_p10 = por %p3213_p7, %p3212_p3 }
 0x2a2   : > { %1802 = vrot.lane.b32.xlu0 %v812_v63, %s3326_s28  ;;  %1548 = vrot.lane.b32.xlu1 %v749_v17, %s3325_s30  ;;  %v1926_v63 = vsel %vm1903_vm3, %v1893_v61, %v1147_v54 }
 0x2a3   : > { %p3215_p13 = pnand %p3214_p10, %p3208_p8 }
 0x2a4   : > { %v1277_v20 = vpop.permute.xlu0 %1276  ;;  %v1275_v30 = vpop.permute.xlu1 %1274 }
 0x2a5   : > { %v1960_v3 = vsel %vm1936_vm4, %v1927_v23, %v1277_v20  ;;  %v1959_v26 = vsel %vm1936_vm4, %v1926_v63, %v1275_v30 }
 0x2a6   : > { %v2923_v58 = vpop.f32.mrb[0].mxu0  ;;  %1676 = vrot.lane.b32.xlu1 %v781_v43, %s3327_s10 }
 0x2a7   : > { %2433 = vst.msk [vmem:[%s4680_s29 + $0x8] sm:$0xff] %vm436_vm0, %v2923_v58  ;;  %v2465_v27 = vsel %vm436_vm0, %v2923_v58, 0.0  ;;  %v2534_v38 = vmul.f32 %v2923_v58, %v2923_v58  ;;  %v2273_v4 = vpop.f32.mrb[1].mxu0 }
 0x2a8   : > { %2432 = vst.msk [vmem:[%s4680_s29] sm:$0xff] %vm436_vm0, %v2273_v4  ;;  %v2464_v41 = vsel %vm436_vm0, %v2273_v4, 0.0  ;;  %v2533_v49 = vmul.f32 %v2273_v4, %v2273_v4  ;;  %v1785_v57 = vpop.permute.xlu0 %1784  ;;  %v1783_v15 = vpop.permute.xlu1 %1782 }
 0x2a9   : > { %v2566_v2 = vsel %vm436_vm0, %v2534_v38, 0.0  ;;  %v2466_v52 = vadd.f32 %v2465_v27, %v2464_v41  ;;  %v2090_v7 = vsel %vm2068_vm8, %v2057_v35, %v1785_v57  ;;  %v2089_v1 = vsel %vm2068_vm8, %v2056_v56, %v1783_v15 }
 0x2aa   : > { %v2565_v36 = vsel %vm436_vm0, %v2533_v49, 0.0  ;;  %1804 = vrot.lane.b32.xlu1 %v813_v10, %s3326_s28  ;;  %2951 = vmatprep.mubr.msk.f32.mxu1 %vm2110_vm9, %v2089_v1  ;;  %v5137_v10 = vld [vmem:[#allocation37_spill] sm:$0xff] }
 0x2ab   : > { %v2567_v32 = vadd.f32 %v2566_v2, %v2565_v36  ;;  %2952 = vmatmul.mubr.msk.f32.gmra.mrb[4].mxu1 %vm2110_vm9, %v2090_v7  ;;  %v1863_v56 = vsel %vm436_vm0, %v4465_v46, %v5137_v10  ;;  %v5138_v36 = vld [vmem:[#allocation32_spill] sm:$0xff] }
 0x2ac   : > { %v1531_v16 = vpop.permute.xlu0 %1530  ;;  %v1403_v48 = vpop.permute.xlu1 %1402  ;;  %v1862_v1 = vsel %vm436_vm0, %v4457_v24, %v5138_v36 }
 0x2ad   : > { %v1992_v47 = vsel %vm1969_vm5, %v1959_v26, %v1403_v48 }
 0x2ae   : > { %v2025_v33 = vsel %vm2002_vm7, %v1992_v47, %v1531_v16 }
 0x2b0   : > { %v1533_v21 = vpop.permute.xlu0 %1532  ;;  %v1405_v37 = vpop.permute.xlu1 %1404 }
 0x2b1   : > { %v1993_v59 = vsel %vm1969_vm5, %v1960_v3, %v1405_v37  ;;  %v5140_v37 = vld [vmem:[#allocation52_spill] sm:$0xff] }
 0x2b2   : > { %v2026_v51 = vsel %vm2002_vm7, %v1993_v59, %v1533_v21  ;;  %v1895_v22 = vsel %vm1870_vm2, %v1862_v1, %v5140_v37 }
 0x2b4   : > { %v1153_v19 = vpop.permute.xlu0 %1152  ;;  %v4699_v25 = vpop.permute.xlu1 %1150 }
 0x2b5   : > { %v1928_v29 = vsel %vm1903_vm3, %v1895_v22, %v4699_v25 }
 0x2b8   : > { %v1661_v18 = vpop.permute.xlu0 %1660  ;;  %v1659_v44 = vpop.permute.xlu1 %1658 }
 0x2b9   : > { %v2059_v13 = vsel %vm2035_vm6, %v2026_v51, %v1661_v18  ;;  %v2058_v43 = vsel %vm2035_vm6, %v2025_v33, %v1659_v44 }
 0x2ba   : > { %v2926_v42 = vpop.f32.mrb[2].mxu0 }
 0x2bb   : > { %2435 = vst.msk [vmem:[%s4680_s29 + $0x18] sm:$0xff] %vm436_vm0, %v2926_v42  ;;  %v2283_v39 = vpop.f32.mrb[3].mxu0  ;;  %v2536_v17 = vmul.f32 %v2926_v42, %v2926_v42  ;;  %v2469_v55 = vsel %vm436_vm0, %v2926_v42, 0.0 }
 0x2bc   : > { %2434 = vst.msk [vmem:[%s4680_s29 + $0x10] sm:$0xff] %vm436_vm0, %v2283_v39  ;;  %v2467_v40 = vsel %vm436_vm0, %v2283_v39, 0.0  ;;  %v2535_v53 = vmul.f32 %v2283_v39, %v2283_v39  ;;  %v1281_v0 = vpop.permute.xlu0 %1280  ;;  %v1279_v8 = vpop.permute.xlu1 %1278 }
 0x2bd   : > { %v2468_v54 = vadd.f32 %v2467_v40, %v2466_v52  ;;  %v2570_v5 = vsel %vm436_vm0, %v2536_v17, 0.0  ;;  %v1961_v61 = vsel %vm1936_vm4, %v1928_v29, %v1279_v8 }
 0x2be   : > { %v2568_v6 = vsel %vm436_vm0, %v2535_v53, 0.0 }
 0x2bf   : > { %v2569_v14 = vadd.f32 %v2568_v6, %v2567_v32  ;;  %v2470_v31 = vadd.f32 %v2469_v55, %v2468_v54  ;;  %v5139_v32 = vld [vmem:[#allocation57_spill] sm:$0xff] }
 0x2c0   : > { %v1789_v20 = vpop.permute.xlu0 %1788  ;;  %v1787_v30 = vpop.permute.xlu1 %1786  ;;  %v1896_v16 = vsel %vm1870_vm2, %v1863_v56, %v5139_v32 }
 0x2c1   : > { %v2092_v9 = vsel %vm2068_vm8, %v2059_v13, %v1789_v20  ;;  %v2571_v58 = vadd.f32 %v2570_v5, %v2569_v14  ;;  %v2091_v28 = vsel %vm2068_vm8, %v2058_v43, %v1787_v30  ;;  %v1929_v46 = vsel %vm1903_vm3, %v1896_v16, %v1153_v19  ;;  %v551_v5 = vld [vmem:[#allocation2 + $0x138] sm:$0xff] }
 0x2c2   : > { %2954 = vmatprep.mubr.msk.f32.mxu1 %vm2110_vm9, %v2091_v28  ;;  %v1962_v18 = vsel %vm1936_vm4, %v1929_v46, %v1281_v0 }
 0x2c3   : > { %2955 = vmatmul.mubr.msk.f32.gmra.mrb[6].mxu1 %vm2110_vm9, %v2092_v9 }
 0x2c4   : > { %v1535_v27 = vpop.permute.xlu0 %1534  ;;  %v1407_v38 = vpop.permute.xlu1 %1406 }
 0x2c5   : > { %v1994_v19 = vsel %vm1969_vm5, %v1961_v61, %v1407_v38 }
 0x2c6   : > { %v2027_v3 = vsel %vm2002_vm7, %v1994_v19, %v1535_v27 }
 0x2c8   : > { %v1537_v4 = vpop.permute.xlu0 %1536  ;;  %v1409_v35 = vpop.permute.xlu1 %1408 }
 0x2c9   : > { %v1995_v62 = vsel %vm1969_vm5, %v1962_v18, %v1409_v35 }
 0x2ca   : > { %v2028_v42 = vsel %vm2002_vm7, %v1995_v62, %v1537_v4  ;;  %v5142_v4 = vld [vmem:[#allocation34_spill] sm:$0xff] }
 0x2cb   : > { %v1864_v35 = vsel %vm436_vm0, %v551_v5, %v5142_v4 }
 0x2cc   : > { %v4733_v12 = vpop.permute.xlu0 %1156  ;;  %v4735_v41 = vpop.permute.xlu1 %1154 }
 0x2ce   : > { %v2929_v49 = vpop.f32.mrb[4].mxu0 }
 0x2cf   : > { %2437 = vst.msk [vmem:[%s4680_s29 + $0x28] sm:$0xff] %vm436_vm0, %v2929_v49  ;;  %v2293_v57 = vpop.f32.mrb[5].mxu0  ;;  %v2538_v2 = vmul.f32 %v2929_v49, %v2929_v49  ;;  %v2473_v34 = vsel %vm436_vm0, %v2929_v49, 0.0  ;;  %v5143_v49 = vld [vmem:[#allocation59_spill] sm:$0xff] }
 0x2d0   : > { %2436 = vst.msk [vmem:[%s4680_s29 + $0x20] sm:$0xff] %vm436_vm0, %v2293_v57  ;;  %v2471_v52 = vsel %vm436_vm0, %v2293_v57, 0.0  ;;  %v2537_v7 = vmul.f32 %v2293_v57, %v2293_v57  ;;  %v1665_v15 = vpop.permute.xlu0 %1664  ;;  %v1663_v21 = vpop.permute.xlu1 %1662 }
 0x2d1   : > { %v2472_v48 = vadd.f32 %v2471_v52, %v2470_v31  ;;  %v2574_v45 = vsel %vm436_vm0, %v2538_v2, 0.0  ;;  %v2061_v25 = vsel %vm2035_vm6, %v2028_v42, %v1665_v15  ;;  %v2060_v39 = vsel %vm2035_vm6, %v2027_v3, %v1663_v21  ;;  %v5144_v2 = vld [vmem:[#allocation54_spill] sm:$0xff] }
 0x2d2   : > { %v2572_v50 = vsel %vm436_vm0, %v2537_v7, 0.0  ;;  %v1897_v52 = vsel %vm1870_vm2, %v1864_v35, %v5144_v2 }
 0x2d3   : > { %v2573_v24 = vadd.f32 %v2572_v50, %v2571_v58  ;;  %v2474_v11 = vadd.f32 %v2473_v34, %v2472_v48  ;;  %v5141_v58 = vld [vmem:[#allocation39_spill] sm:$0xff] }
 0x2d4   : > { %v1285_v44 = vpop.permute.xlu0 %1284  ;;  %v1283_v23 = vpop.permute.xlu1 %1282  ;;  %v1865_v28 = vsel %vm436_vm0, %v4509_v60, %v5141_v58  ;;  %v1930_v60 = vsel %vm1903_vm3, %v1897_v52, %v4735_v41 }
 0x2d5   : > { %v2575_v63 = vadd.f32 %v2574_v45, %v2573_v24  ;;  %v1898_v57 = vsel %vm1870_vm2, %v1865_v28, %v5143_v49  ;;  %v1963_v36 = vsel %vm1936_vm4, %v1930_v60, %v1283_v23 }
 0x2d6   : > { %v1931_v7 = vsel %vm1903_vm3, %v1898_v57, %v4733_v12 }
 0x2d7   : > { %v1964_v15 = vsel %vm1936_vm4, %v1931_v7, %v1285_v44 }
 0x2d8   : > { %v1793_v26 = vpop.permute.xlu0 %1792  ;;  %v1791_v17 = vpop.permute.xlu1 %1790 }
 0x2d9   : > { %v2094_v59 = vsel %vm2068_vm8, %v2061_v25, %v1793_v26  ;;  %v2093_v40 = vsel %vm2068_vm8, %v2060_v39, %v1791_v17  ;;  %v554_v17 = vld [vmem:[#allocation2 + $0x158] sm:$0xff] }
 0x2da   : > { %2957 = vmatprep.mubr.msk.f32.mxu1 %vm2110_vm9, %v2093_v40 }
 0x2db   : > { %2958 = vmatmul.mubr.msk.f32.gmra.mrb[8].mxu1 %vm2110_vm9, %v2094_v59  ;;  %v553_v59 = vld [vmem:[#allocation2 + $0x150] sm:$0xff] }
 0x2dc   : > { %v1539_v53 = vpop.permute.xlu0 %1538  ;;  %v1411_v0 = vpop.permute.xlu1 %1410 }
 0x2dd   : > { %v1996_v16 = vsel %vm1969_vm5, %v1963_v36, %v1411_v0  ;;  %v5145_v0 = vld [vmem:[#allocation36_spill] sm:$0xff] }
 0x2de   : > { %v2029_v12 = vsel %vm2002_vm7, %v1996_v16, %v1539_v53 }
 0x2e0   : > { %v1541_v47 = vpop.permute.xlu0 %1540  ;;  %v1413_v54 = vpop.permute.xlu1 %1412 }
 0x2e1   : > { %v1997_v1 = vsel %vm1969_vm5, %v1964_v15, %v1413_v54  ;;  %v5146_v54 = vld [vmem:[#allocation40_spill] sm:$0xff] }
 0x2e2   : > { %v2932_v8 = vpop.f32.mrb[6].mxu0  ;;  %v2030_v21 = vsel %vm2002_vm7, %v1997_v1, %v1541_v47  ;;  %v1866_v47 = vsel %vm436_vm0, %v553_v59, %v5145_v0 }
 0x2e3   : > { %2439 = vst.msk [vmem:[%s4680_s29 + $0x38] sm:$0xff] %vm436_vm0, %v2932_v8  ;;  %v2303_v55 = vpop.f32.mrb[7].mxu0  ;;  %v2540_v6 = vmul.f32 %v2932_v8, %v2932_v8  ;;  %v2477_v20 = vsel %vm436_vm0, %v2932_v8, 0.0  ;;  %v1867_v8 = vsel %vm436_vm0, %v554_v17, %v5146_v54 }
 0x2e4   : > { %2438 = vst.msk [vmem:[%s4680_s29 + $0x30] sm:$0xff] %vm436_vm0, %v2303_v55  ;;  %v2475_v51 = vsel %vm436_vm0, %v2303_v55, 0.0  ;;  %v2539_v14 = vmul.f32 %v2303_v55, %v2303_v55  ;;  %v4775_v31 = vpop.permute.xlu0 %1160  ;;  %v1159_v33 = vpop.permute.xlu1 %1158 }
 0x2e5   : > { %v2476_v13 = vadd.f32 %v2475_v51, %v2474_v11  ;;  %v2578_v27 = vsel %vm436_vm0, %v2540_v6, 0.0  ;;  %v5147_v6 = vld [vmem:[#allocation56_spill] sm:$0xff] }
 0x2e6   : > { %v2576_v43 = vsel %vm436_vm0, %v2539_v14, 0.0  ;;  %v1899_v51 = vsel %vm1870_vm2, %v1866_v47, %v5147_v6  ;;  %v5148_v14 = vld [vmem:[#allocation60_spill] sm:$0xff] }
 0x2e7   : > { %v2577_v9 = vadd.f32 %v2576_v43, %v2575_v63  ;;  %v2478_v30 = vadd.f32 %v2477_v20, %v2476_v13  ;;  %v1900_v13 = vsel %vm1870_vm2, %v1867_v8, %v5148_v14  ;;  %v1932_v43 = vsel %vm1903_vm3, %v1899_v51, %v1159_v33 }
 0x2e8   : > { %v1669_v38 = vpop.permute.xlu0 %1668  ;;  %v1667_v10 = vpop.permute.xlu1 %1666  ;;  %v1933_v20 = vsel %vm1903_vm3, %v1900_v13, %v4775_v31 }
 0x2e9   : > { %v2579_v56 = vadd.f32 %v2578_v27, %v2577_v9  ;;  %v2063_v37 = vsel %vm2035_vm6, %v2030_v21, %v1669_v38  ;;  %v2062_v41 = vsel %vm2035_vm6, %v2029_v12, %v1667_v10 }
 0x2ec   : > { %v1289_v32 = vpop.permute.xlu0 %1288  ;;  %v1287_v48 = vpop.permute.xlu1 %1286 }
 0x2ed   : > { %v1966_v9 = vsel %vm1936_vm4, %v1933_v20, %v1289_v32 }
 0x2f0   : > { %v1797_v22 = vpop.permute.xlu0 %1796  ;;  %v1795_v34 = vpop.permute.xlu1 %1794 }
 0x2f1   : > { %v2096_v46 = vsel %vm2068_vm8, %v2063_v37, %v1797_v22  ;;  %v2095_v50 = vsel %vm2068_vm8, %v2062_v41, %v1795_v34  ;;  %v5150_v41 = vld [vmem:[#allocation58_spill] sm:$0xff] }
 0x2f2   : > { %2960 = vmatprep.mubr.msk.f32.mxu1 %vm2110_vm9, %v2095_v50 }
 0x2f3   : > { %2961 = vmatmul.mubr.msk.f32.gmra.mrb[10].mxu1 %vm2110_vm9, %v2096_v46 }
 0x2f4   : > { %v1543_v29 = vpop.permute.xlu0 %1542  ;;  %v1415_v18 = vpop.permute.xlu1 %1414 }
 0x2f6   : > { %v2935_v24 = vpop.f32.mrb[8].mxu0 }
 0x2f7   : > { %2441 = vst.msk [vmem:[%s4680_s29 + $0x48] sm:$0xff] %vm436_vm0, %v2935_v24  ;;  %v2313_v11 = vpop.f32.mrb[9].mxu0  ;;  %v2542_v61 = vmul.f32 %v2935_v24, %v2935_v24  ;;  %v2481_v63 = vsel %vm436_vm0, %v2935_v24, 0.0 }
 0x2f8   : > { %2440 = vst.msk [vmem:[%s4680_s29 + $0x40] sm:$0xff] %vm436_vm0, %v2313_v11  ;;  %v2479_v62 = vsel %vm436_vm0, %v2313_v11, 0.0  ;;  %v2541_v45 = vmul.f32 %v2313_v11, %v2313_v11  ;;  %v1545_v44 = vpop.permute.xlu0 %1544  ;;  %v1417_v23 = vpop.permute.xlu1 %1416 }
 0x2f9   : > { %v2480_v19 = vadd.f32 %v2479_v62, %v2478_v30  ;;  %v2582_v26 = vsel %vm436_vm0, %v2542_v61, 0.0  ;;  %v1965_v30 = vsel %vm1936_vm4, %v1932_v43, %v1287_v48  ;;  %v1999_v28 = vsel %vm1969_vm5, %v1966_v9, %v1417_v23  ;;  %v5149_v48 = vld [vmem:[#allocation38_spill] sm:$0xff] }
 0x2fa   : > { %v2580_v42 = vsel %vm436_vm0, %v2541_v45, 0.0  ;;  %v1998_v58 = vsel %vm1969_vm5, %v1965_v30, %v1415_v18  ;;  %v2032_v4 = vsel %vm2002_vm7, %v1999_v28, %v1545_v44  ;;  %v556_v44 = vld [vmem:[#allocation2 + $0x170] sm:$0xff] }
 0x2fb   : > { %v2581_v25 = vadd.f32 %v2580_v42, %v2579_v56  ;;  %v2482_v3 = vadd.f32 %v2481_v63, %v2480_v19  ;;  %v2031_v35 = vsel %vm2002_vm7, %v1998_v58, %v1543_v29  ;;  %v555_v56 = vld [vmem:[#allocation2 + $0x168] sm:$0xff] }
 0x2fc   : > { %v4813_v39 = vpop.permute.xlu0 %1164  ;;  %v1163_v40 = vpop.permute.xlu1 %1162  ;;  %v1868_v21 = vsel %vm436_vm0, %v555_v56, %v5149_v48 }
 0x2fd   : > { %v2583_v53 = vadd.f32 %v2582_v26, %v2581_v25  ;;  %v1901_v46 = vsel %vm1870_vm2, %v1868_v21, %v5150_v41  ;;  %v5151_v25 = vld [vmem:[#allocation41_spill] sm:$0xff] }
 0x2fe   : > { %v1934_v29 = vsel %vm1903_vm3, %v1901_v46, %v1163_v40  ;;  %v5152_v26 = vld [vmem:[#allocation61_spill] sm:$0xff] }
 0x300   : > { %v1673_v55 = vpop.permute.xlu0 %1672  ;;  %v1671_v5 = vpop.permute.xlu1 %1670 }
 0x301   : > { %v2065_v31 = vsel %vm2035_vm6, %v2032_v4, %v1673_v55  ;;  %v2064_v33 = vsel %vm2035_vm6, %v2031_v35, %v1671_v5 }
 0x304   : > { %v1293_v27 = vpop.permute.xlu0 %1292  ;;  %v1291_v38 = vpop.permute.xlu1 %1290 }
 0x305   : > { %v1967_v24 = vsel %vm1936_vm4, %v1934_v29, %v1291_v38 }
 0x307   : > { %v2938_v49 = vpop.f32.mrb[10].mxu0 }
 0x308   : > { %2443 = vst.msk [vmem:[%s4680_s29 + $0x58] sm:$0xff] %vm436_vm0, %v2938_v49  ;;  %v2323_v57 = vpop.f32.mrb[11].mxu0  ;;  %v1801_v10 = vpop.permute.xlu0 %1800  ;;  %v2544_v2 = vmul.f32 %v2938_v49, %v2938_v49  ;;  %v2485_v32 = vsel %vm436_vm0, %v2938_v49, 0.0 }
 0x309   : > { %2442 = vst.msk [vmem:[%s4680_s29 + $0x50] sm:$0xff] %vm436_vm0, %v2323_v57  ;;  %v2483_v52 = vsel %vm436_vm0, %v2323_v57, 0.0  ;;  %v2543_v7 = vmul.f32 %v2323_v57, %v2323_v57  ;;  %v2098_v60 = vsel %vm2068_vm8, %v2065_v31, %v1801_v10  ;;  %v1799_v15 = vpop.permute.xlu1 %1798 }
 0x30a   : > { %v2484_v36 = vadd.f32 %v2483_v52, %v2482_v3  ;;  %v2097_v1 = vsel %vm2068_vm8, %v2064_v33, %v1799_v15  ;;  %v2586_v34 = vsel %vm436_vm0, %v2544_v2, 0.0  ;;  %v1869_v3 = vsel %vm436_vm0, %v556_v44, %v5151_v25 }
 0x30b   : > { %v2584_v16 = vsel %vm436_vm0, %v2543_v7, 0.0  ;;  %2963 = vmatprep.mubr.msk.f32.mxu1 %vm2110_vm9, %v2097_v1  ;;  %v1902_v59 = vsel %vm1870_vm2, %v1869_v3, %v5152_v26 }
 0x30c   : > { %v2585_v37 = vadd.f32 %v2584_v16, %v2583_v53  ;;  %2964 = vmatmul.mubr.msk.f32.gmra.mrb[12].mxu1 %vm2110_vm9, %v2098_v60  ;;  %v1547_v12 = vpop.permute.xlu0 %1546  ;;  %v2486_v22 = vadd.f32 %v2485_v32, %v2484_v36  ;;  %v1935_v17 = vsel %vm1903_vm3, %v1902_v59, %v4813_v39 }
 0x30d   : > { %v1419_v50 = vpop.permute.xlu1 %1418  ;;  %v1968_v53 = vsel %vm1936_vm4, %v1935_v17, %v1293_v27 }
 0x30e   : > { %v2587_v18 = vadd.f32 %v2586_v34, %v2585_v37  ;;  %v2000_v11 = vsel %vm1969_vm5, %v1967_v24, %v1419_v50 }
 0x30f   : > { %v2033_v45 = vsel %vm2002_vm7, %v2000_v11, %v1547_v12 }
 0x310   : > { %v1675_v61 = vpop.permute.xlu0 %1674 }
 0x311   : > { %v1421_v62 = vpop.permute.xlu1 %1420  ;;  %v2066_v19 = vsel %vm2035_vm6, %v2033_v45, %v1675_v61 }
 0x312   : > { %v2001_v0 = vsel %vm1969_vm5, %v1968_v53, %v1421_v62 }
 0x314   : > { %v1803_v23 = vpop.permute.xlu0 %1802 }
 0x315   : > { %v2099_v63 = vsel %vm2068_vm8, %v2066_v19, %v1803_v23  ;;  %v1549_v42 = vpop.permute.xlu1 %1548 }
 0x316   : > { %2966 = vmatprep.mubr.msk.f32.mxu1 %vm2110_vm9, %v2099_v63  ;;  %v2034_v47 = vsel %vm2002_vm7, %v2001_v0, %v1549_v42 }
 0x319   : > { %v1677_v40 = vpop.permute.xlu1 %1676 }
 0x31a   : > { %v2067_v54 = vsel %vm2035_vm6, %v2034_v47, %v1677_v40 }
 0x31d   : > { %v1805_v8 = vpop.permute.xlu1 %1804 }
 0x31e   : > { %v2100_v55 = vsel %vm2068_vm8, %v2067_v54, %v1805_v8 }
 0x31f   : > { %v2941_v6 = vpop.f32.mrb[12].mxu0  ;;  %2967 = vmatmul.mubr.msk.f32.gmra.mrb[14].mxu1 %vm2110_vm9, %v2100_v55 }
 0x320   : > { %2445 = vst.msk [vmem:[%s4680_s29 + $0x68] sm:$0xff] %vm436_vm0, %v2941_v6  ;;  %v2333_v51 = vpop.f32.mrb[13].mxu0  ;;  %v2546_v39 = vmul.f32 %v2941_v6, %v2941_v6  ;;  %v2489_v20 = vsel %vm436_vm0, %v2941_v6, 0.0 }
 0x321   : > { %2444 = vst.msk [vmem:[%s4680_s29 + $0x60] sm:$0xff] %vm436_vm0, %v2333_v51  ;;  %v2487_v14 = vsel %vm436_vm0, %v2333_v51, 0.0  ;;  %v2545_v13 = vmul.f32 %v2333_v51, %v2333_v51 }
 0x322   : > { %v2488_v5 = vadd.f32 %v2487_v14, %v2486_v22  ;;  %v2590_v58 = vsel %vm436_vm0, %v2546_v39, 0.0 }
 0x323   : > { %v2588_v43 = vsel %vm436_vm0, %v2545_v13, 0.0 }
 0x324   : > { %v2589_v9 = vadd.f32 %v2588_v43, %v2587_v18  ;;  %v2490_v30 = vadd.f32 %v2489_v20, %v2488_v5 }
 0x326   : > { %v2591_v28 = vadd.f32 %v2590_v58, %v2589_v9 }
 0x337   : > { %v2944_v27 = vpop.f32.mrb[14].mxu0 }
 0x338   : > { %2447 = vst.msk [vmem:[%s4680_s29 + $0x78] sm:$0xff] %vm436_vm0, %v2944_v27  ;;  %v2343_v38 = vpop.f32.mrb[15].mxu0  ;;  %v2548_v4 = vmul.f32 %v2944_v27, %v2944_v27  ;;  %v2493_v33 = vsel %vm436_vm0, %v2944_v27, 0.0 }
 0x339   : > { %2446 = vst.msk [vmem:[%s4680_s29 + $0x70] sm:$0xff] %vm436_vm0, %v2343_v38  ;;  %v2491_v35 = vsel %vm436_vm0, %v2343_v38, 0.0  ;;  %v2547_v49 = vmul.f32 %v2343_v38, %v2343_v38 }
 0x33a   : > { %v2492_v31 = vadd.f32 %v2491_v35, %v2490_v30  ;;  %v2594_v2 = vsel %vm436_vm0, %v2548_v4, 0.0 }
 0x33b   : > { %v2592_v57 = vsel %vm436_vm0, %v2547_v49, 0.0 }
 0x33c   : > { %v2494_v10 = vadd.f32 %v2493_v33, %v2492_v31  ;;  %v2593_v56 = vadd.f32 %v2592_v57, %v2591_v28 }
 0x33e   : > { %v2595_v52 = vadd.f32 %v2594_v2, %v2593_v56 }
 0x34f   : > { %v2947_v7 = vpop.f32.mrb[0].mxu1 }
 0x350   : > { %2449 = vst.msk [vmem:[%s4680_s29 + $0x88] sm:$0xff] %vm436_vm0, %v2947_v7  ;;  %v2353_v60 = vpop.f32.mrb[1].mxu1  ;;  %v2550_v15 = vmul.f32 %v2947_v7, %v2947_v7  ;;  %v2497_v16 = vsel %vm436_vm0, %v2947_v7, 0.0 }
 0x351   : > { %2448 = vst.msk [vmem:[%s4680_s29 + $0x80] sm:$0xff] %vm436_vm0, %v2353_v60  ;;  %v2495_v36 = vsel %vm436_vm0, %v2353_v60, 0.0  ;;  %v2549_v1 = vmul.f32 %v2353_v60, %v2353_v60 }
 0x352   : > { %v2496_v32 = vadd.f32 %v2495_v36, %v2494_v10  ;;  %v2598_v12 = vsel %vm436_vm0, %v2550_v15, 0.0 }
 0x353   : > { %v2596_v48 = vsel %vm436_vm0, %v2549_v1, 0.0 }
 0x354   : > { %v2597_v21 = vadd.f32 %v2596_v48, %v2595_v52  ;;  %v2498_v37 = vadd.f32 %v2497_v16, %v2496_v32 }
 0x356   : > { %v2599_v22 = vadd.f32 %v2598_v12, %v2597_v21 }
 0x367   : > { %v2950_v41 = vpop.f32.mrb[2].mxu1 }
 0x368   : > { %2451 = vst.msk [vmem:[%s4680_s29 + $0x98] sm:$0xff] %vm436_vm0, %v2950_v41  ;;  %v2363_v46 = vpop.f32.mrb[3].mxu1  ;;  %v2552_v34 = vmul.f32 %v2950_v41, %v2950_v41  ;;  %v2501_v24 = vsel %vm436_vm0, %v2950_v41, 0.0 }
 0x369   : > { %2450 = vst.msk [vmem:[%s4680_s29 + $0x90] sm:$0xff] %vm436_vm0, %v2363_v46  ;;  %v2499_v50 = vsel %vm436_vm0, %v2363_v46, 0.0  ;;  %v2551_v29 = vmul.f32 %v2363_v46, %v2363_v46 }
 0x36a   : > { %v2500_v18 = vadd.f32 %v2499_v50, %v2498_v37  ;;  %v2602_v45 = vsel %vm436_vm0, %v2552_v34, 0.0 }
 0x36b   : > { %v2600_v11 = vsel %vm436_vm0, %v2551_v29, 0.0 }
 0x36c   : > { %v2601_v61 = vadd.f32 %v2600_v11, %v2599_v22  ;;  %v2502_v62 = vadd.f32 %v2501_v24, %v2500_v18 }
 0x36e   : > { %v2603_v44 = vadd.f32 %v2602_v45, %v2601_v61 }
 0x37e   : > { %v2953_v19 = vpop.f32.mrb[4].mxu1 }
 0x37f   : > { %2453 = vst.msk [vmem:[%s4680_s29 + $0xa8] sm:$0xff] %vm436_vm0, %v2953_v19  ;;  %v2373_v23 = vpop.f32.mrb[5].mxu1  ;;  %v2554_v63 = vmul.f32 %v2953_v19, %v2953_v19  ;;  %v2505_v26 = vsel %vm436_vm0, %v2953_v19, 0.0 }
 0x380   : > { %2452 = vst.msk [vmem:[%s4680_s29 + $0xa0] sm:$0xff] %vm436_vm0, %v2373_v23  ;;  %v2503_v42 = vsel %vm436_vm0, %v2373_v23, 0.0  ;;  %v2553_v25 = vmul.f32 %v2373_v23, %v2373_v23 }
 0x381   : > { %v2504_v3 = vadd.f32 %v2503_v42, %v2502_v62  ;;  %v2606_v53 = vsel %vm436_vm0, %v2554_v63, 0.0 }
 0x382   : > { %v2604_v59 = vsel %vm436_vm0, %v2553_v25, 0.0 }
 0x383   : > { %v2605_v17 = vadd.f32 %v2604_v59, %v2603_v44  ;;  %v2506_v40 = vadd.f32 %v2505_v26, %v2504_v3 }
 0x385   : > { %v2607_v0 = vadd.f32 %v2606_v53, %v2605_v17 }
 0x396   : > { %v2956_v47 = vpop.f32.mrb[6].mxu1 }
 0x397   : > { %2455 = vst.msk [vmem:[%s4680_s29 + $0xb8] sm:$0xff] %vm436_vm0, %v2956_v47  ;;  %v2383_v54 = vpop.f32.mrb[7].mxu1  ;;  %v2556_v8 = vmul.f32 %v2956_v47, %v2956_v47  ;;  %v2509_v39 = vsel %vm436_vm0, %v2956_v47, 0.0 }
 0x398   : > { %2454 = vst.msk [vmem:[%s4680_s29 + $0xb0] sm:$0xff] %vm436_vm0, %v2383_v54  ;;  %v2507_v55 = vsel %vm436_vm0, %v2383_v54, 0.0  ;;  %v2555_v6 = vmul.f32 %v2383_v54, %v2383_v54 }
 0x399   : > { %v2508_v51 = vadd.f32 %v2507_v55, %v2506_v40  ;;  %v2610_v20 = vsel %vm436_vm0, %v2556_v8, 0.0 }
 0x39a   : > { %v2608_v14 = vsel %vm436_vm0, %v2555_v6, 0.0 }
 0x39b   : > { %v2609_v13 = vadd.f32 %v2608_v14, %v2607_v0  ;;  %v2510_v5 = vadd.f32 %v2509_v39, %v2508_v51 }
 0x39d   : > { %v2611_v43 = vadd.f32 %v2610_v20, %v2609_v13 }
 0x3ae   : > { %v2959_v9 = vpop.f32.mrb[8].mxu1 }
 0x3af   : > { %2457 = vst.msk [vmem:[%s4680_s29 + $0xc8] sm:$0xff] %vm436_vm0, %v2959_v9  ;;  %v2393_v30 = vpop.f32.mrb[9].mxu1  ;;  %v2558_v58 = vmul.f32 %v2959_v9, %v2959_v9  ;;  %v2513_v4 = vsel %vm436_vm0, %v2959_v9, 0.0 }
 0x3b0   : > { %2456 = vst.msk [vmem:[%s4680_s29 + $0xc0] sm:$0xff] %vm436_vm0, %v2393_v30  ;;  %v2511_v28 = vsel %vm436_vm0, %v2393_v30, 0.0  ;;  %v2557_v27 = vmul.f32 %v2393_v30, %v2393_v30 }
 0x3b1   : > { %v2512_v38 = vadd.f32 %v2511_v28, %v2510_v5  ;;  %v2614_v33 = vsel %vm436_vm0, %v2558_v58, 0.0 }
 0x3b2   : > { %v2612_v35 = vsel %vm436_vm0, %v2557_v27, 0.0 }
 0x3b3   : > { %v2613_v49 = vadd.f32 %v2612_v35, %v2611_v43  ;;  %v2514_v31 = vadd.f32 %v2513_v4, %v2512_v38 }
 0x3b5   : > { %v2615_v57 = vadd.f32 %v2614_v33, %v2613_v49 }
 0x3c6   : > { %v2962_v10 = vpop.f32.mrb[10].mxu1 }
 0x3c7   : > { %2459 = vst.msk [vmem:[%s4680_s29 + $0xd8] sm:$0xff] %vm436_vm0, %v2962_v10  ;;  %v2403_v56 = vpop.f32.mrb[11].mxu1  ;;  %v2560_v2 = vmul.f32 %v2962_v10, %v2962_v10  ;;  %v2517_v15 = vsel %vm436_vm0, %v2962_v10, 0.0 }
 0x3c8   : > { %2458 = vst.msk [vmem:[%s4680_s29 + $0xd0] sm:$0xff] %vm436_vm0, %v2403_v56  ;;  %v2515_v52 = vsel %vm436_vm0, %v2403_v56, 0.0  ;;  %v2559_v7 = vmul.f32 %v2403_v56, %v2403_v56 }
 0x3c9   : > { %v2516_v60 = vadd.f32 %v2515_v52, %v2514_v31  ;;  %v2618_v16 = vsel %vm436_vm0, %v2560_v2, 0.0 }
 0x3ca   : > { %v2616_v36 = vsel %vm436_vm0, %v2559_v7, 0.0 }
 0x3cb   : > { %v2617_v1 = vadd.f32 %v2616_v36, %v2615_v57  ;;  %v2518_v32 = vadd.f32 %v2517_v15, %v2516_v60 }
 0x3cd   : > { %v2619_v48 = vadd.f32 %v2618_v16, %v2617_v1 }
 0x3df   : > { %v2965_v21 = vpop.f32.mrb[12].mxu1 }
 0x3e0   : > { %2461 = vst.msk [vmem:[%s4680_s29 + $0xe8] sm:$0xff] %vm436_vm0, %v2965_v21  ;;  %v2413_v37 = vpop.f32.mrb[13].mxu1  ;;  %v2562_v12 = vmul.f32 %v2965_v21, %v2965_v21  ;;  %v2521_v34 = vsel %vm436_vm0, %v2965_v21, 0.0 }
 0x3e1   : > { %2460 = vst.msk [vmem:[%s4680_s29 + $0xe0] sm:$0xff] %vm436_vm0, %v2413_v37  ;;  %v2519_v22 = vsel %vm436_vm0, %v2413_v37, 0.0  ;;  %v2561_v41 = vmul.f32 %v2413_v37, %v2413_v37 }
 0x3e2   : > { %v2520_v46 = vadd.f32 %v2519_v22, %v2518_v32  ;;  %v2622_v24 = vsel %vm436_vm0, %v2562_v12, 0.0 }
 0x3e3   : > { %v2620_v50 = vsel %vm436_vm0, %v2561_v41, 0.0 }
 0x3e4   : > { %v2621_v29 = vadd.f32 %v2620_v50, %v2619_v48  ;;  %v2522_v18 = vadd.f32 %v2521_v34, %v2520_v46 }
 0x3e6   : > { %v2623_v11 = vadd.f32 %v2622_v24, %v2621_v29 }
 0x3f2   : > { %v2968_v61 = vpop.f32.mrb[14].mxu1 }
 0x3f3   : > { %2463 = vst.msk [vmem:[%s4680_s29 + $0xf8] sm:$0xff] %vm436_vm0, %v2968_v61  ;;  %v2423_v62 = vpop.f32.mrb[15].mxu1  ;;  %v2564_v45 = vmul.f32 %v2968_v61, %v2968_v61 }
 0x3f4   : > { %2462 = vst.msk [vmem:[%s4680_s29 + $0xf0] sm:$0xff] %vm436_vm0, %v2423_v62  ;;  %v2523_v44 = vsel %vm436_vm0, %v2423_v62, 0.0  ;;  %v2563_v19 = vmul.f32 %v2423_v62, %v2423_v62 }
 0x3f5   : > { %v2524_v23 = vadd.f32 %v2523_v44, %v2522_v18 }
 0x3f6   : > { %3218 = shalt.err (!%p3215_p13)
}
 0x3f7   : > { %s3219_s30 = scalar_lea.hbm %s4946_s9, 4096  ;;  %s3223_s29 = scalar_lea.hbm %s5037_s4, 8192 }
 0x3f8   : > { %p3220_p0 = scmp.ne.s32.totalorder %s4946_s9, %s3219_s30  ;;  %p3224_p9 = scmp.lt.u32.totalorder %s4946_s9, %s5037_s4 }
 0x3f9   : > { %p3225_p12 = scmp.lt.u32.totalorder %s3223_s29, %s3219_s30  ;;  %p3227_p1 = scmp.lt.u32.totalorder %s3219_s30, %s4946_s9 }
 0x3fa   : > { %p3221_p5 = pnand %p3220_p0, %p3507_p6 }
 0x3fb   : > { %p3226_p2 = por %p3225_p12, %p3224_p9 }
 0x3fc   : > { %p3222_p11 = pneg %p3221_p5 }
 0x3fd   : > { %p3228_p4 = por %p3227_p1, %p3226_p2 }
 0x3ff   : > { %p3229_p8 = pnand %p3228_p4, %p3222_p11 }
 0x401   : > { %3232 = shalt.err (!%p3229_p8)
}
 0x402   : > { %s3329_s8 = smov 128   ;;  %v2525_v63 = vsel %vm436_vm0, %v2968_v61, 0.0  ;;  %v2624_v42 = vsel %vm436_vm0, %v2563_v19, 0.0  ;;  %v2626_v26 = vsel %vm436_vm0, %v2564_v45, 0.0  ;;  %s2818_s26 = sshll.u32 %s3558_s17, 1  ;;  %vm2634_vm10 = vcmask 1040384  }
 0x403   : > { %3009 = dma.vmem_to_hbm [thread:$0]  (%p3507_p6), %s4948_s23, 4096, %s4946_s9, %s2638_s15, %s3329_s8, %s3329_s8, %s3320_s24   ;;  %v2526_v25 = vadd.f32 %v2525_v63, %v2524_v23  ;;  %v2625_v3 = vadd.f32 %v2624_v42, %v2623_v11 }
 0x404   : > { %s2857_s24 = sshll.u32 %s3382_s22, 5  ;;  %s293_s23 = scalar_lea.vmem [#allocation12], %s2818_s26 }
 0x405   : > { %v2527_v59 = vrot.slane %v2526_v25, 4  ;;  %v2627_v17 = vadd.f32 %v2626_v26, %v2625_v3  ;;  %s2672_s9 = sshll.u32 %s293_s23, 4  ;;  %s4988_s14 = scalar_lea.hbm %s5038_s5, %s2857_s24  ;;  %s4990_s9 = int_to_ptr.vmem [resolvable:$true] %s2672_s9 }
 0x406   : > { %s2643_s11 = scalar_lea.sflag [#allocation13], %s3558_s17  ;;  %s3233_s22 = scalar_lea.vmem %s4990_s9, 32 }
 0x407   : > { %v2528_v40 = vadd.f32 %v2527_v59, %v2526_v25  ;;  %v2628_v53 = vrot.slane %v2627_v17, 4  ;;  %p3234_p3 = scmp.ne.s32.totalorder %s4990_s9, %s3233_s22  ;;  %s3330_s30 = smov [#allocation12]  }
 0x408   : > { %s3237_s28 = sshll.u32 %s3330_s30, 4  ;;  %s3238_s28 = int_to_ptr.vmem [resolvable:$false] %s3237_s28 }
 0x409   : > { %v2529_v0 = vrot.slane %v2528_v40, 2  ;;  %v2629_v47 = vadd.f32 %v2628_v53, %v2627_v17  ;;  %p3235_p7 = pnand %p3234_p3, %p3507_p6  ;;  %s3239_s10 = scalar_lea.vmem %s3238_s28, 64 }
 0x40a   : > { %p3240_p13 = scmp.lt.s32.totalorder %s4990_s9, %s3238_s28  ;;  %p3241_p0 = scmp.lt.s32.totalorder %s3239_s10, %s3233_s22 }
 0x40b   : > { %v2530_v54 = vadd.f32 %v2529_v0, %v2528_v40  ;;  %v2630_v8 = vrot.slane %v2629_v47, 2  ;;  %p3236_p10 = pneg %p3235_p7 }
 0x40c   : > { %p3242_p5 = por %p3241_p0, %p3240_p13 }
 0x40d   : > { %v2531_v55 = vrot.slane %v2530_v54, 1  ;;  %v2631_v6 = vadd.f32 %v2630_v8, %v2629_v47 }
 0x40e   : > { %p3243_p11 = pnand %p3242_p5, %p3236_p10 }
 0x40f   : > { %v2632_v51 = vrot.slane %v2631_v6, 1  ;;  %v2532_v39 = vadd.f32 %v2531_v55, %v2530_v54 }
 0x411   : > { %v2633_v14 = vadd.f32 %v2632_v51, %v2631_v6 }
 0x413   : > { %v2635_v13 = vsel %vm2634_vm10, %v2532_v39, %v2633_v14 }
 0x414   : > { %2636 = vst.msk [vmem:[%s293_s23] sm:$0x3] %vm439_vm1, %v2635_v13 }
 0x415   : > { %3246 = shalt.err (!%p3243_p11)
}
 0x416   : > { %s3247_s17 = scalar_lea.hbm %s4988_s14, 32  ;;  %s3251_s7 = scalar_lea.hbm %s5038_s5, 64 }
 0x417   : > { %p3248_p9 = scmp.ne.s32.totalorder %s4988_s14, %s3247_s17  ;;  %p3252_p1 = scmp.lt.u32.totalorder %s4988_s14, %s5038_s5 }
 0x418   : > { %p3253_p4 = scmp.lt.u32.totalorder %s3251_s7, %s3247_s17  ;;  %p3255_p3 = scmp.lt.u32.totalorder %s3247_s17, %s4988_s14 }
 0x419   : > { %p3249_p12 = pnand %p3248_p9, %p3507_p6 }
 0x41a   : > { %p3254_p8 = por %p3253_p4, %p3252_p1 }
 0x41b   : > { %p3250_p2 = pneg %p3249_p12 }
 0x41c   : > { %p3256_p7 = por %p3255_p3, %p3254_p8 }
 0x41e   : > { %p3257_p10 = pnand %p3256_p7, %p3250_p2 }
 0x420   : > { %3260 = shalt.err (!%p3257_p10)
}
 0x421   : > { %3010 = dma.vmem_to_hbm [thread:$0]  (%p3507_p6), %s4990_s9, 32, %s4988_s14, %s2643_s11  }
 0x422 PF: > { %s2684_s24 = sand.u32 1, %s3299_s18   ;;  %p5153_p13 = scmp.ne.s32.totalorder %s5048_s25, 0 }
 0x423   : > { %p5154_p0 = scmp.ge.s32.totalorder %s3311_s21, 2  ;;  %s2685_s23 = scalar_lea.sflag [#allocation5], %s2684_s24 }
 0x425   : > { %p3028_p5 = pnand %p5154_p0, %p5153_p13 }
 0x427   : > { %3290 = dma.done.wait (!%p3028_p5), %s2685_s23, 4096  }
 0x428   : > { %3292 = vsyncadd (!%p3028_p5), %s2685_s23, 4294963200  ;;  %s2694_s15 = scalar_lea.sflag [#allocation13], %s2684_s24 }
 0x429   : > { %3294 = dma.done.wait (!%p3028_p5), %s2694_s15, 32  }
 0x42a   : > { %3296 = vsyncadd (!%p3028_p5), %s2694_s15, 4294967264  ;;  %p24_p6 = scmp.ge.s32.totalorder %s3493_s16, 4   ;;  %s5155_s18 = smov %s3303_s19 }
 0x42b   : > { %s5156_s19 = smov %s3307_s20  ;;  %s5157_s20 = smov %s3503_s27 }
 0x42c   : > { %s5158_s21 = smov %s3493_s16  ;;  %26 = sbr.rel (!%p24_p6) target bundleno = 9 (0x9), region = 112 }
 0x433   :  { %2699 = vsyncpa [#allocation4], 1 }
 0x434   :  { %2701 = vsyncpa [#allocation4 + $0x1], 1 }
 0x435   :  { %2702 = vsyncpa [#allocation7], 1 }
 0x436   :  { %2703 = vsyncpa [#allocation10], 1 }
 0x437   :  { %2704 = vsyncpa [#allocation5], 1 }
 0x438   :  { %2706 = vsyncpa [#allocation5 + $0x1], 1 }
 0x439   :  { %2707 = vsyncpa [#allocation13], 1 }
 0x43a   :  { %2709 = vsyncpa [#allocation13 + $0x1], 1 }

</bundles_post_ra>
